<compile_context>
chip_gen: v7x
topology: tpu7x:2x2x1
jax: 0.10.0
libtpu: 0.0.40
codegen_flags: <defaults>
</compile_context>

<pallas_src>
import math
import functools

import jax
import jax.numpy as jnp
from jax.experimental import pallas as pl
from jax.experimental.pallas import tpu as pltpu


# ----------------------------- in-kernel helpers -----------------------------

def _torch_layernorm(x, g, b, eps):
    # Annotated-Transformer LayerNorm: a_2 * (x - mean) / (std + eps) + b_2
    # with torch unbiased std (ddof=1) and eps added to std (not variance).  f32.
    d = x.shape[-1]
    mean = jnp.mean(x, axis=-1, keepdims=True)
    diff = x - mean
    var = jnp.sum(diff * diff, axis=-1, keepdims=True) / float(d - 1)
    return g * diff / (jnp.sqrt(var) + eps) + b


def _key_pad_bias(pad):
    # pad: (B, Tk) with 1.0 = keep, 0.0 = masked  ->  (B, 1, Tk) additive bias.
    return jnp.where(pad == 0.0, jnp.float32(-1e9), jnp.float32(0.0))[:, None, :]


def _mha(y, kv_src, bias, wqkv, bqkv, wo, bo, cat_ref, *, h, d_k, scale, self_attn):
    """Multi-head attention on VMEM-resident values.

    y       : (B, Tq, D) f32 pre-normalized query source
    kv_src  : (B, Tk, D) f32 key/value source (== y for self-attention; only read
              when self_attn=False, so self-attention never touches a second copy)
    bias    : additive mask bias broadcastable to (B, Tq, Tk), built in-kernel
    cat_ref : (B, Tq, D) f32 VMEM scratch used as the head-concat buffer
    Returns : (B, Tq, D) f32 attention output (before residual add)
    """
    B, Tq, D = y.shape
    Tk = kv_src.shape[1]
    y2 = y.reshape(B * Tq, D).astype(jnp.bfloat16)

    if self_attn:
        # One fused (B*Tq, D) @ (D, 3D) bf16 matmul for Q, K, V.
        qkv = jnp.dot(y2, wqkv, preferred_element_type=jnp.float32) + bqkv
        q = qkv[:, :D].reshape(B, Tq, D) * scale
        k = qkv[:, D:2 * D].reshape(B, Tk, D)
        v = qkv[:, 2 * D:].reshape(B, Tk, D)
    else:
        q = (jnp.dot(y2, wqkv[:, :D], preferred_element_type=jnp.float32)
             + bqkv[:, :D]).reshape(B, Tq, D) * scale
        m2 = kv_src.reshape(B * Tk, D).astype(jnp.bfloat16)
        kvp = (jnp.dot(m2, wqkv[:, D:], preferred_element_type=jnp.float32)
               + bqkv[:, D:])
        k = kvp[:, :D].reshape(B, Tk, D)
        v = kvp[:, D:].reshape(B, Tk, D)

    # Per-head attention, batched over B; head outputs written into ONE concat
    # buffer so the output projection is a single full-D matmul against wo.
    for hd in range(h):                                   # static unroll over heads
        sl = slice(hd * d_k, (hd + 1) * d_k)
        s = jnp.einsum('bqd,bkd->bqk',
                       q[:, :, sl].astype(jnp.bfloat16),
                       k[:, :, sl].astype(jnp.bfloat16),
                       preferred_element_type=jnp.float32) + bias
        s = s - jnp.max(s, axis=-1, keepdims=True)
        p = jnp.exp(s)
        p = p * pl.reciprocal(jnp.sum(p, axis=-1, keepdims=True), approx=True)
        oh = jnp.einsum('bqk,bkd->bqd',
                        p.astype(jnp.bfloat16),
                        v[:, :, sl].astype(jnp.bfloat16),
                        preferred_element_type=jnp.float32)
        cat_ref[:, :, sl] = oh

    cat = cat_ref[...].reshape(B * Tq, D).astype(jnp.bfloat16)
    out = jnp.dot(cat, wo, preferred_element_type=jnp.float32) + bo   # single (B*Tq,D)@(D,D)
    return out.reshape(B, Tq, D)


def _ffn(x, g, b, w1, b1, w2, b2, eps):
    """pre-LN -> relu(x W1 + b1) W2 + b2 -> residual, bf16 matmuls / f32 accumulate."""
    B, T, D = x.shape
    y = _torch_layernorm(x, g, b, eps)
    y2 = y.reshape(B * T, D).astype(jnp.bfloat16)
    hmid = jnp.maximum(
        jnp.dot(y2, w1, preferred_element_type=jnp.float32) + b1, 0.0)
    out = jnp.dot(hmid.astype(jnp.bfloat16), w2,
                  preferred_element_type=jnp.float32) + b2
    return x + out.reshape(B, T, D)


# ----------------------------- fused layer kernels -----------------------------

def _enc_layer_kernel(x_ref, srcpad_ref,
                      ln1g_ref, ln1b_ref, wqkv_ref, bqkv_ref, wo_ref, bo_ref,
                      ln2g_ref, ln2b_ref, w1_ref, b1_ref, w2_ref, b2_ref,
                      lnfg_ref, lnfb_ref,
                      o_ref, cat_ref,
                      *, h, d_k, scale, eps, apply_final_ln):
    """One full encoder layer (self-attn + FFN), optionally + encoder final LN."""
    x = x_ref[...]                                        # (B, Ts, D) f32
    bias = _key_pad_bias(srcpad_ref[...])                 # (B, 1, Ts) built in-kernel

    # --- self-attention sub-layer ---
    y = _torch_layernorm(x, ln1g_ref[...], ln1b_ref[...], eps)
    x = x + _mha(y, y, bias, wqkv_ref[...], bqkv_ref[...], wo_ref[...], bo_ref[...],
                 cat_ref, h=h, d_k=d_k, scale=scale, self_attn=True)

    # --- FFN sub-layer ---
    x = _ffn(x, ln2g_ref[...], ln2b_ref[...], w1_ref[...], b1_ref[...],
             w2_ref[...], b2_ref[...], eps)

    if apply_final_ln:                                    # encoder stack's final LN
        x = _torch_layernorm(x, lnfg_ref[...], lnfb_ref[...], eps)
    o_ref[...] = x


def _dec_layer_kernel(x_ref, mem_ref, srcpad_ref, tgtpad_ref,
                      ln1g_ref, ln1b_ref, wqkvs_ref, bqkvs_ref, wos_ref, bos_ref,
                      ln2g_ref, ln2b_ref, wqkvc_ref, bqkvc_ref, woc_ref, boc_ref,
                      ln3g_ref, ln3b_ref, w1_ref, b1_ref, w2_ref, b2_ref,
                      lnfg_ref, lnfb_ref,
                      o_ref, cat_ref,
                      *, h, d_k, scale, eps, causal, apply_final_ln):
    """One full decoder layer (self-attn + cross-attn + FFN), optionally + final LN."""
    x = x_ref[...]                                        # (B, Tt, D) f32
    mem = mem_ref[...]                                    # (B, Ts, D) f32
    Tt = x.shape[1]

    # decoder self-attention mask: tgt key padding (+ causal), built in-kernel
    self_bias = _key_pad_bias(tgtpad_ref[...])            # (B, 1, Tt)
    if causal:
        row = jax.lax.broadcasted_iota(jnp.int32, (Tt, Tt), 0)
        col = jax.lax.broadcasted_iota(jnp.int32, (Tt, Tt), 1)
        self_bias = self_bias + jnp.where(col > row, jnp.float32(-1e9),
                                          jnp.float32(0.0))[None, :, :]
    cross_bias = _key_pad_bias(srcpad_ref[...])           # (B, 1, Ts)

    # --- masked self-attention sub-layer ---
    y = _torch_layernorm(x, ln1g_ref[...], ln1b_ref[...], eps)
    x = x + _mha(y, y, self_bias, wqkvs_ref[...], bqkvs_ref[...],
                 wos_ref[...], bos_ref[...], cat_ref,
                 h=h, d_k=d_k, scale=scale, self_attn=True)

    # --- cross-attention sub-layer (K/V from encoder memory) ---
    y = _torch_layernorm(x, ln2g_ref[...], ln2b_ref[...], eps)
    x = x + _mha(y, mem, cross_bias, wqkvc_ref[...], bqkvc_ref[...],
                 woc_ref[...], boc_ref[...], cat_ref,
                 h=h, d_k=d_k, scale=scale, self_attn=False)

    # --- FFN sub-layer ---
    x = _ffn(x, ln3g_ref[...], ln3b_ref[...], w1_ref[...], b1_ref[...],
             w2_ref[...], b2_ref[...], eps)

    if apply_final_ln:                                    # decoder stack's final LN
        x = _torch_layernorm(x, lnfg_ref[...], lnfb_ref[...], eps)
    o_ref[...] = x


# ----------------------------- kernel wrappers -----------------------------

def encoder_layer(x, src_pad, lp, final_ln, *, h, apply_final_ln, eps=1e-6):
    """x: (B,Ts,D) f32; src_pad: (B,Ts) 1/0 key-pad mask."""
    B, T, D = x.shape
    Dff = lp['ffn']['w1'].shape[1]
    kern = functools.partial(_enc_layer_kernel, h=h, d_k=D // h,
                             scale=1.0 / math.sqrt(D // h), eps=eps,
                             apply_final_ln=apply_final_ln)
    return pl.pallas_call(
        kern,
        out_shape=jax.ShapeDtypeStruct((B, T, D), jnp.float32),
        scratch_shapes=[pltpu.VMEM((B, T, D), jnp.float32)],   # head-concat buffer
    )(x, src_pad,
      lp['ln1']['g'].reshape(1, D), lp['ln1']['b'].reshape(1, D),
      lp['self_attn']['w_qkv'], lp['self_attn']['b_qkv'].reshape(1, 3 * D),
      lp['self_attn']['wo'], lp['self_attn']['bo'].reshape(1, D),
      lp['ln2']['g'].reshape(1, D), lp['ln2']['b'].reshape(1, D),
      lp['ffn']['w1'], lp['ffn']['b1'].reshape(1, Dff),
      lp['ffn']['w2'], lp['ffn']['b2'].reshape(1, D),
      final_ln['g'].reshape(1, D), final_ln['b'].reshape(1, D))


def decoder_layer(x, memory, src_pad, tgt_pad, lp, final_ln, *, h,
                  apply_final_ln, causal=True, eps=1e-6):
    """x: (B,Tt,D); memory: (B,Ts,D); src_pad: (B,Ts); tgt_pad: (B,Tt)."""
    B, Tt, D = x.shape
    Dff = lp['ffn']['w1'].shape[1]
    kern = functools.partial(_dec_layer_kernel, h=h, d_k=D // h,
                             scale=1.0 / math.sqrt(D // h), eps=eps,
                             causal=causal, apply_final_ln=apply_final_ln)
    return pl.pallas_call(
        kern,
        out_shape=jax.ShapeDtypeStruct((B, Tt, D), jnp.float32),
        scratch_shapes=[pltpu.VMEM((B, Tt, D), jnp.float32)],  # head-concat buffer
    )(x, memory, src_pad, tgt_pad,
      lp['ln1']['g'].reshape(1, D), lp['ln1']['b'].reshape(1, D),
      lp['self_attn']['w_qkv'], lp['self_attn']['b_qkv'].reshape(1, 3 * D),
      lp['self_attn']['wo'], lp['self_attn']['bo'].reshape(1, D),
      lp['ln2']['g'].reshape(1, D), lp['ln2']['b'].reshape(1, D),
      lp['src_attn']['w_qkv'], lp['src_attn']['b_qkv'].reshape(1, 3 * D),
      lp['src_attn']['wo'], lp['src_attn']['bo'].reshape(1, D),
      lp['ln3']['g'].reshape(1, D), lp['ln3']['b'].reshape(1, D),
      lp['ffn']['w1'], lp['ffn']['b1'].reshape(1, Dff),
      lp['ffn']['w2'], lp['ffn']['b2'].reshape(1, D),
      final_ln['g'].reshape(1, D), final_ln['b'].reshape(1, D))


# ----------------------------- model glue (plain JAX, jit-compiled) -----------------------------

def embed(table, pe, tokens, d_model):
    # TODO(synk): embedding gather + PE add kept in plain JAX (data-dependent
    # gather; not worth a Pallas kernel at this size).
    x = jnp.take(table, tokens, axis=0) * math.sqrt(d_model)
    return x + pe[None, :tokens.shape[1], :]


def encoder_decoder_forward(params, pe, src, tgt, src_pad, tgt_pad, *, h, d_model):
    """forward(src, tgt, src_mask, tgt_mask) -> decoder output (B, Tt, d_model).

    src_pad: (B, Ts) 1/0 key-padding mask (the original (B,1,Ts) src_mask squeezed).
    tgt_pad: (B, Tt) 1/0 key-padding mask; the decoder self-attention additionally
             applies the causal (subsequent-position) mask in-kernel, matching the
             reference tgt_mask = tgt_pad & subsequent_mask.
    (The generator is held by the module but not applied in forward().)"""
    # ---- encode ----
    x = embed(params['src_embed'], pe, src, d_model)
    n_enc = len(params['enc_layers'])
    for i, lp in enumerate(params['enc_layers']):
        x = encoder_layer(x, src_pad, lp, params['enc_ln'], h=h,
                          apply_final_ln=(i == n_enc - 1))
    memory = x
    # ---- decode ----
    y = embed(params['tgt_embed'], pe, tgt, d_model)
    n_dec = len(params['dec_layers'])
    for i, lp in enumerate(params['dec_layers']):
        y = decoder_layer(y, memory, src_pad, tgt_pad, lp, params['dec_ln'], h=h,
                          apply_final_ln=(i == n_dec - 1), causal=True)
    return y


# ----------------------------- parameters -----------------------------

def positional_encoding(max_len, d_model):
    position = jnp.arange(max_len, dtype=jnp.float32)[:, None]
    div_term = jnp.exp(jnp.arange(0, d_model, 2, dtype=jnp.float32)
                       * -(math.log(10000.0) / d_model))
    pe = jnp.zeros((max_len, d_model), jnp.float32)
    pe = pe.at[:, 0::2].set(jnp.sin(position * div_term))
    pe = pe.at[:, 1::2].set(jnp.cos(position * div_term))
    return pe


def init_params(key, vocab_src, vocab_tgt, d_model, d_ff, h, N):
    keys = iter(jax.random.split(key, 512))

    def w(shape, scale=0.1, dtype=jnp.float32):
        return (jax.random.normal(next(keys), shape, jnp.float32) * scale).astype(dtype)

    def attn_params():
        # wq|wk|wv concatenated into one (D, 3D) weight for a fused QKV matmul.
        # Matmul weights stored in bf16 (MXU-native, halves HBM/VMEM traffic).
        return {'w_qkv': w((d_model, 3 * d_model), dtype=jnp.bfloat16),
                'b_qkv': jnp.zeros((3 * d_model,), jnp.float32),
                'wo': w((d_model, d_model), dtype=jnp.bfloat16),
                'bo': jnp.zeros((d_model,), jnp.float32)}

    def ffn_params():
        return {'w1': w((d_model, d_ff), dtype=jnp.bfloat16),
                'b1': jnp.zeros((d_ff,), jnp.float32),
                'w2': w((d_ff, d_model), dtype=jnp.bfloat16),
                'b2': jnp.zeros((d_model,), jnp.float32)}

    def ln_params():
        return {'g': jnp.ones((d_model,), jnp.float32),
                'b': jnp.zeros((d_model,), jnp.float32)}

    enc_layers = [{'self_attn': attn_params(), 'ffn': ffn_params(),
                   'ln1': ln_params(), 'ln2': ln_params()} for _ in range(N)]
    dec_layers = [{'self_attn': attn_params(), 'src_attn': attn_params(),
                   'ffn': ffn_params(),
                   'ln1': ln_params(), 'ln2': ln_params(), 'ln3': ln_params()}
                  for _ in range(N)]
    return {
        'src_embed': w((vocab_src, d_model)),
        'tgt_embed': w((vocab_tgt, d_model)),
        'enc_layers': enc_layers, 'enc_ln': ln_params(),
        'dec_layers': dec_layers, 'dec_ln': ln_params(),
        # generator params exist (as in __init__) but forward() never uses them
        'gen_w': w((d_model, vocab_tgt)),
        'gen_b': jnp.zeros((vocab_tgt,), jnp.float32),
    }


# ----------------------------- main -----------------------------

if __name__ == "__main__":
    B, Ts, Tt = 2, 8, 8
    d_model, d_ff, h, N = 32, 64, 4, 2
    vocab_src = vocab_tgt = 16

    key = jax.random.PRNGKey(0)
    pkey, skey, tkey = jax.random.split(key, 3)

    params = init_params(pkey, vocab_src, vocab_tgt, d_model, d_ff, h, N)
    pe = positional_encoding(64, d_model)

    src = jax.random.randint(skey, (B, Ts), 1, vocab_src, dtype=jnp.int32)
    tgt = jax.random.randint(tkey, (B, Tt), 1, vocab_tgt, dtype=jnp.int32)
    # Compact key-padding masks (all ones here), matching src_mask = ones(B,1,Ts)
    # and tgt_mask = pad & subsequent_mask of the reference (causal built in-kernel).
    src_pad = jnp.ones((B, Ts), jnp.float32)
    tgt_pad = jnp.ones((B, Tt), jnp.float32)

    forward = jax.jit(functools.partial(encoder_decoder_forward,
                                        h=h, d_model=d_model))
    out = forward(params, pe, src, tgt, src_pad, tgt_pad)
    out = jax.block_until_ready(out)
    assert out.shape == (B, Tt, d_model) and out.dtype == jnp.float32
    assert bool(jnp.all(jnp.isfinite(out)))
    print("KERNEL_OK")
</pallas_src>

<mosaic_0001>
module attributes {stable_mosaic.version = 11 : i64} {
  func.func @_enc_layer_kernel(%arg0: memref<2x8x32xf32, #tpu.memory_space<vmem>>, %arg1: memref<2x8xf32, #tpu.memory_space<vmem>>, %arg2: memref<1x32xf32, #tpu.memory_space<vmem>>, %arg3: memref<1x32xf32, #tpu.memory_space<vmem>>, %arg4: memref<32x96xbf16, #tpu.memory_space<vmem>>, %arg5: memref<1x96xf32, #tpu.memory_space<vmem>>, %arg6: memref<32x32xbf16, #tpu.memory_space<vmem>>, %arg7: memref<1x32xf32, #tpu.memory_space<vmem>>, %arg8: memref<1x32xf32, #tpu.memory_space<vmem>>, %arg9: memref<1x32xf32, #tpu.memory_space<vmem>>, %arg10: memref<32x64xbf16, #tpu.memory_space<vmem>>, %arg11: memref<1x64xf32, #tpu.memory_space<vmem>>, %arg12: memref<64x32xbf16, #tpu.memory_space<vmem>>, %arg13: memref<1x32xf32, #tpu.memory_space<vmem>>, %arg14: memref<1x32xf32, #tpu.memory_space<vmem>>, %arg15: memref<1x32xf32, #tpu.memory_space<vmem>>, %arg16: memref<2x8x32xf32, #tpu.memory_space<vmem>>, %arg17: memref<2x8x32xf32, #tpu.memory_space<vmem>>) attributes {dimension_semantics = [], scalar_prefetch = 0 : i64, scratch_operands = 1 : i64, tpu.core_type = #tpu.core_type<tc>} {
    %c0 = arith.constant 0 : index
    %c0_0 = arith.constant 0 : index
    %c0_1 = arith.constant 0 : index
    %0 = vector.load %arg0[%c0, %c0_0, %c0_1] : memref<2x8x32xf32, #tpu.memory_space<vmem>>, vector<2x8x32xf32>
    %c0_2 = arith.constant 0 : index
    %c0_3 = arith.constant 0 : index
    %1 = vector.load %arg1[%c0_2, %c0_3] : memref<2x8xf32, #tpu.memory_space<vmem>>, vector<2x8xf32>
    %cst = arith.constant 0.000000e+00 : f32
    %2 = vector.broadcast %cst : f32 to vector<2x8xf32>
    %3 = arith.cmpf oeq, %1, %2 : vector<2x8xf32>
    %cst_4 = arith.constant -1.000000e+09 : f32
    %cst_5 = arith.constant 0.000000e+00 : f32
    %4 = vector.broadcast %cst_4 : f32 to vector<2x8xf32>
    %5 = vector.broadcast %cst_5 : f32 to vector<2x8xf32>
    %6 = arith.select %3, %4, %5 : vector<2x8xi1>, vector<2x8xf32>
    %7 = vector.shape_cast %6 : vector<2x8xf32> to vector<2x1x8xf32>
    %c0_6 = arith.constant 0 : index
    %c0_7 = arith.constant 0 : index
    %8 = vector.load %arg2[%c0_6, %c0_7] : memref<1x32xf32, #tpu.memory_space<vmem>>, vector<1x32xf32>
    %c0_8 = arith.constant 0 : index
    %c0_9 = arith.constant 0 : index
    %9 = vector.load %arg3[%c0_8, %c0_9] : memref<1x32xf32, #tpu.memory_space<vmem>>, vector<1x32xf32>
    %cst_10 = arith.constant dense<0.000000e+00> : vector<2x8xf32>
    %10 = vector.multi_reduction <add>, %0, %cst_10 [2] : vector<2x8x32xf32> to vector<2x8xf32>
    %11 = vector.shape_cast %10 : vector<2x8xf32> to vector<2x8x1xf32>
    %cst_11 = arith.constant 3.200000e+01 : f32
    %12 = vector.broadcast %cst_11 : f32 to vector<2x8x1xf32>
    %13 = arith.divf %11, %12 : vector<2x8x1xf32>
    %14 = vector.broadcast %13 : vector<2x8x1xf32> to vector<2x8x32xf32>
    %15 = arith.subf %0, %14 : vector<2x8x32xf32>
    %16 = arith.mulf %15, %15 : vector<2x8x32xf32>
    %cst_12 = arith.constant dense<0.000000e+00> : vector<2x8xf32>
    %17 = vector.multi_reduction <add>, %16, %cst_12 [2] : vector<2x8x32xf32> to vector<2x8xf32>
    %18 = vector.shape_cast %17 : vector<2x8xf32> to vector<2x8x1xf32>
    %cst_13 = arith.constant 3.100000e+01 : f32
    %19 = vector.broadcast %cst_13 : f32 to vector<2x8x1xf32>
    %20 = arith.divf %18, %19 : vector<2x8x1xf32>
    %21 = vector.shape_cast %8 : vector<1x32xf32> to vector<1x1x32xf32>
    %22 = vector.broadcast %21 : vector<1x1x32xf32> to vector<2x8x32xf32>
    %23 = arith.mulf %22, %15 : vector<2x8x32xf32>
    %24 = math.sqrt %20 : vector<2x8x1xf32>
    %cst_14 = arith.constant 9.99999997E-7 : f32
    %25 = vector.broadcast %cst_14 : f32 to vector<2x8x1xf32>
    %26 = arith.addf %24, %25 : vector<2x8x1xf32>
    %27 = vector.broadcast %26 : vector<2x8x1xf32> to vector<2x8x32xf32>
    %28 = arith.divf %23, %27 : vector<2x8x32xf32>
    %29 = vector.shape_cast %9 : vector<1x32xf32> to vector<1x1x32xf32>
    %30 = vector.broadcast %29 : vector<1x1x32xf32> to vector<2x8x32xf32>
    %31 = arith.addf %28, %30 : vector<2x8x32xf32>
    %c0_15 = arith.constant 0 : index
    %c0_16 = arith.constant 0 : index
    %32 = vector.load %arg4[%c0_15, %c0_16] : memref<32x96xbf16, #tpu.memory_space<vmem>>, vector<32x96xbf16>
    %c0_17 = arith.constant 0 : index
    %c0_18 = arith.constant 0 : index
    %33 = vector.load %arg5[%c0_17, %c0_18] : memref<1x96xf32, #tpu.memory_space<vmem>>, vector<1x96xf32>
    %c0_19 = arith.constant 0 : index
    %c0_20 = arith.constant 0 : index
    %34 = vector.load %arg6[%c0_19, %c0_20] : memref<32x32xbf16, #tpu.memory_space<vmem>>, vector<32x32xbf16>
    %c0_21 = arith.constant 0 : index
    %c0_22 = arith.constant 0 : index
    %35 = vector.load %arg7[%c0_21, %c0_22] : memref<1x32xf32, #tpu.memory_space<vmem>>, vector<1x32xf32>
    %36 = vector.shape_cast %31 : vector<2x8x32xf32> to vector<16x32xf32>
    %37 = arith.truncf %36 : vector<16x32xf32> to vector<16x32xbf16>
    %cst_23 = arith.constant dense<0.000000e+00> : vector<16x96xf32>
    %38 = tpu.matmul %37, %32, %cst_23 {dimension_numbers = #tpu.dot_dimension_numbers<[1], [0], [0], [1], [0, 0, 1, 1], [], []>} : vector<16x32xbf16>, vector<32x96xbf16>, vector<16x96xf32> -> vector<16x96xf32>
    %39 = vector.broadcast %33 : vector<1x96xf32> to vector<16x96xf32>
    %40 = arith.addf %38, %39 : vector<16x96xf32>
    %41 = vector.extract_strided_slice %40 {offsets = [0, 0], sizes = [16, 32], strides = [1, 1]} : vector<16x96xf32> to vector<16x32xf32>
    %42 = vector.shape_cast %41 : vector<16x32xf32> to vector<2x8x32xf32>
    %cst_24 = arith.constant 0.353553385 : f32
    %43 = vector.broadcast %cst_24 : f32 to vector<2x8x32xf32>
    %44 = arith.mulf %42, %43 : vector<2x8x32xf32>
    %45 = vector.extract_strided_slice %40 {offsets = [0, 32], sizes = [16, 32], strides = [1, 1]} : vector<16x96xf32> to vector<16x32xf32>
    %46 = vector.shape_cast %45 : vector<16x32xf32> to vector<2x8x32xf32>
    %47 = vector.extract_strided_slice %40 {offsets = [0, 64], sizes = [16, 32], strides = [1, 1]} : vector<16x96xf32> to vector<16x32xf32>
    %48 = vector.shape_cast %47 : vector<16x32xf32> to vector<2x8x32xf32>
    %49 = vector.extract_strided_slice %44 {offsets = [0, 0, 0], sizes = [2, 8, 8], strides = [1, 1, 1]} : vector<2x8x32xf32> to vector<2x8x8xf32>
    %50 = arith.truncf %49 : vector<2x8x8xf32> to vector<2x8x8xbf16>
    %51 = vector.extract_strided_slice %46 {offsets = [0, 0, 0], sizes = [2, 8, 8], strides = [1, 1, 1]} : vector<2x8x32xf32> to vector<2x8x8xf32>
    %52 = arith.truncf %51 : vector<2x8x8xf32> to vector<2x8x8xbf16>
    "tpu.trace_start"() <{level = 10 : i32, message = "bqd,bkd->bqk"}> : () -> ()
    %cst_25 = arith.constant dense<0.000000e+00> : vector<2x8x8xf32>
    %53 = tpu.matmul %50, %52, %cst_25 {dimension_numbers = #tpu.dot_dimension_numbers<[2], [2], [1], [1], [0, 0, 0, 1, 1, 1], [0], [0]>} : vector<2x8x8xbf16>, vector<2x8x8xbf16>, vector<2x8x8xf32> -> vector<2x8x8xf32>
    "tpu.trace_stop"() : () -> ()
    %54 = vector.broadcast %7 : vector<2x1x8xf32> to vector<2x8x8xf32>
    %55 = arith.addf %53, %54 : vector<2x8x8xf32>
    %cst_26 = arith.constant dense<0xFF800000> : vector<2x8xf32>
    %56 = vector.multi_reduction <maximumf>, %55, %cst_26 [2] : vector<2x8x8xf32> to vector<2x8xf32>
    %57 = vector.shape_cast %56 : vector<2x8xf32> to vector<2x8x1xf32>
    %58 = vector.broadcast %57 : vector<2x8x1xf32> to vector<2x8x8xf32>
    %59 = arith.subf %55, %58 : vector<2x8x8xf32>
    %60 = math.exp %59 : vector<2x8x8xf32>
    %cst_27 = arith.constant dense<0.000000e+00> : vector<2x8xf32>
    %61 = vector.multi_reduction <add>, %60, %cst_27 [2] : vector<2x8x8xf32> to vector<2x8xf32>
    %62 = vector.shape_cast %61 : vector<2x8xf32> to vector<2x8x1xf32>
    %63 = tpu.reciprocal %62 {approx = true} : vector<2x8x1xf32> -> vector<2x8x1xf32>
    %64 = vector.broadcast %63 : vector<2x8x1xf32> to vector<2x8x8xf32>
    %65 = arith.mulf %60, %64 : vector<2x8x8xf32>
    %66 = arith.truncf %65 : vector<2x8x8xf32> to vector<2x8x8xbf16>
    %67 = vector.extract_strided_slice %48 {offsets = [0, 0, 0], sizes = [2, 8, 8], strides = [1, 1, 1]} : vector<2x8x32xf32> to vector<2x8x8xf32>
    %68 = arith.truncf %67 : vector<2x8x8xf32> to vector<2x8x8xbf16>
    "tpu.trace_start"() <{level = 10 : i32, message = "bqk,bkd->bqd"}> : () -> ()
    %cst_28 = arith.constant dense<0.000000e+00> : vector<2x8x8xf32>
    %69 = tpu.matmul %66, %68, %cst_28 {dimension_numbers = #tpu.dot_dimension_numbers<[2], [1], [1], [2], [0, 0, 0, 1, 1, 2], [0], [0]>} : vector<2x8x8xbf16>, vector<2x8x8xbf16>, vector<2x8x8xf32> -> vector<2x8x8xf32>
    "tpu.trace_stop"() : () -> ()
    %c0_29 = arith.constant 0 : index
    %c0_30 = arith.constant 0 : index
    %c0_31 = arith.constant 0 : index
    %70 = vector.load %arg17[%c0_29, %c0_30, %c0_31] : memref<2x8x32xf32, #tpu.memory_space<vmem>>, vector<2x8x8xf32>
    tpu.vector_store %arg17[%c0_29, %c0_30, %c0_31], %69 {strides = array<i32>} : memref<2x8x32xf32, #tpu.memory_space<vmem>>, vector<2x8x8xf32>,
    %71 = vector.extract_strided_slice %44 {offsets = [0, 0, 8], sizes = [2, 8, 8], strides = [1, 1, 1]} : vector<2x8x32xf32> to vector<2x8x8xf32>
    %72 = arith.truncf %71 : vector<2x8x8xf32> to vector<2x8x8xbf16>
    %73 = vector.extract_strided_slice %46 {offsets = [0, 0, 8], sizes = [2, 8, 8], strides = [1, 1, 1]} : vector<2x8x32xf32> to vector<2x8x8xf32>
    %74 = arith.truncf %73 : vector<2x8x8xf32> to vector<2x8x8xbf16>
    "tpu.trace_start"() <{level = 10 : i32, message = "bqd,bkd->bqk"}> : () -> ()
    %cst_32 = arith.constant dense<0.000000e+00> : vector<2x8x8xf32>
    %75 = tpu.matmul %72, %74, %cst_32 {dimension_numbers = #tpu.dot_dimension_numbers<[2], [2], [1], [1], [0, 0, 0, 1, 1, 1], [0], [0]>} : vector<2x8x8xbf16>, vector<2x8x8xbf16>, vector<2x8x8xf32> -> vector<2x8x8xf32>
    "tpu.trace_stop"() : () -> ()
    %76 = vector.broadcast %7 : vector<2x1x8xf32> to vector<2x8x8xf32>
    %77 = arith.addf %75, %76 : vector<2x8x8xf32>
    %cst_33 = arith.constant dense<0xFF800000> : vector<2x8xf32>
    %78 = vector.multi_reduction <maximumf>, %77, %cst_33 [2] : vector<2x8x8xf32> to vector<2x8xf32>
    %79 = vector.shape_cast %78 : vector<2x8xf32> to vector<2x8x1xf32>
    %80 = vector.broadcast %79 : vector<2x8x1xf32> to vector<2x8x8xf32>
    %81 = arith.subf %77, %80 : vector<2x8x8xf32>
    %82 = math.exp %81 : vector<2x8x8xf32>
    %cst_34 = arith.constant dense<0.000000e+00> : vector<2x8xf32>
    %83 = vector.multi_reduction <add>, %82, %cst_34 [2] : vector<2x8x8xf32> to vector<2x8xf32>
    %84 = vector.shape_cast %83 : vector<2x8xf32> to vector<2x8x1xf32>
    %85 = tpu.reciprocal %84 {approx = true} : vector<2x8x1xf32> -> vector<2x8x1xf32>
    %86 = vector.broadcast %85 : vector<2x8x1xf32> to vector<2x8x8xf32>
    %87 = arith.mulf %82, %86 : vector<2x8x8xf32>
    %88 = arith.truncf %87 : vector<2x8x8xf32> to vector<2x8x8xbf16>
    %89 = vector.extract_strided_slice %48 {offsets = [0, 0, 8], sizes = [2, 8, 8], strides = [1, 1, 1]} : vector<2x8x32xf32> to vector<2x8x8xf32>
    %90 = arith.truncf %89 : vector<2x8x8xf32> to vector<2x8x8xbf16>
    "tpu.trace_start"() <{level = 10 : i32, message = "bqk,bkd->bqd"}> : () -> ()
    %cst_35 = arith.constant dense<0.000000e+00> : vector<2x8x8xf32>
    %91 = tpu.matmul %88, %90, %cst_35 {dimension_numbers = #tpu.dot_dimension_numbers<[2], [1], [1], [2], [0, 0, 0, 1, 1, 2], [0], [0]>} : vector<2x8x8xbf16>, vector<2x8x8xbf16>, vector<2x8x8xf32> -> vector<2x8x8xf32>
    "tpu.trace_stop"() : () -> ()
    %c0_36 = arith.constant 0 : index
    %c0_37 = arith.constant 0 : index
    %c8 = arith.constant 8 : index
    %92 = vector.load %arg17[%c0_36, %c0_37, %c8] : memref<2x8x32xf32, #tpu.memory_space<vmem>>, vector<2x8x8xf32>
    tpu.vector_store %arg17[%c0_36, %c0_37, %c8], %91 {strides = array<i32>} : memref<2x8x32xf32, #tpu.memory_space<vmem>>, vector<2x8x8xf32>,
    %93 = vector.extract_strided_slice %44 {offsets = [0, 0, 16], sizes = [2, 8, 8], strides = [1, 1, 1]} : vector<2x8x32xf32> to vector<2x8x8xf32>
    %94 = arith.truncf %93 : vector<2x8x8xf32> to vector<2x8x8xbf16>
    %95 = vector.extract_strided_slice %46 {offsets = [0, 0, 16], sizes = [2, 8, 8], strides = [1, 1, 1]} : vector<2x8x32xf32> to vector<2x8x8xf32>
    %96 = arith.truncf %95 : vector<2x8x8xf32> to vector<2x8x8xbf16>
    "tpu.trace_start"() <{level = 10 : i32, message = "bqd,bkd->bqk"}> : () -> ()
    %cst_38 = arith.constant dense<0.000000e+00> : vector<2x8x8xf32>
    %97 = tpu.matmul %94, %96, %cst_38 {dimension_numbers = #tpu.dot_dimension_numbers<[2], [2], [1], [1], [0, 0, 0, 1, 1, 1], [0], [0]>} : vector<2x8x8xbf16>, vector<2x8x8xbf16>, vector<2x8x8xf32> -> vector<2x8x8xf32>
    "tpu.trace_stop"() : () -> ()
    %98 = vector.broadcast %7 : vector<2x1x8xf32> to vector<2x8x8xf32>
    %99 = arith.addf %97, %98 : vector<2x8x8xf32>
    %cst_39 = arith.constant dense<0xFF800000> : vector<2x8xf32>
    %100 = vector.multi_reduction <maximumf>, %99, %cst_39 [2] : vector<2x8x8xf32> to vector<2x8xf32>
    %101 = vector.shape_cast %100 : vector<2x8xf32> to vector<2x8x1xf32>
    %102 = vector.broadcast %101 : vector<2x8x1xf32> to vector<2x8x8xf32>
    %103 = arith.subf %99, %102 : vector<2x8x8xf32>
    %104 = math.exp %103 : vector<2x8x8xf32>
    %cst_40 = arith.constant dense<0.000000e+00> : vector<2x8xf32>
    %105 = vector.multi_reduction <add>, %104, %cst_40 [2] : vector<2x8x8xf32> to vector<2x8xf32>
    %106 = vector.shape_cast %105 : vector<2x8xf32> to vector<2x8x1xf32>
    %107 = tpu.reciprocal %106 {approx = true} : vector<2x8x1xf32> -> vector<2x8x1xf32>
    %108 = vector.broadcast %107 : vector<2x8x1xf32> to vector<2x8x8xf32>
    %109 = arith.mulf %104, %108 : vector<2x8x8xf32>
    %110 = arith.truncf %109 : vector<2x8x8xf32> to vector<2x8x8xbf16>
    %111 = vector.extract_strided_slice %48 {offsets = [0, 0, 16], sizes = [2, 8, 8], strides = [1, 1, 1]} : vector<2x8x32xf32> to vector<2x8x8xf32>
    %112 = arith.truncf %111 : vector<2x8x8xf32> to vector<2x8x8xbf16>
    "tpu.trace_start"() <{level = 10 : i32, message = "bqk,bkd->bqd"}> : () -> ()
    %cst_41 = arith.constant dense<0.000000e+00> : vector<2x8x8xf32>
    %113 = tpu.matmul %110, %112, %cst_41 {dimension_numbers = #tpu.dot_dimension_numbers<[2], [1], [1], [2], [0, 0, 0, 1, 1, 2], [0], [0]>} : vector<2x8x8xbf16>, vector<2x8x8xbf16>, vector<2x8x8xf32> -> vector<2x8x8xf32>
    "tpu.trace_stop"() : () -> ()
    %c0_42 = arith.constant 0 : index
    %c0_43 = arith.constant 0 : index
    %c16 = arith.constant 16 : index
    %114 = vector.load %arg17[%c0_42, %c0_43, %c16] : memref<2x8x32xf32, #tpu.memory_space<vmem>>, vector<2x8x8xf32>
    tpu.vector_store %arg17[%c0_42, %c0_43, %c16], %113 {strides = array<i32>} : memref<2x8x32xf32, #tpu.memory_space<vmem>>, vector<2x8x8xf32>,
    %115 = vector.extract_strided_slice %44 {offsets = [0, 0, 24], sizes = [2, 8, 8], strides = [1, 1, 1]} : vector<2x8x32xf32> to vector<2x8x8xf32>
    %116 = arith.truncf %115 : vector<2x8x8xf32> to vector<2x8x8xbf16>
    %117 = vector.extract_strided_slice %46 {offsets = [0, 0, 24], sizes = [2, 8, 8], strides = [1, 1, 1]} : vector<2x8x32xf32> to vector<2x8x8xf32>
    %118 = arith.truncf %117 : vector<2x8x8xf32> to vector<2x8x8xbf16>
    "tpu.trace_start"() <{level = 10 : i32, message = "bqd,bkd->bqk"}> : () -> ()
    %cst_44 = arith.constant dense<0.000000e+00> : vector<2x8x8xf32>
    %119 = tpu.matmul %116, %118, %cst_44 {dimension_numbers = #tpu.dot_dimension_numbers<[2], [2], [1], [1], [0, 0, 0, 1, 1, 1], [0], [0]>} : vector<2x8x8xbf16>, vector<2x8x8xbf16>, vector<2x8x8xf32> -> vector<2x8x8xf32>
    "tpu.trace_stop"() : () -> ()
    %120 = vector.broadcast %7 : vector<2x1x8xf32> to vector<2x8x8xf32>
    %121 = arith.addf %119, %120 : vector<2x8x8xf32>
    %cst_45 = arith.constant dense<0xFF800000> : vector<2x8xf32>
    %122 = vector.multi_reduction <maximumf>, %121, %cst_45 [2] : vector<2x8x8xf32> to vector<2x8xf32>
    %123 = vector.shape_cast %122 : vector<2x8xf32> to vector<2x8x1xf32>
    %124 = vector.broadcast %123 : vector<2x8x1xf32> to vector<2x8x8xf32>
    %125 = arith.subf %121, %124 : vector<2x8x8xf32>
    %126 = math.exp %125 : vector<2x8x8xf32>
    %cst_46 = arith.constant dense<0.000000e+00> : vector<2x8xf32>
    %127 = vector.multi_reduction <add>, %126, %cst_46 [2] : vector<2x8x8xf32> to vector<2x8xf32>
    %128 = vector.shape_cast %127 : vector<2x8xf32> to vector<2x8x1xf32>
    %129 = tpu.reciprocal %128 {approx = true} : vector<2x8x1xf32> -> vector<2x8x1xf32>
    %130 = vector.broadcast %129 : vector<2x8x1xf32> to vector<2x8x8xf32>
    %131 = arith.mulf %126, %130 : vector<2x8x8xf32>
    %132 = arith.truncf %131 : vector<2x8x8xf32> to vector<2x8x8xbf16>
    %133 = vector.extract_strided_slice %48 {offsets = [0, 0, 24], sizes = [2, 8, 8], strides = [1, 1, 1]} : vector<2x8x32xf32> to vector<2x8x8xf32>
    %134 = arith.truncf %133 : vector<2x8x8xf32> to vector<2x8x8xbf16>
    "tpu.trace_start"() <{level = 10 : i32, message = "bqk,bkd->bqd"}> : () -> ()
    %cst_47 = arith.constant dense<0.000000e+00> : vector<2x8x8xf32>
    %135 = tpu.matmul %132, %134, %cst_47 {dimension_numbers = #tpu.dot_dimension_numbers<[2], [1], [1], [2], [0, 0, 0, 1, 1, 2], [0], [0]>} : vector<2x8x8xbf16>, vector<2x8x8xbf16>, vector<2x8x8xf32> -> vector<2x8x8xf32>
    "tpu.trace_stop"() : () -> ()
    %c0_48 = arith.constant 0 : index
    %c0_49 = arith.constant 0 : index
    %c24 = arith.constant 24 : index
    %136 = vector.load %arg17[%c0_48, %c0_49, %c24] : memref<2x8x32xf32, #tpu.memory_space<vmem>>, vector<2x8x8xf32>
    tpu.vector_store %arg17[%c0_48, %c0_49, %c24], %135 {strides = array<i32>} : memref<2x8x32xf32, #tpu.memory_space<vmem>>, vector<2x8x8xf32>,
    %c0_50 = arith.constant 0 : index
    %c0_51 = arith.constant 0 : index
    %c0_52 = arith.constant 0 : index
    %137 = vector.load %arg17[%c0_50, %c0_51, %c0_52] : memref<2x8x32xf32, #tpu.memory_space<vmem>>, vector<2x8x32xf32>
    %138 = vector.shape_cast %137 : vector<2x8x32xf32> to vector<16x32xf32>
    %139 = arith.truncf %138 : vector<16x32xf32> to vector<16x32xbf16>
    %cst_53 = arith.constant dense<0.000000e+00> : vector<16x32xf32>
    %140 = tpu.matmul %139, %34, %cst_53 {dimension_numbers = #tpu.dot_dimension_numbers<[1], [0], [0], [1], [0, 0, 1, 1], [], []>} : vector<16x32xbf16>, vector<32x32xbf16>, vector<16x32xf32> -> vector<16x32xf32>
    %141 = vector.broadcast %35 : vector<1x32xf32> to vector<16x32xf32>
    %142 = arith.addf %140, %141 : vector<16x32xf32>
    %143 = vector.shape_cast %142 : vector<16x32xf32> to vector<2x8x32xf32>
    %144 = arith.addf %0, %143 : vector<2x8x32xf32>
    %c0_54 = arith.constant 0 : index
    %c0_55 = arith.constant 0 : index
    %145 = vector.load %arg8[%c0_54, %c0_55] : memref<1x32xf32, #tpu.memory_space<vmem>>, vector<1x32xf32>
    %c0_56 = arith.constant 0 : index
    %c0_57 = arith.constant 0 : index
    %146 = vector.load %arg9[%c0_56, %c0_57] : memref<1x32xf32, #tpu.memory_space<vmem>>, vector<1x32xf32>
    %c0_58 = arith.constant 0 : index
    %c0_59 = arith.constant 0 : index
    %147 = vector.load %arg10[%c0_58, %c0_59] : memref<32x64xbf16, #tpu.memory_space<vmem>>, vector<32x64xbf16>
    %c0_60 = arith.constant 0 : index
    %c0_61 = arith.constant 0 : index
    %148 = vector.load %arg11[%c0_60, %c0_61] : memref<1x64xf32, #tpu.memory_space<vmem>>, vector<1x64xf32>
    %c0_62 = arith.constant 0 : index
    %c0_63 = arith.constant 0 : index
    %149 = vector.load %arg12[%c0_62, %c0_63] : memref<64x32xbf16, #tpu.memory_space<vmem>>, vector<64x32xbf16>
    %c0_64 = arith.constant 0 : index
    %c0_65 = arith.constant 0 : index
    %150 = vector.load %arg13[%c0_64, %c0_65] : memref<1x32xf32, #tpu.memory_space<vmem>>, vector<1x32xf32>
    %cst_66 = arith.constant dense<0.000000e+00> : vector<2x8xf32>
    %151 = vector.multi_reduction <add>, %144, %cst_66 [2] : vector<2x8x32xf32> to vector<2x8xf32>
    %152 = vector.shape_cast %151 : vector<2x8xf32> to vector<2x8x1xf32>
    %cst_67 = arith.constant 3.200000e+01 : f32
    %153 = vector.broadcast %cst_67 : f32 to vector<2x8x1xf32>
    %154 = arith.divf %152, %153 : vector<2x8x1xf32>
    %155 = vector.broadcast %154 : vector<2x8x1xf32> to vector<2x8x32xf32>
    %156 = arith.subf %144, %155 : vector<2x8x32xf32>
    %157 = arith.mulf %156, %156 : vector<2x8x32xf32>
    %cst_68 = arith.constant dense<0.000000e+00> : vector<2x8xf32>
    %158 = vector.multi_reduction <add>, %157, %cst_68 [2] : vector<2x8x32xf32> to vector<2x8xf32>
    %159 = vector.shape_cast %158 : vector<2x8xf32> to vector<2x8x1xf32>
    %cst_69 = arith.constant 3.100000e+01 : f32
    %160 = vector.broadcast %cst_69 : f32 to vector<2x8x1xf32>
    %161 = arith.divf %159, %160 : vector<2x8x1xf32>
    %162 = vector.shape_cast %145 : vector<1x32xf32> to vector<1x1x32xf32>
    %163 = vector.broadcast %162 : vector<1x1x32xf32> to vector<2x8x32xf32>
    %164 = arith.mulf %163, %156 : vector<2x8x32xf32>
    %165 = math.sqrt %161 : vector<2x8x1xf32>
    %cst_70 = arith.constant 9.99999997E-7 : f32
    %166 = vector.broadcast %cst_70 : f32 to vector<2x8x1xf32>
    %167 = arith.addf %165, %166 : vector<2x8x1xf32>
    %168 = vector.broadcast %167 : vector<2x8x1xf32> to vector<2x8x32xf32>
    %169 = arith.divf %164, %168 : vector<2x8x32xf32>
    %170 = vector.shape_cast %146 : vector<1x32xf32> to vector<1x1x32xf32>
    %171 = vector.broadcast %170 : vector<1x1x32xf32> to vector<2x8x32xf32>
    %172 = arith.addf %169, %171 : vector<2x8x32xf32>
    %173 = vector.shape_cast %172 : vector<2x8x32xf32> to vector<16x32xf32>
    %174 = arith.truncf %173 : vector<16x32xf32> to vector<16x32xbf16>
    %cst_71 = arith.constant dense<0.000000e+00> : vector<16x64xf32>
    %175 = tpu.matmul %174, %147, %cst_71 {dimension_numbers = #tpu.dot_dimension_numbers<[1], [0], [0], [1], [0, 0, 1, 1], [], []>} : vector<16x32xbf16>, vector<32x64xbf16>, vector<16x64xf32> -> vector<16x64xf32>
    %176 = vector.broadcast %148 : vector<1x64xf32> to vector<16x64xf32>
    %177 = arith.addf %175, %176 : vector<16x64xf32>
    %cst_72 = arith.constant 0.000000e+00 : f32
    %178 = vector.broadcast %cst_72 : f32 to vector<16x64xf32>
    %179 = arith.maximumf %177, %178 : vector<16x64xf32>
    %180 = arith.truncf %179 : vector<16x64xf32> to vector<16x64xbf16>
    %cst_73 = arith.constant dense<0.000000e+00> : vector<16x32xf32>
    %181 = tpu.matmul %180, %149, %cst_73 {dimension_numbers = #tpu.dot_dimension_numbers<[1], [0], [0], [1], [0, 0, 1, 1], [], []>} : vector<16x64xbf16>, vector<64x32xbf16>, vector<16x32xf32> -> vector<16x32xf32>
    %182 = vector.broadcast %150 : vector<1x32xf32> to vector<16x32xf32>
    %183 = arith.addf %181, %182 : vector<16x32xf32>
    %184 = vector.shape_cast %183 : vector<16x32xf32> to vector<2x8x32xf32>
    %185 = arith.addf %144, %184 : vector<2x8x32xf32>
    %c0_74 = arith.constant 0 : index
    %c0_75 = arith.constant 0 : index
    %c0_76 = arith.constant 0 : index
    %186 = vector.load %arg16[%c0_74, %c0_75, %c0_76] : memref<2x8x32xf32, #tpu.memory_space<vmem>>, vector<2x8x32xf32>
    tpu.vector_store %arg16[%c0_74, %c0_75, %c0_76], %185 {strides = array<i32>} : memref<2x8x32xf32, #tpu.memory_space<vmem>>, vector<2x8x32xf32>,
    return
  }
}

module attributes {stable_mosaic.version = 11 : i64} {
  func.func @_enc_layer_kernel(%arg0: memref<2x8x32xf32, #tpu.memory_space<vmem>>, %arg1: memref<2x8xf32, #tpu.memory_space<vmem>>, %arg2: memref<1x32xf32, #tpu.memory_space<vmem>>, %arg3: memref<1x32xf32, #tpu.memory_space<vmem>>, %arg4: memref<32x96xbf16, #tpu.memory_space<vmem>>, %arg5: memref<1x96xf32, #tpu.memory_space<vmem>>, %arg6: memref<32x32xbf16, #tpu.memory_space<vmem>>, %arg7: memref<1x32xf32, #tpu.memory_space<vmem>>, %arg8: memref<1x32xf32, #tpu.memory_space<vmem>>, %arg9: memref<1x32xf32, #tpu.memory_space<vmem>>, %arg10: memref<32x64xbf16, #tpu.memory_space<vmem>>, %arg11: memref<1x64xf32, #tpu.memory_space<vmem>>, %arg12: memref<64x32xbf16, #tpu.memory_space<vmem>>, %arg13: memref<1x32xf32, #tpu.memory_space<vmem>>, %arg14: memref<1x32xf32, #tpu.memory_space<vmem>>, %arg15: memref<1x32xf32, #tpu.memory_space<vmem>>, %arg16: memref<2x8x32xf32, #tpu.memory_space<vmem>>, %arg17: memref<2x8x32xf32, #tpu.memory_space<vmem>>) attributes {dimension_semantics = [], scalar_prefetch = 0 : i64, scratch_operands = 1 : i64, tpu.core_type = #tpu.core_type<tc>} {
    %c0 = arith.constant 0 : index
    %c0_0 = arith.constant 0 : index
    %c0_1 = arith.constant 0 : index
    %0 = vector.load %arg0[%c0, %c0_0, %c0_1] : memref<2x8x32xf32, #tpu.memory_space<vmem>>, vector<2x8x32xf32>
    %c0_2 = arith.constant 0 : index
    %c0_3 = arith.constant 0 : index
    %1 = vector.load %arg1[%c0_2, %c0_3] : memref<2x8xf32, #tpu.memory_space<vmem>>, vector<2x8xf32>
    %cst = arith.constant 0.000000e+00 : f32
    %2 = vector.broadcast %cst : f32 to vector<2x8xf32>
    %3 = arith.cmpf oeq, %1, %2 : vector<2x8xf32>
    %cst_4 = arith.constant -1.000000e+09 : f32
    %cst_5 = arith.constant 0.000000e+00 : f32
    %4 = vector.broadcast %cst_4 : f32 to vector<2x8xf32>
    %5 = vector.broadcast %cst_5 : f32 to vector<2x8xf32>
    %6 = arith.select %3, %4, %5 : vector<2x8xi1>, vector<2x8xf32>
    %7 = vector.shape_cast %6 : vector<2x8xf32> to vector<2x1x8xf32>
    %c0_6 = arith.constant 0 : index
    %c0_7 = arith.constant 0 : index
    %8 = vector.load %arg2[%c0_6, %c0_7] : memref<1x32xf32, #tpu.memory_space<vmem>>, vector<1x32xf32>
    %c0_8 = arith.constant 0 : index
    %c0_9 = arith.constant 0 : index
    %9 = vector.load %arg3[%c0_8, %c0_9] : memref<1x32xf32, #tpu.memory_space<vmem>>, vector<1x32xf32>
    %cst_10 = arith.constant dense<0.000000e+00> : vector<2x8xf32>
    %10 = vector.multi_reduction <add>, %0, %cst_10 [2] : vector<2x8x32xf32> to vector<2x8xf32>
    %11 = vector.shape_cast %10 : vector<2x8xf32> to vector<2x8x1xf32>
    %cst_11 = arith.constant 3.200000e+01 : f32
    %12 = vector.broadcast %cst_11 : f32 to vector<2x8x1xf32>
    %13 = arith.divf %11, %12 : vector<2x8x1xf32>
    %14 = vector.broadcast %13 : vector<2x8x1xf32> to vector<2x8x32xf32>
    %15 = arith.subf %0, %14 : vector<2x8x32xf32>
    %16 = arith.mulf %15, %15 : vector<2x8x32xf32>
    %cst_12 = arith.constant dense<0.000000e+00> : vector<2x8xf32>
    %17 = vector.multi_reduction <add>, %16, %cst_12 [2] : vector<2x8x32xf32> to vector<2x8xf32>
    %18 = vector.shape_cast %17 : vector<2x8xf32> to vector<2x8x1xf32>
    %cst_13 = arith.constant 3.100000e+01 : f32
    %19 = vector.broadcast %cst_13 : f32 to vector<2x8x1xf32>
    %20 = arith.divf %18, %19 : vector<2x8x1xf32>
    %21 = vector.shape_cast %8 : vector<1x32xf32> to vector<1x1x32xf32>
    %22 = vector.broadcast %21 : vector<1x1x32xf32> to vector<2x8x32xf32>
    %23 = arith.mulf %22, %15 : vector<2x8x32xf32>
    %24 = math.sqrt %20 : vector<2x8x1xf32>
    %cst_14 = arith.constant 9.99999997E-7 : f32
    %25 = vector.broadcast %cst_14 : f32 to vector<2x8x1xf32>
    %26 = arith.addf %24, %25 : vector<2x8x1xf32>
    %27 = vector.broadcast %26 : vector<2x8x1xf32> to vector<2x8x32xf32>
    %28 = arith.divf %23, %27 : vector<2x8x32xf32>
    %29 = vector.shape_cast %9 : vector<1x32xf32> to vector<1x1x32xf32>
    %30 = vector.broadcast %29 : vector<1x1x32xf32> to vector<2x8x32xf32>
    %31 = arith.addf %28, %30 : vector<2x8x32xf32>
    %c0_15 = arith.constant 0 : index
    %c0_16 = arith.constant 0 : index
    %32 = vector.load %arg4[%c0_15, %c0_16] : memref<32x96xbf16, #tpu.memory_space<vmem>>, vector<32x96xbf16>
    %c0_17 = arith.constant 0 : index
    %c0_18 = arith.constant 0 : index
    %33 = vector.load %arg5[%c0_17, %c0_18] : memref<1x96xf32, #tpu.memory_space<vmem>>, vector<1x96xf32>
    %c0_19 = arith.constant 0 : index
    %c0_20 = arith.constant 0 : index
    %34 = vector.load %arg6[%c0_19, %c0_20] : memref<32x32xbf16, #tpu.memory_space<vmem>>, vector<32x32xbf16>
    %c0_21 = arith.constant 0 : index
    %c0_22 = arith.constant 0 : index
    %35 = vector.load %arg7[%c0_21, %c0_22] : memref<1x32xf32, #tpu.memory_space<vmem>>, vector<1x32xf32>
    %36 = vector.shape_cast %31 : vector<2x8x32xf32> to vector<16x32xf32>
    %37 = arith.truncf %36 : vector<16x32xf32> to vector<16x32xbf16>
    %cst_23 = arith.constant dense<0.000000e+00> : vector<16x96xf32>
    %38 = tpu.matmul %37, %32, %cst_23 {dimension_numbers = #tpu.dot_dimension_numbers<[1], [0], [0], [1], [0, 0, 1, 1], [], []>} : vector<16x32xbf16>, vector<32x96xbf16>, vector<16x96xf32> -> vector<16x96xf32>
    %39 = vector.broadcast %33 : vector<1x96xf32> to vector<16x96xf32>
    %40 = arith.addf %38, %39 : vector<16x96xf32>
    %41 = vector.extract_strided_slice %40 {offsets = [0, 0], sizes = [16, 32], strides = [1, 1]} : vector<16x96xf32> to vector<16x32xf32>
    %42 = vector.shape_cast %41 : vector<16x32xf32> to vector<2x8x32xf32>
    %cst_24 = arith.constant 0.353553385 : f32
    %43 = vector.broadcast %cst_24 : f32 to vector<2x8x32xf32>
    %44 = arith.mulf %42, %43 : vector<2x8x32xf32>
    %45 = vector.extract_strided_slice %40 {offsets = [0, 32], sizes = [16, 32], strides = [1, 1]} : vector<16x96xf32> to vector<16x32xf32>
    %46 = vector.shape_cast %45 : vector<16x32xf32> to vector<2x8x32xf32>
    %47 = vector.extract_strided_slice %40 {offsets = [0, 64], sizes = [16, 32], strides = [1, 1]} : vector<16x96xf32> to vector<16x32xf32>
    %48 = vector.shape_cast %47 : vector<16x32xf32> to vector<2x8x32xf32>
    %49 = vector.extract_strided_slice %44 {offsets = [0, 0, 0], sizes = [2, 8, 8], strides = [1, 1, 1]} : vector<2x8x32xf32> to vector<2x8x8xf32>
    %50 = arith.truncf %49 : vector<2x8x8xf32> to vector<2x8x8xbf16>
    %51 = vector.extract_strided_slice %46 {offsets = [0, 0, 0], sizes = [2, 8, 8], strides = [1, 1, 1]} : vector<2x8x32xf32> to vector<2x8x8xf32>
    %52 = arith.truncf %51 : vector<2x8x8xf32> to vector<2x8x8xbf16>
    "tpu.trace_start"() <{level = 10 : i32, message = "bqd,bkd->bqk"}> : () -> ()
    %cst_25 = arith.constant dense<0.000000e+00> : vector<2x8x8xf32>
    %53 = tpu.matmul %50, %52, %cst_25 {dimension_numbers = #tpu.dot_dimension_numbers<[2], [2], [1], [1], [0, 0, 0, 1, 1, 1], [0], [0]>} : vector<2x8x8xbf16>, vector<2x8x8xbf16>, vector<2x8x8xf32> -> vector<2x8x8xf32>
    "tpu.trace_stop"() : () -> ()
    %54 = vector.broadcast %7 : vector<2x1x8xf32> to vector<2x8x8xf32>
    %55 = arith.addf %53, %54 : vector<2x8x8xf32>
    %cst_26 = arith.constant dense<0xFF800000> : vector<2x8xf32>
    %56 = vector.multi_reduction <maximumf>, %55, %cst_26 [2] : vector<2x8x8xf32> to vector<2x8xf32>
    %57 = vector.shape_cast %56 : vector<2x8xf32> to vector<2x8x1xf32>
    %58 = vector.broadcast %57 : vector<2x8x1xf32> to vector<2x8x8xf32>
    %59 = arith.subf %55, %58 : vector<2x8x8xf32>
    %60 = math.exp %59 : vector<2x8x8xf32>
    %cst_27 = arith.constant dense<0.000000e+00> : vector<2x8xf32>
    %61 = vector.multi_reduction <add>, %60, %cst_27 [2] : vector<2x8x8xf32> to vector<2x8xf32>
    %62 = vector.shape_cast %61 : vector<2x8xf32> to vector<2x8x1xf32>
    %63 = tpu.reciprocal %62 {approx = true} : vector<2x8x1xf32> -> vector<2x8x1xf32>
    %64 = vector.broadcast %63 : vector<2x8x1xf32> to vector<2x8x8xf32>
    %65 = arith.mulf %60, %64 : vector<2x8x8xf32>
    %66 = arith.truncf %65 : vector<2x8x8xf32> to vector<2x8x8xbf16>
    %67 = vector.extract_strided_slice %48 {offsets = [0, 0, 0], sizes = [2, 8, 8], strides = [1, 1, 1]} : vector<2x8x32xf32> to vector<2x8x8xf32>
    %68 = arith.truncf %67 : vector<2x8x8xf32> to vector<2x8x8xbf16>
    "tpu.trace_start"() <{level = 10 : i32, message = "bqk,bkd->bqd"}> : () -> ()
    %cst_28 = arith.constant dense<0.000000e+00> : vector<2x8x8xf32>
    %69 = tpu.matmul %66, %68, %cst_28 {dimension_numbers = #tpu.dot_dimension_numbers<[2], [1], [1], [2], [0, 0, 0, 1, 1, 2], [0], [0]>} : vector<2x8x8xbf16>, vector<2x8x8xbf16>, vector<2x8x8xf32> -> vector<2x8x8xf32>
    "tpu.trace_stop"() : () -> ()
    %c0_29 = arith.constant 0 : index
    %c0_30 = arith.constant 0 : index
    %c0_31 = arith.constant 0 : index
    %70 = vector.load %arg17[%c0_29, %c0_30, %c0_31] : memref<2x8x32xf32, #tpu.memory_space<vmem>>, vector<2x8x8xf32>
    tpu.vector_store %arg17[%c0_29, %c0_30, %c0_31], %69 {strides = array<i32>} : memref<2x8x32xf32, #tpu.memory_space<vmem>>, vector<2x8x8xf32>,
    %71 = vector.extract_strided_slice %44 {offsets = [0, 0, 8], sizes = [2, 8, 8], strides = [1, 1, 1]} : vector<2x8x32xf32> to vector<2x8x8xf32>
    %72 = arith.truncf %71 : vector<2x8x8xf32> to vector<2x8x8xbf16>
    %73 = vector.extract_strided_slice %46 {offsets = [0, 0, 8], sizes = [2, 8, 8], strides = [1, 1, 1]} : vector<2x8x32xf32> to vector<2x8x8xf32>
    %74 = arith.truncf %73 : vector<2x8x8xf32> to vector<2x8x8xbf16>
    "tpu.trace_start"() <{level = 10 : i32, message = "bqd,bkd->bqk"}> : () -> ()
    %cst_32 = arith.constant dense<0.000000e+00> : vector<2x8x8xf32>
    %75 = tpu.matmul %72, %74, %cst_32 {dimension_numbers = #tpu.dot_dimension_numbers<[2], [2], [1], [1], [0, 0, 0, 1, 1, 1], [0], [0]>} : vector<2x8x8xbf16>, vector<2x8x8xbf16>, vector<2x8x8xf32> -> vector<2x8x8xf32>
    "tpu.trace_stop"() : () -> ()
    %76 = vector.broadcast %7 : vector<2x1x8xf32> to vector<2x8x8xf32>
    %77 = arith.addf %75, %76 : vector<2x8x8xf32>
    %cst_33 = arith.constant dense<0xFF800000> : vector<2x8xf32>
    %78 = vector.multi_reduction <maximumf>, %77, %cst_33 [2] : vector<2x8x8xf32> to vector<2x8xf32>
    %79 = vector.shape_cast %78 : vector<2x8xf32> to vector<2x8x1xf32>
    %80 = vector.broadcast %79 : vector<2x8x1xf32> to vector<2x8x8xf32>
    %81 = arith.subf %77, %80 : vector<2x8x8xf32>
    %82 = math.exp %81 : vector<2x8x8xf32>
    %cst_34 = arith.constant dense<0.000000e+00> : vector<2x8xf32>
    %83 = vector.multi_reduction <add>, %82, %cst_34 [2] : vector<2x8x8xf32> to vector<2x8xf32>
    %84 = vector.shape_cast %83 : vector<2x8xf32> to vector<2x8x1xf32>
    %85 = tpu.reciprocal %84 {approx = true} : vector<2x8x1xf32> -> vector<2x8x1xf32>
    %86 = vector.broadcast %85 : vector<2x8x1xf32> to vector<2x8x8xf32>
    %87 = arith.mulf %82, %86 : vector<2x8x8xf32>
    %88 = arith.truncf %87 : vector<2x8x8xf32> to vector<2x8x8xbf16>
    %89 = vector.extract_strided_slice %48 {offsets = [0, 0, 8], sizes = [2, 8, 8], strides = [1, 1, 1]} : vector<2x8x32xf32> to vector<2x8x8xf32>
    %90 = arith.truncf %89 : vector<2x8x8xf32> to vector<2x8x8xbf16>
    "tpu.trace_start"() <{level = 10 : i32, message = "bqk,bkd->bqd"}> : () -> ()
    %cst_35 = arith.constant dense<0.000000e+00> : vector<2x8x8xf32>
    %91 = tpu.matmul %88, %90, %cst_35 {dimension_numbers = #tpu.dot_dimension_numbers<[2], [1], [1], [2], [0, 0, 0, 1, 1, 2], [0], [0]>} : vector<2x8x8xbf16>, vector<2x8x8xbf16>, vector<2x8x8xf32> -> vector<2x8x8xf32>
    "tpu.trace_stop"() : () -> ()
    %c0_36 = arith.constant 0 : index
    %c0_37 = arith.constant 0 : index
    %c8 = arith.constant 8 : index
    %92 = vector.load %arg17[%c0_36, %c0_37, %c8] : memref<2x8x32xf32, #tpu.memory_space<vmem>>, vector<2x8x8xf32>
    tpu.vector_store %arg17[%c0_36, %c0_37, %c8], %91 {strides = array<i32>} : memref<2x8x32xf32, #tpu.memory_space<vmem>>, vector<2x8x8xf32>,
    %93 = vector.extract_strided_slice %44 {offsets = [0, 0, 16], sizes = [2, 8, 8], strides = [1, 1, 1]} : vector<2x8x32xf32> to vector<2x8x8xf32>
    %94 = arith.truncf %93 : vector<2x8x8xf32> to vector<2x8x8xbf16>
    %95 = vector.extract_strided_slice %46 {offsets = [0, 0, 16], sizes = [2, 8, 8], strides = [1, 1, 1]} : vector<2x8x32xf32> to vector<2x8x8xf32>
    %96 = arith.truncf %95 : vector<2x8x8xf32> to vector<2x8x8xbf16>
    "tpu.trace_start"() <{level = 10 : i32, message = "bqd,bkd->bqk"}> : () -> ()
    %cst_38 = arith.constant dense<0.000000e+00> : vector<2x8x8xf32>
    %97 = tpu.matmul %94, %96, %cst_38 {dimension_numbers = #tpu.dot_dimension_numbers<[2], [2], [1], [1], [0, 0, 0, 1, 1, 1], [0], [0]>} : vector<2x8x8xbf16>, vector<2x8x8xbf16>, vector<2x8x8xf32> -> vector<2x8x8xf32>
    "tpu.trace_stop"() : () -> ()
    %98 = vector.broadcast %7 : vector<2x1x8xf32> to vector<2x8x8xf32>
    %99 = arith.addf %97, %98 : vector<2x8x8xf32>
    %cst_39 = arith.constant dense<0xFF800000> : vector<2x8xf32>
    %100 = vector.multi_reduction <maximumf>, %99, %cst_39 [2] : vector<2x8x8xf32> to vector<2x8xf32>
    %101 = vector.shape_cast %100 : vector<2x8xf32> to vector<2x8x1xf32>
    %102 = vector.broadcast %101 : vector<2x8x1xf32> to vector<2x8x8xf32>
    %103 = arith.subf %99, %102 : vector<2x8x8xf32>
    %104 = math.exp %103 : vector<2x8x8xf32>
    %cst_40 = arith.constant dense<0.000000e+00> : vector<2x8xf32>
    %105 = vector.multi_reduction <add>, %104, %cst_40 [2] : vector<2x8x8xf32> to vector<2x8xf32>
    %106 = vector.shape_cast %105 : vector<2x8xf32> to vector<2x8x1xf32>
    %107 = tpu.reciprocal %106 {approx = true} : vector<2x8x1xf32> -> vector<2x8x1xf32>
    %108 = vector.broadcast %107 : vector<2x8x1xf32> to vector<2x8x8xf32>
    %109 = arith.mulf %104, %108 : vector<2x8x8xf32>
    %110 = arith.truncf %109 : vector<2x8x8xf32> to vector<2x8x8xbf16>
    %111 = vector.extract_strided_slice %48 {offsets = [0, 0, 16], sizes = [2, 8, 8], strides = [1, 1, 1]} : vector<2x8x32xf32> to vector<2x8x8xf32>
    %112 = arith.truncf %111 : vector<2x8x8xf32> to vector<2x8x8xbf16>
    "tpu.trace_start"() <{level = 10 : i32, message = "bqk,bkd->bqd"}> : () -> ()
    %cst_41 = arith.constant dense<0.000000e+00> : vector<2x8x8xf32>
    %113 = tpu.matmul %110, %112, %cst_41 {dimension_numbers = #tpu.dot_dimension_numbers<[2], [1], [1], [2], [0, 0, 0, 1, 1, 2], [0], [0]>} : vector<2x8x8xbf16>, vector<2x8x8xbf16>, vector<2x8x8xf32> -> vector<2x8x8xf32>
    "tpu.trace_stop"() : () -> ()
    %c0_42 = arith.constant 0 : index
    %c0_43 = arith.constant 0 : index
    %c16 = arith.constant 16 : index
    %114 = vector.load %arg17[%c0_42, %c0_43, %c16] : memref<2x8x32xf32, #tpu.memory_space<vmem>>, vector<2x8x8xf32>
    tpu.vector_store %arg17[%c0_42, %c0_43, %c16], %113 {strides = array<i32>} : memref<2x8x32xf32, #tpu.memory_space<vmem>>, vector<2x8x8xf32>,
    %115 = vector.extract_strided_slice %44 {offsets = [0, 0, 24], sizes = [2, 8, 8], strides = [1, 1, 1]} : vector<2x8x32xf32> to vector<2x8x8xf32>
    %116 = arith.truncf %115 : vector<2x8x8xf32> to vector<2x8x8xbf16>
    %117 = vector.extract_strided_slice %46 {offsets = [0, 0, 24], sizes = [2, 8, 8], strides = [1, 1, 1]} : vector<2x8x32xf32> to vector<2x8x8xf32>
    %118 = arith.truncf %117 : vector<2x8x8xf32> to vector<2x8x8xbf16>
    "tpu.trace_start"() <{level = 10 : i32, message = "bqd,bkd->bqk"}> : () -> ()
    %cst_44 = arith.constant dense<0.000000e+00> : vector<2x8x8xf32>
    %119 = tpu.matmul %116, %118, %cst_44 {dimension_numbers = #tpu.dot_dimension_numbers<[2], [2], [1], [1], [0, 0, 0, 1, 1, 1], [0], [0]>} : vector<2x8x8xbf16>, vector<2x8x8xbf16>, vector<2x8x8xf32> -> vector<2x8x8xf32>
    "tpu.trace_stop"() : () -> ()
    %120 = vector.broadcast %7 : vector<2x1x8xf32> to vector<2x8x8xf32>
    %121 = arith.addf %119, %120 : vector<2x8x8xf32>
    %cst_45 = arith.constant dense<0xFF800000> : vector<2x8xf32>
    %122 = vector.multi_reduction <maximumf>, %121, %cst_45 [2] : vector<2x8x8xf32> to vector<2x8xf32>
    %123 = vector.shape_cast %122 : vector<2x8xf32> to vector<2x8x1xf32>
    %124 = vector.broadcast %123 : vector<2x8x1xf32> to vector<2x8x8xf32>
    %125 = arith.subf %121, %124 : vector<2x8x8xf32>
    %126 = math.exp %125 : vector<2x8x8xf32>
    %cst_46 = arith.constant dense<0.000000e+00> : vector<2x8xf32>
    %127 = vector.multi_reduction <add>, %126, %cst_46 [2] : vector<2x8x8xf32> to vector<2x8xf32>
    %128 = vector.shape_cast %127 : vector<2x8xf32> to vector<2x8x1xf32>
    %129 = tpu.reciprocal %128 {approx = true} : vector<2x8x1xf32> -> vector<2x8x1xf32>
    %130 = vector.broadcast %129 : vector<2x8x1xf32> to vector<2x8x8xf32>
    %131 = arith.mulf %126, %130 : vector<2x8x8xf32>
    %132 = arith.truncf %131 : vector<2x8x8xf32> to vector<2x8x8xbf16>
    %133 = vector.extract_strided_slice %48 {offsets = [0, 0, 24], sizes = [2, 8, 8], strides = [1, 1, 1]} : vector<2x8x32xf32> to vector<2x8x8xf32>
    %134 = arith.truncf %133 : vector<2x8x8xf32> to vector<2x8x8xbf16>
    "tpu.trace_start"() <{level = 10 : i32, message = "bqk,bkd->bqd"}> : () -> ()
    %cst_47 = arith.constant dense<0.000000e+00> : vector<2x8x8xf32>
    %135 = tpu.matmul %132, %134, %cst_47 {dimension_numbers = #tpu.dot_dimension_numbers<[2], [1], [1], [2], [0, 0, 0, 1, 1, 2], [0], [0]>} : vector<2x8x8xbf16>, vector<2x8x8xbf16>, vector<2x8x8xf32> -> vector<2x8x8xf32>
    "tpu.trace_stop"() : () -> ()
    %c0_48 = arith.constant 0 : index
    %c0_49 = arith.constant 0 : index
    %c24 = arith.constant 24 : index
    %136 = vector.load %arg17[%c0_48, %c0_49, %c24] : memref<2x8x32xf32, #tpu.memory_space<vmem>>, vector<2x8x8xf32>
    tpu.vector_store %arg17[%c0_48, %c0_49, %c24], %135 {strides = array<i32>} : memref<2x8x32xf32, #tpu.memory_space<vmem>>, vector<2x8x8xf32>,
    %c0_50 = arith.constant 0 : index
    %c0_51 = arith.constant 0 : index
    %c0_52 = arith.constant 0 : index
    %137 = vector.load %arg17[%c0_50, %c0_51, %c0_52] : memref<2x8x32xf32, #tpu.memory_space<vmem>>, vector<2x8x32xf32>
    %138 = vector.shape_cast %137 : vector<2x8x32xf32> to vector<16x32xf32>
    %139 = arith.truncf %138 : vector<16x32xf32> to vector<16x32xbf16>
    %cst_53 = arith.constant dense<0.000000e+00> : vector<16x32xf32>
    %140 = tpu.matmul %139, %34, %cst_53 {dimension_numbers = #tpu.dot_dimension_numbers<[1], [0], [0], [1], [0, 0, 1, 1], [], []>} : vector<16x32xbf16>, vector<32x32xbf16>, vector<16x32xf32> -> vector<16x32xf32>
    %141 = vector.broadcast %35 : vector<1x32xf32> to vector<16x32xf32>
    %142 = arith.addf %140, %141 : vector<16x32xf32>
    %143 = vector.shape_cast %142 : vector<16x32xf32> to vector<2x8x32xf32>
    %144 = arith.addf %0, %143 : vector<2x8x32xf32>
    %c0_54 = arith.constant 0 : index
    %c0_55 = arith.constant 0 : index
    %145 = vector.load %arg8[%c0_54, %c0_55] : memref<1x32xf32, #tpu.memory_space<vmem>>, vector<1x32xf32>
    %c0_56 = arith.constant 0 : index
    %c0_57 = arith.constant 0 : index
    %146 = vector.load %arg9[%c0_56, %c0_57] : memref<1x32xf32, #tpu.memory_space<vmem>>, vector<1x32xf32>
    %c0_58 = arith.constant 0 : index
    %c0_59 = arith.constant 0 : index
    %147 = vector.load %arg10[%c0_58, %c0_59] : memref<32x64xbf16, #tpu.memory_space<vmem>>, vector<32x64xbf16>
    %c0_60 = arith.constant 0 : index
    %c0_61 = arith.constant 0 : index
    %148 = vector.load %arg11[%c0_60, %c0_61] : memref<1x64xf32, #tpu.memory_space<vmem>>, vector<1x64xf32>
    %c0_62 = arith.constant 0 : index
    %c0_63 = arith.constant 0 : index
    %149 = vector.load %arg12[%c0_62, %c0_63] : memref<64x32xbf16, #tpu.memory_space<vmem>>, vector<64x32xbf16>
    %c0_64 = arith.constant 0 : index
    %c0_65 = arith.constant 0 : index
    %150 = vector.load %arg13[%c0_64, %c0_65] : memref<1x32xf32, #tpu.memory_space<vmem>>, vector<1x32xf32>
    %cst_66 = arith.constant dense<0.000000e+00> : vector<2x8xf32>
    %151 = vector.multi_reduction <add>, %144, %cst_66 [2] : vector<2x8x32xf32> to vector<2x8xf32>
    %152 = vector.shape_cast %151 : vector<2x8xf32> to vector<2x8x1xf32>
    %cst_67 = arith.constant 3.200000e+01 : f32
    %153 = vector.broadcast %cst_67 : f32 to vector<2x8x1xf32>
    %154 = arith.divf %152, %153 : vector<2x8x1xf32>
    %155 = vector.broadcast %154 : vector<2x8x1xf32> to vector<2x8x32xf32>
    %156 = arith.subf %144, %155 : vector<2x8x32xf32>
    %157 = arith.mulf %156, %156 : vector<2x8x32xf32>
    %cst_68 = arith.constant dense<0.000000e+00> : vector<2x8xf32>
    %158 = vector.multi_reduction <add>, %157, %cst_68 [2] : vector<2x8x32xf32> to vector<2x8xf32>
    %159 = vector.shape_cast %158 : vector<2x8xf32> to vector<2x8x1xf32>
    %cst_69 = arith.constant 3.100000e+01 : f32
    %160 = vector.broadcast %cst_69 : f32 to vector<2x8x1xf32>
    %161 = arith.divf %159, %160 : vector<2x8x1xf32>
    %162 = vector.shape_cast %145 : vector<1x32xf32> to vector<1x1x32xf32>
    %163 = vector.broadcast %162 : vector<1x1x32xf32> to vector<2x8x32xf32>
    %164 = arith.mulf %163, %156 : vector<2x8x32xf32>
    %165 = math.sqrt %161 : vector<2x8x1xf32>
    %cst_70 = arith.constant 9.99999997E-7 : f32
    %166 = vector.broadcast %cst_70 : f32 to vector<2x8x1xf32>
    %167 = arith.addf %165, %166 : vector<2x8x1xf32>
    %168 = vector.broadcast %167 : vector<2x8x1xf32> to vector<2x8x32xf32>
    %169 = arith.divf %164, %168 : vector<2x8x32xf32>
    %170 = vector.shape_cast %146 : vector<1x32xf32> to vector<1x1x32xf32>
    %171 = vector.broadcast %170 : vector<1x1x32xf32> to vector<2x8x32xf32>
    %172 = arith.addf %169, %171 : vector<2x8x32xf32>
    %173 = vector.shape_cast %172 : vector<2x8x32xf32> to vector<16x32xf32>
    %174 = arith.truncf %173 : vector<16x32xf32> to vector<16x32xbf16>
    %cst_71 = arith.constant dense<0.000000e+00> : vector<16x64xf32>
    %175 = tpu.matmul %174, %147, %cst_71 {dimension_numbers = #tpu.dot_dimension_numbers<[1], [0], [0], [1], [0, 0, 1, 1], [], []>} : vector<16x32xbf16>, vector<32x64xbf16>, vector<16x64xf32> -> vector<16x64xf32>
    %176 = vector.broadcast %148 : vector<1x64xf32> to vector<16x64xf32>
    %177 = arith.addf %175, %176 : vector<16x64xf32>
    %cst_72 = arith.constant 0.000000e+00 : f32
    %178 = vector.broadcast %cst_72 : f32 to vector<16x64xf32>
    %179 = arith.maximumf %177, %178 : vector<16x64xf32>
    %180 = arith.truncf %179 : vector<16x64xf32> to vector<16x64xbf16>
    %cst_73 = arith.constant dense<0.000000e+00> : vector<16x32xf32>
    %181 = tpu.matmul %180, %149, %cst_73 {dimension_numbers = #tpu.dot_dimension_numbers<[1], [0], [0], [1], [0, 0, 1, 1], [], []>} : vector<16x64xbf16>, vector<64x32xbf16>, vector<16x32xf32> -> vector<16x32xf32>
    %182 = vector.broadcast %150 : vector<1x32xf32> to vector<16x32xf32>
    %183 = arith.addf %181, %182 : vector<16x32xf32>
    %184 = vector.shape_cast %183 : vector<16x32xf32> to vector<2x8x32xf32>
    %185 = arith.addf %144, %184 : vector<2x8x32xf32>
    %c0_74 = arith.constant 0 : index
    %c0_75 = arith.constant 0 : index
    %186 = vector.load %arg14[%c0_74, %c0_75] : memref<1x32xf32, #tpu.memory_space<vmem>>, vector<1x32xf32>
    %c0_76 = arith.constant 0 : index
    %c0_77 = arith.constant 0 : index
    %187 = vector.load %arg15[%c0_76, %c0_77] : memref<1x32xf32, #tpu.memory_space<vmem>>, vector<1x32xf32>
    %cst_78 = arith.constant dense<0.000000e+00> : vector<2x8xf32>
    %188 = vector.multi_reduction <add>, %185, %cst_78 [2] : vector<2x8x32xf32> to vector<2x8xf32>
    %189 = vector.shape_cast %188 : vector<2x8xf32> to vector<2x8x1xf32>
    %cst_79 = arith.constant 3.200000e+01 : f32
    %190 = vector.broadcast %cst_79 : f32 to vector<2x8x1xf32>
    %191 = arith.divf %189, %190 : vector<2x8x1xf32>
    %192 = vector.broadcast %191 : vector<2x8x1xf32> to vector<2x8x32xf32>
    %193 = arith.subf %185, %192 : vector<2x8x32xf32>
    %194 = arith.mulf %193, %193 : vector<2x8x32xf32>
    %cst_80 = arith.constant dense<0.000000e+00> : vector<2x8xf32>
    %195 = vector.multi_reduction <add>, %194, %cst_80 [2] : vector<2x8x32xf32> to vector<2x8xf32>
    %196 = vector.shape_cast %195 : vector<2x8xf32> to vector<2x8x1xf32>
    %cst_81 = arith.constant 3.100000e+01 : f32
    %197 = vector.broadcast %cst_81 : f32 to vector<2x8x1xf32>
    %198 = arith.divf %196, %197 : vector<2x8x1xf32>
    %199 = vector.shape_cast %186 : vector<1x32xf32> to vector<1x1x32xf32>
    %200 = vector.broadcast %199 : vector<1x1x32xf32> to vector<2x8x32xf32>
    %201 = arith.mulf %200, %193 : vector<2x8x32xf32>
    %202 = math.sqrt %198 : vector<2x8x1xf32>
    %cst_82 = arith.constant 9.99999997E-7 : f32
    %203 = vector.broadcast %cst_82 : f32 to vector<2x8x1xf32>
    %204 = arith.addf %202, %203 : vector<2x8x1xf32>
    %205 = vector.broadcast %204 : vector<2x8x1xf32> to vector<2x8x32xf32>
    %206 = arith.divf %201, %205 : vector<2x8x32xf32>
    %207 = vector.shape_cast %187 : vector<1x32xf32> to vector<1x1x32xf32>
    %208 = vector.broadcast %207 : vector<1x1x32xf32> to vector<2x8x32xf32>
    %209 = arith.addf %206, %208 : vector<2x8x32xf32>
    %c0_83 = arith.constant 0 : index
    %c0_84 = arith.constant 0 : index
    %c0_85 = arith.constant 0 : index
    %210 = vector.load %arg16[%c0_83, %c0_84, %c0_85] : memref<2x8x32xf32, #tpu.memory_space<vmem>>, vector<2x8x32xf32>
    tpu.vector_store %arg16[%c0_83, %c0_84, %c0_85], %209 {strides = array<i32>} : memref<2x8x32xf32, #tpu.memory_space<vmem>>, vector<2x8x32xf32>,
    return
  }
}

module attributes {stable_mosaic.version = 11 : i64} {
  func.func @_dec_layer_kernel(%arg0: memref<2x8x32xf32, #tpu.memory_space<vmem>>, %arg1: memref<2x8x32xf32, #tpu.memory_space<vmem>>, %arg2: memref<2x8xf32, #tpu.memory_space<vmem>>, %arg3: memref<2x8xf32, #tpu.memory_space<vmem>>, %arg4: memref<1x32xf32, #tpu.memory_space<vmem>>, %arg5: memref<1x32xf32, #tpu.memory_space<vmem>>, %arg6: memref<32x96xbf16, #tpu.memory_space<vmem>>, %arg7: memref<1x96xf32, #tpu.memory_space<vmem>>, %arg8: memref<32x32xbf16, #tpu.memory_space<vmem>>, %arg9: memref<1x32xf32, #tpu.memory_space<vmem>>, %arg10: memref<1x32xf32, #tpu.memory_space<vmem>>, %arg11: memref<1x32xf32, #tpu.memory_space<vmem>>, %arg12: memref<32x96xbf16, #tpu.memory_space<vmem>>, %arg13: memref<1x96xf32, #tpu.memory_space<vmem>>, %arg14: memref<32x32xbf16, #tpu.memory_space<vmem>>, %arg15: memref<1x32xf32, #tpu.memory_space<vmem>>, %arg16: memref<1x32xf32, #tpu.memory_space<vmem>>, %arg17: memref<1x32xf32, #tpu.memory_space<vmem>>, %arg18: memref<32x64xbf16, #tpu.memory_space<vmem>>, %arg19: memref<1x64xf32, #tpu.memory_space<vmem>>, %arg20: memref<64x32xbf16, #tpu.memory_space<vmem>>, %arg21: memref<1x32xf32, #tpu.memory_space<vmem>>, %arg22: memref<1x32xf32, #tpu.memory_space<vmem>>, %arg23: memref<1x32xf32, #tpu.memory_space<vmem>>, %arg24: memref<2x8x32xf32, #tpu.memory_space<vmem>>, %arg25: memref<2x8x32xf32, #tpu.memory_space<vmem>>) attributes {dimension_semantics = [], scalar_prefetch = 0 : i64, scratch_operands = 1 : i64, tpu.core_type = #tpu.core_type<tc>} {
    %c0 = arith.constant 0 : index
    %c0_0 = arith.constant 0 : index
    %c0_1 = arith.constant 0 : index
    %0 = vector.load %arg0[%c0, %c0_0, %c0_1] : memref<2x8x32xf32, #tpu.memory_space<vmem>>, vector<2x8x32xf32>
    %c0_2 = arith.constant 0 : index
    %c0_3 = arith.constant 0 : index
    %c0_4 = arith.constant 0 : index
    %1 = vector.load %arg1[%c0_2, %c0_3, %c0_4] : memref<2x8x32xf32, #tpu.memory_space<vmem>>, vector<2x8x32xf32>
    %c0_5 = arith.constant 0 : index
    %c0_6 = arith.constant 0 : index
    %2 = vector.load %arg3[%c0_5, %c0_6] : memref<2x8xf32, #tpu.memory_space<vmem>>, vector<2x8xf32>
    %cst = arith.constant 0.000000e+00 : f32
    %3 = vector.broadcast %cst : f32 to vector<2x8xf32>
    %4 = arith.cmpf oeq, %2, %3 : vector<2x8xf32>
    %cst_7 = arith.constant -1.000000e+09 : f32
    %cst_8 = arith.constant 0.000000e+00 : f32
    %5 = vector.broadcast %cst_7 : f32 to vector<2x8xf32>
    %6 = vector.broadcast %cst_8 : f32 to vector<2x8xf32>
    %7 = arith.select %4, %5, %6 : vector<2x8xi1>, vector<2x8xf32>
    %8 = vector.shape_cast %7 : vector<2x8xf32> to vector<2x1x8xf32>
    %9 = tpu.iota {dimensions = array<i32: 0>} : vector<8x8xi32>
    %10 = tpu.iota {dimensions = array<i32: 1>} : vector<8x8xi32>
    %11 = arith.cmpi sgt, %10, %9 : vector<8x8xi32>
    %cst_9 = arith.constant -1.000000e+09 : f32
    %cst_10 = arith.constant 0.000000e+00 : f32
    %12 = vector.broadcast %cst_9 : f32 to vector<8x8xf32>
    %13 = vector.broadcast %cst_10 : f32 to vector<8x8xf32>
    %14 = arith.select %11, %12, %13 : vector<8x8xi1>, vector<8x8xf32>
    %15 = vector.shape_cast %14 : vector<8x8xf32> to vector<1x8x8xf32>
    %16 = vector.broadcast %8 : vector<2x1x8xf32> to vector<2x8x8xf32>
    %17 = vector.broadcast %15 : vector<1x8x8xf32> to vector<2x8x8xf32>
    %18 = arith.addf %16, %17 : vector<2x8x8xf32>
    %c0_11 = arith.constant 0 : index
    %c0_12 = arith.constant 0 : index
    %19 = vector.load %arg2[%c0_11, %c0_12] : memref<2x8xf32, #tpu.memory_space<vmem>>, vector<2x8xf32>
    %cst_13 = arith.constant 0.000000e+00 : f32
    %20 = vector.broadcast %cst_13 : f32 to vector<2x8xf32>
    %21 = arith.cmpf oeq, %19, %20 : vector<2x8xf32>
    %cst_14 = arith.constant -1.000000e+09 : f32
    %cst_15 = arith.constant 0.000000e+00 : f32
    %22 = vector.broadcast %cst_14 : f32 to vector<2x8xf32>
    %23 = vector.broadcast %cst_15 : f32 to vector<2x8xf32>
    %24 = arith.select %21, %22, %23 : vector<2x8xi1>, vector<2x8xf32>
    %25 = vector.shape_cast %24 : vector<2x8xf32> to vector<2x1x8xf32>
    %c0_16 = arith.constant 0 : index
    %c0_17 = arith.constant 0 : index
    %26 = vector.load %arg4[%c0_16, %c0_17] : memref<1x32xf32, #tpu.memory_space<vmem>>, vector<1x32xf32>
    %c0_18 = arith.constant 0 : index
    %c0_19 = arith.constant 0 : index
    %27 = vector.load %arg5[%c0_18, %c0_19] : memref<1x32xf32, #tpu.memory_space<vmem>>, vector<1x32xf32>
    %cst_20 = arith.constant dense<0.000000e+00> : vector<2x8xf32>
    %28 = vector.multi_reduction <add>, %0, %cst_20 [2] : vector<2x8x32xf32> to vector<2x8xf32>
    %29 = vector.shape_cast %28 : vector<2x8xf32> to vector<2x8x1xf32>
    %cst_21 = arith.constant 3.200000e+01 : f32
    %30 = vector.broadcast %cst_21 : f32 to vector<2x8x1xf32>
    %31 = arith.divf %29, %30 : vector<2x8x1xf32>
    %32 = vector.broadcast %31 : vector<2x8x1xf32> to vector<2x8x32xf32>
    %33 = arith.subf %0, %32 : vector<2x8x32xf32>
    %34 = arith.mulf %33, %33 : vector<2x8x32xf32>
    %cst_22 = arith.constant dense<0.000000e+00> : vector<2x8xf32>
    %35 = vector.multi_reduction <add>, %34, %cst_22 [2] : vector<2x8x32xf32> to vector<2x8xf32>
    %36 = vector.shape_cast %35 : vector<2x8xf32> to vector<2x8x1xf32>
    %cst_23 = arith.constant 3.100000e+01 : f32
    %37 = vector.broadcast %cst_23 : f32 to vector<2x8x1xf32>
    %38 = arith.divf %36, %37 : vector<2x8x1xf32>
    %39 = vector.shape_cast %26 : vector<1x32xf32> to vector<1x1x32xf32>
    %40 = vector.broadcast %39 : vector<1x1x32xf32> to vector<2x8x32xf32>
    %41 = arith.mulf %40, %33 : vector<2x8x32xf32>
    %42 = math.sqrt %38 : vector<2x8x1xf32>
    %cst_24 = arith.constant 9.99999997E-7 : f32
    %43 = vector.broadcast %cst_24 : f32 to vector<2x8x1xf32>
    %44 = arith.addf %42, %43 : vector<2x8x1xf32>
    %45 = vector.broadcast %44 : vector<2x8x1xf32> to vector<2x8x32xf32>
    %46 = arith.divf %41, %45 : vector<2x8x32xf32>
    %47 = vector.shape_cast %27 : vector<1x32xf32> to vector<1x1x32xf32>
    %48 = vector.broadcast %47 : vector<1x1x32xf32> to vector<2x8x32xf32>
    %49 = arith.addf %46, %48 : vector<2x8x32xf32>
    %c0_25 = arith.constant 0 : index
    %c0_26 = arith.constant 0 : index
    %50 = vector.load %arg6[%c0_25, %c0_26] : memref<32x96xbf16, #tpu.memory_space<vmem>>, vector<32x96xbf16>
    %c0_27 = arith.constant 0 : index
    %c0_28 = arith.constant 0 : index
    %51 = vector.load %arg7[%c0_27, %c0_28] : memref<1x96xf32, #tpu.memory_space<vmem>>, vector<1x96xf32>
    %c0_29 = arith.constant 0 : index
    %c0_30 = arith.constant 0 : index
    %52 = vector.load %arg8[%c0_29, %c0_30] : memref<32x32xbf16, #tpu.memory_space<vmem>>, vector<32x32xbf16>
    %c0_31 = arith.constant 0 : index
    %c0_32 = arith.constant 0 : index
    %53 = vector.load %arg9[%c0_31, %c0_32] : memref<1x32xf32, #tpu.memory_space<vmem>>, vector<1x32xf32>
    %54 = vector.shape_cast %49 : vector<2x8x32xf32> to vector<16x32xf32>
    %55 = arith.truncf %54 : vector<16x32xf32> to vector<16x32xbf16>
    %cst_33 = arith.constant dense<0.000000e+00> : vector<16x96xf32>
    %56 = tpu.matmul %55, %50, %cst_33 {dimension_numbers = #tpu.dot_dimension_numbers<[1], [0], [0], [1], [0, 0, 1, 1], [], []>} : vector<16x32xbf16>, vector<32x96xbf16>, vector<16x96xf32> -> vector<16x96xf32>
    %57 = vector.broadcast %51 : vector<1x96xf32> to vector<16x96xf32>
    %58 = arith.addf %56, %57 : vector<16x96xf32>
    %59 = vector.extract_strided_slice %58 {offsets = [0, 0], sizes = [16, 32], strides = [1, 1]} : vector<16x96xf32> to vector<16x32xf32>
    %60 = vector.shape_cast %59 : vector<16x32xf32> to vector<2x8x32xf32>
    %cst_34 = arith.constant 0.353553385 : f32
    %61 = vector.broadcast %cst_34 : f32 to vector<2x8x32xf32>
    %62 = arith.mulf %60, %61 : vector<2x8x32xf32>
    %63 = vector.extract_strided_slice %58 {offsets = [0, 32], sizes = [16, 32], strides = [1, 1]} : vector<16x96xf32> to vector<16x32xf32>
    %64 = vector.shape_cast %63 : vector<16x32xf32> to vector<2x8x32xf32>
    %65 = vector.extract_strided_slice %58 {offsets = [0, 64], sizes = [16, 32], strides = [1, 1]} : vector<16x96xf32> to vector<16x32xf32>
    %66 = vector.shape_cast %65 : vector<16x32xf32> to vector<2x8x32xf32>
    %67 = vector.extract_strided_slice %62 {offsets = [0, 0, 0], sizes = [2, 8, 8], strides = [1, 1, 1]} : vector<2x8x32xf32> to vector<2x8x8xf32>
    %68 = arith.truncf %67 : vector<2x8x8xf32> to vector<2x8x8xbf16>
    %69 = vector.extract_strided_slice %64 {offsets = [0, 0, 0], sizes = [2, 8, 8], strides = [1, 1, 1]} : vector<2x8x32xf32> to vector<2x8x8xf32>
    %70 = arith.truncf %69 : vector<2x8x8xf32> to vector<2x8x8xbf16>
    "tpu.trace_start"() <{level = 10 : i32, message = "bqd,bkd->bqk"}> : () -> ()
    %cst_35 = arith.constant dense<0.000000e+00> : vector<2x8x8xf32>
    %71 = tpu.matmul %68, %70, %cst_35 {dimension_numbers = #tpu.dot_dimension_numbers<[2], [2], [1], [1], [0, 0, 0, 1, 1, 1], [0], [0]>} : vector<2x8x8xbf16>, vector<2x8x8xbf16>, vector<2x8x8xf32> -> vector<2x8x8xf32>
    "tpu.trace_stop"() : () -> ()
    %72 = arith.addf %71, %18 : vector<2x8x8xf32>
    %cst_36 = arith.constant dense<0xFF800000> : vector<2x8xf32>
    %73 = vector.multi_reduction <maximumf>, %72, %cst_36 [2] : vector<2x8x8xf32> to vector<2x8xf32>
    %74 = vector.shape_cast %73 : vector<2x8xf32> to vector<2x8x1xf32>
    %75 = vector.broadcast %74 : vector<2x8x1xf32> to vector<2x8x8xf32>
    %76 = arith.subf %72, %75 : vector<2x8x8xf32>
    %77 = math.exp %76 : vector<2x8x8xf32>
    %cst_37 = arith.constant dense<0.000000e+00> : vector<2x8xf32>
    %78 = vector.multi_reduction <add>, %77, %cst_37 [2] : vector<2x8x8xf32> to vector<2x8xf32>
    %79 = vector.shape_cast %78 : vector<2x8xf32> to vector<2x8x1xf32>
    %80 = tpu.reciprocal %79 {approx = true} : vector<2x8x1xf32> -> vector<2x8x1xf32>
    %81 = vector.broadcast %80 : vector<2x8x1xf32> to vector<2x8x8xf32>
    %82 = arith.mulf %77, %81 : vector<2x8x8xf32>
    %83 = arith.truncf %82 : vector<2x8x8xf32> to vector<2x8x8xbf16>
    %84 = vector.extract_strided_slice %66 {offsets = [0, 0, 0], sizes = [2, 8, 8], strides = [1, 1, 1]} : vector<2x8x32xf32> to vector<2x8x8xf32>
    %85 = arith.truncf %84 : vector<2x8x8xf32> to vector<2x8x8xbf16>
    "tpu.trace_start"() <{level = 10 : i32, message = "bqk,bkd->bqd"}> : () -> ()
    %cst_38 = arith.constant dense<0.000000e+00> : vector<2x8x8xf32>
    %86 = tpu.matmul %83, %85, %cst_38 {dimension_numbers = #tpu.dot_dimension_numbers<[2], [1], [1], [2], [0, 0, 0, 1, 1, 2], [0], [0]>} : vector<2x8x8xbf16>, vector<2x8x8xbf16>, vector<2x8x8xf32> -> vector<2x8x8xf32>
    "tpu.trace_stop"() : () -> ()
    %c0_39 = arith.constant 0 : index
    %c0_40 = arith.constant 0 : index
    %c0_41 = arith.constant 0 : index
    %87 = vector.load %arg25[%c0_39, %c0_40, %c0_41] : memref<2x8x32xf32, #tpu.memory_space<vmem>>, vector<2x8x8xf32>
    tpu.vector_store %arg25[%c0_39, %c0_40, %c0_41], %86 {strides = array<i32>} : memref<2x8x32xf32, #tpu.memory_space<vmem>>, vector<2x8x8xf32>,
    %88 = vector.extract_strided_slice %62 {offsets = [0, 0, 8], sizes = [2, 8, 8], strides = [1, 1, 1]} : vector<2x8x32xf32> to vector<2x8x8xf32>
    %89 = arith.truncf %88 : vector<2x8x8xf32> to vector<2x8x8xbf16>
    %90 = vector.extract_strided_slice %64 {offsets = [0, 0, 8], sizes = [2, 8, 8], strides = [1, 1, 1]} : vector<2x8x32xf32> to vector<2x8x8xf32>
    %91 = arith.truncf %90 : vector<2x8x8xf32> to vector<2x8x8xbf16>
    "tpu.trace_start"() <{level = 10 : i32, message = "bqd,bkd->bqk"}> : () -> ()
    %cst_42 = arith.constant dense<0.000000e+00> : vector<2x8x8xf32>
    %92 = tpu.matmul %89, %91, %cst_42 {dimension_numbers = #tpu.dot_dimension_numbers<[2], [2], [1], [1], [0, 0, 0, 1, 1, 1], [0], [0]>} : vector<2x8x8xbf16>, vector<2x8x8xbf16>, vector<2x8x8xf32> -> vector<2x8x8xf32>
    "tpu.trace_stop"() : () -> ()
    %93 = arith.addf %92, %18 : vector<2x8x8xf32>
    %cst_43 = arith.constant dense<0xFF800000> : vector<2x8xf32>
    %94 = vector.multi_reduction <maximumf>, %93, %cst_43 [2] : vector<2x8x8xf32> to vector<2x8xf32>
    %95 = vector.shape_cast %94 : vector<2x8xf32> to vector<2x8x1xf32>
    %96 = vector.broadcast %95 : vector<2x8x1xf32> to vector<2x8x8xf32>
    %97 = arith.subf %93, %96 : vector<2x8x8xf32>
    %98 = math.exp %97 : vector<2x8x8xf32>
    %cst_44 = arith.constant dense<0.000000e+00> : vector<2x8xf32>
    %99 = vector.multi_reduction <add>, %98, %cst_44 [2] : vector<2x8x8xf32> to vector<2x8xf32>
    %100 = vector.shape_cast %99 : vector<2x8xf32> to vector<2x8x1xf32>
    %101 = tpu.reciprocal %100 {approx = true} : vector<2x8x1xf32> -> vector<2x8x1xf32>
    %102 = vector.broadcast %101 : vector<2x8x1xf32> to vector<2x8x8xf32>
    %103 = arith.mulf %98, %102 : vector<2x8x8xf32>
    %104 = arith.truncf %103 : vector<2x8x8xf32> to vector<2x8x8xbf16>
    %105 = vector.extract_strided_slice %66 {offsets = [0, 0, 8], sizes = [2, 8, 8], strides = [1, 1, 1]} : vector<2x8x32xf32> to vector<2x8x8xf32>
    %106 = arith.truncf %105 : vector<2x8x8xf32> to vector<2x8x8xbf16>
    "tpu.trace_start"() <{level = 10 : i32, message = "bqk,bkd->bqd"}> : () -> ()
    %cst_45 = arith.constant dense<0.000000e+00> : vector<2x8x8xf32>
    %107 = tpu.matmul %104, %106, %cst_45 {dimension_numbers = #tpu.dot_dimension_numbers<[2], [1], [1], [2], [0, 0, 0, 1, 1, 2], [0], [0]>} : vector<2x8x8xbf16>, vector<2x8x8xbf16>, vector<2x8x8xf32> -> vector<2x8x8xf32>
    "tpu.trace_stop"() : () -> ()
    %c0_46 = arith.constant 0 : index
    %c0_47 = arith.constant 0 : index
    %c8 = arith.constant 8 : index
    %108 = vector.load %arg25[%c0_46, %c0_47, %c8] : memref<2x8x32xf32, #tpu.memory_space<vmem>>, vector<2x8x8xf32>
    tpu.vector_store %arg25[%c0_46, %c0_47, %c8], %107 {strides = array<i32>} : memref<2x8x32xf32, #tpu.memory_space<vmem>>, vector<2x8x8xf32>,
    %109 = vector.extract_strided_slice %62 {offsets = [0, 0, 16], sizes = [2, 8, 8], strides = [1, 1, 1]} : vector<2x8x32xf32> to vector<2x8x8xf32>
    %110 = arith.truncf %109 : vector<2x8x8xf32> to vector<2x8x8xbf16>
    %111 = vector.extract_strided_slice %64 {offsets = [0, 0, 16], sizes = [2, 8, 8], strides = [1, 1, 1]} : vector<2x8x32xf32> to vector<2x8x8xf32>
    %112 = arith.truncf %111 : vector<2x8x8xf32> to vector<2x8x8xbf16>
    "tpu.trace_start"() <{level = 10 : i32, message = "bqd,bkd->bqk"}> : () -> ()
    %cst_48 = arith.constant dense<0.000000e+00> : vector<2x8x8xf32>
    %113 = tpu.matmul %110, %112, %cst_48 {dimension_numbers = #tpu.dot_dimension_numbers<[2], [2], [1], [1], [0, 0, 0, 1, 1, 1], [0], [0]>} : vector<2x8x8xbf16>, vector<2x8x8xbf16>, vector<2x8x8xf32> -> vector<2x8x8xf32>
    "tpu.trace_stop"() : () -> ()
    %114 = arith.addf %113, %18 : vector<2x8x8xf32>
    %cst_49 = arith.constant dense<0xFF800000> : vector<2x8xf32>
    %115 = vector.multi_reduction <maximumf>, %114, %cst_49 [2] : vector<2x8x8xf32> to vector<2x8xf32>
    %116 = vector.shape_cast %115 : vector<2x8xf32> to vector<2x8x1xf32>
    %117 = vector.broadcast %116 : vector<2x8x1xf32> to vector<2x8x8xf32>
    %118 = arith.subf %114, %117 : vector<2x8x8xf32>
    %119 = math.exp %118 : vector<2x8x8xf32>
    %cst_50 = arith.constant dense<0.000000e+00> : vector<2x8xf32>
    %120 = vector.multi_reduction <add>, %119, %cst_50 [2] : vector<2x8x8xf32> to vector<2x8xf32>
    %121 = vector.shape_cast %120 : vector<2x8xf32> to vector<2x8x1xf32>
    %122 = tpu.reciprocal %121 {approx = true} : vector<2x8x1xf32> -> vector<2x8x1xf32>
    %123 = vector.broadcast %122 : vector<2x8x1xf32> to vector<2x8x8xf32>
    %124 = arith.mulf %119, %123 : vector<2x8x8xf32>
    %125 = arith.truncf %124 : vector<2x8x8xf32> to vector<2x8x8xbf16>
    %126 = vector.extract_strided_slice %66 {offsets = [0, 0, 16], sizes = [2, 8, 8], strides = [1, 1, 1]} : vector<2x8x32xf32> to vector<2x8x8xf32>
    %127 = arith.truncf %126 : vector<2x8x8xf32> to vector<2x8x8xbf16>
    "tpu.trace_start"() <{level = 10 : i32, message = "bqk,bkd->bqd"}> : () -> ()
    %cst_51 = arith.constant dense<0.000000e+00> : vector<2x8x8xf32>
    %128 = tpu.matmul %125, %127, %cst_51 {dimension_numbers = #tpu.dot_dimension_numbers<[2], [1], [1], [2], [0, 0, 0, 1, 1, 2], [0], [0]>} : vector<2x8x8xbf16>, vector<2x8x8xbf16>, vector<2x8x8xf32> -> vector<2x8x8xf32>
    "tpu.trace_stop"() : () -> ()
    %c0_52 = arith.constant 0 : index
    %c0_53 = arith.constant 0 : index
    %c16 = arith.constant 16 : index
    %129 = vector.load %arg25[%c0_52, %c0_53, %c16] : memref<2x8x32xf32, #tpu.memory_space<vmem>>, vector<2x8x8xf32>
    tpu.vector_store %arg25[%c0_52, %c0_53, %c16], %128 {strides = array<i32>} : memref<2x8x32xf32, #tpu.memory_space<vmem>>, vector<2x8x8xf32>,
    %130 = vector.extract_strided_slice %62 {offsets = [0, 0, 24], sizes = [2, 8, 8], strides = [1, 1, 1]} : vector<2x8x32xf32> to vector<2x8x8xf32>
    %131 = arith.truncf %130 : vector<2x8x8xf32> to vector<2x8x8xbf16>
    %132 = vector.extract_strided_slice %64 {offsets = [0, 0, 24], sizes = [2, 8, 8], strides = [1, 1, 1]} : vector<2x8x32xf32> to vector<2x8x8xf32>
    %133 = arith.truncf %132 : vector<2x8x8xf32> to vector<2x8x8xbf16>
    "tpu.trace_start"() <{level = 10 : i32, message = "bqd,bkd->bqk"}> : () -> ()
    %cst_54 = arith.constant dense<0.000000e+00> : vector<2x8x8xf32>
    %134 = tpu.matmul %131, %133, %cst_54 {dimension_numbers = #tpu.dot_dimension_numbers<[2], [2], [1], [1], [0, 0, 0, 1, 1, 1], [0], [0]>} : vector<2x8x8xbf16>, vector<2x8x8xbf16>, vector<2x8x8xf32> -> vector<2x8x8xf32>
    "tpu.trace_stop"() : () -> ()
    %135 = arith.addf %134, %18 : vector<2x8x8xf32>
    %cst_55 = arith.constant dense<0xFF800000> : vector<2x8xf32>
    %136 = vector.multi_reduction <maximumf>, %135, %cst_55 [2] : vector<2x8x8xf32> to vector<2x8xf32>
    %137 = vector.shape_cast %136 : vector<2x8xf32> to vector<2x8x1xf32>
    %138 = vector.broadcast %137 : vector<2x8x1xf32> to vector<2x8x8xf32>
    %139 = arith.subf %135, %138 : vector<2x8x8xf32>
    %140 = math.exp %139 : vector<2x8x8xf32>
    %cst_56 = arith.constant dense<0.000000e+00> : vector<2x8xf32>
    %141 = vector.multi_reduction <add>, %140, %cst_56 [2] : vector<2x8x8xf32> to vector<2x8xf32>
    %142 = vector.shape_cast %141 : vector<2x8xf32> to vector<2x8x1xf32>
    %143 = tpu.reciprocal %142 {approx = true} : vector<2x8x1xf32> -> vector<2x8x1xf32>
    %144 = vector.broadcast %143 : vector<2x8x1xf32> to vector<2x8x8xf32>
    %145 = arith.mulf %140, %144 : vector<2x8x8xf32>
    %146 = arith.truncf %145 : vector<2x8x8xf32> to vector<2x8x8xbf16>
    %147 = vector.extract_strided_slice %66 {offsets = [0, 0, 24], sizes = [2, 8, 8], strides = [1, 1, 1]} : vector<2x8x32xf32> to vector<2x8x8xf32>
    %148 = arith.truncf %147 : vector<2x8x8xf32> to vector<2x8x8xbf16>
    "tpu.trace_start"() <{level = 10 : i32, message = "bqk,bkd->bqd"}> : () -> ()
    %cst_57 = arith.constant dense<0.000000e+00> : vector<2x8x8xf32>
    %149 = tpu.matmul %146, %148, %cst_57 {dimension_numbers = #tpu.dot_dimension_numbers<[2], [1], [1], [2], [0, 0, 0, 1, 1, 2], [0], [0]>} : vector<2x8x8xbf16>, vector<2x8x8xbf16>, vector<2x8x8xf32> -> vector<2x8x8xf32>
    "tpu.trace_stop"() : () -> ()
    %c0_58 = arith.constant 0 : index
    %c0_59 = arith.constant 0 : index
    %c24 = arith.constant 24 : index
    %150 = vector.load %arg25[%c0_58, %c0_59, %c24] : memref<2x8x32xf32, #tpu.memory_space<vmem>>, vector<2x8x8xf32>
    tpu.vector_store %arg25[%c0_58, %c0_59, %c24], %149 {strides = array<i32>} : memref<2x8x32xf32, #tpu.memory_space<vmem>>, vector<2x8x8xf32>,
    %c0_60 = arith.constant 0 : index
    %c0_61 = arith.constant 0 : index
    %c0_62 = arith.constant 0 : index
    %151 = vector.load %arg25[%c0_60, %c0_61, %c0_62] : memref<2x8x32xf32, #tpu.memory_space<vmem>>, vector<2x8x32xf32>
    %152 = vector.shape_cast %151 : vector<2x8x32xf32> to vector<16x32xf32>
    %153 = arith.truncf %152 : vector<16x32xf32> to vector<16x32xbf16>
    %cst_63 = arith.constant dense<0.000000e+00> : vector<16x32xf32>
    %154 = tpu.matmul %153, %52, %cst_63 {dimension_numbers = #tpu.dot_dimension_numbers<[1], [0], [0], [1], [0, 0, 1, 1], [], []>} : vector<16x32xbf16>, vector<32x32xbf16>, vector<16x32xf32> -> vector<16x32xf32>
    %155 = vector.broadcast %53 : vector<1x32xf32> to vector<16x32xf32>
    %156 = arith.addf %154, %155 : vector<16x32xf32>
    %157 = vector.shape_cast %156 : vector<16x32xf32> to vector<2x8x32xf32>
    %158 = arith.addf %0, %157 : vector<2x8x32xf32>
    %c0_64 = arith.constant 0 : index
    %c0_65 = arith.constant 0 : index
    %159 = vector.load %arg10[%c0_64, %c0_65] : memref<1x32xf32, #tpu.memory_space<vmem>>, vector<1x32xf32>
    %c0_66 = arith.constant 0 : index
    %c0_67 = arith.constant 0 : index
    %160 = vector.load %arg11[%c0_66, %c0_67] : memref<1x32xf32, #tpu.memory_space<vmem>>, vector<1x32xf32>
    %cst_68 = arith.constant dense<0.000000e+00> : vector<2x8xf32>
    %161 = vector.multi_reduction <add>, %158, %cst_68 [2] : vector<2x8x32xf32> to vector<2x8xf32>
    %162 = vector.shape_cast %161 : vector<2x8xf32> to vector<2x8x1xf32>
    %cst_69 = arith.constant 3.200000e+01 : f32
    %163 = vector.broadcast %cst_69 : f32 to vector<2x8x1xf32>
    %164 = arith.divf %162, %163 : vector<2x8x1xf32>
    %165 = vector.broadcast %164 : vector<2x8x1xf32> to vector<2x8x32xf32>
    %166 = arith.subf %158, %165 : vector<2x8x32xf32>
    %167 = arith.mulf %166, %166 : vector<2x8x32xf32>
    %cst_70 = arith.constant dense<0.000000e+00> : vector<2x8xf32>
    %168 = vector.multi_reduction <add>, %167, %cst_70 [2] : vector<2x8x32xf32> to vector<2x8xf32>
    %169 = vector.shape_cast %168 : vector<2x8xf32> to vector<2x8x1xf32>
    %cst_71 = arith.constant 3.100000e+01 : f32
    %170 = vector.broadcast %cst_71 : f32 to vector<2x8x1xf32>
    %171 = arith.divf %169, %170 : vector<2x8x1xf32>
    %172 = vector.shape_cast %159 : vector<1x32xf32> to vector<1x1x32xf32>
    %173 = vector.broadcast %172 : vector<1x1x32xf32> to vector<2x8x32xf32>
    %174 = arith.mulf %173, %166 : vector<2x8x32xf32>
    %175 = math.sqrt %171 : vector<2x8x1xf32>
    %cst_72 = arith.constant 9.99999997E-7 : f32
    %176 = vector.broadcast %cst_72 : f32 to vector<2x8x1xf32>
    %177 = arith.addf %175, %176 : vector<2x8x1xf32>
    %178 = vector.broadcast %177 : vector<2x8x1xf32> to vector<2x8x32xf32>
    %179 = arith.divf %174, %178 : vector<2x8x32xf32>
    %180 = vector.shape_cast %160 : vector<1x32xf32> to vector<1x1x32xf32>
    %181 = vector.broadcast %180 : vector<1x1x32xf32> to vector<2x8x32xf32>
    %182 = arith.addf %179, %181 : vector<2x8x32xf32>
    %c0_73 = arith.constant 0 : index
    %c0_74 = arith.constant 0 : index
    %183 = vector.load %arg12[%c0_73, %c0_74] : memref<32x96xbf16, #tpu.memory_space<vmem>>, vector<32x96xbf16>
    %c0_75 = arith.constant 0 : index
    %c0_76 = arith.constant 0 : index
    %184 = vector.load %arg13[%c0_75, %c0_76] : memref<1x96xf32, #tpu.memory_space<vmem>>, vector<1x96xf32>
    %c0_77 = arith.constant 0 : index
    %c0_78 = arith.constant 0 : index
    %185 = vector.load %arg14[%c0_77, %c0_78] : memref<32x32xbf16, #tpu.memory_space<vmem>>, vector<32x32xbf16>
    %c0_79 = arith.constant 0 : index
    %c0_80 = arith.constant 0 : index
    %186 = vector.load %arg15[%c0_79, %c0_80] : memref<1x32xf32, #tpu.memory_space<vmem>>, vector<1x32xf32>
    %187 = vector.shape_cast %182 : vector<2x8x32xf32> to vector<16x32xf32>
    %188 = arith.truncf %187 : vector<16x32xf32> to vector<16x32xbf16>
    %189 = vector.extract_strided_slice %183 {offsets = [0, 0], sizes = [32, 32], strides = [1, 1]} : vector<32x96xbf16> to vector<32x32xbf16>
    %cst_81 = arith.constant dense<0.000000e+00> : vector<16x32xf32>
    %190 = tpu.matmul %188, %189, %cst_81 {dimension_numbers = #tpu.dot_dimension_numbers<[1], [0], [0], [1], [0, 0, 1, 1], [], []>} : vector<16x32xbf16>, vector<32x32xbf16>, vector<16x32xf32> -> vector<16x32xf32>
    %191 = vector.extract_strided_slice %184 {offsets = [0, 0], sizes = [1, 32], strides = [1, 1]} : vector<1x96xf32> to vector<1x32xf32>
    %192 = vector.broadcast %191 : vector<1x32xf32> to vector<16x32xf32>
    %193 = arith.addf %190, %192 : vector<16x32xf32>
    %194 = vector.shape_cast %193 : vector<16x32xf32> to vector<2x8x32xf32>
    %cst_82 = arith.constant 0.353553385 : f32
    %195 = vector.broadcast %cst_82 : f32 to vector<2x8x32xf32>
    %196 = arith.mulf %194, %195 : vector<2x8x32xf32>
    %197 = vector.shape_cast %1 : vector<2x8x32xf32> to vector<16x32xf32>
    %198 = arith.truncf %197 : vector<16x32xf32> to vector<16x32xbf16>
    %199 = vector.extract_strided_slice %183 {offsets = [0, 32], sizes = [32, 64], strides = [1, 1]} : vector<32x96xbf16> to vector<32x64xbf16>
    %cst_83 = arith.constant dense<0.000000e+00> : vector<16x64xf32>
    %200 = tpu.matmul %198, %199, %cst_83 {dimension_numbers = #tpu.dot_dimension_numbers<[1], [0], [0], [1], [0, 0, 1, 1], [], []>} : vector<16x32xbf16>, vector<32x64xbf16>, vector<16x64xf32> -> vector<16x64xf32>
    %201 = vector.extract_strided_slice %184 {offsets = [0, 32], sizes = [1, 64], strides = [1, 1]} : vector<1x96xf32> to vector<1x64xf32>
    %202 = vector.broadcast %201 : vector<1x64xf32> to vector<16x64xf32>
    %203 = arith.addf %200, %202 : vector<16x64xf32>
    %204 = vector.extract_strided_slice %203 {offsets = [0, 0], sizes = [16, 32], strides = [1, 1]} : vector<16x64xf32> to vector<16x32xf32>
    %205 = vector.shape_cast %204 : vector<16x32xf32> to vector<2x8x32xf32>
    %206 = vector.extract_strided_slice %203 {offsets = [0, 32], sizes = [16, 32], strides = [1, 1]} : vector<16x64xf32> to vector<16x32xf32>
    %207 = vector.shape_cast %206 : vector<16x32xf32> to vector<2x8x32xf32>
    %208 = vector.extract_strided_slice %196 {offsets = [0, 0, 0], sizes = [2, 8, 8], strides = [1, 1, 1]} : vector<2x8x32xf32> to vector<2x8x8xf32>
    %209 = arith.truncf %208 : vector<2x8x8xf32> to vector<2x8x8xbf16>
    %210 = vector.extract_strided_slice %205 {offsets = [0, 0, 0], sizes = [2, 8, 8], strides = [1, 1, 1]} : vector<2x8x32xf32> to vector<2x8x8xf32>
    %211 = arith.truncf %210 : vector<2x8x8xf32> to vector<2x8x8xbf16>
    "tpu.trace_start"() <{level = 10 : i32, message = "bqd,bkd->bqk"}> : () -> ()
    %cst_84 = arith.constant dense<0.000000e+00> : vector<2x8x8xf32>
    %212 = tpu.matmul %209, %211, %cst_84 {dimension_numbers = #tpu.dot_dimension_numbers<[2], [2], [1], [1], [0, 0, 0, 1, 1, 1], [0], [0]>} : vector<2x8x8xbf16>, vector<2x8x8xbf16>, vector<2x8x8xf32> -> vector<2x8x8xf32>
    "tpu.trace_stop"() : () -> ()
    %213 = vector.broadcast %25 : vector<2x1x8xf32> to vector<2x8x8xf32>
    %214 = arith.addf %212, %213 : vector<2x8x8xf32>
    %cst_85 = arith.constant dense<0xFF800000> : vector<2x8xf32>
    %215 = vector.multi_reduction <maximumf>, %214, %cst_85 [2] : vector<2x8x8xf32> to vector<2x8xf32>
    %216 = vector.shape_cast %215 : vector<2x8xf32> to vector<2x8x1xf32>
    %217 = vector.broadcast %216 : vector<2x8x1xf32> to vector<2x8x8xf32>
    %218 = arith.subf %214, %217 : vector<2x8x8xf32>
    %219 = math.exp %218 : vector<2x8x8xf32>
    %cst_86 = arith.constant dense<0.000000e+00> : vector<2x8xf32>
    %220 = vector.multi_reduction <add>, %219, %cst_86 [2] : vector<2x8x8xf32> to vector<2x8xf32>
    %221 = vector.shape_cast %220 : vector<2x8xf32> to vector<2x8x1xf32>
    %222 = tpu.reciprocal %221 {approx = true} : vector<2x8x1xf32> -> vector<2x8x1xf32>
    %223 = vector.broadcast %222 : vector<2x8x1xf32> to vector<2x8x8xf32>
    %224 = arith.mulf %219, %223 : vector<2x8x8xf32>
    %225 = arith.truncf %224 : vector<2x8x8xf32> to vector<2x8x8xbf16>
    %226 = vector.extract_strided_slice %207 {offsets = [0, 0, 0], sizes = [2, 8, 8], strides = [1, 1, 1]} : vector<2x8x32xf32> to vector<2x8x8xf32>
    %227 = arith.truncf %226 : vector<2x8x8xf32> to vector<2x8x8xbf16>
    "tpu.trace_start"() <{level = 10 : i32, message = "bqk,bkd->bqd"}> : () -> ()
    %cst_87 = arith.constant dense<0.000000e+00> : vector<2x8x8xf32>
    %228 = tpu.matmul %225, %227, %cst_87 {dimension_numbers = #tpu.dot_dimension_numbers<[2], [1], [1], [2], [0, 0, 0, 1, 1, 2], [0], [0]>} : vector<2x8x8xbf16>, vector<2x8x8xbf16>, vector<2x8x8xf32> -> vector<2x8x8xf32>
    "tpu.trace_stop"() : () -> ()
    %c0_88 = arith.constant 0 : index
    %c0_89 = arith.constant 0 : index
    %c0_90 = arith.constant 0 : index
    %229 = vector.load %arg25[%c0_88, %c0_89, %c0_90] : memref<2x8x32xf32, #tpu.memory_space<vmem>>, vector<2x8x8xf32>
    tpu.vector_store %arg25[%c0_88, %c0_89, %c0_90], %228 {strides = array<i32>} : memref<2x8x32xf32, #tpu.memory_space<vmem>>, vector<2x8x8xf32>,
    %230 = vector.extract_strided_slice %196 {offsets = [0, 0, 8], sizes = [2, 8, 8], strides = [1, 1, 1]} : vector<2x8x32xf32> to vector<2x8x8xf32>
    %231 = arith.truncf %230 : vector<2x8x8xf32> to vector<2x8x8xbf16>
    %232 = vector.extract_strided_slice %205 {offsets = [0, 0, 8], sizes = [2, 8, 8], strides = [1, 1, 1]} : vector<2x8x32xf32> to vector<2x8x8xf32>
    %233 = arith.truncf %232 : vector<2x8x8xf32> to vector<2x8x8xbf16>
    "tpu.trace_start"() <{level = 10 : i32, message = "bqd,bkd->bqk"}> : () -> ()
    %cst_91 = arith.constant dense<0.000000e+00> : vector<2x8x8xf32>
    %234 = tpu.matmul %231, %233, %cst_91 {dimension_numbers = #tpu.dot_dimension_numbers<[2], [2], [1], [1], [0, 0, 0, 1, 1, 1], [0], [0]>} : vector<2x8x8xbf16>, vector<2x8x8xbf16>, vector<2x8x8xf32> -> vector<2x8x8xf32>
    "tpu.trace_stop"() : () -> ()
    %235 = vector.broadcast %25 : vector<2x1x8xf32> to vector<2x8x8xf32>
    %236 = arith.addf %234, %235 : vector<2x8x8xf32>
    %cst_92 = arith.constant dense<0xFF800000> : vector<2x8xf32>
    %237 = vector.multi_reduction <maximumf>, %236, %cst_92 [2] : vector<2x8x8xf32> to vector<2x8xf32>
    %238 = vector.shape_cast %237 : vector<2x8xf32> to vector<2x8x1xf32>
    %239 = vector.broadcast %238 : vector<2x8x1xf32> to vector<2x8x8xf32>
    %240 = arith.subf %236, %239 : vector<2x8x8xf32>
    %241 = math.exp %240 : vector<2x8x8xf32>
    %cst_93 = arith.constant dense<0.000000e+00> : vector<2x8xf32>
    %242 = vector.multi_reduction <add>, %241, %cst_93 [2] : vector<2x8x8xf32> to vector<2x8xf32>
    %243 = vector.shape_cast %242 : vector<2x8xf32> to vector<2x8x1xf32>
    %244 = tpu.reciprocal %243 {approx = true} : vector<2x8x1xf32> -> vector<2x8x1xf32>
    %245 = vector.broadcast %244 : vector<2x8x1xf32> to vector<2x8x8xf32>
    %246 = arith.mulf %241, %245 : vector<2x8x8xf32>
    %247 = arith.truncf %246 : vector<2x8x8xf32> to vector<2x8x8xbf16>
    %248 = vector.extract_strided_slice %207 {offsets = [0, 0, 8], sizes = [2, 8, 8], strides = [1, 1, 1]} : vector<2x8x32xf32> to vector<2x8x8xf32>
    %249 = arith.truncf %248 : vector<2x8x8xf32> to vector<2x8x8xbf16>
    "tpu.trace_start"() <{level = 10 : i32, message = "bqk,bkd->bqd"}> : () -> ()
    %cst_94 = arith.constant dense<0.000000e+00> : vector<2x8x8xf32>
    %250 = tpu.matmul %247, %249, %cst_94 {dimension_numbers = #tpu.dot_dimension_numbers<[2], [1], [1], [2], [0, 0, 0, 1, 1, 2], [0], [0]>} : vector<2x8x8xbf16>, vector<2x8x8xbf16>, vector<2x8x8xf32> -> vector<2x8x8xf32>
    "tpu.trace_stop"() : () -> ()
    %c0_95 = arith.constant 0 : index
    %c0_96 = arith.constant 0 : index
    %c8_97 = arith.constant 8 : index
    %251 = vector.load %arg25[%c0_95, %c0_96, %c8_97] : memref<2x8x32xf32, #tpu.memory_space<vmem>>, vector<2x8x8xf32>
    tpu.vector_store %arg25[%c0_95, %c0_96, %c8_97], %250 {strides = array<i32>} : memref<2x8x32xf32, #tpu.memory_space<vmem>>, vector<2x8x8xf32>,
    %252 = vector.extract_strided_slice %196 {offsets = [0, 0, 16], sizes = [2, 8, 8], strides = [1, 1, 1]} : vector<2x8x32xf32> to vector<2x8x8xf32>
    %253 = arith.truncf %252 : vector<2x8x8xf32> to vector<2x8x8xbf16>
    %254 = vector.extract_strided_slice %205 {offsets = [0, 0, 16], sizes = [2, 8, 8], strides = [1, 1, 1]} : vector<2x8x32xf32> to vector<2x8x8xf32>
    %255 = arith.truncf %254 : vector<2x8x8xf32> to vector<2x8x8xbf16>
    "tpu.trace_start"() <{level = 10 : i32, message = "bqd,bkd->bqk"}> : () -> ()
    %cst_98 = arith.constant dense<0.000000e+00> : vector<2x8x8xf32>
    %256 = tpu.matmul %253, %255, %cst_98 {dimension_numbers = #tpu.dot_dimension_numbers<[2], [2], [1], [1], [0, 0, 0, 1, 1, 1], [0], [0]>} : vector<2x8x8xbf16>, vector<2x8x8xbf16>, vector<2x8x8xf32> -> vector<2x8x8xf32>
    "tpu.trace_stop"() : () -> ()
    %257 = vector.broadcast %25 : vector<2x1x8xf32> to vector<2x8x8xf32>
    %258 = arith.addf %256, %257 : vector<2x8x8xf32>
    %cst_99 = arith.constant dense<0xFF800000> : vector<2x8xf32>
    %259 = vector.multi_reduction <maximumf>, %258, %cst_99 [2] : vector<2x8x8xf32> to vector<2x8xf32>
    %260 = vector.shape_cast %259 : vector<2x8xf32> to vector<2x8x1xf32>
    %261 = vector.broadcast %260 : vector<2x8x1xf32> to vector<2x8x8xf32>
    %262 = arith.subf %258, %261 : vector<2x8x8xf32>
    %263 = math.exp %262 : vector<2x8x8xf32>
    %cst_100 = arith.constant dense<0.000000e+00> : vector<2x8xf32>
    %264 = vector.multi_reduction <add>, %263, %cst_100 [2] : vector<2x8x8xf32> to vector<2x8xf32>
    %265 = vector.shape_cast %264 : vector<2x8xf32> to vector<2x8x1xf32>
    %266 = tpu.reciprocal %265 {approx = true} : vector<2x8x1xf32> -> vector<2x8x1xf32>
    %267 = vector.broadcast %266 : vector<2x8x1xf32> to vector<2x8x8xf32>
    %268 = arith.mulf %263, %267 : vector<2x8x8xf32>
    %269 = arith.truncf %268 : vector<2x8x8xf32> to vector<2x8x8xbf16>
    %270 = vector.extract_strided_slice %207 {offsets = [0, 0, 16], sizes = [2, 8, 8], strides = [1, 1, 1]} : vector<2x8x32xf32> to vector<2x8x8xf32>
    %271 = arith.truncf %270 : vector<2x8x8xf32> to vector<2x8x8xbf16>
    "tpu.trace_start"() <{level = 10 : i32, message = "bqk,bkd->bqd"}> : () -> ()
    %cst_101 = arith.constant dense<0.000000e+00> : vector<2x8x8xf32>
    %272 = tpu.matmul %269, %271, %cst_101 {dimension_numbers = #tpu.dot_dimension_numbers<[2], [1], [1], [2], [0, 0, 0, 1, 1, 2], [0], [0]>} : vector<2x8x8xbf16>, vector<2x8x8xbf16>, vector<2x8x8xf32> -> vector<2x8x8xf32>
    "tpu.trace_stop"() : () -> ()
    %c0_102 = arith.constant 0 : index
    %c0_103 = arith.constant 0 : index
    %c16_104 = arith.constant 16 : index
    %273 = vector.load %arg25[%c0_102, %c0_103, %c16_104] : memref<2x8x32xf32, #tpu.memory_space<vmem>>, vector<2x8x8xf32>
    tpu.vector_store %arg25[%c0_102, %c0_103, %c16_104], %272 {strides = array<i32>} : memref<2x8x32xf32, #tpu.memory_space<vmem>>, vector<2x8x8xf32>,
    %274 = vector.extract_strided_slice %196 {offsets = [0, 0, 24], sizes = [2, 8, 8], strides = [1, 1, 1]} : vector<2x8x32xf32> to vector<2x8x8xf32>
    %275 = arith.truncf %274 : vector<2x8x8xf32> to vector<2x8x8xbf16>
    %276 = vector.extract_strided_slice %205 {offsets = [0, 0, 24], sizes = [2, 8, 8], strides = [1, 1, 1]} : vector<2x8x32xf32> to vector<2x8x8xf32>
    %277 = arith.truncf %276 : vector<2x8x8xf32> to vector<2x8x8xbf16>
    "tpu.trace_start"() <{level = 10 : i32, message = "bqd,bkd->bqk"}> : () -> ()
    %cst_105 = arith.constant dense<0.000000e+00> : vector<2x8x8xf32>
    %278 = tpu.matmul %275, %277, %cst_105 {dimension_numbers = #tpu.dot_dimension_numbers<[2], [2], [1], [1], [0, 0, 0, 1, 1, 1], [0], [0]>} : vector<2x8x8xbf16>, vector<2x8x8xbf16>, vector<2x8x8xf32> -> vector<2x8x8xf32>
    "tpu.trace_stop"() : () -> ()
    %279 = vector.broadcast %25 : vector<2x1x8xf32> to vector<2x8x8xf32>
    %280 = arith.addf %278, %279 : vector<2x8x8xf32>
    %cst_106 = arith.constant dense<0xFF800000> : vector<2x8xf32>
    %281 = vector.multi_reduction <maximumf>, %280, %cst_106 [2] : vector<2x8x8xf32> to vector<2x8xf32>
    %282 = vector.shape_cast %281 : vector<2x8xf32> to vector<2x8x1xf32>
    %283 = vector.broadcast %282 : vector<2x8x1xf32> to vector<2x8x8xf32>
    %284 = arith.subf %280, %283 : vector<2x8x8xf32>
    %285 = math.exp %284 : vector<2x8x8xf32>
    %cst_107 = arith.constant dense<0.000000e+00> : vector<2x8xf32>
    %286 = vector.multi_reduction <add>, %285, %cst_107 [2] : vector<2x8x8xf32> to vector<2x8xf32>
    %287 = vector.shape_cast %286 : vector<2x8xf32> to vector<2x8x1xf32>
    %288 = tpu.reciprocal %287 {approx = true} : vector<2x8x1xf32> -> vector<2x8x1xf32>
    %289 = vector.broadcast %288 : vector<2x8x1xf32> to vector<2x8x8xf32>
    %290 = arith.mulf %285, %289 : vector<2x8x8xf32>
    %291 = arith.truncf %290 : vector<2x8x8xf32> to vector<2x8x8xbf16>
    %292 = vector.extract_strided_slice %207 {offsets = [0, 0, 24], sizes = [2, 8, 8], strides = [1, 1, 1]} : vector<2x8x32xf32> to vector<2x8x8xf32>
    %293 = arith.truncf %292 : vector<2x8x8xf32> to vector<2x8x8xbf16>
    "tpu.trace_start"() <{level = 10 : i32, message = "bqk,bkd->bqd"}> : () -> ()
    %cst_108 = arith.constant dense<0.000000e+00> : vector<2x8x8xf32>
    %294 = tpu.matmul %291, %293, %cst_108 {dimension_numbers = #tpu.dot_dimension_numbers<[2], [1], [1], [2], [0, 0, 0, 1, 1, 2], [0], [0]>} : vector<2x8x8xbf16>, vector<2x8x8xbf16>, vector<2x8x8xf32> -> vector<2x8x8xf32>
    "tpu.trace_stop"() : () -> ()
    %c0_109 = arith.constant 0 : index
    %c0_110 = arith.constant 0 : index
    %c24_111 = arith.constant 24 : index
    %295 = vector.load %arg25[%c0_109, %c0_110, %c24_111] : memref<2x8x32xf32, #tpu.memory_space<vmem>>, vector<2x8x8xf32>
    tpu.vector_store %arg25[%c0_109, %c0_110, %c24_111], %294 {strides = array<i32>} : memref<2x8x32xf32, #tpu.memory_space<vmem>>, vector<2x8x8xf32>,
    %c0_112 = arith.constant 0 : index
    %c0_113 = arith.constant 0 : index
    %c0_114 = arith.constant 0 : index
    %296 = vector.load %arg25[%c0_112, %c0_113, %c0_114] : memref<2x8x32xf32, #tpu.memory_space<vmem>>, vector<2x8x32xf32>
    %297 = vector.shape_cast %296 : vector<2x8x32xf32> to vector<16x32xf32>
    %298 = arith.truncf %297 : vector<16x32xf32> to vector<16x32xbf16>
    %cst_115 = arith.constant dense<0.000000e+00> : vector<16x32xf32>
    %299 = tpu.matmul %298, %185, %cst_115 {dimension_numbers = #tpu.dot_dimension_numbers<[1], [0], [0], [1], [0, 0, 1, 1], [], []>} : vector<16x32xbf16>, vector<32x32xbf16>, vector<16x32xf32> -> vector<16x32xf32>
    %300 = vector.broadcast %186 : vector<1x32xf32> to vector<16x32xf32>
    %301 = arith.addf %299, %300 : vector<16x32xf32>
    %302 = vector.shape_cast %301 : vector<16x32xf32> to vector<2x8x32xf32>
    %303 = arith.addf %158, %302 : vector<2x8x32xf32>
    %c0_116 = arith.constant 0 : index
    %c0_117 = arith.constant 0 : index
    %304 = vector.load %arg16[%c0_116, %c0_117] : memref<1x32xf32, #tpu.memory_space<vmem>>, vector<1x32xf32>
    %c0_118 = arith.constant 0 : index
    %c0_119 = arith.constant 0 : index
    %305 = vector.load %arg17[%c0_118, %c0_119] : memref<1x32xf32, #tpu.memory_space<vmem>>, vector<1x32xf32>
    %c0_120 = arith.constant 0 : index
    %c0_121 = arith.constant 0 : index
    %306 = vector.load %arg18[%c0_120, %c0_121] : memref<32x64xbf16, #tpu.memory_space<vmem>>, vector<32x64xbf16>
    %c0_122 = arith.constant 0 : index
    %c0_123 = arith.constant 0 : index
    %307 = vector.load %arg19[%c0_122, %c0_123] : memref<1x64xf32, #tpu.memory_space<vmem>>, vector<1x64xf32>
    %c0_124 = arith.constant 0 : index
    %c0_125 = arith.constant 0 : index
    %308 = vector.load %arg20[%c0_124, %c0_125] : memref<64x32xbf16, #tpu.memory_space<vmem>>, vector<64x32xbf16>
    %c0_126 = arith.constant 0 : index
    %c0_127 = arith.constant 0 : index
    %309 = vector.load %arg21[%c0_126, %c0_127] : memref<1x32xf32, #tpu.memory_space<vmem>>, vector<1x32xf32>
    %cst_128 = arith.constant dense<0.000000e+00> : vector<2x8xf32>
    %310 = vector.multi_reduction <add>, %303, %cst_128 [2] : vector<2x8x32xf32> to vector<2x8xf32>
    %311 = vector.shape_cast %310 : vector<2x8xf32> to vector<2x8x1xf32>
    %cst_129 = arith.constant 3.200000e+01 : f32
    %312 = vector.broadcast %cst_129 : f32 to vector<2x8x1xf32>
    %313 = arith.divf %311, %312 : vector<2x8x1xf32>
    %314 = vector.broadcast %313 : vector<2x8x1xf32> to vector<2x8x32xf32>
    %315 = arith.subf %303, %314 : vector<2x8x32xf32>
    %316 = arith.mulf %315, %315 : vector<2x8x32xf32>
    %cst_130 = arith.constant dense<0.000000e+00> : vector<2x8xf32>
    %317 = vector.multi_reduction <add>, %316, %cst_130 [2] : vector<2x8x32xf32> to vector<2x8xf32>
    %318 = vector.shape_cast %317 : vector<2x8xf32> to vector<2x8x1xf32>
    %cst_131 = arith.constant 3.100000e+01 : f32
    %319 = vector.broadcast %cst_131 : f32 to vector<2x8x1xf32>
    %320 = arith.divf %318, %319 : vector<2x8x1xf32>
    %321 = vector.shape_cast %304 : vector<1x32xf32> to vector<1x1x32xf32>
    %322 = vector.broadcast %321 : vector<1x1x32xf32> to vector<2x8x32xf32>
    %323 = arith.mulf %322, %315 : vector<2x8x32xf32>
    %324 = math.sqrt %320 : vector<2x8x1xf32>
    %cst_132 = arith.constant 9.99999997E-7 : f32
    %325 = vector.broadcast %cst_132 : f32 to vector<2x8x1xf32>
    %326 = arith.addf %324, %325 : vector<2x8x1xf32>
    %327 = vector.broadcast %326 : vector<2x8x1xf32> to vector<2x8x32xf32>
    %328 = arith.divf %323, %327 : vector<2x8x32xf32>
    %329 = vector.shape_cast %305 : vector<1x32xf32> to vector<1x1x32xf32>
    %330 = vector.broadcast %329 : vector<1x1x32xf32> to vector<2x8x32xf32>
    %331 = arith.addf %328, %330 : vector<2x8x32xf32>
    %332 = vector.shape_cast %331 : vector<2x8x32xf32> to vector<16x32xf32>
    %333 = arith.truncf %332 : vector<16x32xf32> to vector<16x32xbf16>
    %cst_133 = arith.constant dense<0.000000e+00> : vector<16x64xf32>
    %334 = tpu.matmul %333, %306, %cst_133 {dimension_numbers = #tpu.dot_dimension_numbers<[1], [0], [0], [1], [0, 0, 1, 1], [], []>} : vector<16x32xbf16>, vector<32x64xbf16>, vector<16x64xf32> -> vector<16x64xf32>
    %335 = vector.broadcast %307 : vector<1x64xf32> to vector<16x64xf32>
    %336 = arith.addf %334, %335 : vector<16x64xf32>
    %cst_134 = arith.constant 0.000000e+00 : f32
    %337 = vector.broadcast %cst_134 : f32 to vector<16x64xf32>
    %338 = arith.maximumf %336, %337 : vector<16x64xf32>
    %339 = arith.truncf %338 : vector<16x64xf32> to vector<16x64xbf16>
    %cst_135 = arith.constant dense<0.000000e+00> : vector<16x32xf32>
    %340 = tpu.matmul %339, %308, %cst_135 {dimension_numbers = #tpu.dot_dimension_numbers<[1], [0], [0], [1], [0, 0, 1, 1], [], []>} : vector<16x64xbf16>, vector<64x32xbf16>, vector<16x32xf32> -> vector<16x32xf32>
    %341 = vector.broadcast %309 : vector<1x32xf32> to vector<16x32xf32>
    %342 = arith.addf %340, %341 : vector<16x32xf32>
    %343 = vector.shape_cast %342 : vector<16x32xf32> to vector<2x8x32xf32>
    %344 = arith.addf %303, %343 : vector<2x8x32xf32>
    %c0_136 = arith.constant 0 : index
    %c0_137 = arith.constant 0 : index
    %c0_138 = arith.constant 0 : index
    %345 = vector.load %arg24[%c0_136, %c0_137, %c0_138] : memref<2x8x32xf32, #tpu.memory_space<vmem>>, vector<2x8x32xf32>
    tpu.vector_store %arg24[%c0_136, %c0_137, %c0_138], %344 {strides = array<i32>} : memref<2x8x32xf32, #tpu.memory_space<vmem>>, vector<2x8x32xf32>,
    return
  }
}

module attributes {stable_mosaic.version = 11 : i64} {
  func.func @_dec_layer_kernel(%arg0: memref<2x8x32xf32, #tpu.memory_space<vmem>>, %arg1: memref<2x8x32xf32, #tpu.memory_space<vmem>>, %arg2: memref<2x8xf32, #tpu.memory_space<vmem>>, %arg3: memref<2x8xf32, #tpu.memory_space<vmem>>, %arg4: memref<1x32xf32, #tpu.memory_space<vmem>>, %arg5: memref<1x32xf32, #tpu.memory_space<vmem>>, %arg6: memref<32x96xbf16, #tpu.memory_space<vmem>>, %arg7: memref<1x96xf32, #tpu.memory_space<vmem>>, %arg8: memref<32x32xbf16, #tpu.memory_space<vmem>>, %arg9: memref<1x32xf32, #tpu.memory_space<vmem>>, %arg10: memref<1x32xf32, #tpu.memory_space<vmem>>, %arg11: memref<1x32xf32, #tpu.memory_space<vmem>>, %arg12: memref<32x96xbf16, #tpu.memory_space<vmem>>, %arg13: memref<1x96xf32, #tpu.memory_space<vmem>>, %arg14: memref<32x32xbf16, #tpu.memory_space<vmem>>, %arg15: memref<1x32xf32, #tpu.memory_space<vmem>>, %arg16: memref<1x32xf32, #tpu.memory_space<vmem>>, %arg17: memref<1x32xf32, #tpu.memory_space<vmem>>, %arg18: memref<32x64xbf16, #tpu.memory_space<vmem>>, %arg19: memref<1x64xf32, #tpu.memory_space<vmem>>, %arg20: memref<64x32xbf16, #tpu.memory_space<vmem>>, %arg21: memref<1x32xf32, #tpu.memory_space<vmem>>, %arg22: memref<1x32xf32, #tpu.memory_space<vmem>>, %arg23: memref<1x32xf32, #tpu.memory_space<vmem>>, %arg24: memref<2x8x32xf32, #tpu.memory_space<vmem>>, %arg25: memref<2x8x32xf32, #tpu.memory_space<vmem>>) attributes {dimension_semantics = [], scalar_prefetch = 0 : i64, scratch_operands = 1 : i64, tpu.core_type = #tpu.core_type<tc>} {
    %c0 = arith.constant 0 : index
    %c0_0 = arith.constant 0 : index
    %c0_1 = arith.constant 0 : index
    %0 = vector.load %arg0[%c0, %c0_0, %c0_1] : memref<2x8x32xf32, #tpu.memory_space<vmem>>, vector<2x8x32xf32>
    %c0_2 = arith.constant 0 : index
    %c0_3 = arith.constant 0 : index
    %c0_4 = arith.constant 0 : index
    %1 = vector.load %arg1[%c0_2, %c0_3, %c0_4] : memref<2x8x32xf32, #tpu.memory_space<vmem>>, vector<2x8x32xf32>
    %c0_5 = arith.constant 0 : index
    %c0_6 = arith.constant 0 : index
    %2 = vector.load %arg3[%c0_5, %c0_6] : memref<2x8xf32, #tpu.memory_space<vmem>>, vector<2x8xf32>
    %cst = arith.constant 0.000000e+00 : f32
    %3 = vector.broadcast %cst : f32 to vector<2x8xf32>
    %4 = arith.cmpf oeq, %2, %3 : vector<2x8xf32>
    %cst_7 = arith.constant -1.000000e+09 : f32
    %cst_8 = arith.constant 0.000000e+00 : f32
    %5 = vector.broadcast %cst_7 : f32 to vector<2x8xf32>
    %6 = vector.broadcast %cst_8 : f32 to vector<2x8xf32>
    %7 = arith.select %4, %5, %6 : vector<2x8xi1>, vector<2x8xf32>
    %8 = vector.shape_cast %7 : vector<2x8xf32> to vector<2x1x8xf32>
    %9 = tpu.iota {dimensions = array<i32: 0>} : vector<8x8xi32>
    %10 = tpu.iota {dimensions = array<i32: 1>} : vector<8x8xi32>
    %11 = arith.cmpi sgt, %10, %9 : vector<8x8xi32>
    %cst_9 = arith.constant -1.000000e+09 : f32
    %cst_10 = arith.constant 0.000000e+00 : f32
    %12 = vector.broadcast %cst_9 : f32 to vector<8x8xf32>
    %13 = vector.broadcast %cst_10 : f32 to vector<8x8xf32>
    %14 = arith.select %11, %12, %13 : vector<8x8xi1>, vector<8x8xf32>
    %15 = vector.shape_cast %14 : vector<8x8xf32> to vector<1x8x8xf32>
    %16 = vector.broadcast %8 : vector<2x1x8xf32> to vector<2x8x8xf32>
    %17 = vector.broadcast %15 : vector<1x8x8xf32> to vector<2x8x8xf32>
    %18 = arith.addf %16, %17 : vector<2x8x8xf32>
    %c0_11 = arith.constant 0 : index
    %c0_12 = arith.constant 0 : index
    %19 = vector.load %arg2[%c0_11, %c0_12] : memref<2x8xf32, #tpu.memory_space<vmem>>, vector<2x8xf32>
    %cst_13 = arith.constant 0.000000e+00 : f32
    %20 = vector.broadcast %cst_13 : f32 to vector<2x8xf32>
    %21 = arith.cmpf oeq, %19, %20 : vector<2x8xf32>
    %cst_14 = arith.constant -1.000000e+09 : f32
    %cst_15 = arith.constant 0.000000e+00 : f32
    %22 = vector.broadcast %cst_14 : f32 to vector<2x8xf32>
    %23 = vector.broadcast %cst_15 : f32 to vector<2x8xf32>
    %24 = arith.select %21, %22, %23 : vector<2x8xi1>, vector<2x8xf32>
    %25 = vector.shape_cast %24 : vector<2x8xf32> to vector<2x1x8xf32>
    %c0_16 = arith.constant 0 : index
    %c0_17 = arith.constant 0 : index
    %26 = vector.load %arg4[%c0_16, %c0_17] : memref<1x32xf32, #tpu.memory_space<vmem>>, vector<1x32xf32>
    %c0_18 = arith.constant 0 : index
    %c0_19 = arith.constant 0 : index
    %27 = vector.load %arg5[%c0_18, %c0_19] : memref<1x32xf32, #tpu.memory_space<vmem>>, vector<1x32xf32>
    %cst_20 = arith.constant dense<0.000000e+00> : vector<2x8xf32>
    %28 = vector.multi_reduction <add>, %0, %cst_20 [2] : vector<2x8x32xf32> to vector<2x8xf32>
    %29 = vector.shape_cast %28 : vector<2x8xf32> to vector<2x8x1xf32>
    %cst_21 = arith.constant 3.200000e+01 : f32
    %30 = vector.broadcast %cst_21 : f32 to vector<2x8x1xf32>
    %31 = arith.divf %29, %30 : vector<2x8x1xf32>
    %32 = vector.broadcast %31 : vector<2x8x1xf32> to vector<2x8x32xf32>
    %33 = arith.subf %0, %32 : vector<2x8x32xf32>
    %34 = arith.mulf %33, %33 : vector<2x8x32xf32>
    %cst_22 = arith.constant dense<0.000000e+00> : vector<2x8xf32>
    %35 = vector.multi_reduction <add>, %34, %cst_22 [2] : vector<2x8x32xf32> to vector<2x8xf32>
    %36 = vector.shape_cast %35 : vector<2x8xf32> to vector<2x8x1xf32>
    %cst_23 = arith.constant 3.100000e+01 : f32
    %37 = vector.broadcast %cst_23 : f32 to vector<2x8x1xf32>
    %38 = arith.divf %36, %37 : vector<2x8x1xf32>
    %39 = vector.shape_cast %26 : vector<1x32xf32> to vector<1x1x32xf32>
    %40 = vector.broadcast %39 : vector<1x1x32xf32> to vector<2x8x32xf32>
    %41 = arith.mulf %40, %33 : vector<2x8x32xf32>
    %42 = math.sqrt %38 : vector<2x8x1xf32>
    %cst_24 = arith.constant 9.99999997E-7 : f32
    %43 = vector.broadcast %cst_24 : f32 to vector<2x8x1xf32>
    %44 = arith.addf %42, %43 : vector<2x8x1xf32>
    %45 = vector.broadcast %44 : vector<2x8x1xf32> to vector<2x8x32xf32>
    %46 = arith.divf %41, %45 : vector<2x8x32xf32>
    %47 = vector.shape_cast %27 : vector<1x32xf32> to vector<1x1x32xf32>
    %48 = vector.broadcast %47 : vector<1x1x32xf32> to vector<2x8x32xf32>
    %49 = arith.addf %46, %48 : vector<2x8x32xf32>
    %c0_25 = arith.constant 0 : index
    %c0_26 = arith.constant 0 : index
    %50 = vector.load %arg6[%c0_25, %c0_26] : memref<32x96xbf16, #tpu.memory_space<vmem>>, vector<32x96xbf16>
    %c0_27 = arith.constant 0 : index
    %c0_28 = arith.constant 0 : index
    %51 = vector.load %arg7[%c0_27, %c0_28] : memref<1x96xf32, #tpu.memory_space<vmem>>, vector<1x96xf32>
    %c0_29 = arith.constant 0 : index
    %c0_30 = arith.constant 0 : index
    %52 = vector.load %arg8[%c0_29, %c0_30] : memref<32x32xbf16, #tpu.memory_space<vmem>>, vector<32x32xbf16>
    %c0_31 = arith.constant 0 : index
    %c0_32 = arith.constant 0 : index
    %53 = vector.load %arg9[%c0_31, %c0_32] : memref<1x32xf32, #tpu.memory_space<vmem>>, vector<1x32xf32>
    %54 = vector.shape_cast %49 : vector<2x8x32xf32> to vector<16x32xf32>
    %55 = arith.truncf %54 : vector<16x32xf32> to vector<16x32xbf16>
    %cst_33 = arith.constant dense<0.000000e+00> : vector<16x96xf32>
    %56 = tpu.matmul %55, %50, %cst_33 {dimension_numbers = #tpu.dot_dimension_numbers<[1], [0], [0], [1], [0, 0, 1, 1], [], []>} : vector<16x32xbf16>, vector<32x96xbf16>, vector<16x96xf32> -> vector<16x96xf32>
    %57 = vector.broadcast %51 : vector<1x96xf32> to vector<16x96xf32>
    %58 = arith.addf %56, %57 : vector<16x96xf32>
    %59 = vector.extract_strided_slice %58 {offsets = [0, 0], sizes = [16, 32], strides = [1, 1]} : vector<16x96xf32> to vector<16x32xf32>
    %60 = vector.shape_cast %59 : vector<16x32xf32> to vector<2x8x32xf32>
    %cst_34 = arith.constant 0.353553385 : f32
    %61 = vector.broadcast %cst_34 : f32 to vector<2x8x32xf32>
    %62 = arith.mulf %60, %61 : vector<2x8x32xf32>
    %63 = vector.extract_strided_slice %58 {offsets = [0, 32], sizes = [16, 32], strides = [1, 1]} : vector<16x96xf32> to vector<16x32xf32>
    %64 = vector.shape_cast %63 : vector<16x32xf32> to vector<2x8x32xf32>
    %65 = vector.extract_strided_slice %58 {offsets = [0, 64], sizes = [16, 32], strides = [1, 1]} : vector<16x96xf32> to vector<16x32xf32>
    %66 = vector.shape_cast %65 : vector<16x32xf32> to vector<2x8x32xf32>
    %67 = vector.extract_strided_slice %62 {offsets = [0, 0, 0], sizes = [2, 8, 8], strides = [1, 1, 1]} : vector<2x8x32xf32> to vector<2x8x8xf32>
    %68 = arith.truncf %67 : vector<2x8x8xf32> to vector<2x8x8xbf16>
    %69 = vector.extract_strided_slice %64 {offsets = [0, 0, 0], sizes = [2, 8, 8], strides = [1, 1, 1]} : vector<2x8x32xf32> to vector<2x8x8xf32>
    %70 = arith.truncf %69 : vector<2x8x8xf32> to vector<2x8x8xbf16>
    "tpu.trace_start"() <{level = 10 : i32, message = "bqd,bkd->bqk"}> : () -> ()
    %cst_35 = arith.constant dense<0.000000e+00> : vector<2x8x8xf32>
    %71 = tpu.matmul %68, %70, %cst_35 {dimension_numbers = #tpu.dot_dimension_numbers<[2], [2], [1], [1], [0, 0, 0, 1, 1, 1], [0], [0]>} : vector<2x8x8xbf16>, vector<2x8x8xbf16>, vector<2x8x8xf32> -> vector<2x8x8xf32>
    "tpu.trace_stop"() : () -> ()
    %72 = arith.addf %71, %18 : vector<2x8x8xf32>
    %cst_36 = arith.constant dense<0xFF800000> : vector<2x8xf32>
    %73 = vector.multi_reduction <maximumf>, %72, %cst_36 [2] : vector<2x8x8xf32> to vector<2x8xf32>
    %74 = vector.shape_cast %73 : vector<2x8xf32> to vector<2x8x1xf32>
    %75 = vector.broadcast %74 : vector<2x8x1xf32> to vector<2x8x8xf32>
    %76 = arith.subf %72, %75 : vector<2x8x8xf32>
    %77 = math.exp %76 : vector<2x8x8xf32>
    %cst_37 = arith.constant dense<0.000000e+00> : vector<2x8xf32>
    %78 = vector.multi_reduction <add>, %77, %cst_37 [2] : vector<2x8x8xf32> to vector<2x8xf32>
    %79 = vector.shape_cast %78 : vector<2x8xf32> to vector<2x8x1xf32>
    %80 = tpu.reciprocal %79 {approx = true} : vector<2x8x1xf32> -> vector<2x8x1xf32>
    %81 = vector.broadcast %80 : vector<2x8x1xf32> to vector<2x8x8xf32>
    %82 = arith.mulf %77, %81 : vector<2x8x8xf32>
    %83 = arith.truncf %82 : vector<2x8x8xf32> to vector<2x8x8xbf16>
    %84 = vector.extract_strided_slice %66 {offsets = [0, 0, 0], sizes = [2, 8, 8], strides = [1, 1, 1]} : vector<2x8x32xf32> to vector<2x8x8xf32>
    %85 = arith.truncf %84 : vector<2x8x8xf32> to vector<2x8x8xbf16>
    "tpu.trace_start"() <{level = 10 : i32, message = "bqk,bkd->bqd"}> : () -> ()
    %cst_38 = arith.constant dense<0.000000e+00> : vector<2x8x8xf32>
    %86 = tpu.matmul %83, %85, %cst_38 {dimension_numbers = #tpu.dot_dimension_numbers<[2], [1], [1], [2], [0, 0, 0, 1, 1, 2], [0], [0]>} : vector<2x8x8xbf16>, vector<2x8x8xbf16>, vector<2x8x8xf32> -> vector<2x8x8xf32>
    "tpu.trace_stop"() : () -> ()
    %c0_39 = arith.constant 0 : index
    %c0_40 = arith.constant 0 : index
    %c0_41 = arith.constant 0 : index
    %87 = vector.load %arg25[%c0_39, %c0_40, %c0_41] : memref<2x8x32xf32, #tpu.memory_space<vmem>>, vector<2x8x8xf32>
    tpu.vector_store %arg25[%c0_39, %c0_40, %c0_41], %86 {strides = array<i32>} : memref<2x8x32xf32, #tpu.memory_space<vmem>>, vector<2x8x8xf32>,
    %88 = vector.extract_strided_slice %62 {offsets = [0, 0, 8], sizes = [2, 8, 8], strides = [1, 1, 1]} : vector<2x8x32xf32> to vector<2x8x8xf32>
    %89 = arith.truncf %88 : vector<2x8x8xf32> to vector<2x8x8xbf16>
    %90 = vector.extract_strided_slice %64 {offsets = [0, 0, 8], sizes = [2, 8, 8], strides = [1, 1, 1]} : vector<2x8x32xf32> to vector<2x8x8xf32>
    %91 = arith.truncf %90 : vector<2x8x8xf32> to vector<2x8x8xbf16>
    "tpu.trace_start"() <{level = 10 : i32, message = "bqd,bkd->bqk"}> : () -> ()
    %cst_42 = arith.constant dense<0.000000e+00> : vector<2x8x8xf32>
    %92 = tpu.matmul %89, %91, %cst_42 {dimension_numbers = #tpu.dot_dimension_numbers<[2], [2], [1], [1], [0, 0, 0, 1, 1, 1], [0], [0]>} : vector<2x8x8xbf16>, vector<2x8x8xbf16>, vector<2x8x8xf32> -> vector<2x8x8xf32>
    "tpu.trace_stop"() : () -> ()
    %93 = arith.addf %92, %18 : vector<2x8x8xf32>
    %cst_43 = arith.constant dense<0xFF800000> : vector<2x8xf32>
    %94 = vector.multi_reduction <maximumf>, %93, %cst_43 [2] : vector<2x8x8xf32> to vector<2x8xf32>
    %95 = vector.shape_cast %94 : vector<2x8xf32> to vector<2x8x1xf32>
    %96 = vector.broadcast %95 : vector<2x8x1xf32> to vector<2x8x8xf32>
    %97 = arith.subf %93, %96 : vector<2x8x8xf32>
    %98 = math.exp %97 : vector<2x8x8xf32>
    %cst_44 = arith.constant dense<0.000000e+00> : vector<2x8xf32>
    %99 = vector.multi_reduction <add>, %98, %cst_44 [2] : vector<2x8x8xf32> to vector<2x8xf32>
    %100 = vector.shape_cast %99 : vector<2x8xf32> to vector<2x8x1xf32>
    %101 = tpu.reciprocal %100 {approx = true} : vector<2x8x1xf32> -> vector<2x8x1xf32>
    %102 = vector.broadcast %101 : vector<2x8x1xf32> to vector<2x8x8xf32>
    %103 = arith.mulf %98, %102 : vector<2x8x8xf32>
    %104 = arith.truncf %103 : vector<2x8x8xf32> to vector<2x8x8xbf16>
    %105 = vector.extract_strided_slice %66 {offsets = [0, 0, 8], sizes = [2, 8, 8], strides = [1, 1, 1]} : vector<2x8x32xf32> to vector<2x8x8xf32>
    %106 = arith.truncf %105 : vector<2x8x8xf32> to vector<2x8x8xbf16>
    "tpu.trace_start"() <{level = 10 : i32, message = "bqk,bkd->bqd"}> : () -> ()
    %cst_45 = arith.constant dense<0.000000e+00> : vector<2x8x8xf32>
    %107 = tpu.matmul %104, %106, %cst_45 {dimension_numbers = #tpu.dot_dimension_numbers<[2], [1], [1], [2], [0, 0, 0, 1, 1, 2], [0], [0]>} : vector<2x8x8xbf16>, vector<2x8x8xbf16>, vector<2x8x8xf32> -> vector<2x8x8xf32>
    "tpu.trace_stop"() : () -> ()
    %c0_46 = arith.constant 0 : index
    %c0_47 = arith.constant 0 : index
    %c8 = arith.constant 8 : index
    %108 = vector.load %arg25[%c0_46, %c0_47, %c8] : memref<2x8x32xf32, #tpu.memory_space<vmem>>, vector<2x8x8xf32>
    tpu.vector_store %arg25[%c0_46, %c0_47, %c8], %107 {strides = array<i32>} : memref<2x8x32xf32, #tpu.memory_space<vmem>>, vector<2x8x8xf32>,
    %109 = vector.extract_strided_slice %62 {offsets = [0, 0, 16], sizes = [2, 8, 8], strides = [1, 1, 1]} : vector<2x8x32xf32> to vector<2x8x8xf32>
    %110 = arith.truncf %109 : vector<2x8x8xf32> to vector<2x8x8xbf16>
    %111 = vector.extract_strided_slice %64 {offsets = [0, 0, 16], sizes = [2, 8, 8], strides = [1, 1, 1]} : vector<2x8x32xf32> to vector<2x8x8xf32>
    %112 = arith.truncf %111 : vector<2x8x8xf32> to vector<2x8x8xbf16>
    "tpu.trace_start"() <{level = 10 : i32, message = "bqd,bkd->bqk"}> : () -> ()
    %cst_48 = arith.constant dense<0.000000e+00> : vector<2x8x8xf32>
    %113 = tpu.matmul %110, %112, %cst_48 {dimension_numbers = #tpu.dot_dimension_numbers<[2], [2], [1], [1], [0, 0, 0, 1, 1, 1], [0], [0]>} : vector<2x8x8xbf16>, vector<2x8x8xbf16>, vector<2x8x8xf32> -> vector<2x8x8xf32>
    "tpu.trace_stop"() : () -> ()
    %114 = arith.addf %113, %18 : vector<2x8x8xf32>
    %cst_49 = arith.constant dense<0xFF800000> : vector<2x8xf32>
    %115 = vector.multi_reduction <maximumf>, %114, %cst_49 [2] : vector<2x8x8xf32> to vector<2x8xf32>
    %116 = vector.shape_cast %115 : vector<2x8xf32> to vector<2x8x1xf32>
    %117 = vector.broadcast %116 : vector<2x8x1xf32> to vector<2x8x8xf32>
    %118 = arith.subf %114, %117 : vector<2x8x8xf32>
    %119 = math.exp %118 : vector<2x8x8xf32>
    %cst_50 = arith.constant dense<0.000000e+00> : vector<2x8xf32>
    %120 = vector.multi_reduction <add>, %119, %cst_50 [2] : vector<2x8x8xf32> to vector<2x8xf32>
    %121 = vector.shape_cast %120 : vector<2x8xf32> to vector<2x8x1xf32>
    %122 = tpu.reciprocal %121 {approx = true} : vector<2x8x1xf32> -> vector<2x8x1xf32>
    %123 = vector.broadcast %122 : vector<2x8x1xf32> to vector<2x8x8xf32>
    %124 = arith.mulf %119, %123 : vector<2x8x8xf32>
    %125 = arith.truncf %124 : vector<2x8x8xf32> to vector<2x8x8xbf16>
    %126 = vector.extract_strided_slice %66 {offsets = [0, 0, 16], sizes = [2, 8, 8], strides = [1, 1, 1]} : vector<2x8x32xf32> to vector<2x8x8xf32>
    %127 = arith.truncf %126 : vector<2x8x8xf32> to vector<2x8x8xbf16>
    "tpu.trace_start"() <{level = 10 : i32, message = "bqk,bkd->bqd"}> : () -> ()
    %cst_51 = arith.constant dense<0.000000e+00> : vector<2x8x8xf32>
    %128 = tpu.matmul %125, %127, %cst_51 {dimension_numbers = #tpu.dot_dimension_numbers<[2], [1], [1], [2], [0, 0, 0, 1, 1, 2], [0], [0]>} : vector<2x8x8xbf16>, vector<2x8x8xbf16>, vector<2x8x8xf32> -> vector<2x8x8xf32>
    "tpu.trace_stop"() : () -> ()
    %c0_52 = arith.constant 0 : index
    %c0_53 = arith.constant 0 : index
    %c16 = arith.constant 16 : index
    %129 = vector.load %arg25[%c0_52, %c0_53, %c16] : memref<2x8x32xf32, #tpu.memory_space<vmem>>, vector<2x8x8xf32>
    tpu.vector_store %arg25[%c0_52, %c0_53, %c16], %128 {strides = array<i32>} : memref<2x8x32xf32, #tpu.memory_space<vmem>>, vector<2x8x8xf32>,
    %130 = vector.extract_strided_slice %62 {offsets = [0, 0, 24], sizes = [2, 8, 8], strides = [1, 1, 1]} : vector<2x8x32xf32> to vector<2x8x8xf32>
    %131 = arith.truncf %130 : vector<2x8x8xf32> to vector<2x8x8xbf16>
    %132 = vector.extract_strided_slice %64 {offsets = [0, 0, 24], sizes = [2, 8, 8], strides = [1, 1, 1]} : vector<2x8x32xf32> to vector<2x8x8xf32>
    %133 = arith.truncf %132 : vector<2x8x8xf32> to vector<2x8x8xbf16>
    "tpu.trace_start"() <{level = 10 : i32, message = "bqd,bkd->bqk"}> : () -> ()
    %cst_54 = arith.constant dense<0.000000e+00> : vector<2x8x8xf32>
    %134 = tpu.matmul %131, %133, %cst_54 {dimension_numbers = #tpu.dot_dimension_numbers<[2], [2], [1], [1], [0, 0, 0, 1, 1, 1], [0], [0]>} : vector<2x8x8xbf16>, vector<2x8x8xbf16>, vector<2x8x8xf32> -> vector<2x8x8xf32>
    "tpu.trace_stop"() : () -> ()
    %135 = arith.addf %134, %18 : vector<2x8x8xf32>
    %cst_55 = arith.constant dense<0xFF800000> : vector<2x8xf32>
    %136 = vector.multi_reduction <maximumf>, %135, %cst_55 [2] : vector<2x8x8xf32> to vector<2x8xf32>
    %137 = vector.shape_cast %136 : vector<2x8xf32> to vector<2x8x1xf32>
    %138 = vector.broadcast %137 : vector<2x8x1xf32> to vector<2x8x8xf32>
    %139 = arith.subf %135, %138 : vector<2x8x8xf32>
    %140 = math.exp %139 : vector<2x8x8xf32>
    %cst_56 = arith.constant dense<0.000000e+00> : vector<2x8xf32>
    %141 = vector.multi_reduction <add>, %140, %cst_56 [2] : vector<2x8x8xf32> to vector<2x8xf32>
    %142 = vector.shape_cast %141 : vector<2x8xf32> to vector<2x8x1xf32>
    %143 = tpu.reciprocal %142 {approx = true} : vector<2x8x1xf32> -> vector<2x8x1xf32>
    %144 = vector.broadcast %143 : vector<2x8x1xf32> to vector<2x8x8xf32>
    %145 = arith.mulf %140, %144 : vector<2x8x8xf32>
    %146 = arith.truncf %145 : vector<2x8x8xf32> to vector<2x8x8xbf16>
    %147 = vector.extract_strided_slice %66 {offsets = [0, 0, 24], sizes = [2, 8, 8], strides = [1, 1, 1]} : vector<2x8x32xf32> to vector<2x8x8xf32>
    %148 = arith.truncf %147 : vector<2x8x8xf32> to vector<2x8x8xbf16>
    "tpu.trace_start"() <{level = 10 : i32, message = "bqk,bkd->bqd"}> : () -> ()
    %cst_57 = arith.constant dense<0.000000e+00> : vector<2x8x8xf32>
    %149 = tpu.matmul %146, %148, %cst_57 {dimension_numbers = #tpu.dot_dimension_numbers<[2], [1], [1], [2], [0, 0, 0, 1, 1, 2], [0], [0]>} : vector<2x8x8xbf16>, vector<2x8x8xbf16>, vector<2x8x8xf32> -> vector<2x8x8xf32>
    "tpu.trace_stop"() : () -> ()
    %c0_58 = arith.constant 0 : index
    %c0_59 = arith.constant 0 : index
    %c24 = arith.constant 24 : index
    %150 = vector.load %arg25[%c0_58, %c0_59, %c24] : memref<2x8x32xf32, #tpu.memory_space<vmem>>, vector<2x8x8xf32>
    tpu.vector_store %arg25[%c0_58, %c0_59, %c24], %149 {strides = array<i32>} : memref<2x8x32xf32, #tpu.memory_space<vmem>>, vector<2x8x8xf32>,
    %c0_60 = arith.constant 0 : index
    %c0_61 = arith.constant 0 : index
    %c0_62 = arith.constant 0 : index
    %151 = vector.load %arg25[%c0_60, %c0_61, %c0_62] : memref<2x8x32xf32, #tpu.memory_space<vmem>>, vector<2x8x32xf32>
    %152 = vector.shape_cast %151 : vector<2x8x32xf32> to vector<16x32xf32>
    %153 = arith.truncf %152 : vector<16x32xf32> to vector<16x32xbf16>
    %cst_63 = arith.constant dense<0.000000e+00> : vector<16x32xf32>
    %154 = tpu.matmul %153, %52, %cst_63 {dimension_numbers = #tpu.dot_dimension_numbers<[1], [0], [0], [1], [0, 0, 1, 1], [], []>} : vector<16x32xbf16>, vector<32x32xbf16>, vector<16x32xf32> -> vector<16x32xf32>
    %155 = vector.broadcast %53 : vector<1x32xf32> to vector<16x32xf32>
    %156 = arith.addf %154, %155 : vector<16x32xf32>
    %157 = vector.shape_cast %156 : vector<16x32xf32> to vector<2x8x32xf32>
    %158 = arith.addf %0, %157 : vector<2x8x32xf32>
    %c0_64 = arith.constant 0 : index
    %c0_65 = arith.constant 0 : index
    %159 = vector.load %arg10[%c0_64, %c0_65] : memref<1x32xf32, #tpu.memory_space<vmem>>, vector<1x32xf32>
    %c0_66 = arith.constant 0 : index
    %c0_67 = arith.constant 0 : index
    %160 = vector.load %arg11[%c0_66, %c0_67] : memref<1x32xf32, #tpu.memory_space<vmem>>, vector<1x32xf32>
    %cst_68 = arith.constant dense<0.000000e+00> : vector<2x8xf32>
    %161 = vector.multi_reduction <add>, %158, %cst_68 [2] : vector<2x8x32xf32> to vector<2x8xf32>
    %162 = vector.shape_cast %161 : vector<2x8xf32> to vector<2x8x1xf32>
    %cst_69 = arith.constant 3.200000e+01 : f32
    %163 = vector.broadcast %cst_69 : f32 to vector<2x8x1xf32>
    %164 = arith.divf %162, %163 : vector<2x8x1xf32>
    %165 = vector.broadcast %164 : vector<2x8x1xf32> to vector<2x8x32xf32>
    %166 = arith.subf %158, %165 : vector<2x8x32xf32>
    %167 = arith.mulf %166, %166 : vector<2x8x32xf32>
    %cst_70 = arith.constant dense<0.000000e+00> : vector<2x8xf32>
    %168 = vector.multi_reduction <add>, %167, %cst_70 [2] : vector<2x8x32xf32> to vector<2x8xf32>
    %169 = vector.shape_cast %168 : vector<2x8xf32> to vector<2x8x1xf32>
    %cst_71 = arith.constant 3.100000e+01 : f32
    %170 = vector.broadcast %cst_71 : f32 to vector<2x8x1xf32>
    %171 = arith.divf %169, %170 : vector<2x8x1xf32>
    %172 = vector.shape_cast %159 : vector<1x32xf32> to vector<1x1x32xf32>
    %173 = vector.broadcast %172 : vector<1x1x32xf32> to vector<2x8x32xf32>
    %174 = arith.mulf %173, %166 : vector<2x8x32xf32>
    %175 = math.sqrt %171 : vector<2x8x1xf32>
    %cst_72 = arith.constant 9.99999997E-7 : f32
    %176 = vector.broadcast %cst_72 : f32 to vector<2x8x1xf32>
    %177 = arith.addf %175, %176 : vector<2x8x1xf32>
    %178 = vector.broadcast %177 : vector<2x8x1xf32> to vector<2x8x32xf32>
    %179 = arith.divf %174, %178 : vector<2x8x32xf32>
    %180 = vector.shape_cast %160 : vector<1x32xf32> to vector<1x1x32xf32>
    %181 = vector.broadcast %180 : vector<1x1x32xf32> to vector<2x8x32xf32>
    %182 = arith.addf %179, %181 : vector<2x8x32xf32>
    %c0_73 = arith.constant 0 : index
    %c0_74 = arith.constant 0 : index
    %183 = vector.load %arg12[%c0_73, %c0_74] : memref<32x96xbf16, #tpu.memory_space<vmem>>, vector<32x96xbf16>
    %c0_75 = arith.constant 0 : index
    %c0_76 = arith.constant 0 : index
    %184 = vector.load %arg13[%c0_75, %c0_76] : memref<1x96xf32, #tpu.memory_space<vmem>>, vector<1x96xf32>
    %c0_77 = arith.constant 0 : index
    %c0_78 = arith.constant 0 : index
    %185 = vector.load %arg14[%c0_77, %c0_78] : memref<32x32xbf16, #tpu.memory_space<vmem>>, vector<32x32xbf16>
    %c0_79 = arith.constant 0 : index
    %c0_80 = arith.constant 0 : index
    %186 = vector.load %arg15[%c0_79, %c0_80] : memref<1x32xf32, #tpu.memory_space<vmem>>, vector<1x32xf32>
    %187 = vector.shape_cast %182 : vector<2x8x32xf32> to vector<16x32xf32>
    %188 = arith.truncf %187 : vector<16x32xf32> to vector<16x32xbf16>
    %189 = vector.extract_strided_slice %183 {offsets = [0, 0], sizes = [32, 32], strides = [1, 1]} : vector<32x96xbf16> to vector<32x32xbf16>
    %cst_81 = arith.constant dense<0.000000e+00> : vector<16x32xf32>
    %190 = tpu.matmul %188, %189, %cst_81 {dimension_numbers = #tpu.dot_dimension_numbers<[1], [0], [0], [1], [0, 0, 1, 1], [], []>} : vector<16x32xbf16>, vector<32x32xbf16>, vector<16x32xf32> -> vector<16x32xf32>
    %191 = vector.extract_strided_slice %184 {offsets = [0, 0], sizes = [1, 32], strides = [1, 1]} : vector<1x96xf32> to vector<1x32xf32>
    %192 = vector.broadcast %191 : vector<1x32xf32> to vector<16x32xf32>
    %193 = arith.addf %190, %192 : vector<16x32xf32>
    %194 = vector.shape_cast %193 : vector<16x32xf32> to vector<2x8x32xf32>
    %cst_82 = arith.constant 0.353553385 : f32
    %195 = vector.broadcast %cst_82 : f32 to vector<2x8x32xf32>
    %196 = arith.mulf %194, %195 : vector<2x8x32xf32>
    %197 = vector.shape_cast %1 : vector<2x8x32xf32> to vector<16x32xf32>
    %198 = arith.truncf %197 : vector<16x32xf32> to vector<16x32xbf16>
    %199 = vector.extract_strided_slice %183 {offsets = [0, 32], sizes = [32, 64], strides = [1, 1]} : vector<32x96xbf16> to vector<32x64xbf16>
    %cst_83 = arith.constant dense<0.000000e+00> : vector<16x64xf32>
    %200 = tpu.matmul %198, %199, %cst_83 {dimension_numbers = #tpu.dot_dimension_numbers<[1], [0], [0], [1], [0, 0, 1, 1], [], []>} : vector<16x32xbf16>, vector<32x64xbf16>, vector<16x64xf32> -> vector<16x64xf32>
    %201 = vector.extract_strided_slice %184 {offsets = [0, 32], sizes = [1, 64], strides = [1, 1]} : vector<1x96xf32> to vector<1x64xf32>
    %202 = vector.broadcast %201 : vector<1x64xf32> to vector<16x64xf32>
    %203 = arith.addf %200, %202 : vector<16x64xf32>
    %204 = vector.extract_strided_slice %203 {offsets = [0, 0], sizes = [16, 32], strides = [1, 1]} : vector<16x64xf32> to vector<16x32xf32>
    %205 = vector.shape_cast %204 : vector<16x32xf32> to vector<2x8x32xf32>
    %206 = vector.extract_strided_slice %203 {offsets = [0, 32], sizes = [16, 32], strides = [1, 1]} : vector<16x64xf32> to vector<16x32xf32>
    %207 = vector.shape_cast %206 : vector<16x32xf32> to vector<2x8x32xf32>
    %208 = vector.extract_strided_slice %196 {offsets = [0, 0, 0], sizes = [2, 8, 8], strides = [1, 1, 1]} : vector<2x8x32xf32> to vector<2x8x8xf32>
    %209 = arith.truncf %208 : vector<2x8x8xf32> to vector<2x8x8xbf16>
    %210 = vector.extract_strided_slice %205 {offsets = [0, 0, 0], sizes = [2, 8, 8], strides = [1, 1, 1]} : vector<2x8x32xf32> to vector<2x8x8xf32>
    %211 = arith.truncf %210 : vector<2x8x8xf32> to vector<2x8x8xbf16>
    "tpu.trace_start"() <{level = 10 : i32, message = "bqd,bkd->bqk"}> : () -> ()
    %cst_84 = arith.constant dense<0.000000e+00> : vector<2x8x8xf32>
    %212 = tpu.matmul %209, %211, %cst_84 {dimension_numbers = #tpu.dot_dimension_numbers<[2], [2], [1], [1], [0, 0, 0, 1, 1, 1], [0], [0]>} : vector<2x8x8xbf16>, vector<2x8x8xbf16>, vector<2x8x8xf32> -> vector<2x8x8xf32>
    "tpu.trace_stop"() : () -> ()
    %213 = vector.broadcast %25 : vector<2x1x8xf32> to vector<2x8x8xf32>
    %214 = arith.addf %212, %213 : vector<2x8x8xf32>
    %cst_85 = arith.constant dense<0xFF800000> : vector<2x8xf32>
    %215 = vector.multi_reduction <maximumf>, %214, %cst_85 [2] : vector<2x8x8xf32> to vector<2x8xf32>
    %216 = vector.shape_cast %215 : vector<2x8xf32> to vector<2x8x1xf32>
    %217 = vector.broadcast %216 : vector<2x8x1xf32> to vector<2x8x8xf32>
    %218 = arith.subf %214, %217 : vector<2x8x8xf32>
    %219 = math.exp %218 : vector<2x8x8xf32>
    %cst_86 = arith.constant dense<0.000000e+00> : vector<2x8xf32>
    %220 = vector.multi_reduction <add>, %219, %cst_86 [2] : vector<2x8x8xf32> to vector<2x8xf32>
    %221 = vector.shape_cast %220 : vector<2x8xf32> to vector<2x8x1xf32>
    %222 = tpu.reciprocal %221 {approx = true} : vector<2x8x1xf32> -> vector<2x8x1xf32>
    %223 = vector.broadcast %222 : vector<2x8x1xf32> to vector<2x8x8xf32>
    %224 = arith.mulf %219, %223 : vector<2x8x8xf32>
    %225 = arith.truncf %224 : vector<2x8x8xf32> to vector<2x8x8xbf16>
    %226 = vector.extract_strided_slice %207 {offsets = [0, 0, 0], sizes = [2, 8, 8], strides = [1, 1, 1]} : vector<2x8x32xf32> to vector<2x8x8xf32>
    %227 = arith.truncf %226 : vector<2x8x8xf32> to vector<2x8x8xbf16>
    "tpu.trace_start"() <{level = 10 : i32, message = "bqk,bkd->bqd"}> : () -> ()
    %cst_87 = arith.constant dense<0.000000e+00> : vector<2x8x8xf32>
    %228 = tpu.matmul %225, %227, %cst_87 {dimension_numbers = #tpu.dot_dimension_numbers<[2], [1], [1], [2], [0, 0, 0, 1, 1, 2], [0], [0]>} : vector<2x8x8xbf16>, vector<2x8x8xbf16>, vector<2x8x8xf32> -> vector<2x8x8xf32>
    "tpu.trace_stop"() : () -> ()
    %c0_88 = arith.constant 0 : index
    %c0_89 = arith.constant 0 : index
    %c0_90 = arith.constant 0 : index
    %229 = vector.load %arg25[%c0_88, %c0_89, %c0_90] : memref<2x8x32xf32, #tpu.memory_space<vmem>>, vector<2x8x8xf32>
    tpu.vector_store %arg25[%c0_88, %c0_89, %c0_90], %228 {strides = array<i32>} : memref<2x8x32xf32, #tpu.memory_space<vmem>>, vector<2x8x8xf32>,
    %230 = vector.extract_strided_slice %196 {offsets = [0, 0, 8], sizes = [2, 8, 8], strides = [1, 1, 1]} : vector<2x8x32xf32> to vector<2x8x8xf32>
    %231 = arith.truncf %230 : vector<2x8x8xf32> to vector<2x8x8xbf16>
    %232 = vector.extract_strided_slice %205 {offsets = [0, 0, 8], sizes = [2, 8, 8], strides = [1, 1, 1]} : vector<2x8x32xf32> to vector<2x8x8xf32>
    %233 = arith.truncf %232 : vector<2x8x8xf32> to vector<2x8x8xbf16>
    "tpu.trace_start"() <{level = 10 : i32, message = "bqd,bkd->bqk"}> : () -> ()
    %cst_91 = arith.constant dense<0.000000e+00> : vector<2x8x8xf32>
    %234 = tpu.matmul %231, %233, %cst_91 {dimension_numbers = #tpu.dot_dimension_numbers<[2], [2], [1], [1], [0, 0, 0, 1, 1, 1], [0], [0]>} : vector<2x8x8xbf16>, vector<2x8x8xbf16>, vector<2x8x8xf32> -> vector<2x8x8xf32>
    "tpu.trace_stop"() : () -> ()
    %235 = vector.broadcast %25 : vector<2x1x8xf32> to vector<2x8x8xf32>
    %236 = arith.addf %234, %235 : vector<2x8x8xf32>
    %cst_92 = arith.constant dense<0xFF800000> : vector<2x8xf32>
    %237 = vector.multi_reduction <maximumf>, %236, %cst_92 [2] : vector<2x8x8xf32> to vector<2x8xf32>
    %238 = vector.shape_cast %237 : vector<2x8xf32> to vector<2x8x1xf32>
    %239 = vector.broadcast %238 : vector<2x8x1xf32> to vector<2x8x8xf32>
    %240 = arith.subf %236, %239 : vector<2x8x8xf32>
    %241 = math.exp %240 : vector<2x8x8xf32>
    %cst_93 = arith.constant dense<0.000000e+00> : vector<2x8xf32>
    %242 = vector.multi_reduction <add>, %241, %cst_93 [2] : vector<2x8x8xf32> to vector<2x8xf32>
    %243 = vector.shape_cast %242 : vector<2x8xf32> to vector<2x8x1xf32>
    %244 = tpu.reciprocal %243 {approx = true} : vector<2x8x1xf32> -> vector<2x8x1xf32>
    %245 = vector.broadcast %244 : vector<2x8x1xf32> to vector<2x8x8xf32>
    %246 = arith.mulf %241, %245 : vector<2x8x8xf32>
    %247 = arith.truncf %246 : vector<2x8x8xf32> to vector<2x8x8xbf16>
    %248 = vector.extract_strided_slice %207 {offsets = [0, 0, 8], sizes = [2, 8, 8], strides = [1, 1, 1]} : vector<2x8x32xf32> to vector<2x8x8xf32>
    %249 = arith.truncf %248 : vector<2x8x8xf32> to vector<2x8x8xbf16>
    "tpu.trace_start"() <{level = 10 : i32, message = "bqk,bkd->bqd"}> : () -> ()
    %cst_94 = arith.constant dense<0.000000e+00> : vector<2x8x8xf32>
    %250 = tpu.matmul %247, %249, %cst_94 {dimension_numbers = #tpu.dot_dimension_numbers<[2], [1], [1], [2], [0, 0, 0, 1, 1, 2], [0], [0]>} : vector<2x8x8xbf16>, vector<2x8x8xbf16>, vector<2x8x8xf32> -> vector<2x8x8xf32>
    "tpu.trace_stop"() : () -> ()
    %c0_95 = arith.constant 0 : index
    %c0_96 = arith.constant 0 : index
    %c8_97 = arith.constant 8 : index
    %251 = vector.load %arg25[%c0_95, %c0_96, %c8_97] : memref<2x8x32xf32, #tpu.memory_space<vmem>>, vector<2x8x8xf32>
    tpu.vector_store %arg25[%c0_95, %c0_96, %c8_97], %250 {strides = array<i32>} : memref<2x8x32xf32, #tpu.memory_space<vmem>>, vector<2x8x8xf32>,
    %252 = vector.extract_strided_slice %196 {offsets = [0, 0, 16], sizes = [2, 8, 8], strides = [1, 1, 1]} : vector<2x8x32xf32> to vector<2x8x8xf32>
    %253 = arith.truncf %252 : vector<2x8x8xf32> to vector<2x8x8xbf16>
    %254 = vector.extract_strided_slice %205 {offsets = [0, 0, 16], sizes = [2, 8, 8], strides = [1, 1, 1]} : vector<2x8x32xf32> to vector<2x8x8xf32>
    %255 = arith.truncf %254 : vector<2x8x8xf32> to vector<2x8x8xbf16>
    "tpu.trace_start"() <{level = 10 : i32, message = "bqd,bkd->bqk"}> : () -> ()
    %cst_98 = arith.constant dense<0.000000e+00> : vector<2x8x8xf32>
    %256 = tpu.matmul %253, %255, %cst_98 {dimension_numbers = #tpu.dot_dimension_numbers<[2], [2], [1], [1], [0, 0, 0, 1, 1, 1], [0], [0]>} : vector<2x8x8xbf16>, vector<2x8x8xbf16>, vector<2x8x8xf32> -> vector<2x8x8xf32>
    "tpu.trace_stop"() : () -> ()
    %257 = vector.broadcast %25 : vector<2x1x8xf32> to vector<2x8x8xf32>
    %258 = arith.addf %256, %257 : vector<2x8x8xf32>
    %cst_99 = arith.constant dense<0xFF800000> : vector<2x8xf32>
    %259 = vector.multi_reduction <maximumf>, %258, %cst_99 [2] : vector<2x8x8xf32> to vector<2x8xf32>
    %260 = vector.shape_cast %259 : vector<2x8xf32> to vector<2x8x1xf32>
    %261 = vector.broadcast %260 : vector<2x8x1xf32> to vector<2x8x8xf32>
    %262 = arith.subf %258, %261 : vector<2x8x8xf32>
    %263 = math.exp %262 : vector<2x8x8xf32>
    %cst_100 = arith.constant dense<0.000000e+00> : vector<2x8xf32>
    %264 = vector.multi_reduction <add>, %263, %cst_100 [2] : vector<2x8x8xf32> to vector<2x8xf32>
    %265 = vector.shape_cast %264 : vector<2x8xf32> to vector<2x8x1xf32>
    %266 = tpu.reciprocal %265 {approx = true} : vector<2x8x1xf32> -> vector<2x8x1xf32>
    %267 = vector.broadcast %266 : vector<2x8x1xf32> to vector<2x8x8xf32>
    %268 = arith.mulf %263, %267 : vector<2x8x8xf32>
    %269 = arith.truncf %268 : vector<2x8x8xf32> to vector<2x8x8xbf16>
    %270 = vector.extract_strided_slice %207 {offsets = [0, 0, 16], sizes = [2, 8, 8], strides = [1, 1, 1]} : vector<2x8x32xf32> to vector<2x8x8xf32>
    %271 = arith.truncf %270 : vector<2x8x8xf32> to vector<2x8x8xbf16>
    "tpu.trace_start"() <{level = 10 : i32, message = "bqk,bkd->bqd"}> : () -> ()
    %cst_101 = arith.constant dense<0.000000e+00> : vector<2x8x8xf32>
    %272 = tpu.matmul %269, %271, %cst_101 {dimension_numbers = #tpu.dot_dimension_numbers<[2], [1], [1], [2], [0, 0, 0, 1, 1, 2], [0], [0]>} : vector<2x8x8xbf16>, vector<2x8x8xbf16>, vector<2x8x8xf32> -> vector<2x8x8xf32>
    "tpu.trace_stop"() : () -> ()
    %c0_102 = arith.constant 0 : index
    %c0_103 = arith.constant 0 : index
    %c16_104 = arith.constant 16 : index
    %273 = vector.load %arg25[%c0_102, %c0_103, %c16_104] : memref<2x8x32xf32, #tpu.memory_space<vmem>>, vector<2x8x8xf32>
    tpu.vector_store %arg25[%c0_102, %c0_103, %c16_104], %272 {strides = array<i32>} : memref<2x8x32xf32, #tpu.memory_space<vmem>>, vector<2x8x8xf32>,
    %274 = vector.extract_strided_slice %196 {offsets = [0, 0, 24], sizes = [2, 8, 8], strides = [1, 1, 1]} : vector<2x8x32xf32> to vector<2x8x8xf32>
    %275 = arith.truncf %274 : vector<2x8x8xf32> to vector<2x8x8xbf16>
    %276 = vector.extract_strided_slice %205 {offsets = [0, 0, 24], sizes = [2, 8, 8], strides = [1, 1, 1]} : vector<2x8x32xf32> to vector<2x8x8xf32>
    %277 = arith.truncf %276 : vector<2x8x8xf32> to vector<2x8x8xbf16>
    "tpu.trace_start"() <{level = 10 : i32, message = "bqd,bkd->bqk"}> : () -> ()
    %cst_105 = arith.constant dense<0.000000e+00> : vector<2x8x8xf32>
    %278 = tpu.matmul %275, %277, %cst_105 {dimension_numbers = #tpu.dot_dimension_numbers<[2], [2], [1], [1], [0, 0, 0, 1, 1, 1], [0], [0]>} : vector<2x8x8xbf16>, vector<2x8x8xbf16>, vector<2x8x8xf32> -> vector<2x8x8xf32>
    "tpu.trace_stop"() : () -> ()
    %279 = vector.broadcast %25 : vector<2x1x8xf32> to vector<2x8x8xf32>
    %280 = arith.addf %278, %279 : vector<2x8x8xf32>
    %cst_106 = arith.constant dense<0xFF800000> : vector<2x8xf32>
    %281 = vector.multi_reduction <maximumf>, %280, %cst_106 [2] : vector<2x8x8xf32> to vector<2x8xf32>
    %282 = vector.shape_cast %281 : vector<2x8xf32> to vector<2x8x1xf32>
    %283 = vector.broadcast %282 : vector<2x8x1xf32> to vector<2x8x8xf32>
    %284 = arith.subf %280, %283 : vector<2x8x8xf32>
    %285 = math.exp %284 : vector<2x8x8xf32>
    %cst_107 = arith.constant dense<0.000000e+00> : vector<2x8xf32>
    %286 = vector.multi_reduction <add>, %285, %cst_107 [2] : vector<2x8x8xf32> to vector<2x8xf32>
    %287 = vector.shape_cast %286 : vector<2x8xf32> to vector<2x8x1xf32>
    %288 = tpu.reciprocal %287 {approx = true} : vector<2x8x1xf32> -> vector<2x8x1xf32>
    %289 = vector.broadcast %288 : vector<2x8x1xf32> to vector<2x8x8xf32>
    %290 = arith.mulf %285, %289 : vector<2x8x8xf32>
    %291 = arith.truncf %290 : vector<2x8x8xf32> to vector<2x8x8xbf16>
    %292 = vector.extract_strided_slice %207 {offsets = [0, 0, 24], sizes = [2, 8, 8], strides = [1, 1, 1]} : vector<2x8x32xf32> to vector<2x8x8xf32>
    %293 = arith.truncf %292 : vector<2x8x8xf32> to vector<2x8x8xbf16>
    "tpu.trace_start"() <{level = 10 : i32, message = "bqk,bkd->bqd"}> : () -> ()
    %cst_108 = arith.constant dense<0.000000e+00> : vector<2x8x8xf32>
    %294 = tpu.matmul %291, %293, %cst_108 {dimension_numbers = #tpu.dot_dimension_numbers<[2], [1], [1], [2], [0, 0, 0, 1, 1, 2], [0], [0]>} : vector<2x8x8xbf16>, vector<2x8x8xbf16>, vector<2x8x8xf32> -> vector<2x8x8xf32>
    "tpu.trace_stop"() : () -> ()
    %c0_109 = arith.constant 0 : index
    %c0_110 = arith.constant 0 : index
    %c24_111 = arith.constant 24 : index
    %295 = vector.load %arg25[%c0_109, %c0_110, %c24_111] : memref<2x8x32xf32, #tpu.memory_space<vmem>>, vector<2x8x8xf32>
    tpu.vector_store %arg25[%c0_109, %c0_110, %c24_111], %294 {strides = array<i32>} : memref<2x8x32xf32, #tpu.memory_space<vmem>>, vector<2x8x8xf32>,
    %c0_112 = arith.constant 0 : index
    %c0_113 = arith.constant 0 : index
    %c0_114 = arith.constant 0 : index
    %296 = vector.load %arg25[%c0_112, %c0_113, %c0_114] : memref<2x8x32xf32, #tpu.memory_space<vmem>>, vector<2x8x32xf32>
    %297 = vector.shape_cast %296 : vector<2x8x32xf32> to vector<16x32xf32>
    %298 = arith.truncf %297 : vector<16x32xf32> to vector<16x32xbf16>
    %cst_115 = arith.constant dense<0.000000e+00> : vector<16x32xf32>
    %299 = tpu.matmul %298, %185, %cst_115 {dimension_numbers = #tpu.dot_dimension_numbers<[1], [0], [0], [1], [0, 0, 1, 1], [], []>} : vector<16x32xbf16>, vector<32x32xbf16>, vector<16x32xf32> -> vector<16x32xf32>
    %300 = vector.broadcast %186 : vector<1x32xf32> to vector<16x32xf32>
    %301 = arith.addf %299, %300 : vector<16x32xf32>
    %302 = vector.shape_cast %301 : vector<16x32xf32> to vector<2x8x32xf32>
    %303 = arith.addf %158, %302 : vector<2x8x32xf32>
    %c0_116 = arith.constant 0 : index
    %c0_117 = arith.constant 0 : index
    %304 = vector.load %arg16[%c0_116, %c0_117] : memref<1x32xf32, #tpu.memory_space<vmem>>, vector<1x32xf32>
    %c0_118 = arith.constant 0 : index
    %c0_119 = arith.constant 0 : index
    %305 = vector.load %arg17[%c0_118, %c0_119] : memref<1x32xf32, #tpu.memory_space<vmem>>, vector<1x32xf32>
    %c0_120 = arith.constant 0 : index
    %c0_121 = arith.constant 0 : index
    %306 = vector.load %arg18[%c0_120, %c0_121] : memref<32x64xbf16, #tpu.memory_space<vmem>>, vector<32x64xbf16>
    %c0_122 = arith.constant 0 : index
    %c0_123 = arith.constant 0 : index
    %307 = vector.load %arg19[%c0_122, %c0_123] : memref<1x64xf32, #tpu.memory_space<vmem>>, vector<1x64xf32>
    %c0_124 = arith.constant 0 : index
    %c0_125 = arith.constant 0 : index
    %308 = vector.load %arg20[%c0_124, %c0_125] : memref<64x32xbf16, #tpu.memory_space<vmem>>, vector<64x32xbf16>
    %c0_126 = arith.constant 0 : index
    %c0_127 = arith.constant 0 : index
    %309 = vector.load %arg21[%c0_126, %c0_127] : memref<1x32xf32, #tpu.memory_space<vmem>>, vector<1x32xf32>
    %cst_128 = arith.constant dense<0.000000e+00> : vector<2x8xf32>
    %310 = vector.multi_reduction <add>, %303, %cst_128 [2] : vector<2x8x32xf32> to vector<2x8xf32>
    %311 = vector.shape_cast %310 : vector<2x8xf32> to vector<2x8x1xf32>
    %cst_129 = arith.constant 3.200000e+01 : f32
    %312 = vector.broadcast %cst_129 : f32 to vector<2x8x1xf32>
    %313 = arith.divf %311, %312 : vector<2x8x1xf32>
    %314 = vector.broadcast %313 : vector<2x8x1xf32> to vector<2x8x32xf32>
    %315 = arith.subf %303, %314 : vector<2x8x32xf32>
    %316 = arith.mulf %315, %315 : vector<2x8x32xf32>
    %cst_130 = arith.constant dense<0.000000e+00> : vector<2x8xf32>
    %317 = vector.multi_reduction <add>, %316, %cst_130 [2] : vector<2x8x32xf32> to vector<2x8xf32>
    %318 = vector.shape_cast %317 : vector<2x8xf32> to vector<2x8x1xf32>
    %cst_131 = arith.constant 3.100000e+01 : f32
    %319 = vector.broadcast %cst_131 : f32 to vector<2x8x1xf32>
    %320 = arith.divf %318, %319 : vector<2x8x1xf32>
    %321 = vector.shape_cast %304 : vector<1x32xf32> to vector<1x1x32xf32>
    %322 = vector.broadcast %321 : vector<1x1x32xf32> to vector<2x8x32xf32>
    %323 = arith.mulf %322, %315 : vector<2x8x32xf32>
    %324 = math.sqrt %320 : vector<2x8x1xf32>
    %cst_132 = arith.constant 9.99999997E-7 : f32
    %325 = vector.broadcast %cst_132 : f32 to vector<2x8x1xf32>
    %326 = arith.addf %324, %325 : vector<2x8x1xf32>
    %327 = vector.broadcast %326 : vector<2x8x1xf32> to vector<2x8x32xf32>
    %328 = arith.divf %323, %327 : vector<2x8x32xf32>
    %329 = vector.shape_cast %305 : vector<1x32xf32> to vector<1x1x32xf32>
    %330 = vector.broadcast %329 : vector<1x1x32xf32> to vector<2x8x32xf32>
    %331 = arith.addf %328, %330 : vector<2x8x32xf32>
    %332 = vector.shape_cast %331 : vector<2x8x32xf32> to vector<16x32xf32>
    %333 = arith.truncf %332 : vector<16x32xf32> to vector<16x32xbf16>
    %cst_133 = arith.constant dense<0.000000e+00> : vector<16x64xf32>
    %334 = tpu.matmul %333, %306, %cst_133 {dimension_numbers = #tpu.dot_dimension_numbers<[1], [0], [0], [1], [0, 0, 1, 1], [], []>} : vector<16x32xbf16>, vector<32x64xbf16>, vector<16x64xf32> -> vector<16x64xf32>
    %335 = vector.broadcast %307 : vector<1x64xf32> to vector<16x64xf32>
    %336 = arith.addf %334, %335 : vector<16x64xf32>
    %cst_134 = arith.constant 0.000000e+00 : f32
    %337 = vector.broadcast %cst_134 : f32 to vector<16x64xf32>
    %338 = arith.maximumf %336, %337 : vector<16x64xf32>
    %339 = arith.truncf %338 : vector<16x64xf32> to vector<16x64xbf16>
    %cst_135 = arith.constant dense<0.000000e+00> : vector<16x32xf32>
    %340 = tpu.matmul %339, %308, %cst_135 {dimension_numbers = #tpu.dot_dimension_numbers<[1], [0], [0], [1], [0, 0, 1, 1], [], []>} : vector<16x64xbf16>, vector<64x32xbf16>, vector<16x32xf32> -> vector<16x32xf32>
    %341 = vector.broadcast %309 : vector<1x32xf32> to vector<16x32xf32>
    %342 = arith.addf %340, %341 : vector<16x32xf32>
    %343 = vector.shape_cast %342 : vector<16x32xf32> to vector<2x8x32xf32>
    %344 = arith.addf %303, %343 : vector<2x8x32xf32>
    %c0_136 = arith.constant 0 : index
    %c0_137 = arith.constant 0 : index
    %345 = vector.load %arg22[%c0_136, %c0_137] : memref<1x32xf32, #tpu.memory_space<vmem>>, vector<1x32xf32>
    %c0_138 = arith.constant 0 : index
    %c0_139 = arith.constant 0 : index
    %346 = vector.load %arg23[%c0_138, %c0_139] : memref<1x32xf32, #tpu.memory_space<vmem>>, vector<1x32xf32>
    %cst_140 = arith.constant dense<0.000000e+00> : vector<2x8xf32>
    %347 = vector.multi_reduction <add>, %344, %cst_140 [2] : vector<2x8x32xf32> to vector<2x8xf32>
    %348 = vector.shape_cast %347 : vector<2x8xf32> to vector<2x8x1xf32>
    %cst_141 = arith.constant 3.200000e+01 : f32
    %349 = vector.broadcast %cst_141 : f32 to vector<2x8x1xf32>
    %350 = arith.divf %348, %349 : vector<2x8x1xf32>
    %351 = vector.broadcast %350 : vector<2x8x1xf32> to vector<2x8x32xf32>
    %352 = arith.subf %344, %351 : vector<2x8x32xf32>
    %353 = arith.mulf %352, %352 : vector<2x8x32xf32>
    %cst_142 = arith.constant dense<0.000000e+00> : vector<2x8xf32>
    %354 = vector.multi_reduction <add>, %353, %cst_142 [2] : vector<2x8x32xf32> to vector<2x8xf32>
    %355 = vector.shape_cast %354 : vector<2x8xf32> to vector<2x8x1xf32>
    %cst_143 = arith.constant 3.100000e+01 : f32
    %356 = vector.broadcast %cst_143 : f32 to vector<2x8x1xf32>
    %357 = arith.divf %355, %356 : vector<2x8x1xf32>
    %358 = vector.shape_cast %345 : vector<1x32xf32> to vector<1x1x32xf32>
    %359 = vector.broadcast %358 : vector<1x1x32xf32> to vector<2x8x32xf32>
    %360 = arith.mulf %359, %352 : vector<2x8x32xf32>
    %361 = math.sqrt %357 : vector<2x8x1xf32>
    %cst_144 = arith.constant 9.99999997E-7 : f32
    %362 = vector.broadcast %cst_144 : f32 to vector<2x8x1xf32>
    %363 = arith.addf %361, %362 : vector<2x8x1xf32>
    %364 = vector.broadcast %363 : vector<2x8x1xf32> to vector<2x8x32xf32>
    %365 = arith.divf %360, %364 : vector<2x8x32xf32>
    %366 = vector.shape_cast %346 : vector<1x32xf32> to vector<1x1x32xf32>
    %367 = vector.broadcast %366 : vector<1x1x32xf32> to vector<2x8x32xf32>
    %368 = arith.addf %365, %367 : vector<2x8x32xf32>
    %c0_145 = arith.constant 0 : index
    %c0_146 = arith.constant 0 : index
    %c0_147 = arith.constant 0 : index
    %369 = vector.load %arg24[%c0_145, %c0_146, %c0_147] : memref<2x8x32xf32, #tpu.memory_space<vmem>>, vector<2x8x32xf32>
    tpu.vector_store %arg24[%c0_145, %c0_146, %c0_147], %368 {strides = array<i32>} : memref<2x8x32xf32, #tpu.memory_space<vmem>>, vector<2x8x32xf32>,
    return
  }
}

</mosaic_0001>

<bundles_post_ra>
// kernel: encoder_decoder_forward.4
= control target key start
LH: loop header
LB: loop body
LE: loop exit
PB: predicated region body
PF: predicated region fallthrough
CT: control target
= control target key end

     0   :  { %vm84_vm0 = vcmask 261120   ;;  %v1728_v14 = vmov 0.0   ;;  %vm1729_vm1 = vmmov 0   ;;  %vm235_vm6 = vcmask 64512   ;;  %s1733_s30 = smov 88   ;;  %s1734_s17 = smov 120   ;;  %s2103_s0 = inlined_call_operand.vmem [shape: f32[2,8,32], index: 0, kind: input, shape index: {}]   ;;  %s2104_s14 = inlined_call_operand.vmem [shape: f32[1,32], index: 14, kind: input, shape index: {}]   ;;  %s2105_s15 = inlined_call_operand.vmem [shape: f32[1,32], index: 15, kind: input, shape index: {}]   ;;  %s2106_s4 = inlined_call_operand.vmem [shape: bf16[32,96], index: 4, kind: input, shape index: {}]   ;;  %s2107_s2 = inlined_call_operand.vmem [shape: f32[1,32], index: 2, kind: input, shape index: {}]   ;;  %s2108_s3 = inlined_call_operand.vmem [shape: f32[1,32], index: 3, kind: input, shape index: {}]   ;;  %s2109_s5 = inlined_call_operand.vmem [shape: f32[1,96], index: 5, kind: input, shape index: {}]   ;;  %s2110_s1 = inlined_call_operand.vmem [shape: f32[2,8], index: 1, kind: input, shape index: {}]   ;;  %s2111_s6 = inlined_call_operand.vmem [shape: bf16[32,32], index: 6, kind: input, shape index: {}]   ;;  %s2112_s7 = inlined_call_operand.vmem [shape: f32[1,32], index: 7, kind: input, shape index: {}]   ;;  %s2113_s10 = inlined_call_operand.vmem [shape: bf16[32,64], index: 10, kind: input, shape index: {}]   ;;  %s2114_s12 = inlined_call_operand.vmem [shape: bf16[64,32], index: 12, kind: input, shape index: {}]   ;;  %s2115_s8 = inlined_call_operand.vmem [shape: f32[1,32], index: 8, kind: input, shape index: {}]   ;;  %s2116_s9 = inlined_call_operand.vmem [shape: f32[1,32], index: 9, kind: input, shape index: {}]   ;;  %s2117_s11 = inlined_call_operand.vmem [shape: f32[1,64], index: 11, kind: input, shape index: {}]   ;;  %s2118_s13 = inlined_call_operand.vmem [shape: f32[1,32], index: 13, kind: input, shape index: {}]   ;;  %s2119_s16 = inlined_call_operand.vmem [shape: f32[2,8,32], index: 16, kind: output, shape index: {}]  }
   0x1   :  { %2121 = sst [smem:[#allocation3_spill]] %s2103_s0  ;;  %1521 = vmatprep.subr.bf16.mxu0 %v1728_v14  ;;  %v1670_v15 = vld [vmem:[%s2106_s4] sm:$0xff]   ;;  %1525 = vmatprep.mubr.msk.bf16.mxu0 %vm1729_vm1, %v1728_v14  ;;  %v1671_v16 = vld [vmem:[%s2106_s4 + $0x8] sm:$0xff]   ;;  %v1731_v61 = vmov 1966171168   ;;  %v63_v63 = vlaneseq  ;;  %vm360_vm8 = vcmask 1043456  }
   0x2   :  { %s2122_s15 = sld [smem:[#allocation3_spill]]  ;;  %1529 = vmatprep.subr.bf16.mxu1 %v1728_v14  ;;  %1531 = vmatprep.mubr.msk.bf16.mxu1 %vm1729_vm1, %v1728_v14  ;;  %v1437_v33 = vld [vmem:[%s2107_s2] ss:$0 sm:$0xff]  ;;  %v61_v62 = vunpack.c.l.s4 %v1731_v61  ;;  %s1735_s18 = smov 56   ;;  %vm684_vm9 = vcmask 130112   ;;  %vm915_vm10 = vcmask 195712  }
   0x3   :  { %1522 = vmatpush3.bf16.msra.mxu0 %v1670_v15  ;;  %v1438_v39 = vld [vmem:[%s2108_s3] ss:$0 sm:$0xff]  ;;  %s1730_s3 = smov 96   ;;  %s1736_s14 = smov 80   ;;  %vm1146_vm11 = vcmask 261312  }
   0x4   :  { %1523 = vmatprep.subr.bf16.mxu0 %v1728_v14  ;;  %v1439_v44 = vld [vmem:[%s2109_s5] ss:$0 sm:$0xff]  ;;  %s1737_s19 = smov 112   ;;  %s1739_s20 = smov 72  }
   0x5   :  { %s1740_s21 = smov 104   ;;  %s1741_s22 = smov 40  }
   0x6   :  { %s1742_s23 = smov 8   ;;  %s1743_s24 = smov 16  }
   0x7   :  { %1524 = vmatpush3.bf16.msra.mxu0 %v1671_v16  ;;  %s1744_s28 = smov 24  }
   0x8   :  { %v1833_v0 = vld [vmem:[%s2122_s15] sm:$0xff]  ;;  %v1838_v1 = vld [vmem:[%s2122_s15 + $0x8] sm:$0xff]  ;;  %1535 = vmatprep.subr.bf16.mxu0 %v1728_v14  ;;  %s1738_s15 = smov 48  }
   0x9   :  { %v85_v2 = vsel %vm84_vm0, %v1833_v0, 0.0  ;;  %v88_v3 = vsel %vm84_vm0, %v1838_v1, 0.0 }
   0xa   :  { %86 = vadd.xlane.f32.xlu0 %v85_v2  ;;  %v56_v2 = vld [vmem:[%s2110_s1] sm:$0x3]  ;;  %s1732_s1 = smov 64  }
   0xb   :  { %vm57_vm7 = vcmp.eq.f32.partialorder %v56_v2, 0.0 }
   0xe   :  { %89 = vadd.xlane.f32.xlu0 %v88_v3  ;;  %v62_v3 = vunpack.c.0.s8 %v61_v62 }
  0x97   :  { %v87_v4 = vpop.xlane.xlu0 %86 }
  0x98   :  { %v92_v5 = vmul.f32 0.03125, %v87_v4  ;;  %v64_v4 = vshrl.u32 %v63_v63, 7 }
  0x9a   :  { %v94_v6 = vsub.f32 %v1833_v0, %v92_v5  ;;  %v65_v5 = vsub.s32 %v62_v3, %v64_v4 }
  0x9b   :  { %v90_v7 = vpop.xlane.xlu0 %89 }
  0x9c   :  { %v93_v8 = vmul.f32 0.03125, %v90_v7  ;;  %v96_v9 = vmul.f32 %v94_v6, %v94_v6  ;;  %v113_v35 = vmul.f32 %v1437_v33, %v94_v6  ;;  %v58_v6 = vsel %vm57_vm7, -1e+09, %v1728_v14 }
  0x9d   :  { %v66_v7 = vrot.slane %v58_v6, %v65_v5 }
  0x9e   :  { %v95_v10 = vsub.f32 %v1838_v1, %v93_v8  ;;  %v98_v11 = vsel %vm84_vm0, %v96_v9, 0.0 }
  0x9f   :  { %99 = vadd.xlane.f32.xlu1 %v98_v11  ;;  %v67_v8 = vcombine.high %v66_v7, %v66_v7  ;;  %v74_v9 = vrot.slane %v66_v7, %v65_v5 }
  0xa0   :  { %v97_v12 = vmul.f32 %v95_v10, %v95_v10  ;;  %v114_v36 = vmul.f32 %v1437_v33, %v95_v10  ;;  %v224_v10 = vsub.s32 0, %v64_v4 }
  0xa1   :  { %v81_v11 = vrot.slane %v67_v8, %v65_v5 }
  0xa2   :  { %v101_v13 = vsel %vm84_vm0, %v97_v12, 0.0  ;;  %v1900_v12 = vrot.slane %v74_v9, %v224_v10 }
  0xa3   :  { %102 = vadd.xlane.f32.xlu1 %v101_v13  ;;  %v1902_v13 = vrot.slane %v81_v11, %v224_v10 }
 0x12c   :  { %v100_v17 = vpop.xlane.xlu1 %99 }
 0x12d   :  { %v105_v18 = vmul.f32 0.032258064, %v100_v17 }
 0x12f   :  { %1680 = vrsqrt.f32 %v105_v18  ;;  %vm117_vm2 = vcmp.eq.f32.partialorder %v105_v18, inf  ;;  %v120_v23 = vand.u32 2147483648, %v105_v18  ;;  %vm119_vm3 = vcmp.eq.f32.partialorder %v105_v18, 0.0 }
 0x130   :  { %v103_v19 = vpop.xlane.xlu1 %102 }
 0x131   :  { %v106_v20 = vmul.f32 0.032258064, %v103_v19 }
 0x133   :  { %1682 = vrsqrt.f32 %v106_v20  ;;  %vm124_vm4 = vcmp.eq.f32.partialorder %v106_v20, inf  ;;  %v127_v29 = vand.u32 2147483648, %v106_v20  ;;  %vm126_vm5 = vcmp.eq.f32.partialorder %v106_v20, 0.0 }
 0x139   :  { %v1681_v21 = vpop.eup %1680 }
 0x13a   :  { %v116_v22 = vmul.f32 %v1681_v21, %v105_v18 }
 0x13c   :  { %v118_v24 = vsel %vm117_vm2, %v105_v18, %v116_v22 }
 0x13d   :  { %v1683_v25 = vpop.eup %1682  ;;  %v121_v26 = vsel %vm119_vm3, %v120_v23, %v118_v24 }
 0x13e   :  { %v129_v27 = vadd.f32 1e-06, %v121_v26  ;;  %v123_v28 = vmul.f32 %v1683_v25, %v106_v20 }
 0x140   :  { %1684 = vrcp.f32 %v129_v27  ;;  %v125_v30 = vsel %vm124_vm4, %v106_v20, %v123_v28 }
 0x141   :  { %v128_v31 = vsel %vm126_vm5, %v127_v29, %v125_v30 }
 0x142   :  { %v130_v32 = vadd.f32 1e-06, %v128_v31 }
 0x144   :  { %1686 = vrcp.f32 %v130_v32 }
 0x14a   :  { %v1685_v34 = vpop.eup %1684 }
 0x14b   :  { %v132_v37 = vmul.f32 %v1685_v34, %v113_v35 }
 0x14d   :  { %v141_v41 = vadd.f32 %v1438_v39, %v132_v37 }
 0x14e   :  { %v1687_v38 = vpop.eup %1686 }
 0x14f   :  { %v134_v40 = vmul.f32 %v1687_v38, %v114_v36 }
 0x151   :  { %v142_v42 = vadd.f32 %v1438_v39, %v134_v40 }
 0x153   :  { %v153_v43 = vpack.c.bf16 %v142_v42, %v141_v41 }
 0x155   :  { %1526 = vmatmul.mubr.msk.bf16.vlgmr.msra.gmra.mrb[0].mxu0 %vm84_vm0, %v153_v43 }
 0x156   :  { %1537 = vmatprep.mubr.msk.bf16.mxu0 %vm1729_vm1, %v1728_v14 }
 0x228   :  { %v209_v45 = vpop.f32.mrb[0].mxu0 }
 0x229   :  { %v210_v46 = vadd.f32 %v1439_v44, %v209_v45  ;;  %v1527_v47 = vpop.f32.mrb[1].mxu0 }
 0x22a   :  { %v212_v48 = vpop.f32.mrb[2].mxu0 }
 0x22b   :  { %v1874_v49 = vpack.c.bf16 %v210_v46, %v210_v46  ;;  %v213_v50 = vadd.f32 %v1439_v44, %v212_v48  ;;  %v1528_v51 = vpop.f32.mrb[3].mxu0  ;;  %v216_v56 = vmul.f32 0.35355338, %v210_v46 }
 0x22d   :  { %v1876_v52 = vpack.c.bf16 %v213_v50, %v213_v50  ;;  %233 = vrot.lane.b32.xlu0 %v1874_v49, %s1730_s3  ;;  %v217_v58 = vmul.f32 0.35355338, %v213_v50  ;;  %v1884_v59 = vpack.c.bf16 %v216_v56, %v216_v56 }
 0x22f   :  { %283 = vrot.lane.b32.xlu1 %v1876_v52, %s1730_s3  ;;  %v1886_v60 = vpack.c.bf16 %v217_v58, %v217_v58 }
 0x29f   :  { %v234_v53 = vpop.permute.xlu0 %233 }
 0x2a0   :  { %v240_v54 = vsel %vm235_vm6, %v234_v53, 0 }
 0x2a1   :  { %1530 = vmatpush3.bf16.xpose.msra.mxu1 %v240_v54  ;;  %v284_v55 = vpop.permute.xlu1 %283 }
 0x2a2   :  { %v289_v57 = vsel %vm235_vm6, %v284_v55, 0  ;;  %1541 = vmatprep.subr.bf16.mxu1 %v1728_v14 }
 0x2a3   :  { %1536 = vmatpush3.bf16.xpose.msra.mxu0 %v289_v57 }
 0x2a4   :  { %1547 = vmatprep.subr.bf16.mxu0 %v1728_v14 }
 0x2a8   :  { %1532 = vmatmul.mubr.msk.bf16.vlgmr.msra.gmra.mrb[0].mxu1 %vm235_vm6, %v1884_v59 }
 0x2a9   :  { %1543 = vmatprep.mubr.msk.bf16.mxu1 %vm1729_vm1, %v1728_v14 }
 0x2aa   :  { %1538 = vmatmul.mubr.msk.bf16.vlgmr.msra.gmra.mrb[4].mxu0 %vm235_vm6, %v1886_v60 }
 0x2ab   :  { %1549 = vmatprep.mubr.msk.bf16.mxu0 %vm1729_vm1, %v1728_v14 }
 0x37b   :  { %v276_v15 = vpop.f32.mrb[0].mxu1 }
 0x37c   :  { %v277_v16 = vadd.f32 %v276_v15, %v1900_v12  ;;  %v1533_v17 = vpop.f32.mrb[1].mxu1 }
 0x37d   :  { %v279_v18 = vpop.f32.mrb[2].mxu1  ;;  %v325_v19 = vpop.f32.mrb[4].mxu0 }
 0x37e   :  { %v326_v20 = vadd.f32 %v325_v19, %v1902_v13  ;;  %v1534_v21 = vpop.f32.mrb[3].mxu1  ;;  %v1539_v22 = vpop.f32.mrb[5].mxu0  ;;  %v331_v23 = vsel %vm235_vm6, %v277_v16, -inf }
 0x37f   :  { %332 = vmax.xlane.f32.xlu1 %v331_v23  ;;  %v328_v24 = vpop.f32.mrb[6].mxu0 }
 0x380   :  { %v1540_v25 = vpop.f32.mrb[7].mxu0  ;;  %v334_v26 = vsel %vm235_vm6, %v326_v20, -inf }
 0x381   :  { %335 = vmax.xlane.f32.xlu0 %v334_v26 }
 0x390   :  { %404 = vrot.lane.b32.xlu1 %v1876_v52, %s1732_s1 }
 0x394   :  { %457 = vrot.lane.b32.xlu1 %v1874_v49, %s1733_s30 }
 0x40c   :  { %v333_v27 = vpop.xlane.xlu1 %332 }
 0x40d   :  { %v337_v28 = vsub.f32 %v277_v16, %v333_v27 }
 0x40e   :  { %v336_v29 = vpop.xlane.xlu0 %335 }
 0x40f   :  { %v339_v30 = vmul.f32 1.442695, %v337_v28  ;;  %v338_v31 = vsub.f32 %v326_v20, %v336_v29 }
 0x410   :  { %v405_v32 = vpop.permute.xlu1 %404 }
 0x411   :  { %1688 = vpow2.f32 %v339_v30  ;;  %v341_v33 = vmul.f32 1.442695, %v338_v31  ;;  %v410_v34 = vsel %vm360_vm8, %v405_v32, 0 }
 0x412   :  { %1548 = vmatpush3.bf16.msra.mxu0 %v410_v34 }
 0x413   :  { %1690 = vpow2.f32 %v341_v33  ;;  %1559 = vmatprep.subr.bf16.mxu0 %v1728_v14 }
 0x414   :  { %v458_v39 = vpop.permute.xlu1 %457 }
 0x415   :  { %v463_v51 = vsel %vm235_vm6, %v458_v39, 0 }
 0x41b   :  { %v1689_v35 = vpop.eup %1688 }
 0x41c   :  { %v343_v36 = vsel %vm235_vm6, %v1689_v35, 0.0 }
 0x41d   :  { %v1691_v37 = vpop.eup %1690  ;;  %344 = vadd.xlane.f32.xlu0 %v343_v36 }
 0x41e   :  { %v346_v38 = vsel %vm235_vm6, %v1691_v37, 0.0 }
 0x41f   :  { %347 = vadd.xlane.f32.xlu1 %v346_v38 }
 0x430   :  { %508 = vrot.lane.b32.xlu1 %v1876_v52, %s1733_s30 }
 0x433   :  { %355 = vrot.lane.b32.xlu0 %v1874_v49, %s1732_s1 }
 0x434   :  { %506 = vrot.lane.b32.xlu1 %v1886_v60, %s1734_s17 }
 0x437   :  { %455 = vrot.lane.b32.xlu0 %v1884_v59, %s1734_s17 }
 0x4aa   :  { %v345_v40 = vpop.xlane.xlu0 %344 }
 0x4ab   :  { %1692 = vrcp.f32 %v345_v40 }
 0x4ac   :  { %v348_v41 = vpop.xlane.xlu1 %347 }
 0x4ad   :  { %1694 = vrcp.f32 %v348_v41 }
 0x4ae   :  { %v356_v42 = vpop.permute.xlu0 %355 }
 0x4af   :  { %v362_v43 = vsel %vm360_vm8, %v356_v42, 0 }
 0x4b0   :  { %1542 = vmatpush3.bf16.msra.mxu1 %v362_v43  ;;  %v509_v50 = vpop.permute.xlu1 %508 }
 0x4b1   :  { %1553 = vmatprep.subr.bf16.mxu1 %v1728_v14  ;;  %v514_v54 = vsel %vm235_vm6, %v509_v50, 0 }
 0x4b2   :  { %v456_v55 = vpop.permute.xlu0 %455 }
 0x4b4   :  { %v507_v56 = vpop.permute.xlu1 %506 }
 0x4b5   :  { %v1693_v44 = vpop.eup %1692 }
 0x4b6   :  { %v351_v45 = vmul.f32 %v1693_v44, %v1689_v35 }
 0x4b7   :  { %v1695_v46 = vpop.eup %1694 }
 0x4b8   :  { %v352_v47 = vmul.f32 %v1695_v46, %v1691_v37  ;;  %v353_v48 = vpack.c.bf16 %v351_v45, %v351_v45 }
 0x4ba   :  { %1544 = vmatmul.mubr.msk.bf16.vlgmr.msra.gmra.mrb[4].mxu1 %vm235_vm6, %v353_v48  ;;  %v354_v53 = vpack.c.bf16 %v352_v47, %v352_v47 }
 0x4bb   :  { %1554 = vmatpush3.bf16.xpose.msra.mxu1 %v463_v51  ;;  %1555 = vmatprep.mubr.msk.bf16.mxu1 %vm1729_vm1, %v1728_v14 }
 0x4bc   :  { %1550 = vmatmul.mubr.msk.bf16.vlgmr.msra.gmra.mrb[8].mxu0 %vm235_vm6, %v354_v53  ;;  %1565 = vmatprep.subr.bf16.mxu1 %v1728_v14 }
 0x4bd   :  { %1560 = vmatpush3.bf16.xpose.msra.mxu0 %v514_v54  ;;  %1561 = vmatprep.mubr.msk.bf16.mxu0 %vm1729_vm1, %v1728_v14 }
 0x4be   :  { %1571 = vmatprep.subr.bf16.mxu0 %v1728_v14 }
 0x4c2   :  { %1556 = vmatmul.mubr.msk.bf16.vlgmr.msra.gmra.mrb[8].mxu1 %vm235_vm6, %v456_v55 }
 0x4c3   :  { %1567 = vmatprep.mubr.msk.bf16.mxu1 %vm1729_vm1, %v1728_v14 }
 0x4c4   :  { %1562 = vmatmul.mubr.msk.bf16.vlgmr.msra.gmra.mrb[12].mxu0 %vm235_vm6, %v507_v56 }
 0x4c5   :  { %1573 = vmatprep.mubr.msk.bf16.mxu0 %vm1729_vm1, %v1728_v14 }
 0x58d   :  { %v398_v57 = vpop.f32.mrb[4].mxu1 }
 0x58e   :  { %452 = vst.msk [vmem:[#allocation2] sm:$0xff] %vm235_vm6, %v398_v57  ;;  %v1545_v58 = vpop.f32.mrb[5].mxu1 }
 0x58f   :  { %v401_v61 = vpop.f32.mrb[6].mxu1  ;;  %v446_v62 = vpop.f32.mrb[8].mxu0 }
 0x590   :  { %453 = vst.msk [vmem:[#allocation2 + $0x8] sm:$0xff] %vm235_vm6, %v446_v62  ;;  %v1546_v63 = vpop.f32.mrb[7].mxu1  ;;  %v1551_v2 = vpop.f32.mrb[9].mxu0 }
 0x591   :  { %v449_v3 = vpop.f32.mrb[10].mxu0 }
 0x592   :  { %v1552_v4 = vpop.f32.mrb[11].mxu0 }
 0x595   :  { %v499_v5 = vpop.f32.mrb[8].mxu1 }
 0x596   :  { %v500_v6 = vadd.f32 %v499_v5, %v1900_v12  ;;  %v1557_v7 = vpop.f32.mrb[9].mxu1 }
 0x597   :  { %v502_v8 = vpop.f32.mrb[10].mxu1  ;;  %v550_v9 = vpop.f32.mrb[12].mxu0 }
 0x598   :  { %v551_v10 = vadd.f32 %v550_v9, %v1902_v13  ;;  %v1558_v11 = vpop.f32.mrb[11].mxu1  ;;  %v1563_v15 = vpop.f32.mrb[13].mxu0  ;;  %v556_v16 = vsel %vm235_vm6, %v500_v6, -inf }
 0x599   :  { %557 = vmax.xlane.f32.xlu0 %v556_v16  ;;  %v553_v17 = vpop.f32.mrb[14].mxu0 }
 0x59a   :  { %v1564_v18 = vpop.f32.mrb[15].mxu0  ;;  %v559_v19 = vsel %vm235_vm6, %v551_v10, -inf }
 0x59b   :  { %560 = vmax.xlane.f32.xlu1 %v559_v19 }
 0x5ac   :  { %628 = vrot.lane.b32.xlu1 %v1876_v52, %s1735_s18 }
 0x5b0   :  { %689 = vrot.lane.b32.xlu1 %v1874_v49, %s1736_s14 }
 0x5b4   :  { %739 = vrot.lane.b32.xlu1 %v1876_v52, %s1736_s14 }
 0x5b8   :  { %737 = vrot.lane.b32.xlu1 %v1886_v60, %s1737_s19 }
 0x626   :  { %v558_v20 = vpop.xlane.xlu0 %557 }
 0x627   :  { %v562_v21 = vsub.f32 %v500_v6, %v558_v20 }
 0x628   :  { %v561_v22 = vpop.xlane.xlu1 %560 }
 0x629   :  { %v564_v23 = vmul.f32 1.442695, %v562_v21  ;;  %v563_v24 = vsub.f32 %v551_v10, %v561_v22 }
 0x62b   :  { %1696 = vpow2.f32 %v564_v23  ;;  %v566_v25 = vmul.f32 1.442695, %v563_v24 }
 0x62c   :  { %v629_v26 = vpop.permute.xlu1 %628 }
 0x62d   :  { %1698 = vpow2.f32 %v566_v25  ;;  %v634_v27 = vsel %vm360_vm8, %v629_v26, 0 }
 0x62e   :  { %1572 = vmatpush3.bf16.msra.mxu0 %v634_v27 }
 0x62f   :  { %1583 = vmatprep.subr.bf16.mxu0 %v1728_v14 }
 0x630   :  { %v690_v37 = vpop.permute.xlu1 %689 }
 0x631   :  { %v695_v43 = vsel %vm235_vm6, %v690_v37, 0 }
 0x634   :  { %v740_v42 = vpop.permute.xlu1 %739 }
 0x635   :  { %v1697_v28 = vpop.eup %1696  ;;  %v745_v45 = vsel %vm235_vm6, %v740_v42, 0 }
 0x636   :  { %v568_v29 = vsel %vm235_vm6, %v1697_v28, 0.0 }
 0x637   :  { %v1699_v30 = vpop.eup %1698  ;;  %569 = vadd.xlane.f32.xlu0 %v568_v29 }
 0x638   :  { %v571_v31 = vsel %vm235_vm6, %v1699_v30, 0.0  ;;  %v738_v47 = vpop.permute.xlu1 %737 }
 0x63b   :  { %572 = vadd.xlane.f32.xlu0 %v571_v31 }
 0x651   :  { %580 = vrot.lane.b32.xlu0 %v1874_v49, %s1735_s18 }
 0x655   :  { %687 = vrot.lane.b32.xlu0 %v1884_v59, %s1737_s19 }
 0x6c4   :  { %v570_v32 = vpop.xlane.xlu0 %569 }
 0x6c5   :  { %1700 = vrcp.f32 %v570_v32 }
 0x6c8   :  { %v573_v33 = vpop.xlane.xlu0 %572 }
 0x6c9   :  { %1702 = vrcp.f32 %v573_v33 }
 0x6cc   :  { %v581_v34 = vpop.permute.xlu0 %580 }
 0x6cd   :  { %v586_v35 = vsel %vm360_vm8, %v581_v34, 0 }
 0x6ce   :  { %1566 = vmatpush3.bf16.msra.mxu1 %v586_v35 }
 0x6cf   :  { %v1701_v36 = vpop.eup %1700  ;;  %1577 = vmatprep.subr.bf16.mxu1 %v1728_v14 }
 0x6d0   :  { %v576_v38 = vmul.f32 %v1701_v36, %v1697_v28  ;;  %v688_v46 = vpop.permute.xlu0 %687 }
 0x6d2   :  { %v578_v39 = vpack.c.bf16 %v576_v38, %v576_v38 }
 0x6d3   :  { %v1703_v40 = vpop.eup %1702 }
 0x6d4   :  { %v577_v41 = vmul.f32 %v1703_v40, %v1699_v30  ;;  %1568 = vmatmul.mubr.msk.bf16.vlgmr.msra.gmra.mrb[12].mxu1 %vm235_vm6, %v578_v39 }
 0x6d5   :  { %1579 = vmatprep.mubr.msk.bf16.mxu1 %vm1729_vm1, %v1728_v14 }
 0x6d6   :  { %v579_v44 = vpack.c.bf16 %v577_v41, %v577_v41 }
 0x6d7   :  { %1578 = vmatpush3.bf16.xpose.msra.mxu1 %v695_v43 }
 0x6d8   :  { %1574 = vmatmul.mubr.msk.bf16.vlgmr.msra.gmra.mrb[16].mxu0 %vm235_vm6, %v579_v44  ;;  %1589 = vmatprep.subr.bf16.mxu1 %v1728_v14 }
 0x6d9   :  { %1584 = vmatpush3.bf16.xpose.msra.mxu0 %v745_v45  ;;  %1585 = vmatprep.mubr.msk.bf16.mxu0 %vm1729_vm1, %v1728_v14 }
 0x6da   :  { %1595 = vmatprep.subr.bf16.mxu0 %v1728_v14 }
 0x6de   :  { %1580 = vmatmul.mubr.msk.bf16.vlgmr.msra.gmra.mrb[16].mxu1 %vm235_vm6, %v688_v46 }
 0x6df   :  { %1591 = vmatprep.mubr.msk.bf16.mxu1 %vm1729_vm1, %v1728_v14 }
 0x6e0   :  { %1586 = vmatmul.mubr.msk.bf16.vlgmr.msra.gmra.mrb[20].mxu0 %vm235_vm6, %v738_v47 }
 0x6e1   :  { %1597 = vmatprep.mubr.msk.bf16.mxu0 %vm1729_vm1, %v1728_v14 }
 0x7a7   :  { %v1970_v48 = vpop.f32.mrb[12].mxu1 }
 0x7a8   :  { %v1569_v50 = vpop.f32.mrb[13].mxu1 }
 0x7a9   :  { %v625_v51 = vpop.f32.mrb[14].mxu1 }
 0x7aa   :  { %v1570_v53 = vpop.f32.mrb[15].mxu1 }
 0x7ab   :  { %v1972_v54 = vpop.f32.mrb[16].mxu0 }
 0x7ac   :  { %v1575_v55 = vpop.f32.mrb[17].mxu0 }
 0x7ad   :  { %v673_v56 = vpop.f32.mrb[18].mxu0 }
 0x7ae   :  { %v1576_v57 = vpop.f32.mrb[19].mxu0 }
 0x7b1   :  { %v731_v58 = vpop.f32.mrb[16].mxu1 }
 0x7b2   :  { %v732_v61 = vadd.f32 %v731_v58, %v1900_v12  ;;  %v1581_v62 = vpop.f32.mrb[17].mxu1 }
 0x7b3   :  { %v734_v63 = vpop.f32.mrb[18].mxu1  ;;  %v781_v2 = vpop.f32.mrb[20].mxu0 }
 0x7b4   :  { %v782_v3 = vadd.f32 %v781_v2, %v1902_v13  ;;  %v1582_v4 = vpop.f32.mrb[19].mxu1  ;;  %v1587_v5 = vpop.f32.mrb[21].mxu0  ;;  %v787_v6 = vsel %vm235_vm6, %v732_v61, -inf }
 0x7b5   :  { %788 = vmax.xlane.f32.xlu0 %v787_v6  ;;  %v784_v7 = vpop.f32.mrb[22].mxu0 }
 0x7b6   :  { %v1588_v8 = vpop.f32.mrb[23].mxu0  ;;  %v790_v9 = vsel %vm235_vm6, %v782_v3, -inf }
 0x7b7   :  { %791 = vmax.xlane.f32.xlu1 %v790_v9 }
 0x7c8   :  { %859 = vrot.lane.b32.xlu1 %v1876_v52, %s1738_s15 }
 0x7cc   :  { %920 = vrot.lane.b32.xlu1 %v1874_v49, %s1739_s20 }
 0x7d0   :  { %970 = vrot.lane.b32.xlu1 %v1876_v52, %s1739_s20 }
 0x7d4   :  { %968 = vrot.lane.b32.xlu1 %v1886_v60, %s1740_s21 }
 0x842   :  { %v789_v10 = vpop.xlane.xlu0 %788 }
 0x843   :  { %v793_v11 = vsub.f32 %v732_v61, %v789_v10 }
 0x844   :  { %v792_v15 = vpop.xlane.xlu1 %791 }
 0x845   :  { %v795_v16 = vmul.f32 1.442695, %v793_v11  ;;  %v794_v17 = vsub.f32 %v782_v3, %v792_v15 }
 0x847   :  { %1704 = vpow2.f32 %v795_v16  ;;  %v797_v18 = vmul.f32 1.442695, %v794_v17 }
 0x848   :  { %v860_v19 = vpop.permute.xlu1 %859 }
 0x849   :  { %1706 = vpow2.f32 %v797_v18  ;;  %v865_v20 = vsel %vm360_vm8, %v860_v19, 0 }
 0x84a   :  { %1596 = vmatpush3.bf16.msra.mxu0 %v865_v20 }
 0x84b   :  { %1607 = vmatprep.subr.bf16.mxu0 %v1728_v14 }
 0x84c   :  { %v921_v29 = vpop.permute.xlu1 %920 }
 0x850   :  { %v971_v34 = vpop.permute.xlu1 %970 }
 0x851   :  { %v1705_v21 = vpop.eup %1704  ;;  %v976_v36 = vsel %vm235_vm6, %v971_v34, 0 }
 0x852   :  { %v799_v22 = vsel %vm235_vm6, %v1705_v21, 0.0 }
 0x853   :  { %v1707_v23 = vpop.eup %1706  ;;  %800 = vadd.xlane.f32.xlu0 %v799_v22 }
 0x854   :  { %v802_v60 = vsel %vm235_vm6, %v1707_v23, 0.0  ;;  %v969_v38 = vpop.permute.xlu1 %968 }
 0x857   :  { %803 = vadd.xlane.f32.xlu0 %v802_v60 }
 0x86d   :  { %811 = vrot.lane.b32.xlu0 %v1874_v49, %s1738_s15 }
 0x871   :  { %918 = vrot.lane.b32.xlu0 %v1884_v59, %s1740_s21  ;;  %v926_v59 = vsel %vm235_vm6, %v921_v29, 0 }
 0x8e0   :  { %v801_v24 = vpop.xlane.xlu0 %800 }
 0x8e1   :  { %1708 = vrcp.f32 %v801_v24 }
 0x8e4   :  { %v804_v25 = vpop.xlane.xlu0 %803 }
 0x8e5   :  { %1710 = vrcp.f32 %v804_v25  ;;  %v1672_v25 = vld [vmem:[%s2111_s6] sm:$0xff]  }
 0x8e8   :  { %v812_v26 = vpop.permute.xlu0 %811 }
 0x8e9   :  { %v817_v27 = vsel %vm360_vm8, %v812_v26, 0  ;;  %v1673_v26 = vld [vmem:[%s2111_s6 + $0x8] sm:$0xff]  }
 0x8ea   :  { %1590 = vmatpush3.bf16.msra.mxu1 %v817_v27 }
 0x8eb   :  { %v1709_v28 = vpop.eup %1708  ;;  %1601 = vmatprep.subr.bf16.mxu1 %v1728_v14 }
 0x8ec   :  { %v807_v30 = vmul.f32 %v1709_v28, %v1705_v21  ;;  %v919_v37 = vpop.permute.xlu0 %918 }
 0x8ee   :  { %v809_v31 = vpack.c.bf16 %v807_v30, %v807_v30 }
 0x8ef   :  { %v1711_v32 = vpop.eup %1710 }
 0x8f0   :  { %v808_v33 = vmul.f32 %v1711_v32, %v1707_v23  ;;  %1592 = vmatmul.mubr.msk.bf16.vlgmr.msra.gmra.mrb[20].mxu1 %vm235_vm6, %v809_v31 }
 0x8f1   :  { %1603 = vmatprep.mubr.msk.bf16.mxu1 %vm1729_vm1, %v1728_v14 }
 0x8f2   :  { %v810_v35 = vpack.c.bf16 %v808_v33, %v808_v33 }
 0x8f3   :  { %1602 = vmatpush3.bf16.xpose.msra.mxu1 %v926_v59 }
 0x8f4   :  { %1598 = vmatmul.mubr.msk.bf16.vlgmr.msra.gmra.mrb[24].mxu0 %vm235_vm6, %v810_v35  ;;  %1613 = vmatprep.subr.bf16.mxu1 %v1728_v14 }
 0x8f5   :  { %1608 = vmatpush3.bf16.xpose.msra.mxu0 %v976_v36  ;;  %1609 = vmatprep.mubr.msk.bf16.mxu0 %vm1729_vm1, %v1728_v14 }
 0x8f6   :  { %1619 = vmatprep.subr.bf16.mxu0 %v1728_v14 }
 0x8fa   :  { %1604 = vmatmul.mubr.msk.bf16.vlgmr.msra.gmra.mrb[24].mxu1 %vm235_vm6, %v919_v37 }
 0x8fb   :  { %1615 = vmatprep.mubr.msk.bf16.mxu1 %vm1729_vm1, %v1728_v14 }
 0x8fc   :  { %1610 = vmatmul.mubr.msk.bf16.vlgmr.msra.gmra.mrb[28].mxu0 %vm235_vm6, %v969_v38 }
 0x8fd   :  { %1621 = vmatprep.mubr.msk.bf16.mxu0 %vm1729_vm1, %v1728_v14 }
 0x9c3   :  { %v853_v39 = vpop.f32.mrb[20].mxu1 }
 0x9c4   :  { %v1593_v40 = vpop.f32.mrb[21].mxu1 }
 0x9c5   :  { %v856_v41 = vpop.f32.mrb[22].mxu1 }
 0x9c6   :  { %v1594_v42 = vpop.f32.mrb[23].mxu1 }
 0x9c7   :  { %v901_v43 = vpop.f32.mrb[24].mxu0 }
 0x9c8   :  { %v1599_v44 = vpop.f32.mrb[25].mxu0 }
 0x9c9   :  { %v904_v45 = vpop.f32.mrb[26].mxu0 }
 0x9ca   :  { %v1600_v46 = vpop.f32.mrb[27].mxu0 }
 0x9cd   :  { %v962_v47 = vpop.f32.mrb[24].mxu1 }
 0x9ce   :  { %v963_v50 = vadd.f32 %v962_v47, %v1900_v12  ;;  %v1605_v51 = vpop.f32.mrb[25].mxu1 }
 0x9cf   :  { %v965_v53 = vpop.f32.mrb[26].mxu1  ;;  %v1012_v55 = vpop.f32.mrb[28].mxu0 }
 0x9d0   :  { %v1013_v56 = vadd.f32 %v1012_v55, %v1902_v13  ;;  %v1606_v57 = vpop.f32.mrb[27].mxu1  ;;  %v1611_v58 = vpop.f32.mrb[29].mxu0  ;;  %v1018_v61 = vsel %vm235_vm6, %v963_v50, -inf }
 0x9d1   :  { %1019 = vmax.xlane.f32.xlu0 %v1018_v61  ;;  %v1015_v62 = vpop.f32.mrb[30].mxu0 }
 0x9d2   :  { %v1612_v63 = vpop.f32.mrb[31].mxu0  ;;  %v1021_v2 = vsel %vm235_vm6, %v1013_v56, -inf }
 0x9d3   :  { %1022 = vmax.xlane.f32.xlu1 %v1021_v2  ;;  %v1674_v2 = vld [vmem:[%s2113_s10] sm:$0xff]  }
 0x9e4   :  { %1090 = vrot.lane.b32.xlu1 %v1876_v52, %s1741_s22 }
 0x9e8   :  { %678 = vrot.lane.b32.xlu1 %v1970_v48, %s1742_s23 }
 0x9ec   :  { %680 = vrot.lane.b32.xlu1 %v1972_v54, %s1742_s23 }
 0x9f0   :  { %911 = vrot.lane.b32.xlu1 %v901_v43, %s1743_s24 }
 0xa5e   :  { %v1020_v12 = vpop.xlane.xlu0 %1019 }
 0xa5f   :  { %v1024_v13 = vsub.f32 %v963_v50, %v1020_v12  ;;  %v1675_v12 = vld [vmem:[%s2113_s10 + $0x8] sm:$0xff]  }
 0xa60   :  { %v1023_v3 = vpop.xlane.xlu1 %1022 }
 0xa61   :  { %v1026_v4 = vmul.f32 1.442695, %v1024_v13  ;;  %v1025_v5 = vsub.f32 %v1013_v56, %v1023_v3  ;;  %v1676_v13 = vld [vmem:[%s2114_s12] sm:$0xff]   ;;  %v1677_v3 = vld [vmem:[%s2114_s12 + $0x8] sm:$0xff]  }
 0xa63   :  { %1712 = vpow2.f32 %v1026_v4  ;;  %v1028_v6 = vmul.f32 1.442695, %v1025_v5 }
 0xa64   :  { %v1091_v7 = vpop.permute.xlu1 %1090 }
 0xa65   :  { %1714 = vpow2.f32 %v1028_v6  ;;  %v1096_v8 = vsel %vm360_vm8, %v1091_v7, 0 }
 0xa66   :  { %1620 = vmatpush3.bf16.msra.mxu0 %v1096_v8 }
 0xa67   :  { %1633 = vmatprep.subr.bf16.mxu0 %v1728_v14 }
 0xa68   :  { %v679_v52 = vpop.permute.xlu1 %678 }
 0xa69   :  { %685 = vst.msk [vmem:[#allocation2] sm:$0xff] %vm684_vm9, %v679_v52 }
 0xa6c   :  { %v681_v48 = vpop.permute.xlu1 %680 }
 0xa6d   :  { %v1713_v54 = vpop.eup %1712  ;;  %686 = vst.msk [vmem:[#allocation2 + $0x8] sm:$0xff] %vm684_vm9, %v681_v48 }
 0xa6e   :  { %v1030_v9 = vsel %vm235_vm6, %v1713_v54, 0.0 }
 0xa6f   :  { %v1715_v10 = vpop.eup %1714  ;;  %1031 = vadd.xlane.f32.xlu0 %v1030_v9 }
 0xa70   :  { %v912_v11 = vpop.permute.xlu1 %911  ;;  %v1033_v15 = vsel %vm235_vm6, %v1715_v10, 0.0 }
 0xa71   :  { %917 = vst.msk [vmem:[#allocation2 + $0x8] sm:$0xff] %vm915_vm10, %v912_v11 }
 0xa73   :  { %1034 = vadd.xlane.f32.xlu0 %v1033_v15 }
 0xa89   :  { %1042 = vrot.lane.b32.xlu0 %v1874_v49, %s1741_s22 }
 0xa8d   :  { %909 = vrot.lane.b32.xlu0 %v853_v39, %s1743_s24  ;;  %v1459_v39 = vld [vmem:[%s2112_s7] ss:$0 sm:$0xff] }
 0xafc   :  { %v1032_v16 = vpop.xlane.xlu0 %1031 }
 0xafd   :  { %1716 = vrcp.f32 %v1032_v16 }
 0xb00   :  { %v1035_v17 = vpop.xlane.xlu0 %1034 }
 0xb01   :  { %1718 = vrcp.f32 %v1035_v17 }
 0xb04   :  { %v1043_v18 = vpop.permute.xlu0 %1042 }
 0xb05   :  { %v1048_v19 = vsel %vm360_vm8, %v1043_v18, 0 }
 0xb06   :  { %1614 = vmatpush3.bf16.msra.mxu1 %v1048_v19 }
 0xb07   :  { %v1717_v20 = vpop.eup %1716  ;;  %1625 = vmatprep.subr.bf16.mxu1 %v1728_v14 }
 0xb08   :  { %v1038_v21 = vmul.f32 %v1717_v20, %v1713_v54  ;;  %v910_v22 = vpop.permute.xlu0 %909  ;;  %v1463_v20 = vld [vmem:[%s2115_s8] ss:$0 sm:$0xff] }
 0xb09   :  { %916 = vst.msk [vmem:[#allocation2] sm:$0xff] %vm915_vm10, %v910_v22 }
 0xb0a   :  { %v1040_v23 = vpack.c.bf16 %v1038_v21, %v1038_v21 }
 0xb0b   :  { %v1719_v60 = vpop.eup %1718 }
 0xb0c   :  { %v1039_v24 = vmul.f32 %v1719_v60, %v1715_v10  ;;  %1616 = vmatmul.mubr.msk.bf16.vlgmr.msra.gmra.mrb[28].mxu1 %vm235_vm6, %v1040_v23 }
 0xb0d   :  { %1629 = vmatprep.mubr.msk.bf16.mxu1 %vm1729_vm1, %v1728_v14  ;;  %1626 = vmatpush3.bf16.msra.mxu1 %v1672_v25 }
 0xb0e   :  { %v1041_v49 = vpack.c.bf16 %v1039_v24, %v1039_v24  ;;  %1627 = vmatprep.subr.bf16.mxu1 %v1728_v14 }
 0xb10   :  { %1622 = vmatmul.mubr.msk.bf16.vlgmr.msra.gmra.mrb[32].mxu0 %vm235_vm6, %v1041_v49  ;;  %v1464_v49 = vld [vmem:[%s2116_s9] ss:$0 sm:$0xff] }
 0xb11   :  { %1637 = vmatprep.mubr.msk.bf16.mxu0 %vm1729_vm1, %v1728_v14  ;;  %1628 = vmatpush3.bf16.msra.mxu1 %v1673_v26 }
 0xb12   :  { %1641 = vmatprep.subr.bf16.mxu1 %v1728_v14  ;;  %1634 = vmatpush3.bf16.msra.mxu0 %v1674_v2 }
 0xb13   :  { %1635 = vmatprep.subr.bf16.mxu0 %v1728_v14 }
 0xb16   :  { %1636 = vmatpush3.bf16.msra.mxu0 %v1675_v12 }
 0xbdf   :  { %v1084_v27 = vpop.f32.mrb[28].mxu1 }
 0xbe0   :  { %1140 = vrot.lane.b32.xlu0 %v1084_v27, %s1744_s28  ;;  %v1617_v28 = vpop.f32.mrb[29].mxu1 }
 0xbe1   :  { %v1087_v29 = vpop.f32.mrb[30].mxu1 }
 0xbe2   :  { %v1618_v30 = vpop.f32.mrb[31].mxu1  ;;  %v1678_v29 = vld [vmem:[%s2114_s12 + $0x10] sm:$0xff]  }
 0xbe3   :  { %v1132_v31 = vpop.f32.mrb[32].mxu0  ;;  %v1679_v30 = vld [vmem:[%s2114_s12 + $0x18] sm:$0xff]  }
 0xbe4   :  { %1142 = vrot.lane.b32.xlu1 %v1132_v31, %s1744_s28  ;;  %v1623_v32 = vpop.f32.mrb[33].mxu0  ;;  %v1465_v31 = vld [vmem:[%s2117_s11] ss:$0 sm:$0xff] }
 0xbe5   :  { %v1135_v33 = vpop.f32.mrb[34].mxu0 }
 0xbe6   :  { %v1624_v34 = vpop.f32.mrb[35].mxu0 }
 0xc52   :  { %v1141_v59 = vpop.permute.xlu0 %1140 }
 0xc53   :  { %1147 = vst.msk [vmem:[#allocation2] sm:$0xff] %vm1146_vm11, %v1141_v59 }
 0xc56   :  { %v1143_v35 = vpop.permute.xlu1 %1142 }
 0xc57   :  { %1148 = vst.msk [vmem:[#allocation2 + $0x8] sm:$0xff] %vm1146_vm11, %v1143_v35 }
 0xc5a   :  { %v1149_v36 = vld [vmem:[#allocation2] sm:$0xff] }
 0xc5e   :  { %v1150_v37 = vld [vmem:[#allocation2 + $0x8] sm:$0xff] }
 0xc5f   :  { %v1151_v38 = vpack.c.bf16 %v1150_v37, %v1149_v36 }
 0xc61   :  { %1630 = vmatmul.mubr.msk.bf16.vlgmr.msra.gmra.mrb[32].mxu1 %vm84_vm0, %v1151_v38 }
 0xc62   :  { %1649 = vmatprep.mubr.msk.bf16.mxu1 %vm1729_vm1, %v1728_v14  ;;  %1642 = vmatpush3.bf16.msra.mxu1 %v1676_v13  ;;  %vm1384_vm1 = vcmask 523264  }
 0xc63   :  { %1643 = vmatprep.subr.bf16.mxu1 %v1728_v14 }
 0xc66   :  { %1644 = vmatpush3.bf16.msra.mxu1 %v1677_v3 }
 0xc67   :  { %1645 = vmatprep.subr.bf16.mxu1 %v1728_v14 }
 0xc6a   :  { %1646 = vmatpush3.bf16.msra.mxu1 %v1678_v29 }
 0xc6b   :  { %1647 = vmatprep.subr.bf16.mxu1 %v1728_v14  ;;  %v1469_v14 = vld [vmem:[%s2118_s13] ss:$0 sm:$0xff] }
 0xc6e   :  { %1648 = vmatpush3.bf16.msra.mxu1 %v1679_v30 }
 0xd34   :  { %v1207_v40 = vpop.f32.mrb[32].mxu1 }
 0xd35   :  { %v1208_v41 = vadd.f32 %v1459_v39, %v1207_v40  ;;  %v1631_v42 = vpop.f32.mrb[33].mxu1 }
 0xd36   :  { %v1210_v43 = vpop.f32.mrb[34].mxu1 }
 0xd37   :  { %v2045_v44 = vadd.f32 %v1208_v41, %v1833_v0  ;;  %v1211_v45 = vadd.f32 %v1459_v39, %v1210_v43  ;;  %v1632_v46 = vpop.f32.mrb[35].mxu1 }
 0xd39   :  { %v2048_v47 = vadd.f32 %v1211_v45, %v1838_v1  ;;  %v1232_v50 = vsel %vm84_vm0, %v2045_v44, 0.0 }
 0xd3a   :  { %1233 = vadd.xlane.f32.xlu0 %v1232_v50 }
 0xd3b   :  { %v1235_v51 = vsel %vm84_vm0, %v2048_v47, 0.0 }
 0xd3c   :  { %1236 = vadd.xlane.f32.xlu1 %v1235_v51 }
 0xdc7   :  { %v1234_v53 = vpop.xlane.xlu0 %1233 }
 0xdc8   :  { %v1238_v55 = vmul.f32 0.03125, %v1234_v53 }
 0xdc9   :  { %v1237_v56 = vpop.xlane.xlu1 %1236 }
 0xdca   :  { %v1240_v57 = vsub.f32 %v2045_v44, %v1238_v55  ;;  %v1239_v0 = vmul.f32 0.03125, %v1237_v56 }
 0xdcc   :  { %v1241_v58 = vsub.f32 %v2048_v47, %v1239_v0  ;;  %v1242_v61 = vmul.f32 %v1240_v57, %v1240_v57  ;;  %v1258_v22 = vmul.f32 %v1463_v20, %v1240_v57 }
 0xdce   :  { %v1244_v1 = vsel %vm84_vm0, %v1242_v61, 0.0  ;;  %v1243_v62 = vmul.f32 %v1241_v58, %v1241_v58  ;;  %v1259_v23 = vmul.f32 %v1463_v20, %v1241_v58 }
 0xdcf   :  { %1245 = vadd.xlane.f32.xlu0 %v1244_v1 }
 0xdd0   :  { %v1247_v63 = vsel %vm84_vm0, %v1243_v62, 0.0 }
 0xdd3   :  { %1248 = vadd.xlane.f32.xlu0 %v1247_v63 }
 0xe5c   :  { %v1246_v4 = vpop.xlane.xlu0 %1245 }
 0xe5d   :  { %v1250_v5 = vmul.f32 0.032258064, %v1246_v4 }
 0xe5f   :  { %1720 = vrsqrt.f32 %v1250_v5  ;;  %vm1262_vm12 = vcmp.eq.f32.partialorder %v1250_v5, inf  ;;  %v1265_v48 = vand.u32 2147483648, %v1250_v5  ;;  %vm1264_vm13 = vcmp.eq.f32.partialorder %v1250_v5, 0.0 }
 0xe60   :  { %v1249_v6 = vpop.xlane.xlu0 %1248 }
 0xe61   :  { %v1251_v7 = vmul.f32 0.032258064, %v1249_v6 }
 0xe63   :  { %1722 = vrsqrt.f32 %v1251_v7  ;;  %vm1269_vm14 = vcmp.eq.f32.partialorder %v1251_v7, inf  ;;  %v1272_v16 = vand.u32 2147483648, %v1251_v7  ;;  %vm1271_vm15 = vcmp.eq.f32.partialorder %v1251_v7, 0.0 }
 0xe69   :  { %v1721_v8 = vpop.eup %1720 }
 0xe6a   :  { %v1261_v52 = vmul.f32 %v1721_v8, %v1250_v5 }
 0xe6c   :  { %v1263_v54 = vsel %vm1262_vm12, %v1250_v5, %v1261_v52 }
 0xe6d   :  { %v1723_v9 = vpop.eup %1722  ;;  %v1266_v10 = vsel %vm1264_vm13, %v1265_v48, %v1263_v54 }
 0xe6e   :  { %v1274_v11 = vadd.f32 1e-06, %v1266_v10  ;;  %v1268_v15 = vmul.f32 %v1723_v9, %v1251_v7 }
 0xe70   :  { %1724 = vrcp.f32 %v1274_v11  ;;  %v1270_v17 = vsel %vm1269_vm14, %v1251_v7, %v1268_v15 }
 0xe71   :  { %v1273_v18 = vsel %vm1271_vm15, %v1272_v16, %v1270_v17 }
 0xe72   :  { %v1275_v19 = vadd.f32 1e-06, %v1273_v18 }
 0xe74   :  { %1726 = vrcp.f32 %v1275_v19 }
 0xe7a   :  { %v1725_v21 = vpop.eup %1724 }
 0xe7b   :  { %v1277_v60 = vmul.f32 %v1725_v21, %v1258_v22 }
 0xe7d   :  { %v1286_v26 = vadd.f32 %v1464_v49, %v1277_v60 }
 0xe7e   :  { %v1727_v24 = vpop.eup %1726 }
 0xe7f   :  { %v1279_v25 = vmul.f32 %v1727_v24, %v1259_v23 }
 0xe81   :  { %v1287_v27 = vadd.f32 %v1464_v49, %v1279_v25 }
 0xe83   :  { %v1288_v28 = vpack.c.bf16 %v1287_v27, %v1286_v26 }
 0xe85   :  { %1638 = vmatmul.mubr.msk.bf16.vlgmr.msra.gmra.mrb[36].mxu0 %vm84_vm0, %v1288_v28 }
 0xf58   :  { %v1344_v32 = vpop.f32.mrb[36].mxu0 }
 0xf59   :  { %v1345_v33 = vadd.f32 %v1465_v31, %v1344_v32  ;;  %v1639_v34 = vpop.f32.mrb[37].mxu0 }
 0xf5a   :  { %v1347_v59 = vpop.f32.mrb[38].mxu0 }
 0xf5b   :  { %v1348_v35 = vadd.f32 %v1465_v31, %v1347_v59  ;;  %v1640_v36 = vpop.f32.mrb[39].mxu0  ;;  %v1351_v37 = vmax.f32 %v1345_v33, 0.0 }
 0xf5d   :  { %v1352_v38 = vmax.f32 %v1348_v35, 0.0 }
 0xf5f   :  { %v1353_v39 = vpack.c.bf16 %v1352_v38, %v1351_v37 }
 0xf61   :  { %1650 = vmatmul.mubr.msk.bf16.vlgmr.msra.gmra.mrb[36].mxu1 %vm1384_vm1, %v1353_v39 }
0x1034   :  { %v1422_v40 = vpop.f32.mrb[36].mxu1 }
0x1035   :  { %v1423_v41 = vadd.f32 %v1469_v14, %v1422_v40  ;;  %v1651_v42 = vpop.f32.mrb[37].mxu1 }
0x1036   :  { %v1425_v43 = vpop.f32.mrb[38].mxu1 }
0x1037   :  { %v1429_v45 = vadd.f32 %v1423_v41, %v2045_v44  ;;  %v1426_v46 = vadd.f32 %v1469_v14, %v1425_v43  ;;  %v1652_v50 = vpop.f32.mrb[39].mxu1 }
0x1039   :  { %1431 = vst.msk [vmem:[%s2119_s16] sm:$0xff] %vm84_vm0, %v1429_v45  ;;  %v1430_v51 = vadd.f32 %v1426_v46, %v2048_v47 }
0x103b   :  { %1432 = vst.msk [vmem:[%s2119_s16 + $0x8] sm:$0xff] %vm84_vm0, %v1430_v51 }

// kernel: encoder_decoder_forward.5
= control target key start
LH: loop header
LB: loop body
LE: loop exit
PB: predicated region body
PF: predicated region fallthrough
CT: control target
= control target key end

     0   :  { %vm84_vm0 = vcmask 261120   ;;  %v1796_v14 = vmov 0.0   ;;  %vm1797_vm1 = vmmov 0   ;;  %vm235_vm6 = vcmask 64512   ;;  %s1801_s20 = smov 88   ;;  %s1802_s21 = smov 120   ;;  %s2181_s0 = inlined_call_operand.vmem [shape: f32[2,8,32], index: 0, kind: input, shape index: {}]   ;;  %s2182_s4 = inlined_call_operand.vmem [shape: bf16[32,96], index: 4, kind: input, shape index: {}]   ;;  %s2183_s2 = inlined_call_operand.vmem [shape: f32[1,32], index: 2, kind: input, shape index: {}]   ;;  %s2184_s3 = inlined_call_operand.vmem [shape: f32[1,32], index: 3, kind: input, shape index: {}]   ;;  %s2185_s5 = inlined_call_operand.vmem [shape: f32[1,96], index: 5, kind: input, shape index: {}]   ;;  %s2186_s1 = inlined_call_operand.vmem [shape: f32[2,8], index: 1, kind: input, shape index: {}]   ;;  %s2187_s6 = inlined_call_operand.vmem [shape: bf16[32,32], index: 6, kind: input, shape index: {}]   ;;  %s2188_s7 = inlined_call_operand.vmem [shape: f32[1,32], index: 7, kind: input, shape index: {}]   ;;  %s2189_s10 = inlined_call_operand.vmem [shape: bf16[32,64], index: 10, kind: input, shape index: {}]   ;;  %s2190_s12 = inlined_call_operand.vmem [shape: bf16[64,32], index: 12, kind: input, shape index: {}]   ;;  %s2191_s8 = inlined_call_operand.vmem [shape: f32[1,32], index: 8, kind: input, shape index: {}]   ;;  %s2192_s9 = inlined_call_operand.vmem [shape: f32[1,32], index: 9, kind: input, shape index: {}]   ;;  %s2193_s11 = inlined_call_operand.vmem [shape: f32[1,64], index: 11, kind: input, shape index: {}]   ;;  %s2194_s13 = inlined_call_operand.vmem [shape: f32[1,32], index: 13, kind: input, shape index: {}]   ;;  %s2195_s14 = inlined_call_operand.vmem [shape: f32[1,32], index: 14, kind: input, shape index: {}]   ;;  %s2196_s15 = inlined_call_operand.vmem [shape: f32[1,32], index: 15, kind: input, shape index: {}]   ;;  %s2197_s16 = inlined_call_operand.vmem [shape: f32[2,8,32], index: 16, kind: output, shape index: {}]  }
   0x1   :  { %2199 = sst [smem:[#allocation3_spill]] %s2181_s0  ;;  %1581 = vmatprep.subr.bf16.mxu0 %v1796_v14  ;;  %v1730_v15 = vld [vmem:[%s2182_s4] sm:$0xff]   ;;  %1585 = vmatprep.mubr.msk.bf16.mxu0 %vm1797_vm1, %v1796_v14  ;;  %v1731_v16 = vld [vmem:[%s2182_s4 + $0x8] sm:$0xff]   ;;  %v1799_v61 = vmov 1966171168   ;;  %v63_v63 = vlaneseq  ;;  %vm360_vm8 = vcmask 1043456  }
   0x2   :  { %s2200_s23 = sld [smem:[#allocation3_spill]]  ;;  %1589 = vmatprep.subr.bf16.mxu1 %v1796_v14  ;;  %1591 = vmatprep.mubr.msk.bf16.mxu1 %vm1797_vm1, %v1796_v14  ;;  %v1495_v33 = vld [vmem:[%s2183_s2] ss:$0 sm:$0xff]  ;;  %v61_v62 = vunpack.c.l.s4 %v1799_v61  ;;  %s1803_s22 = smov 56   ;;  %vm684_vm9 = vcmask 130112   ;;  %vm915_vm10 = vcmask 195712  }
   0x3   :  { %1582 = vmatpush3.bf16.msra.mxu0 %v1730_v15  ;;  %v1496_v39 = vld [vmem:[%s2184_s3] ss:$0 sm:$0xff]  ;;  %s1798_s3 = smov 96   ;;  %s1805_s24 = smov 112   ;;  %vm1146_vm11 = vcmask 261312  }
   0x4   :  { %1583 = vmatprep.subr.bf16.mxu0 %v1796_v14  ;;  %v1497_v44 = vld [vmem:[%s2185_s5] ss:$0 sm:$0xff]  ;;  %s1806_s25 = smov 48   ;;  %s1807_s26 = smov 72  }
   0x5   :  { %s1808_s27 = smov 104   ;;  %s1809_s28 = smov 40  }
   0x6   :  { %s1810_s29 = smov 8   ;;  %s1811_s4 = smov 16  }
   0x7   :  { %1584 = vmatpush3.bf16.msra.mxu0 %v1731_v16  ;;  %s1812_s2 = smov 24  }
   0x8   :  { %v1901_v0 = vld [vmem:[%s2200_s23] sm:$0xff]  ;;  %v1906_v1 = vld [vmem:[%s2200_s23 + $0x8] sm:$0xff]  ;;  %1595 = vmatprep.subr.bf16.mxu0 %v1796_v14  ;;  %s1804_s23 = smov 80  }
   0x9   :  { %v85_v2 = vsel %vm84_vm0, %v1901_v0, 0.0  ;;  %v88_v3 = vsel %vm84_vm0, %v1906_v1, 0.0 }
   0xa   :  { %86 = vadd.xlane.f32.xlu0 %v85_v2  ;;  %v56_v2 = vld [vmem:[%s2186_s1] sm:$0x3]  ;;  %s1800_s1 = smov 64  }
   0xb   :  { %vm57_vm7 = vcmp.eq.f32.partialorder %v56_v2, 0.0 }
   0xe   :  { %89 = vadd.xlane.f32.xlu0 %v88_v3  ;;  %v62_v3 = vunpack.c.0.s8 %v61_v62 }
  0x97   :  { %v87_v4 = vpop.xlane.xlu0 %86 }
  0x98   :  { %v92_v5 = vmul.f32 0.03125, %v87_v4  ;;  %v64_v4 = vshrl.u32 %v63_v63, 7 }
  0x9a   :  { %v94_v6 = vsub.f32 %v1901_v0, %v92_v5  ;;  %v65_v5 = vsub.s32 %v62_v3, %v64_v4 }
  0x9b   :  { %v90_v7 = vpop.xlane.xlu0 %89 }
  0x9c   :  { %v93_v8 = vmul.f32 0.03125, %v90_v7  ;;  %v96_v9 = vmul.f32 %v94_v6, %v94_v6  ;;  %v113_v35 = vmul.f32 %v1495_v33, %v94_v6  ;;  %v58_v6 = vsel %vm57_vm7, -1e+09, %v1796_v14 }
  0x9d   :  { %v66_v7 = vrot.slane %v58_v6, %v65_v5 }
  0x9e   :  { %v95_v10 = vsub.f32 %v1906_v1, %v93_v8  ;;  %v98_v11 = vsel %vm84_vm0, %v96_v9, 0.0 }
  0x9f   :  { %99 = vadd.xlane.f32.xlu1 %v98_v11  ;;  %v67_v8 = vcombine.high %v66_v7, %v66_v7  ;;  %v74_v9 = vrot.slane %v66_v7, %v65_v5 }
  0xa0   :  { %v97_v12 = vmul.f32 %v95_v10, %v95_v10  ;;  %v114_v36 = vmul.f32 %v1495_v33, %v95_v10  ;;  %v224_v10 = vsub.s32 0, %v64_v4 }
  0xa1   :  { %v81_v11 = vrot.slane %v67_v8, %v65_v5 }
  0xa2   :  { %v101_v13 = vsel %vm84_vm0, %v97_v12, 0.0  ;;  %v1968_v12 = vrot.slane %v74_v9, %v224_v10 }
  0xa3   :  { %102 = vadd.xlane.f32.xlu1 %v101_v13  ;;  %v1970_v13 = vrot.slane %v81_v11, %v224_v10 }
 0x12c   :  { %v100_v17 = vpop.xlane.xlu1 %99 }
 0x12d   :  { %v105_v18 = vmul.f32 0.032258064, %v100_v17 }
 0x12f   :  { %1740 = vrsqrt.f32 %v105_v18  ;;  %vm117_vm2 = vcmp.eq.f32.partialorder %v105_v18, inf  ;;  %v120_v23 = vand.u32 2147483648, %v105_v18  ;;  %vm119_vm3 = vcmp.eq.f32.partialorder %v105_v18, 0.0 }
 0x130   :  { %v103_v19 = vpop.xlane.xlu1 %102 }
 0x131   :  { %v106_v20 = vmul.f32 0.032258064, %v103_v19 }
 0x133   :  { %1742 = vrsqrt.f32 %v106_v20  ;;  %vm124_vm4 = vcmp.eq.f32.partialorder %v106_v20, inf  ;;  %v127_v29 = vand.u32 2147483648, %v106_v20  ;;  %vm126_vm5 = vcmp.eq.f32.partialorder %v106_v20, 0.0 }
 0x139   :  { %v1741_v21 = vpop.eup %1740 }
 0x13a   :  { %v116_v22 = vmul.f32 %v1741_v21, %v105_v18 }
 0x13c   :  { %v118_v24 = vsel %vm117_vm2, %v105_v18, %v116_v22 }
 0x13d   :  { %v1743_v25 = vpop.eup %1742  ;;  %v121_v26 = vsel %vm119_vm3, %v120_v23, %v118_v24 }
 0x13e   :  { %v129_v27 = vadd.f32 1e-06, %v121_v26  ;;  %v123_v28 = vmul.f32 %v1743_v25, %v106_v20 }
 0x140   :  { %1744 = vrcp.f32 %v129_v27  ;;  %v125_v30 = vsel %vm124_vm4, %v106_v20, %v123_v28 }
 0x141   :  { %v128_v31 = vsel %vm126_vm5, %v127_v29, %v125_v30 }
 0x142   :  { %v130_v32 = vadd.f32 1e-06, %v128_v31 }
 0x144   :  { %1746 = vrcp.f32 %v130_v32 }
 0x14a   :  { %v1745_v34 = vpop.eup %1744 }
 0x14b   :  { %v132_v37 = vmul.f32 %v1745_v34, %v113_v35 }
 0x14d   :  { %v141_v41 = vadd.f32 %v1496_v39, %v132_v37 }
 0x14e   :  { %v1747_v38 = vpop.eup %1746 }
 0x14f   :  { %v134_v40 = vmul.f32 %v1747_v38, %v114_v36 }
 0x151   :  { %v142_v42 = vadd.f32 %v1496_v39, %v134_v40 }
 0x153   :  { %v153_v43 = vpack.c.bf16 %v142_v42, %v141_v41 }
 0x155   :  { %1586 = vmatmul.mubr.msk.bf16.vlgmr.msra.gmra.mrb[0].mxu0 %vm84_vm0, %v153_v43 }
 0x156   :  { %1597 = vmatprep.mubr.msk.bf16.mxu0 %vm1797_vm1, %v1796_v14 }
 0x228   :  { %v209_v45 = vpop.f32.mrb[0].mxu0 }
 0x229   :  { %v210_v46 = vadd.f32 %v1497_v44, %v209_v45  ;;  %v1587_v47 = vpop.f32.mrb[1].mxu0 }
 0x22a   :  { %v212_v48 = vpop.f32.mrb[2].mxu0 }
 0x22b   :  { %v1942_v49 = vpack.c.bf16 %v210_v46, %v210_v46  ;;  %v213_v50 = vadd.f32 %v1497_v44, %v212_v48  ;;  %v1588_v51 = vpop.f32.mrb[3].mxu0  ;;  %v216_v56 = vmul.f32 0.35355338, %v210_v46 }
 0x22d   :  { %v1944_v52 = vpack.c.bf16 %v213_v50, %v213_v50  ;;  %233 = vrot.lane.b32.xlu0 %v1942_v49, %s1798_s3  ;;  %v217_v58 = vmul.f32 0.35355338, %v213_v50  ;;  %v1952_v59 = vpack.c.bf16 %v216_v56, %v216_v56 }
 0x22f   :  { %283 = vrot.lane.b32.xlu1 %v1944_v52, %s1798_s3  ;;  %v1954_v60 = vpack.c.bf16 %v217_v58, %v217_v58 }
 0x29f   :  { %v234_v53 = vpop.permute.xlu0 %233 }
 0x2a0   :  { %v240_v54 = vsel %vm235_vm6, %v234_v53, 0 }
 0x2a1   :  { %1590 = vmatpush3.bf16.xpose.msra.mxu1 %v240_v54  ;;  %v284_v55 = vpop.permute.xlu1 %283 }
 0x2a2   :  { %v289_v57 = vsel %vm235_vm6, %v284_v55, 0  ;;  %1601 = vmatprep.subr.bf16.mxu1 %v1796_v14 }
 0x2a3   :  { %1596 = vmatpush3.bf16.xpose.msra.mxu0 %v289_v57 }
 0x2a4   :  { %1607 = vmatprep.subr.bf16.mxu0 %v1796_v14 }
 0x2a8   :  { %1592 = vmatmul.mubr.msk.bf16.vlgmr.msra.gmra.mrb[0].mxu1 %vm235_vm6, %v1952_v59 }
 0x2a9   :  { %1603 = vmatprep.mubr.msk.bf16.mxu1 %vm1797_vm1, %v1796_v14 }
 0x2aa   :  { %1598 = vmatmul.mubr.msk.bf16.vlgmr.msra.gmra.mrb[4].mxu0 %vm235_vm6, %v1954_v60 }
 0x2ab   :  { %1609 = vmatprep.mubr.msk.bf16.mxu0 %vm1797_vm1, %v1796_v14 }
 0x37b   :  { %v276_v15 = vpop.f32.mrb[0].mxu1 }
 0x37c   :  { %v277_v16 = vadd.f32 %v276_v15, %v1968_v12  ;;  %v1593_v17 = vpop.f32.mrb[1].mxu1 }
 0x37d   :  { %v279_v18 = vpop.f32.mrb[2].mxu1  ;;  %v325_v19 = vpop.f32.mrb[4].mxu0 }
 0x37e   :  { %v326_v20 = vadd.f32 %v325_v19, %v1970_v13  ;;  %v1594_v21 = vpop.f32.mrb[3].mxu1  ;;  %v1599_v22 = vpop.f32.mrb[5].mxu0  ;;  %v331_v23 = vsel %vm235_vm6, %v277_v16, -inf }
 0x37f   :  { %332 = vmax.xlane.f32.xlu1 %v331_v23  ;;  %v328_v24 = vpop.f32.mrb[6].mxu0 }
 0x380   :  { %v1600_v25 = vpop.f32.mrb[7].mxu0  ;;  %v334_v26 = vsel %vm235_vm6, %v326_v20, -inf }
 0x381   :  { %335 = vmax.xlane.f32.xlu0 %v334_v26 }
 0x390   :  { %404 = vrot.lane.b32.xlu1 %v1944_v52, %s1800_s1 }
 0x394   :  { %457 = vrot.lane.b32.xlu1 %v1942_v49, %s1801_s20 }
 0x40c   :  { %v333_v27 = vpop.xlane.xlu1 %332 }
 0x40d   :  { %v337_v28 = vsub.f32 %v277_v16, %v333_v27 }
 0x40e   :  { %v336_v29 = vpop.xlane.xlu0 %335 }
 0x40f   :  { %v339_v30 = vmul.f32 1.442695, %v337_v28  ;;  %v338_v31 = vsub.f32 %v326_v20, %v336_v29 }
 0x410   :  { %v405_v32 = vpop.permute.xlu1 %404 }
 0x411   :  { %1748 = vpow2.f32 %v339_v30  ;;  %v341_v33 = vmul.f32 1.442695, %v338_v31  ;;  %v410_v34 = vsel %vm360_vm8, %v405_v32, 0 }
 0x412   :  { %1608 = vmatpush3.bf16.msra.mxu0 %v410_v34 }
 0x413   :  { %1750 = vpow2.f32 %v341_v33  ;;  %1619 = vmatprep.subr.bf16.mxu0 %v1796_v14 }
 0x414   :  { %v458_v39 = vpop.permute.xlu1 %457 }
 0x415   :  { %v463_v51 = vsel %vm235_vm6, %v458_v39, 0 }
 0x41b   :  { %v1749_v35 = vpop.eup %1748 }
 0x41c   :  { %v343_v36 = vsel %vm235_vm6, %v1749_v35, 0.0 }
 0x41d   :  { %v1751_v37 = vpop.eup %1750  ;;  %344 = vadd.xlane.f32.xlu0 %v343_v36 }
 0x41e   :  { %v346_v38 = vsel %vm235_vm6, %v1751_v37, 0.0 }
 0x41f   :  { %347 = vadd.xlane.f32.xlu1 %v346_v38 }
 0x430   :  { %508 = vrot.lane.b32.xlu1 %v1944_v52, %s1801_s20 }
 0x433   :  { %355 = vrot.lane.b32.xlu0 %v1942_v49, %s1800_s1 }
 0x434   :  { %506 = vrot.lane.b32.xlu1 %v1954_v60, %s1802_s21 }
 0x437   :  { %455 = vrot.lane.b32.xlu0 %v1952_v59, %s1802_s21 }
 0x4aa   :  { %v345_v40 = vpop.xlane.xlu0 %344 }
 0x4ab   :  { %1752 = vrcp.f32 %v345_v40 }
 0x4ac   :  { %v348_v41 = vpop.xlane.xlu1 %347 }
 0x4ad   :  { %1754 = vrcp.f32 %v348_v41 }
 0x4ae   :  { %v356_v42 = vpop.permute.xlu0 %355 }
 0x4af   :  { %v362_v43 = vsel %vm360_vm8, %v356_v42, 0 }
 0x4b0   :  { %1602 = vmatpush3.bf16.msra.mxu1 %v362_v43  ;;  %v509_v50 = vpop.permute.xlu1 %508 }
 0x4b1   :  { %1613 = vmatprep.subr.bf16.mxu1 %v1796_v14  ;;  %v514_v54 = vsel %vm235_vm6, %v509_v50, 0 }
 0x4b2   :  { %v456_v55 = vpop.permute.xlu0 %455 }
 0x4b4   :  { %v507_v56 = vpop.permute.xlu1 %506 }
 0x4b5   :  { %v1753_v44 = vpop.eup %1752 }
 0x4b6   :  { %v351_v45 = vmul.f32 %v1753_v44, %v1749_v35 }
 0x4b7   :  { %v1755_v46 = vpop.eup %1754 }
 0x4b8   :  { %v352_v47 = vmul.f32 %v1755_v46, %v1751_v37  ;;  %v353_v48 = vpack.c.bf16 %v351_v45, %v351_v45 }
 0x4ba   :  { %1604 = vmatmul.mubr.msk.bf16.vlgmr.msra.gmra.mrb[4].mxu1 %vm235_vm6, %v353_v48  ;;  %v354_v53 = vpack.c.bf16 %v352_v47, %v352_v47 }
 0x4bb   :  { %1614 = vmatpush3.bf16.xpose.msra.mxu1 %v463_v51  ;;  %1615 = vmatprep.mubr.msk.bf16.mxu1 %vm1797_vm1, %v1796_v14 }
 0x4bc   :  { %1610 = vmatmul.mubr.msk.bf16.vlgmr.msra.gmra.mrb[8].mxu0 %vm235_vm6, %v354_v53  ;;  %1625 = vmatprep.subr.bf16.mxu1 %v1796_v14 }
 0x4bd   :  { %1620 = vmatpush3.bf16.xpose.msra.mxu0 %v514_v54  ;;  %1621 = vmatprep.mubr.msk.bf16.mxu0 %vm1797_vm1, %v1796_v14 }
 0x4be   :  { %1631 = vmatprep.subr.bf16.mxu0 %v1796_v14 }
 0x4c2   :  { %1616 = vmatmul.mubr.msk.bf16.vlgmr.msra.gmra.mrb[8].mxu1 %vm235_vm6, %v456_v55 }
 0x4c3   :  { %1627 = vmatprep.mubr.msk.bf16.mxu1 %vm1797_vm1, %v1796_v14 }
 0x4c4   :  { %1622 = vmatmul.mubr.msk.bf16.vlgmr.msra.gmra.mrb[12].mxu0 %vm235_vm6, %v507_v56 }
 0x4c5   :  { %1633 = vmatprep.mubr.msk.bf16.mxu0 %vm1797_vm1, %v1796_v14 }
 0x58d   :  { %v398_v57 = vpop.f32.mrb[4].mxu1 }
 0x58e   :  { %452 = vst.msk [vmem:[#allocation2] sm:$0xff] %vm235_vm6, %v398_v57  ;;  %v1605_v58 = vpop.f32.mrb[5].mxu1 }
 0x58f   :  { %v401_v61 = vpop.f32.mrb[6].mxu1  ;;  %v446_v62 = vpop.f32.mrb[8].mxu0 }
 0x590   :  { %453 = vst.msk [vmem:[#allocation2 + $0x8] sm:$0xff] %vm235_vm6, %v446_v62  ;;  %v1606_v63 = vpop.f32.mrb[7].mxu1  ;;  %v1611_v2 = vpop.f32.mrb[9].mxu0 }
 0x591   :  { %v449_v3 = vpop.f32.mrb[10].mxu0 }
 0x592   :  { %v1612_v4 = vpop.f32.mrb[11].mxu0 }
 0x595   :  { %v499_v5 = vpop.f32.mrb[8].mxu1 }
 0x596   :  { %v500_v6 = vadd.f32 %v499_v5, %v1968_v12  ;;  %v1617_v7 = vpop.f32.mrb[9].mxu1 }
 0x597   :  { %v502_v8 = vpop.f32.mrb[10].mxu1  ;;  %v550_v9 = vpop.f32.mrb[12].mxu0 }
 0x598   :  { %v551_v10 = vadd.f32 %v550_v9, %v1970_v13  ;;  %v1618_v11 = vpop.f32.mrb[11].mxu1  ;;  %v1623_v15 = vpop.f32.mrb[13].mxu0  ;;  %v556_v16 = vsel %vm235_vm6, %v500_v6, -inf }
 0x599   :  { %557 = vmax.xlane.f32.xlu0 %v556_v16  ;;  %v553_v17 = vpop.f32.mrb[14].mxu0 }
 0x59a   :  { %v1624_v18 = vpop.f32.mrb[15].mxu0  ;;  %v559_v19 = vsel %vm235_vm6, %v551_v10, -inf }
 0x59b   :  { %560 = vmax.xlane.f32.xlu1 %v559_v19 }
 0x5ac   :  { %628 = vrot.lane.b32.xlu1 %v1944_v52, %s1803_s22 }
 0x5b0   :  { %689 = vrot.lane.b32.xlu1 %v1942_v49, %s1804_s23 }
 0x5b4   :  { %739 = vrot.lane.b32.xlu1 %v1944_v52, %s1804_s23 }
 0x5b8   :  { %737 = vrot.lane.b32.xlu1 %v1954_v60, %s1805_s24 }
 0x626   :  { %v558_v20 = vpop.xlane.xlu0 %557 }
 0x627   :  { %v562_v21 = vsub.f32 %v500_v6, %v558_v20 }
 0x628   :  { %v561_v22 = vpop.xlane.xlu1 %560 }
 0x629   :  { %v564_v23 = vmul.f32 1.442695, %v562_v21  ;;  %v563_v24 = vsub.f32 %v551_v10, %v561_v22 }
 0x62b   :  { %1756 = vpow2.f32 %v564_v23  ;;  %v566_v25 = vmul.f32 1.442695, %v563_v24 }
 0x62c   :  { %v629_v26 = vpop.permute.xlu1 %628 }
 0x62d   :  { %1758 = vpow2.f32 %v566_v25  ;;  %v634_v27 = vsel %vm360_vm8, %v629_v26, 0 }
 0x62e   :  { %1632 = vmatpush3.bf16.msra.mxu0 %v634_v27 }
 0x62f   :  { %1643 = vmatprep.subr.bf16.mxu0 %v1796_v14 }
 0x630   :  { %v690_v37 = vpop.permute.xlu1 %689 }
 0x631   :  { %v695_v43 = vsel %vm235_vm6, %v690_v37, 0 }
 0x634   :  { %v740_v42 = vpop.permute.xlu1 %739 }
 0x635   :  { %v1757_v28 = vpop.eup %1756  ;;  %v745_v45 = vsel %vm235_vm6, %v740_v42, 0 }
 0x636   :  { %v568_v29 = vsel %vm235_vm6, %v1757_v28, 0.0 }
 0x637   :  { %v1759_v30 = vpop.eup %1758  ;;  %569 = vadd.xlane.f32.xlu0 %v568_v29 }
 0x638   :  { %v571_v31 = vsel %vm235_vm6, %v1759_v30, 0.0  ;;  %v738_v47 = vpop.permute.xlu1 %737 }
 0x63b   :  { %572 = vadd.xlane.f32.xlu0 %v571_v31 }
 0x651   :  { %580 = vrot.lane.b32.xlu0 %v1942_v49, %s1803_s22 }
 0x655   :  { %687 = vrot.lane.b32.xlu0 %v1952_v59, %s1805_s24 }
 0x6c4   :  { %v570_v32 = vpop.xlane.xlu0 %569 }
 0x6c5   :  { %1760 = vrcp.f32 %v570_v32 }
 0x6c8   :  { %v573_v33 = vpop.xlane.xlu0 %572 }
 0x6c9   :  { %1762 = vrcp.f32 %v573_v33 }
 0x6cc   :  { %v581_v34 = vpop.permute.xlu0 %580 }
 0x6cd   :  { %v586_v35 = vsel %vm360_vm8, %v581_v34, 0 }
 0x6ce   :  { %1626 = vmatpush3.bf16.msra.mxu1 %v586_v35 }
 0x6cf   :  { %v1761_v36 = vpop.eup %1760  ;;  %1637 = vmatprep.subr.bf16.mxu1 %v1796_v14 }
 0x6d0   :  { %v576_v38 = vmul.f32 %v1761_v36, %v1757_v28  ;;  %v688_v46 = vpop.permute.xlu0 %687 }
 0x6d2   :  { %v578_v39 = vpack.c.bf16 %v576_v38, %v576_v38 }
 0x6d3   :  { %v1763_v40 = vpop.eup %1762 }
 0x6d4   :  { %v577_v41 = vmul.f32 %v1763_v40, %v1759_v30  ;;  %1628 = vmatmul.mubr.msk.bf16.vlgmr.msra.gmra.mrb[12].mxu1 %vm235_vm6, %v578_v39 }
 0x6d5   :  { %1639 = vmatprep.mubr.msk.bf16.mxu1 %vm1797_vm1, %v1796_v14 }
 0x6d6   :  { %v579_v44 = vpack.c.bf16 %v577_v41, %v577_v41 }
 0x6d7   :  { %1638 = vmatpush3.bf16.xpose.msra.mxu1 %v695_v43 }
 0x6d8   :  { %1634 = vmatmul.mubr.msk.bf16.vlgmr.msra.gmra.mrb[16].mxu0 %vm235_vm6, %v579_v44  ;;  %1649 = vmatprep.subr.bf16.mxu1 %v1796_v14 }
 0x6d9   :  { %1644 = vmatpush3.bf16.xpose.msra.mxu0 %v745_v45  ;;  %1645 = vmatprep.mubr.msk.bf16.mxu0 %vm1797_vm1, %v1796_v14 }
 0x6da   :  { %1655 = vmatprep.subr.bf16.mxu0 %v1796_v14 }
 0x6de   :  { %1640 = vmatmul.mubr.msk.bf16.vlgmr.msra.gmra.mrb[16].mxu1 %vm235_vm6, %v688_v46 }
 0x6df   :  { %1651 = vmatprep.mubr.msk.bf16.mxu1 %vm1797_vm1, %v1796_v14 }
 0x6e0   :  { %1646 = vmatmul.mubr.msk.bf16.vlgmr.msra.gmra.mrb[20].mxu0 %vm235_vm6, %v738_v47 }
 0x6e1   :  { %1657 = vmatprep.mubr.msk.bf16.mxu0 %vm1797_vm1, %v1796_v14 }
 0x7a7   :  { %v2038_v48 = vpop.f32.mrb[12].mxu1 }
 0x7a8   :  { %v1629_v50 = vpop.f32.mrb[13].mxu1 }
 0x7a9   :  { %v625_v51 = vpop.f32.mrb[14].mxu1 }
 0x7aa   :  { %v1630_v53 = vpop.f32.mrb[15].mxu1 }
 0x7ab   :  { %v2040_v54 = vpop.f32.mrb[16].mxu0 }
 0x7ac   :  { %v1635_v55 = vpop.f32.mrb[17].mxu0 }
 0x7ad   :  { %v673_v56 = vpop.f32.mrb[18].mxu0 }
 0x7ae   :  { %v1636_v57 = vpop.f32.mrb[19].mxu0 }
 0x7b1   :  { %v731_v58 = vpop.f32.mrb[16].mxu1 }
 0x7b2   :  { %v732_v61 = vadd.f32 %v731_v58, %v1968_v12  ;;  %v1641_v62 = vpop.f32.mrb[17].mxu1 }
 0x7b3   :  { %v734_v63 = vpop.f32.mrb[18].mxu1  ;;  %v781_v2 = vpop.f32.mrb[20].mxu0 }
 0x7b4   :  { %v782_v3 = vadd.f32 %v781_v2, %v1970_v13  ;;  %v1642_v4 = vpop.f32.mrb[19].mxu1  ;;  %v1647_v5 = vpop.f32.mrb[21].mxu0  ;;  %v787_v6 = vsel %vm235_vm6, %v732_v61, -inf }
 0x7b5   :  { %788 = vmax.xlane.f32.xlu0 %v787_v6  ;;  %v784_v7 = vpop.f32.mrb[22].mxu0 }
 0x7b6   :  { %v1648_v8 = vpop.f32.mrb[23].mxu0  ;;  %v790_v9 = vsel %vm235_vm6, %v782_v3, -inf }
 0x7b7   :  { %791 = vmax.xlane.f32.xlu1 %v790_v9 }
 0x7c8   :  { %859 = vrot.lane.b32.xlu1 %v1944_v52, %s1806_s25 }
 0x7cc   :  { %920 = vrot.lane.b32.xlu1 %v1942_v49, %s1807_s26 }
 0x7d0   :  { %970 = vrot.lane.b32.xlu1 %v1944_v52, %s1807_s26 }
 0x7d4   :  { %968 = vrot.lane.b32.xlu1 %v1954_v60, %s1808_s27 }
 0x842   :  { %v789_v10 = vpop.xlane.xlu0 %788 }
 0x843   :  { %v793_v11 = vsub.f32 %v732_v61, %v789_v10 }
 0x844   :  { %v792_v15 = vpop.xlane.xlu1 %791 }
 0x845   :  { %v795_v16 = vmul.f32 1.442695, %v793_v11  ;;  %v794_v17 = vsub.f32 %v782_v3, %v792_v15 }
 0x847   :  { %1764 = vpow2.f32 %v795_v16  ;;  %v797_v18 = vmul.f32 1.442695, %v794_v17 }
 0x848   :  { %v860_v19 = vpop.permute.xlu1 %859 }
 0x849   :  { %1766 = vpow2.f32 %v797_v18  ;;  %v865_v20 = vsel %vm360_vm8, %v860_v19, 0 }
 0x84a   :  { %1656 = vmatpush3.bf16.msra.mxu0 %v865_v20 }
 0x84b   :  { %1667 = vmatprep.subr.bf16.mxu0 %v1796_v14 }
 0x84c   :  { %v921_v29 = vpop.permute.xlu1 %920 }
 0x850   :  { %v971_v34 = vpop.permute.xlu1 %970 }
 0x851   :  { %v1765_v21 = vpop.eup %1764  ;;  %v976_v36 = vsel %vm235_vm6, %v971_v34, 0 }
 0x852   :  { %v799_v22 = vsel %vm235_vm6, %v1765_v21, 0.0 }
 0x853   :  { %v1767_v23 = vpop.eup %1766  ;;  %800 = vadd.xlane.f32.xlu0 %v799_v22 }
 0x854   :  { %v802_v60 = vsel %vm235_vm6, %v1767_v23, 0.0  ;;  %v969_v38 = vpop.permute.xlu1 %968 }
 0x857   :  { %803 = vadd.xlane.f32.xlu0 %v802_v60 }
 0x86d   :  { %811 = vrot.lane.b32.xlu0 %v1942_v49, %s1806_s25 }
 0x871   :  { %918 = vrot.lane.b32.xlu0 %v1952_v59, %s1808_s27  ;;  %v926_v59 = vsel %vm235_vm6, %v921_v29, 0 }
 0x8e0   :  { %v801_v24 = vpop.xlane.xlu0 %800 }
 0x8e1   :  { %1768 = vrcp.f32 %v801_v24 }
 0x8e4   :  { %v804_v25 = vpop.xlane.xlu0 %803 }
 0x8e5   :  { %1770 = vrcp.f32 %v804_v25  ;;  %v1732_v25 = vld [vmem:[%s2187_s6] sm:$0xff]  }
 0x8e8   :  { %v812_v26 = vpop.permute.xlu0 %811 }
 0x8e9   :  { %v817_v27 = vsel %vm360_vm8, %v812_v26, 0  ;;  %v1733_v26 = vld [vmem:[%s2187_s6 + $0x8] sm:$0xff]  }
 0x8ea   :  { %1650 = vmatpush3.bf16.msra.mxu1 %v817_v27 }
 0x8eb   :  { %v1769_v28 = vpop.eup %1768  ;;  %1661 = vmatprep.subr.bf16.mxu1 %v1796_v14 }
 0x8ec   :  { %v807_v30 = vmul.f32 %v1769_v28, %v1765_v21  ;;  %v919_v37 = vpop.permute.xlu0 %918 }
 0x8ee   :  { %v809_v31 = vpack.c.bf16 %v807_v30, %v807_v30 }
 0x8ef   :  { %v1771_v32 = vpop.eup %1770 }
 0x8f0   :  { %v808_v33 = vmul.f32 %v1771_v32, %v1767_v23  ;;  %1652 = vmatmul.mubr.msk.bf16.vlgmr.msra.gmra.mrb[20].mxu1 %vm235_vm6, %v809_v31 }
 0x8f1   :  { %1663 = vmatprep.mubr.msk.bf16.mxu1 %vm1797_vm1, %v1796_v14 }
 0x8f2   :  { %v810_v35 = vpack.c.bf16 %v808_v33, %v808_v33 }
 0x8f3   :  { %1662 = vmatpush3.bf16.xpose.msra.mxu1 %v926_v59 }
 0x8f4   :  { %1658 = vmatmul.mubr.msk.bf16.vlgmr.msra.gmra.mrb[24].mxu0 %vm235_vm6, %v810_v35  ;;  %1673 = vmatprep.subr.bf16.mxu1 %v1796_v14 }
 0x8f5   :  { %1668 = vmatpush3.bf16.xpose.msra.mxu0 %v976_v36  ;;  %1669 = vmatprep.mubr.msk.bf16.mxu0 %vm1797_vm1, %v1796_v14 }
 0x8f6   :  { %1679 = vmatprep.subr.bf16.mxu0 %v1796_v14 }
 0x8fa   :  { %1664 = vmatmul.mubr.msk.bf16.vlgmr.msra.gmra.mrb[24].mxu1 %vm235_vm6, %v919_v37 }
 0x8fb   :  { %1675 = vmatprep.mubr.msk.bf16.mxu1 %vm1797_vm1, %v1796_v14 }
 0x8fc   :  { %1670 = vmatmul.mubr.msk.bf16.vlgmr.msra.gmra.mrb[28].mxu0 %vm235_vm6, %v969_v38 }
 0x8fd   :  { %1681 = vmatprep.mubr.msk.bf16.mxu0 %vm1797_vm1, %v1796_v14 }
 0x9c3   :  { %v853_v39 = vpop.f32.mrb[20].mxu1 }
 0x9c4   :  { %v1653_v40 = vpop.f32.mrb[21].mxu1 }
 0x9c5   :  { %v856_v41 = vpop.f32.mrb[22].mxu1 }
 0x9c6   :  { %v1654_v42 = vpop.f32.mrb[23].mxu1 }
 0x9c7   :  { %v901_v43 = vpop.f32.mrb[24].mxu0 }
 0x9c8   :  { %v1659_v44 = vpop.f32.mrb[25].mxu0 }
 0x9c9   :  { %v904_v45 = vpop.f32.mrb[26].mxu0 }
 0x9ca   :  { %v1660_v46 = vpop.f32.mrb[27].mxu0 }
 0x9cd   :  { %v962_v47 = vpop.f32.mrb[24].mxu1 }
 0x9ce   :  { %v963_v50 = vadd.f32 %v962_v47, %v1968_v12  ;;  %v1665_v51 = vpop.f32.mrb[25].mxu1 }
 0x9cf   :  { %v965_v53 = vpop.f32.mrb[26].mxu1  ;;  %v1012_v55 = vpop.f32.mrb[28].mxu0 }
 0x9d0   :  { %v1013_v56 = vadd.f32 %v1012_v55, %v1970_v13  ;;  %v1666_v57 = vpop.f32.mrb[27].mxu1  ;;  %v1671_v58 = vpop.f32.mrb[29].mxu0  ;;  %v1018_v61 = vsel %vm235_vm6, %v963_v50, -inf }
 0x9d1   :  { %1019 = vmax.xlane.f32.xlu0 %v1018_v61  ;;  %v1015_v62 = vpop.f32.mrb[30].mxu0 }
 0x9d2   :  { %v1672_v63 = vpop.f32.mrb[31].mxu0  ;;  %v1021_v2 = vsel %vm235_vm6, %v1013_v56, -inf }
 0x9d3   :  { %1022 = vmax.xlane.f32.xlu1 %v1021_v2  ;;  %v1734_v2 = vld [vmem:[%s2189_s10] sm:$0xff]  }
 0x9e4   :  { %1090 = vrot.lane.b32.xlu1 %v1944_v52, %s1809_s28 }
 0x9e8   :  { %678 = vrot.lane.b32.xlu1 %v2038_v48, %s1810_s29 }
 0x9ec   :  { %680 = vrot.lane.b32.xlu1 %v2040_v54, %s1810_s29 }
 0x9f0   :  { %911 = vrot.lane.b32.xlu1 %v901_v43, %s1811_s4 }
 0xa5e   :  { %v1020_v12 = vpop.xlane.xlu0 %1019 }
 0xa5f   :  { %v1024_v13 = vsub.f32 %v963_v50, %v1020_v12  ;;  %v1735_v12 = vld [vmem:[%s2189_s10 + $0x8] sm:$0xff]  }
 0xa60   :  { %v1023_v3 = vpop.xlane.xlu1 %1022 }
 0xa61   :  { %v1026_v4 = vmul.f32 1.442695, %v1024_v13  ;;  %v1025_v5 = vsub.f32 %v1013_v56, %v1023_v3  ;;  %v1736_v13 = vld [vmem:[%s2190_s12] sm:$0xff]   ;;  %v1737_v3 = vld [vmem:[%s2190_s12 + $0x8] sm:$0xff]  }
 0xa63   :  { %1772 = vpow2.f32 %v1026_v4  ;;  %v1028_v6 = vmul.f32 1.442695, %v1025_v5 }
 0xa64   :  { %v1091_v7 = vpop.permute.xlu1 %1090 }
 0xa65   :  { %1774 = vpow2.f32 %v1028_v6  ;;  %v1096_v8 = vsel %vm360_vm8, %v1091_v7, 0 }
 0xa66   :  { %1680 = vmatpush3.bf16.msra.mxu0 %v1096_v8 }
 0xa67   :  { %1693 = vmatprep.subr.bf16.mxu0 %v1796_v14 }
 0xa68   :  { %v679_v52 = vpop.permute.xlu1 %678 }
 0xa69   :  { %685 = vst.msk [vmem:[#allocation2] sm:$0xff] %vm684_vm9, %v679_v52 }
 0xa6c   :  { %v681_v48 = vpop.permute.xlu1 %680 }
 0xa6d   :  { %v1773_v54 = vpop.eup %1772  ;;  %686 = vst.msk [vmem:[#allocation2 + $0x8] sm:$0xff] %vm684_vm9, %v681_v48 }
 0xa6e   :  { %v1030_v9 = vsel %vm235_vm6, %v1773_v54, 0.0 }
 0xa6f   :  { %v1775_v10 = vpop.eup %1774  ;;  %1031 = vadd.xlane.f32.xlu0 %v1030_v9 }
 0xa70   :  { %v912_v11 = vpop.permute.xlu1 %911  ;;  %v1033_v15 = vsel %vm235_vm6, %v1775_v10, 0.0 }
 0xa71   :  { %917 = vst.msk [vmem:[#allocation2 + $0x8] sm:$0xff] %vm915_vm10, %v912_v11 }
 0xa73   :  { %1034 = vadd.xlane.f32.xlu0 %v1033_v15 }
 0xa89   :  { %1042 = vrot.lane.b32.xlu0 %v1942_v49, %s1809_s28 }
 0xa8d   :  { %909 = vrot.lane.b32.xlu0 %v853_v39, %s1811_s4  ;;  %v1517_v39 = vld [vmem:[%s2188_s7] ss:$0 sm:$0xff] }
 0xafc   :  { %v1032_v16 = vpop.xlane.xlu0 %1031 }
 0xafd   :  { %1776 = vrcp.f32 %v1032_v16 }
 0xb00   :  { %v1035_v17 = vpop.xlane.xlu0 %1034 }
 0xb01   :  { %1778 = vrcp.f32 %v1035_v17 }
 0xb04   :  { %v1043_v18 = vpop.permute.xlu0 %1042 }
 0xb05   :  { %v1048_v19 = vsel %vm360_vm8, %v1043_v18, 0 }
 0xb06   :  { %1674 = vmatpush3.bf16.msra.mxu1 %v1048_v19 }
 0xb07   :  { %v1777_v20 = vpop.eup %1776  ;;  %1685 = vmatprep.subr.bf16.mxu1 %v1796_v14 }
 0xb08   :  { %v1038_v21 = vmul.f32 %v1777_v20, %v1773_v54  ;;  %v910_v22 = vpop.permute.xlu0 %909  ;;  %v1521_v20 = vld [vmem:[%s2191_s8] ss:$0 sm:$0xff] }
 0xb09   :  { %916 = vst.msk [vmem:[#allocation2] sm:$0xff] %vm915_vm10, %v910_v22 }
 0xb0a   :  { %v1040_v23 = vpack.c.bf16 %v1038_v21, %v1038_v21 }
 0xb0b   :  { %v1779_v60 = vpop.eup %1778 }
 0xb0c   :  { %v1039_v24 = vmul.f32 %v1779_v60, %v1775_v10  ;;  %1676 = vmatmul.mubr.msk.bf16.vlgmr.msra.gmra.mrb[28].mxu1 %vm235_vm6, %v1040_v23 }
 0xb0d   :  { %1689 = vmatprep.mubr.msk.bf16.mxu1 %vm1797_vm1, %v1796_v14  ;;  %1686 = vmatpush3.bf16.msra.mxu1 %v1732_v25 }
 0xb0e   :  { %v1041_v49 = vpack.c.bf16 %v1039_v24, %v1039_v24  ;;  %1687 = vmatprep.subr.bf16.mxu1 %v1796_v14 }
 0xb10   :  { %1682 = vmatmul.mubr.msk.bf16.vlgmr.msra.gmra.mrb[32].mxu0 %vm235_vm6, %v1041_v49  ;;  %v1522_v49 = vld [vmem:[%s2192_s9] ss:$0 sm:$0xff] }
 0xb11   :  { %1697 = vmatprep.mubr.msk.bf16.mxu0 %vm1797_vm1, %v1796_v14  ;;  %1688 = vmatpush3.bf16.msra.mxu1 %v1733_v26 }
 0xb12   :  { %1701 = vmatprep.subr.bf16.mxu1 %v1796_v14  ;;  %1694 = vmatpush3.bf16.msra.mxu0 %v1734_v2 }
 0xb13   :  { %1695 = vmatprep.subr.bf16.mxu0 %v1796_v14 }
 0xb16   :  { %1696 = vmatpush3.bf16.msra.mxu0 %v1735_v12 }
 0xbdf   :  { %v1084_v27 = vpop.f32.mrb[28].mxu1 }
 0xbe0   :  { %1140 = vrot.lane.b32.xlu0 %v1084_v27, %s1812_s2  ;;  %v1677_v28 = vpop.f32.mrb[29].mxu1 }
 0xbe1   :  { %v1087_v29 = vpop.f32.mrb[30].mxu1 }
 0xbe2   :  { %v1678_v30 = vpop.f32.mrb[31].mxu1  ;;  %v1738_v29 = vld [vmem:[%s2190_s12 + $0x10] sm:$0xff]  }
 0xbe3   :  { %v1132_v31 = vpop.f32.mrb[32].mxu0  ;;  %v1739_v30 = vld [vmem:[%s2190_s12 + $0x18] sm:$0xff]  }
 0xbe4   :  { %1142 = vrot.lane.b32.xlu1 %v1132_v31, %s1812_s2  ;;  %v1683_v32 = vpop.f32.mrb[33].mxu0  ;;  %v1523_v31 = vld [vmem:[%s2193_s11] ss:$0 sm:$0xff] }
 0xbe5   :  { %v1135_v33 = vpop.f32.mrb[34].mxu0 }
 0xbe6   :  { %v1684_v34 = vpop.f32.mrb[35].mxu0 }
 0xc52   :  { %v1141_v59 = vpop.permute.xlu0 %1140 }
 0xc53   :  { %1147 = vst.msk [vmem:[#allocation2] sm:$0xff] %vm1146_vm11, %v1141_v59 }
 0xc56   :  { %v1143_v35 = vpop.permute.xlu1 %1142 }
 0xc57   :  { %1148 = vst.msk [vmem:[#allocation2 + $0x8] sm:$0xff] %vm1146_vm11, %v1143_v35 }
 0xc5a   :  { %v1149_v36 = vld [vmem:[#allocation2] sm:$0xff] }
 0xc5e   :  { %v1150_v37 = vld [vmem:[#allocation2 + $0x8] sm:$0xff] }
 0xc5f   :  { %v1151_v38 = vpack.c.bf16 %v1150_v37, %v1149_v36 }
 0xc61   :  { %1690 = vmatmul.mubr.msk.bf16.vlgmr.msra.gmra.mrb[32].mxu1 %vm84_vm0, %v1151_v38 }
 0xc62   :  { %1709 = vmatprep.mubr.msk.bf16.mxu1 %vm1797_vm1, %v1796_v14  ;;  %1702 = vmatpush3.bf16.msra.mxu1 %v1736_v13  ;;  %vm1384_vm1 = vcmask 523264  }
 0xc63   :  { %1703 = vmatprep.subr.bf16.mxu1 %v1796_v14 }
 0xc66   :  { %1704 = vmatpush3.bf16.msra.mxu1 %v1737_v3 }
 0xc67   :  { %1705 = vmatprep.subr.bf16.mxu1 %v1796_v14 }
 0xc6a   :  { %1706 = vmatpush3.bf16.msra.mxu1 %v1738_v29 }
 0xc6b   :  { %1707 = vmatprep.subr.bf16.mxu1 %v1796_v14  ;;  %v1527_v14 = vld [vmem:[%s2194_s13] ss:$0 sm:$0xff] }
 0xc6e   :  { %1708 = vmatpush3.bf16.msra.mxu1 %v1739_v30 }
 0xd34   :  { %v1207_v40 = vpop.f32.mrb[32].mxu1 }
 0xd35   :  { %v1208_v41 = vadd.f32 %v1517_v39, %v1207_v40  ;;  %v1691_v42 = vpop.f32.mrb[33].mxu1 }
 0xd36   :  { %v1210_v43 = vpop.f32.mrb[34].mxu1 }
 0xd37   :  { %v2113_v44 = vadd.f32 %v1208_v41, %v1901_v0  ;;  %v1211_v45 = vadd.f32 %v1517_v39, %v1210_v43  ;;  %v1692_v46 = vpop.f32.mrb[35].mxu1 }
 0xd39   :  { %v2116_v47 = vadd.f32 %v1211_v45, %v1906_v1  ;;  %v1232_v50 = vsel %vm84_vm0, %v2113_v44, 0.0 }
 0xd3a   :  { %1233 = vadd.xlane.f32.xlu0 %v1232_v50 }
 0xd3b   :  { %v1235_v51 = vsel %vm84_vm0, %v2116_v47, 0.0 }
 0xd3c   :  { %1236 = vadd.xlane.f32.xlu1 %v1235_v51 }
 0xdc7   :  { %v1234_v53 = vpop.xlane.xlu0 %1233 }
 0xdc8   :  { %v1238_v55 = vmul.f32 0.03125, %v1234_v53 }
 0xdc9   :  { %v1237_v56 = vpop.xlane.xlu1 %1236 }
 0xdca   :  { %v1240_v57 = vsub.f32 %v2113_v44, %v1238_v55  ;;  %v1239_v0 = vmul.f32 0.03125, %v1237_v56 }
 0xdcc   :  { %v1241_v58 = vsub.f32 %v2116_v47, %v1239_v0  ;;  %v1242_v61 = vmul.f32 %v1240_v57, %v1240_v57  ;;  %v1258_v22 = vmul.f32 %v1521_v20, %v1240_v57 }
 0xdce   :  { %v1244_v1 = vsel %vm84_vm0, %v1242_v61, 0.0  ;;  %v1243_v62 = vmul.f32 %v1241_v58, %v1241_v58  ;;  %v1259_v23 = vmul.f32 %v1521_v20, %v1241_v58 }
 0xdcf   :  { %1245 = vadd.xlane.f32.xlu0 %v1244_v1 }
 0xdd0   :  { %v1247_v63 = vsel %vm84_vm0, %v1243_v62, 0.0 }
 0xdd3   :  { %1248 = vadd.xlane.f32.xlu0 %v1247_v63 }
 0xe5c   :  { %v1246_v4 = vpop.xlane.xlu0 %1245 }
 0xe5d   :  { %v1250_v5 = vmul.f32 0.032258064, %v1246_v4 }
 0xe5f   :  { %1780 = vrsqrt.f32 %v1250_v5  ;;  %vm1262_vm12 = vcmp.eq.f32.partialorder %v1250_v5, inf  ;;  %v1265_v48 = vand.u32 2147483648, %v1250_v5  ;;  %vm1264_vm13 = vcmp.eq.f32.partialorder %v1250_v5, 0.0 }
 0xe60   :  { %v1249_v6 = vpop.xlane.xlu0 %1248 }
 0xe61   :  { %v1251_v7 = vmul.f32 0.032258064, %v1249_v6 }
 0xe63   :  { %1782 = vrsqrt.f32 %v1251_v7  ;;  %vm1269_vm14 = vcmp.eq.f32.partialorder %v1251_v7, inf  ;;  %v1272_v16 = vand.u32 2147483648, %v1251_v7  ;;  %vm1271_vm15 = vcmp.eq.f32.partialorder %v1251_v7, 0.0 }
 0xe69   :  { %v1781_v8 = vpop.eup %1780 }
 0xe6a   :  { %v1261_v52 = vmul.f32 %v1781_v8, %v1250_v5 }
 0xe6c   :  { %v1263_v54 = vsel %vm1262_vm12, %v1250_v5, %v1261_v52 }
 0xe6d   :  { %v1783_v9 = vpop.eup %1782  ;;  %v1266_v10 = vsel %vm1264_vm13, %v1265_v48, %v1263_v54 }
 0xe6e   :  { %v1274_v11 = vadd.f32 1e-06, %v1266_v10  ;;  %v1268_v15 = vmul.f32 %v1783_v9, %v1251_v7 }
 0xe70   :  { %1784 = vrcp.f32 %v1274_v11  ;;  %v1270_v17 = vsel %vm1269_vm14, %v1251_v7, %v1268_v15 }
 0xe71   :  { %v1273_v18 = vsel %vm1271_vm15, %v1272_v16, %v1270_v17  ;;  %v1533_v16 = vld [vmem:[%s2195_s14] ss:$0 sm:$0xff] }
 0xe72   :  { %v1275_v19 = vadd.f32 1e-06, %v1273_v18 }
 0xe74   :  { %1786 = vrcp.f32 %v1275_v19  ;;  %v1534_v19 = vld [vmem:[%s2196_s15] ss:$0 sm:$0xff] }
 0xe7a   :  { %v1785_v21 = vpop.eup %1784 }
 0xe7b   :  { %v1277_v60 = vmul.f32 %v1785_v21, %v1258_v22 }
 0xe7d   :  { %v1286_v26 = vadd.f32 %v1522_v49, %v1277_v60 }
 0xe7e   :  { %v1787_v24 = vpop.eup %1786 }
 0xe7f   :  { %v1279_v25 = vmul.f32 %v1787_v24, %v1259_v23 }
 0xe81   :  { %v1287_v27 = vadd.f32 %v1522_v49, %v1279_v25 }
 0xe83   :  { %v1288_v28 = vpack.c.bf16 %v1287_v27, %v1286_v26 }
 0xe85   :  { %1698 = vmatmul.mubr.msk.bf16.vlgmr.msra.gmra.mrb[36].mxu0 %vm84_vm0, %v1288_v28 }
 0xf58   :  { %v1344_v32 = vpop.f32.mrb[36].mxu0 }
 0xf59   :  { %v1345_v33 = vadd.f32 %v1523_v31, %v1344_v32  ;;  %v1699_v34 = vpop.f32.mrb[37].mxu0 }
 0xf5a   :  { %v1347_v59 = vpop.f32.mrb[38].mxu0 }
 0xf5b   :  { %v1348_v35 = vadd.f32 %v1523_v31, %v1347_v59  ;;  %v1700_v36 = vpop.f32.mrb[39].mxu0  ;;  %v1351_v37 = vmax.f32 %v1345_v33, 0.0 }
 0xf5d   :  { %v1352_v38 = vmax.f32 %v1348_v35, 0.0 }
 0xf5f   :  { %v1353_v39 = vpack.c.bf16 %v1352_v38, %v1351_v37 }
 0xf61   :  { %1710 = vmatmul.mubr.msk.bf16.vlgmr.msra.gmra.mrb[36].mxu1 %vm1384_vm1, %v1353_v39 }
0x1034   :  { %v1422_v40 = vpop.f32.mrb[36].mxu1 }
0x1035   :  { %v1423_v41 = vadd.f32 %v1527_v14, %v1422_v40  ;;  %v1711_v42 = vpop.f32.mrb[37].mxu1 }
0x1036   :  { %v1425_v43 = vpop.f32.mrb[38].mxu1 }
0x1037   :  { %v1426_v45 = vadd.f32 %v1527_v14, %v1425_v43  ;;  %v1712_v46 = vpop.f32.mrb[39].mxu1  ;;  %v1429_v50 = vadd.f32 %v1423_v41, %v2113_v44 }
0x1039   :  { %v1433_v51 = vsel %vm84_vm0, %v1429_v50, 0.0  ;;  %v1430_v53 = vadd.f32 %v1426_v45, %v2116_v47 }
0x103a   :  { %1434 = vadd.xlane.f32.xlu0 %v1433_v51 }
0x103b   :  { %v1436_v55 = vsel %vm84_vm0, %v1430_v53, 0.0 }
0x103c   :  { %1437 = vadd.xlane.f32.xlu1 %v1436_v55 }
0x10c7   :  { %v1435_v56 = vpop.xlane.xlu0 %1434 }
0x10c8   :  { %v1439_v57 = vmul.f32 0.03125, %v1435_v56 }
0x10c9   :  { %v1438_v0 = vpop.xlane.xlu1 %1437 }
0x10ca   :  { %v1441_v58 = vsub.f32 %v1429_v50, %v1439_v57  ;;  %v1440_v61 = vmul.f32 0.03125, %v1438_v0 }
0x10cc   :  { %v1442_v1 = vsub.f32 %v1430_v53, %v1440_v61  ;;  %v1443_v62 = vmul.f32 %v1441_v58, %v1441_v58  ;;  %v1459_v17 = vmul.f32 %v1533_v16, %v1441_v58 }
0x10ce   :  { %v1445_v63 = vsel %vm84_vm0, %v1443_v62, 0.0  ;;  %v1444_v2 = vmul.f32 %v1442_v1, %v1442_v1  ;;  %v1460_v21 = vmul.f32 %v1533_v16, %v1442_v1 }
0x10cf   :  { %1446 = vadd.xlane.f32.xlu0 %v1445_v63 }
0x10d0   :  { %v1448_v44 = vsel %vm84_vm0, %v1444_v2, 0.0 }
0x10d1   :  { %1449 = vadd.xlane.f32.xlu1 %v1448_v44 }
0x115c   :  { %v1447_v12 = vpop.xlane.xlu0 %1446 }
0x115d   :  { %v1451_v47 = vmul.f32 0.032258064, %v1447_v12 }
0x115e   :  { %v1450_v13 = vpop.xlane.xlu1 %1449 }
0x115f   :  { %1788 = vrsqrt.f32 %v1451_v47  ;;  %v1452_v3 = vmul.f32 0.032258064, %v1450_v13  ;;  %vm1463_vm2 = vcmp.eq.f32.partialorder %v1451_v47, inf  ;;  %v1466_v6 = vand.u32 2147483648, %v1451_v47 }
0x1160   :  { %vm1465_vm3 = vcmp.eq.f32.partialorder %v1451_v47, 0.0 }
0x1161   :  { %1790 = vrsqrt.f32 %v1452_v3  ;;  %vm1470_vm4 = vcmp.eq.f32.partialorder %v1452_v3, inf  ;;  %v1473_v9 = vand.u32 2147483648, %v1452_v3  ;;  %vm1472_vm5 = vcmp.eq.f32.partialorder %v1452_v3, 0.0 }
0x1169   :  { %v1789_v4 = vpop.eup %1788 }
0x116a   :  { %v1462_v5 = vmul.f32 %v1789_v4, %v1451_v47 }
0x116b   :  { %v1791_v7 = vpop.eup %1790 }
0x116c   :  { %v1464_v8 = vsel %vm1463_vm2, %v1451_v47, %v1462_v5  ;;  %v1469_v48 = vmul.f32 %v1791_v7, %v1452_v3 }
0x116d   :  { %v1467_v52 = vsel %vm1465_vm3, %v1466_v6, %v1464_v8 }
0x116e   :  { %v1475_v54 = vadd.f32 1e-06, %v1467_v52  ;;  %v1471_v10 = vsel %vm1470_vm4, %v1452_v3, %v1469_v48 }
0x116f   :  { %v1474_v11 = vsel %vm1472_vm5, %v1473_v9, %v1471_v10 }
0x1170   :  { %1792 = vrcp.f32 %v1475_v54  ;;  %v1476_v15 = vadd.f32 1e-06, %v1474_v11 }
0x1172   :  { %1794 = vrcp.f32 %v1476_v15 }
0x117a   :  { %v1793_v18 = vpop.eup %1792 }
0x117b   :  { %v1478_v20 = vmul.f32 %v1793_v18, %v1459_v17 }
0x117c   :  { %v1795_v22 = vpop.eup %1794 }
0x117d   :  { %v1487_v23 = vadd.f32 %v1534_v19, %v1478_v20  ;;  %v1480_v60 = vmul.f32 %v1795_v22, %v1460_v21 }
0x117f   :  { %1489 = vst.msk [vmem:[%s2197_s16] sm:$0xff] %vm84_vm0, %v1487_v23  ;;  %v1488_v24 = vadd.f32 %v1534_v19, %v1480_v60 }
0x1181   :  { %1490 = vst.msk [vmem:[%s2197_s16 + $0x8] sm:$0xff] %vm84_vm0, %v1488_v24 }

// kernel: encoder_decoder_forward.6
= control target key start
LH: loop header
LB: loop body
LE: loop exit
PB: predicated region body
PF: predicated region fallthrough
CT: control target
= control target key end

     0   :  { %vm154_vm0 = vcmask 261120   ;;  %v3196_v14 = vmov 0.0   ;;  %vm3197_vm1 = vmmov 0   ;;  %vm295_vm6 = vcmask 64512   ;;  %s3201_s30 = smov 88   ;;  %s3203_s25 = smov 56   ;;  %s3901_s0 = inlined_call_operand.vmem [shape: f32[2,8,32], index: 0, kind: input, shape index: {}]   ;;  %s3902_s22 = inlined_call_operand.vmem [shape: f32[1,32], index: 22, kind: input, shape index: {}]   ;;  %s3903_s23 = inlined_call_operand.vmem [shape: f32[1,32], index: 23, kind: input, shape index: {}]   ;;  %s3904_s6 = inlined_call_operand.vmem [shape: bf16[32,96], index: 6, kind: input, shape index: {}]   ;;  %s3905_s4 = inlined_call_operand.vmem [shape: f32[1,32], index: 4, kind: input, shape index: {}]   ;;  %s3906_s5 = inlined_call_operand.vmem [shape: f32[1,32], index: 5, kind: input, shape index: {}]   ;;  %s3907_s7 = inlined_call_operand.vmem [shape: f32[1,96], index: 7, kind: input, shape index: {}]   ;;  %s3908_s3 = inlined_call_operand.vmem [shape: f32[2,8], index: 3, kind: input, shape index: {}]   ;;  %s3909_s8 = inlined_call_operand.vmem [shape: bf16[32,32], index: 8, kind: input, shape index: {}]   ;;  %s3910_s9 = inlined_call_operand.vmem [shape: f32[1,32], index: 9, kind: input, shape index: {}]   ;;  %s3911_s12 = inlined_call_operand.vmem [shape: bf16[32,96], index: 12, kind: input, shape index: {}]   ;;  %s3912_s13 = inlined_call_operand.vmem [shape: f32[1,96], index: 13, kind: input, shape index: {}]   ;;  %s3913_s1 = inlined_call_operand.vmem [shape: f32[2,8,32], index: 1, kind: input, shape index: {}]   ;;  %s3914_s10 = inlined_call_operand.vmem [shape: f32[1,32], index: 10, kind: input, shape index: {}]   ;;  %s3915_s11 = inlined_call_operand.vmem [shape: f32[1,32], index: 11, kind: input, shape index: {}]   ;;  %s3916_s2 = inlined_call_operand.vmem [shape: f32[2,8], index: 2, kind: input, shape index: {}]   ;;  %s3917_s14 = inlined_call_operand.vmem [shape: bf16[32,32], index: 14, kind: input, shape index: {}]   ;;  %s3918_s15 = inlined_call_operand.vmem [shape: f32[1,32], index: 15, kind: input, shape index: {}]   ;;  %s3919_s18 = inlined_call_operand.vmem [shape: bf16[32,64], index: 18, kind: input, shape index: {}]   ;;  %s3920_s20 = inlined_call_operand.vmem [shape: bf16[64,32], index: 20, kind: input, shape index: {}]   ;;  %s3921_s16 = inlined_call_operand.vmem [shape: f32[1,32], index: 16, kind: input, shape index: {}]   ;;  %s3922_s17 = inlined_call_operand.vmem [shape: f32[1,32], index: 17, kind: input, shape index: {}]   ;;  %s3923_s19 = inlined_call_operand.vmem [shape: f32[1,64], index: 19, kind: input, shape index: {}]   ;;  %s3924_s21 = inlined_call_operand.vmem [shape: f32[1,32], index: 21, kind: input, shape index: {}]   ;;  %s3925_s24 = inlined_call_operand.vmem [shape: f32[2,8,32], index: 24, kind: output, shape index: {}]  }
   0x1   :  { %3929 = sst [smem:[#allocation3_spill]] %s3901_s0  ;;  %2825 = vmatprep.subr.bf16.mxu1 %v3196_v14  ;;  %2829 = vmatprep.mubr.msk.bf16.mxu1 %vm3197_vm1, %v3196_v14  ;;  %v3199_v61 = vmov 1966171168   ;;  %v89_v63 = vlaneseq  ;;  %vm420_vm9 = vcmask 1043456   ;;  %s3206_s22 = smov 48   ;;  %vm744_vm10 = vcmask 130112  }
   0x2   :  { %3930 = sst [smem:[#allocation4_spill]] %s3904_s6  ;;  %s3936_s27 = sld [smem:[#allocation3_spill]]  ;;  %2839 = vmatprep.subr.bf16.mxu0 %v3196_v14  ;;  %2841 = vmatprep.mubr.msk.bf16.mxu0 %vm3197_vm1, %v3196_v14  ;;  %v87_v62 = vunpack.c.l.s4 %v3199_v61  ;;  %vm975_vm11 = vcmask 195712   ;;  %vm1206_vm12 = vcmask 261312  }
   0x3   :  { %3931 = sst [smem:[#allocation5_spill]] %s3905_s4  ;;  %s3937_s0 = sld [smem:[#allocation4_spill]] }
   0x4   :  { %3932 = sst [smem:[#allocation6_spill]] %s3906_s5  ;;  %s3202_s6 = smov 120  }
   0x5   :  { %3933 = sst [smem:[#allocation7_spill]] %s3907_s7  ;;  %s3939_s5 = sld [smem:[#allocation6_spill]] }
   0x6   :  { %3934 = sst [smem:[#allocation8_spill]] %s3908_s3  ;;  %s3940_s28 = sld [smem:[#allocation7_spill]] }
   0x7   :  { %3935 = sst [smem:[#allocation9_spill]] %s3909_s8  ;;  %s3938_s8 = sld [smem:[#allocation5_spill]] }
   0x8   :  { %v3341_v0 = vld [vmem:[%s3936_s27] sm:$0xff]  ;;  %v3346_v1 = vld [vmem:[%s3936_s27 + $0x8] sm:$0xff]  ;;  %s3198_s7 = smov 96   ;;  %s3200_s3 = smov 64  }
   0x9   :  { %v155_v2 = vsel %vm154_vm0, %v3341_v0, 0.0  ;;  %v158_v3 = vsel %vm154_vm0, %v3346_v1, 0.0  ;;  %v3094_v15 = vld [vmem:[%s3937_s0] sm:$0xff]   ;;  %v3095_v16 = vld [vmem:[%s3937_s0 + $0x8] sm:$0xff]   ;;  %s3941_s0 = sld [smem:[#allocation8_spill]]  ;;  %s3205_s4 = smov 112  }
   0xa   :  { %156 = vadd.xlane.f32.xlu0 %v155_v2  ;;  %2826 = vmatpush3.bf16.msra.mxu1 %v3094_v15  ;;  %s3208_s26 = smov 104   ;;  %s3209_s27 = smov 40  }
   0xb   :  { %2827 = vmatprep.subr.bf16.mxu1 %v3196_v14  ;;  %v2674_v39 = vld [vmem:[%s3939_s5] ss:$0 sm:$0xff]  ;;  %s3207_s5 = smov 72   ;;  %s3211_s23 = smov 16  }
   0xc   :  { %v2675_v44 = vld [vmem:[%s3940_s28] ss:$0 sm:$0xff]  ;;  %s3210_s28 = smov 8  }
   0xd   :  { %v2673_v33 = vld [vmem:[%s3938_s8] ss:$0 sm:$0xff]  ;;  %s3204_s8 = smov 80  }
   0xe   :  { %159 = vadd.xlane.f32.xlu0 %v158_v3  ;;  %2828 = vmatpush3.bf16.msra.mxu1 %v3095_v16  ;;  %v88_v3 = vunpack.c.0.s8 %v87_v62 }
   0xf   :  { %2833 = vmatprep.subr.bf16.mxu1 %v3196_v14  ;;  %v82_v2 = vld [vmem:[%s3941_s0] sm:$0x3] }
  0x10   :  { %vm83_vm7 = vcmp.eq.f32.partialorder %v82_v2, 0.0 }
  0x97   :  { %v157_v4 = vpop.xlane.xlu0 %156 }
  0x98   :  { %v162_v5 = vmul.f32 0.03125, %v157_v4  ;;  %v90_v4 = vshrl.u32 %v89_v63, 7 }
  0x9a   :  { %v164_v6 = vsub.f32 %v3341_v0, %v162_v5  ;;  %v3409_v5 = vsub.s32 %v88_v3, %v90_v4 }
  0x9b   :  { %v160_v7 = vpop.xlane.xlu0 %159 }
  0x9c   :  { %v163_v8 = vmul.f32 0.03125, %v160_v7  ;;  %v166_v9 = vmul.f32 %v164_v6, %v164_v6  ;;  %v183_v35 = vmul.f32 %v2673_v33, %v164_v6  ;;  %v84_v6 = vsel %vm83_vm7, -1e+09, %v3196_v14 }
  0x9d   :  { %v92_v7 = vrot.slane %v84_v6, %v3409_v5  ;;  %vm2620_vm7 = vcmask 523264  }
  0x9e   :  { %v165_v10 = vsub.f32 %v3346_v1, %v163_v8  ;;  %v168_v11 = vsel %vm154_vm0, %v166_v9, 0.0  ;;  %v111_v8 = vand.u32 127, %v89_v63 }
  0x9f   :  { %169 = vadd.xlane.f32.xlu1 %v168_v11  ;;  %v93_v9 = vcombine.high %v92_v7, %v92_v7  ;;  %v3414_v11 = vsub.s32 0, %v90_v4 }
  0xa0   :  { %v167_v12 = vmul.f32 %v165_v10, %v165_v10  ;;  %v184_v36 = vmul.f32 %v2673_v33, %v165_v10  ;;  %v100_v10 = vrot.slane %v92_v7, %v3409_v5  ;;  %vm112_vm8 = vcmp.gt.s32.totalorder %v111_v8, %v90_v4 }
  0xa1   :  { %v113_v15 = vsel %vm112_vm8, -1e+09, %v3196_v14 }
  0xa2   :  { %v171_v13 = vsel %vm154_vm0, %v167_v12, 0.0  ;;  %v107_v12 = vrot.slane %v93_v9, %v3409_v5 }
  0xa3   :  { %172 = vadd.xlane.f32.xlu1 %v171_v13  ;;  %v117_v13 = vrot.slane %v100_v10, %v3414_v11 }
  0xa4   :  { %v121_v16 = vrot.slane %v107_v12, %v3414_v11 }
 0x12c   :  { %v170_v17 = vpop.xlane.xlu1 %169 }
 0x12d   :  { %v175_v18 = vmul.f32 0.032258064, %v170_v17  ;;  %v3420_v17 = vadd.f32 %v117_v13, %v113_v15 }
 0x12f   :  { %3108 = vrsqrt.f32 %v175_v18  ;;  %vm187_vm2 = vcmp.eq.f32.partialorder %v175_v18, inf  ;;  %v190_v23 = vand.u32 2147483648, %v175_v18  ;;  %vm189_vm3 = vcmp.eq.f32.partialorder %v175_v18, 0.0 }
 0x130   :  { %v173_v19 = vpop.xlane.xlu1 %172 }
 0x131   :  { %v176_v20 = vmul.f32 0.032258064, %v173_v19 }
 0x133   :  { %3110 = vrsqrt.f32 %v176_v20  ;;  %vm194_vm4 = vcmp.eq.f32.partialorder %v176_v20, inf  ;;  %v197_v29 = vand.u32 2147483648, %v176_v20  ;;  %vm196_vm5 = vcmp.eq.f32.partialorder %v176_v20, 0.0 }
 0x139   :  { %v3109_v21 = vpop.eup %3108 }
 0x13a   :  { %v186_v22 = vmul.f32 %v3109_v21, %v175_v18 }
 0x13c   :  { %v188_v24 = vsel %vm187_vm2, %v175_v18, %v186_v22  ;;  %v3422_v18 = vadd.f32 %v121_v16, %v113_v15 }
 0x13d   :  { %v3111_v25 = vpop.eup %3110  ;;  %v191_v26 = vsel %vm189_vm3, %v190_v23, %v188_v24 }
 0x13e   :  { %v199_v27 = vadd.f32 1e-06, %v191_v26  ;;  %v193_v28 = vmul.f32 %v3111_v25, %v176_v20 }
 0x140   :  { %v195_v30 = vsel %vm194_vm4, %v176_v20, %v193_v28  ;;  %3112 = vrcp.f32 %v199_v27 }
 0x141   :  { %v198_v31 = vsel %vm196_vm5, %v197_v29, %v195_v30 }
 0x142   :  { %v200_v32 = vadd.f32 1e-06, %v198_v31 }
 0x144   :  { %3114 = vrcp.f32 %v200_v32 }
 0x14a   :  { %v3113_v34 = vpop.eup %3112 }
 0x14b   :  { %v202_v37 = vmul.f32 %v3113_v34, %v183_v35 }
 0x14d   :  { %v211_v41 = vadd.f32 %v2674_v39, %v202_v37 }
 0x14e   :  { %v3115_v38 = vpop.eup %3114 }
 0x14f   :  { %v204_v40 = vmul.f32 %v3115_v38, %v184_v36 }
 0x151   :  { %v212_v42 = vadd.f32 %v2674_v39, %v204_v40 }
 0x153   :  { %v223_v43 = vpack.c.bf16 %v212_v42, %v211_v41 }
 0x155   :  { %2830 = vmatmul.mubr.msk.bf16.vlgmr.msra.gmra.mrb[0].mxu1 %vm154_vm0, %v223_v43 }
 0x156   :  { %2835 = vmatprep.mubr.msk.bf16.mxu1 %vm3197_vm1, %v3196_v14 }
 0x228   :  { %v279_v45 = vpop.f32.mrb[0].mxu1 }
 0x229   :  { %v280_v46 = vadd.f32 %v2675_v44, %v279_v45  ;;  %v2831_v47 = vpop.f32.mrb[1].mxu1 }
 0x22a   :  { %v282_v48 = vpop.f32.mrb[2].mxu1 }
 0x22b   :  { %v3382_v49 = vpack.c.bf16 %v280_v46, %v280_v46  ;;  %v283_v50 = vadd.f32 %v2675_v44, %v282_v48  ;;  %v2832_v51 = vpop.f32.mrb[3].mxu1  ;;  %v286_v56 = vmul.f32 0.35355338, %v280_v46 }
 0x22d   :  { %v3384_v52 = vpack.c.bf16 %v283_v50, %v283_v50  ;;  %293 = vrot.lane.b32.xlu0 %v3382_v49, %s3198_s7  ;;  %v287_v58 = vmul.f32 0.35355338, %v283_v50  ;;  %v3394_v59 = vpack.c.bf16 %v286_v56, %v286_v56 }
 0x22f   :  { %343 = vrot.lane.b32.xlu1 %v3384_v52, %s3198_s7  ;;  %v3396_v60 = vpack.c.bf16 %v287_v58, %v287_v58 }
 0x29f   :  { %v294_v53 = vpop.permute.xlu0 %293 }
 0x2a0   :  { %v300_v54 = vsel %vm295_vm6, %v294_v53, 0 }
 0x2a1   :  { %2834 = vmatpush3.bf16.xpose.msra.mxu1 %v300_v54  ;;  %v344_v55 = vpop.permute.xlu1 %343 }
 0x2a2   :  { %v349_v57 = vsel %vm295_vm6, %v344_v55, 0  ;;  %2845 = vmatprep.subr.bf16.mxu1 %v3196_v14 }
 0x2a3   :  { %2840 = vmatpush3.bf16.xpose.msra.mxu0 %v349_v57 }
 0x2a4   :  { %2851 = vmatprep.subr.bf16.mxu0 %v3196_v14 }
 0x2a8   :  { %2836 = vmatmul.mubr.msk.bf16.vlgmr.msra.gmra.mrb[4].mxu1 %vm295_vm6, %v3394_v59 }
 0x2a9   :  { %2847 = vmatprep.mubr.msk.bf16.mxu1 %vm3197_vm1, %v3196_v14 }
 0x2aa   :  { %2842 = vmatmul.mubr.msk.bf16.vlgmr.msra.gmra.mrb[0].mxu0 %vm295_vm6, %v3396_v60 }
 0x2ab   :  { %2853 = vmatprep.mubr.msk.bf16.mxu0 %vm3197_vm1, %v3196_v14 }
 0x37b   :  { %v336_v19 = vpop.f32.mrb[4].mxu1 }
 0x37c   :  { %v337_v20 = vadd.f32 %v336_v19, %v3420_v17  ;;  %v2837_v21 = vpop.f32.mrb[5].mxu1 }
 0x37d   :  { %v339_v22 = vpop.f32.mrb[6].mxu1  ;;  %v385_v23 = vpop.f32.mrb[0].mxu0 }
 0x37e   :  { %v386_v24 = vadd.f32 %v385_v23, %v3422_v18  ;;  %v2838_v25 = vpop.f32.mrb[7].mxu1  ;;  %v2843_v26 = vpop.f32.mrb[1].mxu0  ;;  %v391_v27 = vsel %vm295_vm6, %v337_v20, -inf }
 0x37f   :  { %v388_v28 = vpop.f32.mrb[2].mxu0  ;;  %392 = vmax.xlane.f32.xlu1 %v391_v27 }
 0x380   :  { %v2844_v29 = vpop.f32.mrb[3].mxu0  ;;  %v394_v30 = vsel %vm295_vm6, %v386_v24, -inf }
 0x381   :  { %395 = vmax.xlane.f32.xlu0 %v394_v30 }
 0x390   :  { %464 = vrot.lane.b32.xlu1 %v3384_v52, %s3200_s3 }
 0x394   :  { %517 = vrot.lane.b32.xlu1 %v3382_v49, %s3201_s30 }
 0x40c   :  { %v393_v31 = vpop.xlane.xlu1 %392 }
 0x40d   :  { %v397_v32 = vsub.f32 %v337_v20, %v393_v31 }
 0x40e   :  { %v396_v33 = vpop.xlane.xlu0 %395 }
 0x40f   :  { %v399_v34 = vmul.f32 1.442695, %v397_v32  ;;  %v398_v35 = vsub.f32 %v386_v24, %v396_v33 }
 0x410   :  { %v465_v36 = vpop.permute.xlu1 %464 }
 0x411   :  { %3116 = vpow2.f32 %v399_v34  ;;  %v401_v37 = vmul.f32 1.442695, %v398_v35  ;;  %v470_v38 = vsel %vm420_vm9, %v465_v36, 0 }
 0x412   :  { %2852 = vmatpush3.bf16.msra.mxu0 %v470_v38 }
 0x413   :  { %3118 = vpow2.f32 %v401_v37  ;;  %2863 = vmatprep.subr.bf16.mxu0 %v3196_v14 }
 0x414   :  { %v518_v43 = vpop.permute.xlu1 %517 }
 0x415   :  { %v523_v56 = vsel %vm295_vm6, %v518_v43, 0 }
 0x41b   :  { %v3117_v39 = vpop.eup %3116 }
 0x41c   :  { %v403_v40 = vsel %vm295_vm6, %v3117_v39, 0.0 }
 0x41d   :  { %v3119_v41 = vpop.eup %3118  ;;  %404 = vadd.xlane.f32.xlu0 %v403_v40 }
 0x41e   :  { %v406_v42 = vsel %vm295_vm6, %v3119_v41, 0.0 }
 0x41f   :  { %407 = vadd.xlane.f32.xlu1 %v406_v42 }
 0x430   :  { %568 = vrot.lane.b32.xlu1 %v3384_v52, %s3201_s30 }
 0x433   :  { %415 = vrot.lane.b32.xlu0 %v3382_v49, %s3200_s3  ;;  %s3942_s3 = sld [smem:[#allocation9_spill]] }
 0x434   :  { %566 = vrot.lane.b32.xlu1 %v3396_v60, %s3202_s6 }
 0x437   :  { %515 = vrot.lane.b32.xlu0 %v3394_v59, %s3202_s6 }
 0x4aa   :  { %v405_v44 = vpop.xlane.xlu0 %404 }
 0x4ab   :  { %3120 = vrcp.f32 %v405_v44 }
 0x4ac   :  { %v408_v45 = vpop.xlane.xlu1 %407 }
 0x4ad   :  { %3122 = vrcp.f32 %v408_v45 }
 0x4ae   :  { %v416_v46 = vpop.permute.xlu0 %415 }
 0x4af   :  { %v422_v47 = vsel %vm420_vm9, %v416_v46, 0 }
 0x4b0   :  { %2846 = vmatpush3.bf16.msra.mxu1 %v422_v47  ;;  %v569_v55 = vpop.permute.xlu1 %568 }
 0x4b1   :  { %2857 = vmatprep.subr.bf16.mxu1 %v3196_v14  ;;  %v574_v58 = vsel %vm295_vm6, %v569_v55, 0 }
 0x4b2   :  { %v516_v61 = vpop.permute.xlu0 %515 }
 0x4b4   :  { %v567_v62 = vpop.permute.xlu1 %566 }
 0x4b5   :  { %v3121_v48 = vpop.eup %3120 }
 0x4b6   :  { %v411_v50 = vmul.f32 %v3121_v48, %v3117_v39 }
 0x4b7   :  { %v3123_v51 = vpop.eup %3122 }
 0x4b8   :  { %v412_v53 = vmul.f32 %v3123_v51, %v3119_v41  ;;  %v413_v54 = vpack.c.bf16 %v411_v50, %v411_v50 }
 0x4ba   :  { %2848 = vmatmul.mubr.msk.bf16.vlgmr.msra.gmra.mrb[8].mxu1 %vm295_vm6, %v413_v54  ;;  %v414_v57 = vpack.c.bf16 %v412_v53, %v412_v53 }
 0x4bb   :  { %2858 = vmatpush3.bf16.xpose.msra.mxu1 %v523_v56  ;;  %2859 = vmatprep.mubr.msk.bf16.mxu1 %vm3197_vm1, %v3196_v14 }
 0x4bc   :  { %2854 = vmatmul.mubr.msk.bf16.vlgmr.msra.gmra.mrb[4].mxu0 %vm295_vm6, %v414_v57  ;;  %2869 = vmatprep.subr.bf16.mxu1 %v3196_v14 }
 0x4bd   :  { %2864 = vmatpush3.bf16.xpose.msra.mxu0 %v574_v58  ;;  %2865 = vmatprep.mubr.msk.bf16.mxu0 %vm3197_vm1, %v3196_v14 }
 0x4be   :  { %2875 = vmatprep.subr.bf16.mxu0 %v3196_v14 }
 0x4c2   :  { %2860 = vmatmul.mubr.msk.bf16.vlgmr.msra.gmra.mrb[12].mxu1 %vm295_vm6, %v516_v61 }
 0x4c3   :  { %2871 = vmatprep.mubr.msk.bf16.mxu1 %vm3197_vm1, %v3196_v14 }
 0x4c4   :  { %2866 = vmatmul.mubr.msk.bf16.vlgmr.msra.gmra.mrb[8].mxu0 %vm295_vm6, %v567_v62 }
 0x4c5   :  { %2877 = vmatprep.mubr.msk.bf16.mxu0 %vm3197_vm1, %v3196_v14 }
 0x58d   :  { %v458_v63 = vpop.f32.mrb[8].mxu1 }
 0x58e   :  { %512 = vst.msk [vmem:[#allocation2] sm:$0xff] %vm295_vm6, %v458_v63  ;;  %v2849_v2 = vpop.f32.mrb[9].mxu1 }
 0x58f   :  { %v461_v3 = vpop.f32.mrb[10].mxu1  ;;  %v506_v4 = vpop.f32.mrb[4].mxu0 }
 0x590   :  { %513 = vst.msk [vmem:[#allocation2 + $0x8] sm:$0xff] %vm295_vm6, %v506_v4  ;;  %v2850_v6 = vpop.f32.mrb[11].mxu1  ;;  %v2855_v7 = vpop.f32.mrb[5].mxu0 }
 0x591   :  { %v509_v8 = vpop.f32.mrb[6].mxu0 }
 0x592   :  { %v2856_v9 = vpop.f32.mrb[7].mxu0 }
 0x595   :  { %v559_v10 = vpop.f32.mrb[12].mxu1 }
 0x596   :  { %v560_v12 = vadd.f32 %v559_v10, %v3420_v17  ;;  %v2861_v13 = vpop.f32.mrb[13].mxu1 }
 0x597   :  { %v562_v15 = vpop.f32.mrb[14].mxu1  ;;  %v610_v16 = vpop.f32.mrb[8].mxu0 }
 0x598   :  { %v611_v19 = vadd.f32 %v610_v16, %v3422_v18  ;;  %v2862_v20 = vpop.f32.mrb[15].mxu1  ;;  %v2867_v21 = vpop.f32.mrb[9].mxu0  ;;  %v616_v22 = vsel %vm295_vm6, %v560_v12, -inf }
 0x599   :  { %v613_v23 = vpop.f32.mrb[10].mxu0  ;;  %617 = vmax.xlane.f32.xlu0 %v616_v22 }
 0x59a   :  { %v2868_v24 = vpop.f32.mrb[11].mxu0  ;;  %v619_v25 = vsel %vm295_vm6, %v611_v19, -inf }
 0x59b   :  { %620 = vmax.xlane.f32.xlu1 %v619_v25 }
 0x5ac   :  { %688 = vrot.lane.b32.xlu1 %v3384_v52, %s3203_s25 }
 0x5b0   :  { %749 = vrot.lane.b32.xlu1 %v3382_v49, %s3204_s8 }
 0x5b4   :  { %799 = vrot.lane.b32.xlu1 %v3384_v52, %s3204_s8 }
 0x5b8   :  { %797 = vrot.lane.b32.xlu1 %v3396_v60, %s3205_s4 }
 0x626   :  { %v618_v26 = vpop.xlane.xlu0 %617 }
 0x627   :  { %v622_v27 = vsub.f32 %v560_v12, %v618_v26 }
 0x628   :  { %v621_v28 = vpop.xlane.xlu1 %620 }
 0x629   :  { %v624_v29 = vmul.f32 1.442695, %v622_v27  ;;  %v623_v30 = vsub.f32 %v611_v19, %v621_v28 }
 0x62b   :  { %3124 = vpow2.f32 %v624_v29  ;;  %v626_v31 = vmul.f32 1.442695, %v623_v30 }
 0x62c   :  { %v689_v32 = vpop.permute.xlu1 %688 }
 0x62d   :  { %3126 = vpow2.f32 %v626_v31  ;;  %v694_v33 = vsel %vm420_vm9, %v689_v32, 0 }
 0x62e   :  { %2876 = vmatpush3.bf16.msra.mxu0 %v694_v33 }
 0x62f   :  { %2887 = vmatprep.subr.bf16.mxu0 %v3196_v14 }
 0x630   :  { %v750_v43 = vpop.permute.xlu1 %749 }
 0x631   :  { %v755_v50 = vsel %vm295_vm6, %v750_v43, 0 }
 0x634   :  { %v800_v48 = vpop.permute.xlu1 %799 }
 0x635   :  { %v3125_v34 = vpop.eup %3124  ;;  %v805_v53 = vsel %vm295_vm6, %v800_v48, 0 }
 0x636   :  { %v628_v35 = vsel %vm295_vm6, %v3125_v34, 0.0 }
 0x637   :  { %v3127_v36 = vpop.eup %3126  ;;  %629 = vadd.xlane.f32.xlu0 %v628_v35 }
 0x638   :  { %v631_v37 = vsel %vm295_vm6, %v3127_v36, 0.0  ;;  %v798_v55 = vpop.permute.xlu1 %797 }
 0x63b   :  { %632 = vadd.xlane.f32.xlu0 %v631_v37 }
 0x651   :  { %640 = vrot.lane.b32.xlu0 %v3382_v49, %s3203_s25 }
 0x655   :  { %747 = vrot.lane.b32.xlu0 %v3394_v59, %s3205_s4 }
 0x6c4   :  { %v630_v38 = vpop.xlane.xlu0 %629 }
 0x6c5   :  { %3128 = vrcp.f32 %v630_v38 }
 0x6c8   :  { %v633_v39 = vpop.xlane.xlu0 %632 }
 0x6c9   :  { %3130 = vrcp.f32 %v633_v39 }
 0x6cc   :  { %v641_v40 = vpop.permute.xlu0 %640 }
 0x6cd   :  { %v646_v41 = vsel %vm420_vm9, %v641_v40, 0 }
 0x6ce   :  { %2870 = vmatpush3.bf16.msra.mxu1 %v646_v41 }
 0x6cf   :  { %v3129_v42 = vpop.eup %3128  ;;  %2881 = vmatprep.subr.bf16.mxu1 %v3196_v14 }
 0x6d0   :  { %v636_v44 = vmul.f32 %v3129_v42, %v3125_v34  ;;  %v748_v54 = vpop.permute.xlu0 %747 }
 0x6d2   :  { %v638_v45 = vpack.c.bf16 %v636_v44, %v636_v44 }
 0x6d3   :  { %v3131_v46 = vpop.eup %3130 }
 0x6d4   :  { %v637_v47 = vmul.f32 %v3131_v46, %v3127_v36  ;;  %2872 = vmatmul.mubr.msk.bf16.vlgmr.msra.gmra.mrb[16].mxu1 %vm295_vm6, %v638_v45 }
 0x6d5   :  { %2883 = vmatprep.mubr.msk.bf16.mxu1 %vm3197_vm1, %v3196_v14 }
 0x6d6   :  { %v639_v51 = vpack.c.bf16 %v637_v47, %v637_v47 }
 0x6d7   :  { %2882 = vmatpush3.bf16.xpose.msra.mxu1 %v755_v50 }
 0x6d8   :  { %2878 = vmatmul.mubr.msk.bf16.vlgmr.msra.gmra.mrb[12].mxu0 %vm295_vm6, %v639_v51  ;;  %2893 = vmatprep.subr.bf16.mxu1 %v3196_v14 }
 0x6d9   :  { %2888 = vmatpush3.bf16.xpose.msra.mxu0 %v805_v53  ;;  %2889 = vmatprep.mubr.msk.bf16.mxu0 %vm3197_vm1, %v3196_v14 }
 0x6da   :  { %2899 = vmatprep.subr.bf16.mxu0 %v3196_v14 }
 0x6de   :  { %2884 = vmatmul.mubr.msk.bf16.vlgmr.msra.gmra.mrb[20].mxu1 %vm295_vm6, %v748_v54 }
 0x6df   :  { %2895 = vmatprep.mubr.msk.bf16.mxu1 %vm3197_vm1, %v3196_v14 }
 0x6e0   :  { %2890 = vmatmul.mubr.msk.bf16.vlgmr.msra.gmra.mrb[16].mxu0 %vm295_vm6, %v798_v55 }
 0x6e1   :  { %2901 = vmatprep.mubr.msk.bf16.mxu0 %vm3197_vm1, %v3196_v14 }
 0x7a7   :  { %v3498_v56 = vpop.f32.mrb[16].mxu1 }
 0x7a8   :  { %v2873_v57 = vpop.f32.mrb[17].mxu1 }
 0x7a9   :  { %v685_v58 = vpop.f32.mrb[18].mxu1 }
 0x7aa   :  { %v2874_v61 = vpop.f32.mrb[19].mxu1 }
 0x7ab   :  { %v3500_v62 = vpop.f32.mrb[12].mxu0 }
 0x7ac   :  { %v2879_v63 = vpop.f32.mrb[13].mxu0 }
 0x7ad   :  { %v733_v2 = vpop.f32.mrb[14].mxu0 }
 0x7ae   :  { %v2880_v3 = vpop.f32.mrb[15].mxu0 }
 0x7b1   :  { %v791_v4 = vpop.f32.mrb[20].mxu1 }
 0x7b2   :  { %v792_v6 = vadd.f32 %v791_v4, %v3420_v17  ;;  %v2885_v7 = vpop.f32.mrb[21].mxu1 }
 0x7b3   :  { %v794_v8 = vpop.f32.mrb[22].mxu1  ;;  %v841_v9 = vpop.f32.mrb[16].mxu0 }
 0x7b4   :  { %v842_v10 = vadd.f32 %v841_v9, %v3422_v18  ;;  %v2886_v12 = vpop.f32.mrb[23].mxu1  ;;  %v2891_v13 = vpop.f32.mrb[17].mxu0  ;;  %v847_v15 = vsel %vm295_vm6, %v792_v6, -inf }
 0x7b5   :  { %v844_v16 = vpop.f32.mrb[18].mxu0  ;;  %848 = vmax.xlane.f32.xlu0 %v847_v15 }
 0x7b6   :  { %v2892_v19 = vpop.f32.mrb[19].mxu0  ;;  %v850_v20 = vsel %vm295_vm6, %v842_v10, -inf }
 0x7b7   :  { %851 = vmax.xlane.f32.xlu1 %v850_v20 }
 0x7c8   :  { %919 = vrot.lane.b32.xlu1 %v3384_v52, %s3206_s22 }
 0x7cc   :  { %980 = vrot.lane.b32.xlu1 %v3382_v49, %s3207_s5 }
 0x7d0   :  { %1030 = vrot.lane.b32.xlu1 %v3384_v52, %s3207_s5 }
 0x7d4   :  { %1028 = vrot.lane.b32.xlu1 %v3396_v60, %s3208_s26 }
 0x842   :  { %v849_v21 = vpop.xlane.xlu0 %848 }
 0x843   :  { %v853_v22 = vsub.f32 %v792_v6, %v849_v21 }
 0x844   :  { %v852_v23 = vpop.xlane.xlu1 %851 }
 0x845   :  { %v855_v24 = vmul.f32 1.442695, %v853_v22  ;;  %v854_v25 = vsub.f32 %v842_v10, %v852_v23 }
 0x847   :  { %3132 = vpow2.f32 %v855_v24  ;;  %v857_v26 = vmul.f32 1.442695, %v854_v25 }
 0x848   :  { %v920_v27 = vpop.permute.xlu1 %919 }
 0x849   :  { %3134 = vpow2.f32 %v857_v26  ;;  %v925_v28 = vsel %vm420_vm9, %v920_v27, 0 }
 0x84a   :  { %2900 = vmatpush3.bf16.msra.mxu0 %v925_v28 }
 0x84b   :  { %2911 = vmatprep.subr.bf16.mxu0 %v3196_v14 }
 0x84c   :  { %v981_v37 = vpop.permute.xlu1 %980 }
 0x850   :  { %v1031_v42 = vpop.permute.xlu1 %1030 }
 0x851   :  { %v3133_v29 = vpop.eup %3132  ;;  %v1036_v44 = vsel %vm295_vm6, %v1031_v42, 0 }
 0x852   :  { %v859_v30 = vsel %vm295_vm6, %v3133_v29, 0.0 }
 0x853   :  { %v3135_v31 = vpop.eup %3134  ;;  %860 = vadd.xlane.f32.xlu0 %v859_v30 }
 0x854   :  { %v862_v60 = vsel %vm295_vm6, %v3135_v31, 0.0  ;;  %v1029_v46 = vpop.permute.xlu1 %1028 }
 0x857   :  { %863 = vadd.xlane.f32.xlu0 %v862_v60 }
 0x86d   :  { %871 = vrot.lane.b32.xlu0 %v3382_v49, %s3206_s22 }
 0x871   :  { %978 = vrot.lane.b32.xlu0 %v3394_v59, %s3208_s26  ;;  %v986_v59 = vsel %vm295_vm6, %v981_v37, 0 }
 0x8e0   :  { %v861_v32 = vpop.xlane.xlu0 %860 }
 0x8e1   :  { %3136 = vrcp.f32 %v861_v32 }
 0x8e4   :  { %v864_v33 = vpop.xlane.xlu0 %863 }
 0x8e5   :  { %3138 = vrcp.f32 %v864_v33 }
 0x8e8   :  { %v872_v34 = vpop.permute.xlu0 %871 }
 0x8e9   :  { %v877_v35 = vsel %vm420_vm9, %v872_v34, 0 }
 0x8ea   :  { %2894 = vmatpush3.bf16.msra.mxu1 %v877_v35  ;;  %v3096_v35 = vld [vmem:[%s3942_s3] sm:$0xff]  }
 0x8eb   :  { %v3137_v36 = vpop.eup %3136  ;;  %2905 = vmatprep.subr.bf16.mxu1 %v3196_v14 }
 0x8ec   :  { %v867_v38 = vmul.f32 %v3137_v36, %v3133_v29  ;;  %v979_v45 = vpop.permute.xlu0 %978  ;;  %v3097_v36 = vld [vmem:[%s3942_s3 + $0x8] sm:$0xff]  }
 0x8ee   :  { %v869_v39 = vpack.c.bf16 %v867_v38, %v867_v38 }
 0x8ef   :  { %v3139_v40 = vpop.eup %3138 }
 0x8f0   :  { %v868_v41 = vmul.f32 %v3139_v40, %v3135_v31  ;;  %2896 = vmatmul.mubr.msk.bf16.vlgmr.msra.gmra.mrb[24].mxu1 %vm295_vm6, %v869_v39 }
 0x8f1   :  { %2907 = vmatprep.mubr.msk.bf16.mxu1 %vm3197_vm1, %v3196_v14 }
 0x8f2   :  { %v870_v43 = vpack.c.bf16 %v868_v41, %v868_v41 }
 0x8f3   :  { %2906 = vmatpush3.bf16.xpose.msra.mxu1 %v986_v59 }
 0x8f4   :  { %2902 = vmatmul.mubr.msk.bf16.vlgmr.msra.gmra.mrb[20].mxu0 %vm295_vm6, %v870_v43  ;;  %2917 = vmatprep.subr.bf16.mxu1 %v3196_v14 }
 0x8f5   :  { %2912 = vmatpush3.bf16.xpose.msra.mxu0 %v1036_v44  ;;  %2913 = vmatprep.mubr.msk.bf16.mxu0 %vm3197_vm1, %v3196_v14 }
 0x8f6   :  { %2923 = vmatprep.subr.bf16.mxu0 %v3196_v14 }
 0x8fa   :  { %2908 = vmatmul.mubr.msk.bf16.vlgmr.msra.gmra.mrb[28].mxu1 %vm295_vm6, %v979_v45 }
 0x8fb   :  { %2919 = vmatprep.mubr.msk.bf16.mxu1 %vm3197_vm1, %v3196_v14 }
 0x8fc   :  { %2914 = vmatmul.mubr.msk.bf16.vlgmr.msra.gmra.mrb[24].mxu0 %vm295_vm6, %v1029_v46 }
 0x8fd   :  { %2925 = vmatprep.mubr.msk.bf16.mxu0 %vm3197_vm1, %v3196_v14 }
 0x9c3   :  { %v913_v47 = vpop.f32.mrb[24].mxu1 }
 0x9c4   :  { %v2897_v48 = vpop.f32.mrb[25].mxu1 }
 0x9c5   :  { %v916_v50 = vpop.f32.mrb[26].mxu1 }
 0x9c6   :  { %v2898_v51 = vpop.f32.mrb[27].mxu1  ;;  %v2695_v50 = vld [vmem:[%s3910_s9] ss:$0 sm:$0xff] }
 0x9c7   :  { %v961_v53 = vpop.f32.mrb[20].mxu0 }
 0x9c8   :  { %v2903_v54 = vpop.f32.mrb[21].mxu0 }
 0x9c9   :  { %v964_v55 = vpop.f32.mrb[22].mxu0 }
 0x9ca   :  { %v2904_v57 = vpop.f32.mrb[23].mxu0 }
 0x9cd   :  { %v1022_v58 = vpop.f32.mrb[28].mxu1 }
 0x9ce   :  { %v1023_v61 = vadd.f32 %v1022_v58, %v3420_v17  ;;  %v2909_v63 = vpop.f32.mrb[29].mxu1 }
 0x9cf   :  { %v1025_v2 = vpop.f32.mrb[30].mxu1  ;;  %v1072_v3 = vpop.f32.mrb[24].mxu0 }
 0x9d0   :  { %v1073_v4 = vadd.f32 %v1072_v3, %v3422_v18  ;;  %v2910_v6 = vpop.f32.mrb[31].mxu1  ;;  %v2915_v7 = vpop.f32.mrb[25].mxu0  ;;  %v1078_v8 = vsel %vm295_vm6, %v1023_v61, -inf }
 0x9d1   :  { %v1075_v9 = vpop.f32.mrb[26].mxu0  ;;  %1079 = vmax.xlane.f32.xlu0 %v1078_v8 }
 0x9d2   :  { %v2916_v10 = vpop.f32.mrb[27].mxu0  ;;  %v1081_v12 = vsel %vm295_vm6, %v1073_v4, -inf }
 0x9d3   :  { %1082 = vmax.xlane.f32.xlu1 %v1081_v12 }
 0x9e4   :  { %1150 = vrot.lane.b32.xlu1 %v3384_v52, %s3209_s27 }
 0x9e8   :  { %738 = vrot.lane.b32.xlu1 %v3498_v56, %s3210_s28 }
 0x9ec   :  { %740 = vrot.lane.b32.xlu1 %v3500_v62, %s3210_s28 }
 0x9f0   :  { %971 = vrot.lane.b32.xlu1 %v961_v53, %s3211_s23 }
 0xa5e   :  { %v1080_v17 = vpop.xlane.xlu0 %1079 }
 0xa5f   :  { %v1084_v18 = vsub.f32 %v1023_v61, %v1080_v17 }
 0xa60   :  { %v1083_v13 = vpop.xlane.xlu1 %1082 }
 0xa61   :  { %v1086_v15 = vmul.f32 1.442695, %v1084_v18  ;;  %v1085_v16 = vsub.f32 %v1073_v4, %v1083_v13  ;;  %v3098_v4 = vld [vmem:[%s3911_s12] sm:$0xff]  }
 0xa63   :  { %3140 = vpow2.f32 %v1086_v15  ;;  %v1088_v19 = vmul.f32 1.442695, %v1085_v16  ;;  %v3613_v15 = vld [vmem:[%s3912_s13] ss:$0 sm:$0xff] }
 0xa64   :  { %v1151_v20 = vpop.permute.xlu1 %1150 }
 0xa65   :  { %3142 = vpow2.f32 %v1088_v19  ;;  %v1156_v52 = vsel %vm420_vm9, %v1151_v20, 0 }
 0xa66   :  { %2924 = vmatpush3.bf16.msra.mxu0 %v1156_v52 }
 0xa67   :  { %2937 = vmatprep.subr.bf16.mxu0 %v3196_v14 }
 0xa68   :  { %v739_v56 = vpop.permute.xlu1 %738 }
 0xa69   :  { %745 = vst.msk [vmem:[#allocation2] sm:$0xff] %vm744_vm10, %v739_v56 }
 0xa6c   :  { %v741_v62 = vpop.permute.xlu1 %740 }
 0xa6d   :  { %v3141_v21 = vpop.eup %3140  ;;  %746 = vst.msk [vmem:[#allocation2 + $0x8] sm:$0xff] %vm744_vm10, %v741_v62  ;;  %v80_v62 = vld [vmem:[%s3913_s1] sm:$0xff] }
 0xa6e   :  { %v1090_v22 = vsel %vm295_vm6, %v3141_v21, 0.0 }
 0xa6f   :  { %v3143_v23 = vpop.eup %3142  ;;  %1091 = vadd.xlane.f32.xlu0 %v1090_v22 }
 0xa70   :  { %v972_v24 = vpop.permute.xlu1 %971  ;;  %v1093_v25 = vsel %vm295_vm6, %v3143_v23, 0.0 }
 0xa71   :  { %977 = vst.msk [vmem:[#allocation2 + $0x8] sm:$0xff] %vm975_vm11, %v972_v24 }
 0xa73   :  { %1094 = vadd.xlane.f32.xlu0 %v1093_v25 }
 0xa89   :  { %1102 = vrot.lane.b32.xlu0 %v3382_v49, %s3209_s27  ;;  %s3212_s27 = smov 24  }
 0xa8d   :  { %969 = vrot.lane.b32.xlu0 %v913_v47, %s3211_s23 }
 0xafc   :  { %v1092_v26 = vpop.xlane.xlu0 %1091 }
 0xafd   :  { %3144 = vrcp.f32 %v1092_v26 }
 0xb00   :  { %v1095_v27 = vpop.xlane.xlu0 %1094 }
 0xb01   :  { %3146 = vrcp.f32 %v1095_v27 }
 0xb04   :  { %v1103_v28 = vpop.permute.xlu0 %1102 }
 0xb05   :  { %v1108_v29 = vsel %vm420_vm9, %v1103_v28, 0 }
 0xb06   :  { %2918 = vmatpush3.bf16.msra.mxu1 %v1108_v29 }
 0xb07   :  { %v3145_v30 = vpop.eup %3144  ;;  %2929 = vmatprep.subr.bf16.mxu1 %v3196_v14 }
 0xb08   :  { %v1098_v31 = vmul.f32 %v3145_v30, %v3141_v21  ;;  %v970_v60 = vpop.permute.xlu0 %969  ;;  %v81_v21 = vld [vmem:[%s3913_s1 + $0x8] sm:$0xff] }
 0xb09   :  { %976 = vst.msk [vmem:[#allocation2] sm:$0xff] %vm975_vm11, %v970_v60 }
 0xb0a   :  { %v1100_v32 = vpack.c.bf16 %v1098_v31, %v1098_v31 }
 0xb0b   :  { %v3147_v33 = vpop.eup %3146 }
 0xb0c   :  { %v1099_v49 = vmul.f32 %v3147_v33, %v3143_v23  ;;  %2920 = vmatmul.mubr.msk.bf16.vlgmr.msra.gmra.mrb[32].mxu1 %vm295_vm6, %v1100_v32  ;;  %v1409_v23 = vpack.c.bf16 %v81_v21, %v80_v62 }
 0xb0d   :  { %2933 = vmatprep.mubr.msk.bf16.mxu1 %vm3197_vm1, %v3196_v14  ;;  %2930 = vmatpush3.bf16.msra.mxu1 %v3096_v35 }
 0xb0e   :  { %v1101_v34 = vpack.c.bf16 %v1099_v49, %v1099_v49  ;;  %2931 = vmatprep.subr.bf16.mxu1 %v3196_v14 }
 0xb10   :  { %2926 = vmatmul.mubr.msk.bf16.vlgmr.msra.gmra.mrb[28].mxu0 %vm295_vm6, %v1101_v34  ;;  %v2699_v34 = vld [vmem:[%s3914_s10] ss:$0 sm:$0xff] }
 0xb11   :  { %2941 = vmatprep.mubr.msk.bf16.mxu0 %vm3197_vm1, %v3196_v14  ;;  %2932 = vmatpush3.bf16.msra.mxu1 %v3097_v36 }
 0xb12   :  { %2945 = vmatprep.subr.bf16.mxu1 %v3196_v14  ;;  %2938 = vmatpush3.bf16.msra.mxu0 %v3098_v4 }
 0xb13   :  { %2939 = vmatprep.subr.bf16.mxu0 %v3196_v14 }
 0xbdf   :  { %v1144_v37 = vpop.f32.mrb[32].mxu1 }
 0xbe0   :  { %1200 = vrot.lane.b32.xlu0 %v1144_v37, %s3212_s27  ;;  %v2921_v38 = vpop.f32.mrb[33].mxu1 }
 0xbe1   :  { %v1147_v39 = vpop.f32.mrb[34].mxu1 }
 0xbe2   :  { %v2922_v40 = vpop.f32.mrb[35].mxu1 }
 0xbe3   :  { %v1192_v41 = vpop.f32.mrb[28].mxu0  ;;  %v2700_v40 = vld [vmem:[%s3915_s11] ss:$0 sm:$0xff] }
 0xbe4   :  { %1202 = vrot.lane.b32.xlu1 %v1192_v41, %s3212_s27  ;;  %v2927_v42 = vpop.f32.mrb[29].mxu0 }
 0xbe5   :  { %v1195_v59 = vpop.f32.mrb[30].mxu0 }
 0xbe6   :  { %v2928_v43 = vpop.f32.mrb[31].mxu0 }
 0xc52   :  { %v1201_v44 = vpop.permute.xlu0 %1200 }
 0xc53   :  { %1207 = vst.msk [vmem:[#allocation2] sm:$0xff] %vm1206_vm12, %v1201_v44 }
 0xc56   :  { %v1203_v45 = vpop.permute.xlu1 %1202 }
 0xc57   :  { %1208 = vst.msk [vmem:[#allocation2 + $0x8] sm:$0xff] %vm1206_vm12, %v1203_v45 }
 0xc5a   :  { %v1209_v46 = vld [vmem:[#allocation2] sm:$0xff] }
 0xc5e   :  { %v1210_v47 = vld [vmem:[#allocation2 + $0x8] sm:$0xff] }
 0xc5f   :  { %v1211_v48 = vpack.c.bf16 %v1210_v47, %v1209_v46 }
 0xc61   :  { %2934 = vmatmul.mubr.msk.bf16.vlgmr.msra.gmra.mrb[36].mxu1 %vm154_vm0, %v1211_v48 }
 0xc62   :  { %2949 = vmatprep.mubr.msk.bf16.mxu1 %vm3197_vm1, %v3196_v14 }
 0xd34   :  { %v1267_v51 = vpop.f32.mrb[36].mxu1 }
 0xd35   :  { %v1268_v53 = vadd.f32 %v2695_v50, %v1267_v51  ;;  %v2935_v54 = vpop.f32.mrb[37].mxu1 }
 0xd36   :  { %v1270_v55 = vpop.f32.mrb[38].mxu1 }
 0xd37   :  { %v3587_v57 = vadd.f32 %v1268_v53, %v3341_v0  ;;  %v1271_v58 = vadd.f32 %v2695_v50, %v1270_v55  ;;  %v2936_v61 = vpop.f32.mrb[39].mxu1  ;;  %v3099_v0 = vld [vmem:[%s3911_s12 + $0x8] sm:$0xff]  }
 0xd38   :  { %2940 = vmatpush3.bf16.msra.mxu0 %v3099_v0 }
 0xd39   :  { %v3590_v63 = vadd.f32 %v1271_v58, %v3346_v1  ;;  %v1278_v2 = vsel %vm154_vm0, %v3587_v57, 0.0  ;;  %2953 = vmatprep.subr.bf16.mxu0 %v3196_v14 }
 0xd3a   :  { %1279 = vadd.xlane.f32.xlu0 %v1278_v2 }
 0xd3b   :  { %v1281_v3 = vsel %vm154_vm0, %v3590_v63, 0.0 }
 0xd3c   :  { %1282 = vadd.xlane.f32.xlu1 %v1281_v3 }
 0xd4d   :  { %1412 = vrot.lane.b32.xlu1 %v3099_v0, %s3198_s7 }
 0xd51   :  { %1416 = vrot.lane.b32.xlu1 %v3613_v15, %s3198_s7 }
 0xdc7   :  { %v1280_v1 = vpop.xlane.xlu0 %1279 }
 0xdc8   :  { %v1284_v6 = vmul.f32 0.03125, %v1280_v1 }
 0xdc9   :  { %v1283_v7 = vpop.xlane.xlu1 %1282 }
 0xdca   :  { %v1286_v8 = vsub.f32 %v3587_v57, %v1284_v6  ;;  %v1285_v9 = vmul.f32 0.03125, %v1283_v7 }
 0xdcc   :  { %v1287_v10 = vsub.f32 %v3590_v63, %v1285_v9  ;;  %v1288_v12 = vmul.f32 %v1286_v8, %v1286_v8  ;;  %v1304_v36 = vmul.f32 %v2699_v34, %v1286_v8 }
 0xdcd   :  { %v1413_v22 = vpop.permute.xlu1 %1412 }
 0xdce   :  { %v1290_v17 = vsel %vm154_vm0, %v1288_v12, 0.0  ;;  %v1289_v18 = vmul.f32 %v1287_v10, %v1287_v10  ;;  %v1305_v37 = vmul.f32 %v2699_v34, %v1287_v10  ;;  %v126_v10 = vld [vmem:[%s3916_s2] sm:$0x3] }
 0xdcf   :  { %1291 = vadd.xlane.f32.xlu0 %v1290_v17  ;;  %vm127_vm3 = vcmp.eq.f32.partialorder %v126_v10, 0.0 }
 0xdd0   :  { %v1293_v13 = vsel %vm154_vm0, %v1289_v18, 0.0  ;;  %v128_v12 = vsel %vm127_vm3, -1e+09, %v3196_v14 }
 0xdd1   :  { %v1417_v44 = vpop.permute.xlu1 %1416  ;;  %v136_v17 = vrot.slane %v128_v12, %v3409_v5 }
 0xdd3   :  { %1294 = vadd.xlane.f32.xlu0 %v1293_v13  ;;  %v137_v18 = vcombine.high %v136_v17, %v136_v17  ;;  %v144_v13 = vrot.slane %v136_v17, %v3409_v5 }
 0xde9   :  { %1410 = vrot.lane.b32.xlu0 %v3098_v4, %s3198_s7 }
 0xe5c   :  { %v1292_v16 = vpop.xlane.xlu0 %1291 }
 0xe5d   :  { %v1296_v19 = vmul.f32 0.032258064, %v1292_v16  ;;  %v3669_v16 = vrot.slane %v144_v13, %v3414_v11 }
 0xe5f   :  { %3148 = vrsqrt.f32 %v1296_v19  ;;  %vm1308_vm13 = vcmp.eq.f32.partialorder %v1296_v19, inf  ;;  %v1311_v26 = vand.u32 2147483648, %v1296_v19  ;;  %vm1310_vm14 = vcmp.eq.f32.partialorder %v1296_v19, 0.0 }
 0xe60   :  { %v1295_v20 = vpop.xlane.xlu0 %1294 }
 0xe61   :  { %v1297_v52 = vmul.f32 0.032258064, %v1295_v20 }
 0xe63   :  { %3150 = vrsqrt.f32 %v1297_v52  ;;  %vm1315_vm15 = vcmp.eq.f32.partialorder %v1297_v52, inf  ;;  %v1318_v60 = vand.u32 2147483648, %v1297_v52  ;;  %vm1317_vm2 = vcmp.eq.f32.partialorder %v1297_v52, 0.0 }
 0xe64   :  { %v1411_v56 = vpop.permute.xlu0 %1410 }
 0xe65   :  { %2946 = vmatpush3.bf16.msra.mxu1 %v1411_v56 }
 0xe66   :  { %2947 = vmatprep.subr.bf16.mxu1 %v3196_v14 }
 0xe69   :  { %v3149_v24 = vpop.eup %3148  ;;  %2948 = vmatpush3.bf16.msra.mxu1 %v1413_v22 }
 0xe6a   :  { %v1307_v25 = vmul.f32 %v3149_v24, %v1296_v19  ;;  %2959 = vmatprep.subr.bf16.mxu1 %v3196_v14 }
 0xe6c   :  { %v1309_v27 = vsel %vm1308_vm13, %v1296_v19, %v1307_v25  ;;  %2950 = vmatmul.mubr.msk.bf16.vlgmr.msra.gmra.mrb[40].mxu1 %vm154_vm0, %v1409_v23 }
 0xe6d   :  { %v3151_v28 = vpop.eup %3150  ;;  %v1312_v29 = vsel %vm1310_vm14, %v1311_v26, %v1309_v27  ;;  %2961 = vmatprep.mubr.msk.bf16.mxu1 %vm3197_vm1, %v3196_v14 }
 0xe6e   :  { %v1320_v30 = vadd.f32 1e-06, %v1312_v29  ;;  %v1314_v31 = vmul.f32 %v3151_v28, %v1297_v52 }
 0xe70   :  { %3152 = vrcp.f32 %v1320_v30  ;;  %v1316_v32 = vsel %vm1315_vm15, %v1297_v52, %v1314_v31 }
 0xe71   :  { %v1319_v33 = vsel %vm1317_vm2, %v1318_v60, %v1316_v32 }
 0xe72   :  { %v1321_v49 = vadd.f32 1e-06, %v1319_v33 }
 0xe74   :  { %3154 = vrcp.f32 %v1321_v49 }
 0xe7a   :  { %v3153_v35 = vpop.eup %3152 }
 0xe7b   :  { %v1323_v38 = vmul.f32 %v3153_v35, %v1304_v36 }
 0xe7d   :  { %v1332_v42 = vadd.f32 %v2700_v40, %v1323_v38 }
 0xe7e   :  { %v3155_v39 = vpop.eup %3154 }
 0xe7f   :  { %v1325_v41 = vmul.f32 %v3155_v39, %v1305_v37 }
 0xe81   :  { %v1333_v59 = vadd.f32 %v2700_v40, %v1325_v41 }
 0xe83   :  { %v1344_v43 = vpack.c.bf16 %v1333_v59, %v1332_v42 }
 0xe85   :  { %2942 = vmatmul.mubr.msk.bf16.vlgmr.msra.gmra.mrb[32].mxu0 %vm154_vm0, %v1344_v43 }
 0xe86   :  { %2955 = vmatprep.mubr.msk.bf16.mxu0 %vm3197_vm1, %v3196_v14 }
 0xf3f   :  { %v1456_v45 = vpop.f32.mrb[40].mxu1 }
 0xf40   :  { %v2951_v46 = vpop.f32.mrb[41].mxu1  ;;  %v1457_v47 = vadd.f32 %v1456_v45, %v1417_v44 }
 0xf41   :  { %v1459_v48 = vpop.f32.mrb[42].mxu1 }
 0xf42   :  { %v1460_v50 = vadd.f32 %v1459_v48, %v1417_v44  ;;  %v3637_v51 = vpack.c.bf16 %v1457_v47, %v1457_v47  ;;  %v2952_v53 = vpop.f32.mrb[43].mxu1 }
 0xf44   :  { %v3639_v54 = vpack.c.bf16 %v1460_v50, %v1460_v50  ;;  %v1481_v55 = vsel %vm295_vm6, %v3637_v51, 0 }
 0xf45   :  { %2954 = vmatpush3.bf16.xpose.msra.mxu0 %v1481_v55 }
 0xf46   :  { %v1527_v58 = vsel %vm295_vm6, %v3639_v54, 0  ;;  %2965 = vmatprep.subr.bf16.mxu0 %v3196_v14 }
 0xf47   :  { %2960 = vmatpush3.bf16.xpose.msra.mxu1 %v1527_v58 }
 0xf48   :  { %2971 = vmatprep.subr.bf16.mxu1 %v3196_v14 }
 0xf58   :  { %v1400_v61 = vpop.f32.mrb[32].mxu0 }
 0xf59   :  { %v1401_v2 = vadd.f32 %v3613_v15, %v1400_v61  ;;  %v2943_v3 = vpop.f32.mrb[33].mxu0 }
 0xf5a   :  { %v1403_v4 = vpop.f32.mrb[34].mxu0 }
 0xf5b   :  { %v1407_v0 = vmul.f32 0.35355338, %v1401_v2  ;;  %v1404_v1 = vadd.f32 %v3613_v15, %v1403_v4  ;;  %v2944_v6 = vpop.f32.mrb[35].mxu0  ;;  %v151_v15 = vrot.slane %v137_v18, %v3409_v5 }
 0xf5d   :  { %v3649_v7 = vpack.c.bf16 %v1407_v0, %v1407_v0  ;;  %v1408_v8 = vmul.f32 0.35355338, %v1404_v1  ;;  %v3672_v19 = vrot.slane %v151_v15, %v3414_v11 }
 0xf5f   :  { %v3651_v9 = vpack.c.bf16 %v1408_v8, %v1408_v8  ;;  %2956 = vmatmul.mubr.msk.bf16.vlgmr.msra.gmra.mrb[36].mxu0 %vm295_vm6, %v3649_v7 }
 0xf60   :  { %2967 = vmatprep.mubr.msk.bf16.mxu0 %vm3197_vm1, %v3196_v14 }
 0xf61   :  { %2962 = vmatmul.mubr.msk.bf16.vlgmr.msra.gmra.mrb[44].mxu1 %vm295_vm6, %v3651_v9 }
 0xf62   :  { %2973 = vmatprep.mubr.msk.bf16.mxu1 %vm3197_vm1, %v3196_v14 }
0x1032   :  { %v1517_v20 = vpop.f32.mrb[36].mxu0 }
0x1033   :  { %v1518_v52 = vadd.f32 %v1517_v20, %v3669_v16  ;;  %v2957_v56 = vpop.f32.mrb[37].mxu0 }
0x1034   :  { %v1520_v62 = vpop.f32.mrb[38].mxu0  ;;  %v1563_v21 = vpop.f32.mrb[44].mxu1 }
0x1035   :  { %v1564_v22 = vadd.f32 %v1563_v21, %v3672_v19  ;;  %v2958_v23 = vpop.f32.mrb[39].mxu0  ;;  %v2963_v24 = vpop.f32.mrb[45].mxu1  ;;  %v1569_v25 = vsel %vm295_vm6, %v1518_v52, -inf }
0x1036   :  { %1570 = vmax.xlane.f32.xlu1 %v1569_v25  ;;  %v1566_v5 = vpop.f32.mrb[46].mxu1 }
0x1037   :  { %v2964_v26 = vpop.f32.mrb[47].mxu1  ;;  %v1572_v27 = vsel %vm295_vm6, %v1564_v22, -inf }
0x1038   :  { %1573 = vmax.xlane.f32.xlu0 %v1572_v27 }
0x1047   :  { %1594 = vrot.lane.b32.xlu1 %v3637_v51, %s3198_s7 }
0x104b   :  { %1696 = vrot.lane.b32.xlu1 %v3637_v51, %s3202_s6 }
0x104f   :  { %1747 = vrot.lane.b32.xlu1 %v3639_v54, %s3202_s6 }
0x1053   :  { %1694 = vrot.lane.b32.xlu1 %v3649_v7, %s3202_s6 }
0x10c3   :  { %v1571_v11 = vpop.xlane.xlu1 %1570 }
0x10c4   :  { %v1575_v28 = vsub.f32 %v1518_v52, %v1571_v11 }
0x10c5   :  { %v1574_v29 = vpop.xlane.xlu0 %1573 }
0x10c6   :  { %v1577_v30 = vmul.f32 1.442695, %v1575_v28  ;;  %v1576_v31 = vsub.f32 %v1564_v22, %v1574_v29 }
0x10c7   :  { %v1595_v60 = vpop.permute.xlu1 %1594 }
0x10c8   :  { %3156 = vpow2.f32 %v1577_v30  ;;  %v1579_v32 = vmul.f32 1.442695, %v1576_v31  ;;  %v1600_v33 = vsel %vm420_vm9, %v1595_v60, 0 }
0x10c9   :  { %2966 = vmatpush3.bf16.msra.mxu0 %v1600_v33 }
0x10ca   :  { %3158 = vpow2.f32 %v1579_v32  ;;  %2977 = vmatprep.subr.bf16.mxu0 %v3196_v14 }
0x10cb   :  { %v1697_v42 = vpop.permute.xlu1 %1696 }
0x10cc   :  { %v1702_v45 = vsel %vm295_vm6, %v1697_v42, 0 }
0x10cf   :  { %v1748_v47 = vpop.permute.xlu1 %1747 }
0x10d0   :  { %v1753_v50 = vsel %vm295_vm6, %v1748_v47, 0 }
0x10d2   :  { %v3157_v49 = vpop.eup %3156 }
0x10d3   :  { %v1581_v34 = vsel %vm295_vm6, %v3157_v49, 0.0  ;;  %v1695_v53 = vpop.permute.xlu1 %1694 }
0x10d4   :  { %v3159_v35 = vpop.eup %3158  ;;  %1582 = vadd.xlane.f32.xlu0 %v1581_v34 }
0x10d5   :  { %v1584_v36 = vsel %vm295_vm6, %v3159_v35, 0.0 }
0x10d8   :  { %1585 = vadd.xlane.f32.xlu0 %v1584_v36 }
0x10ee   :  { %1643 = vrot.lane.b32.xlu0 %v3639_v54, %s3198_s7 }
0x10f2   :  { %1745 = vrot.lane.b32.xlu0 %v3651_v9, %s3202_s6 }
0x1161   :  { %v1583_v37 = vpop.xlane.xlu0 %1582 }
0x1162   :  { %3160 = vrcp.f32 %v1583_v37 }
0x1165   :  { %v1586_v38 = vpop.xlane.xlu0 %1585 }
0x1166   :  { %3162 = vrcp.f32 %v1586_v38 }
0x1169   :  { %v1644_v39 = vpop.permute.xlu0 %1643 }
0x116a   :  { %v1649_v40 = vsel %vm420_vm9, %v1644_v39, 0 }
0x116b   :  { %2972 = vmatpush3.bf16.msra.mxu1 %v1649_v40 }
0x116c   :  { %v3161_v41 = vpop.eup %3160  ;;  %2983 = vmatprep.subr.bf16.mxu1 %v3196_v14 }
0x116d   :  { %v1589_v59 = vmul.f32 %v3161_v41, %v3157_v49  ;;  %v1746_v55 = vpop.permute.xlu0 %1745 }
0x116f   :  { %v1591_v43 = vpack.c.bf16 %v1589_v59, %v1589_v59 }
0x1170   :  { %v3163_v44 = vpop.eup %3162 }
0x1171   :  { %v1590_v46 = vmul.f32 %v3163_v44, %v3159_v35  ;;  %2968 = vmatmul.mubr.msk.bf16.vlgmr.msra.gmra.mrb[40].mxu0 %vm295_vm6, %v1591_v43 }
0x1172   :  { %2978 = vmatpush3.bf16.xpose.msra.mxu0 %v1702_v45  ;;  %2979 = vmatprep.mubr.msk.bf16.mxu0 %vm3197_vm1, %v3196_v14 }
0x1173   :  { %v1592_v48 = vpack.c.bf16 %v1590_v46, %v1590_v46  ;;  %2989 = vmatprep.subr.bf16.mxu0 %v3196_v14 }
0x1175   :  { %2974 = vmatmul.mubr.msk.bf16.vlgmr.msra.gmra.mrb[48].mxu1 %vm295_vm6, %v1592_v48 }
0x1176   :  { %2984 = vmatpush3.bf16.xpose.msra.mxu1 %v1753_v50  ;;  %2985 = vmatprep.mubr.msk.bf16.mxu1 %vm3197_vm1, %v3196_v14 }
0x1177   :  { %2995 = vmatprep.subr.bf16.mxu1 %v3196_v14 }
0x1179   :  { %2980 = vmatmul.mubr.msk.bf16.vlgmr.msra.gmra.mrb[44].mxu0 %vm295_vm6, %v1695_v53 }
0x117a   :  { %2991 = vmatprep.mubr.msk.bf16.mxu0 %vm3197_vm1, %v3196_v14 }
0x117d   :  { %2986 = vmatmul.mubr.msk.bf16.vlgmr.msra.gmra.mrb[52].mxu1 %vm295_vm6, %v1746_v55 }
0x117e   :  { %2997 = vmatprep.mubr.msk.bf16.mxu1 %vm3197_vm1, %v3196_v14 }
0x1244   :  { %v1636_v58 = vpop.f32.mrb[40].mxu0 }
0x1245   :  { %1691 = vst.msk [vmem:[#allocation2] sm:$0xff] %vm295_vm6, %v1636_v58  ;;  %v2969_v61 = vpop.f32.mrb[41].mxu0 }
0x1246   :  { %v1639_v2 = vpop.f32.mrb[42].mxu0 }
0x1247   :  { %v2970_v3 = vpop.f32.mrb[43].mxu0 }
0x1248   :  { %v1685_v4 = vpop.f32.mrb[48].mxu1 }
0x1249   :  { %1692 = vst.msk [vmem:[#allocation2 + $0x8] sm:$0xff] %vm295_vm6, %v1685_v4  ;;  %v2975_v0 = vpop.f32.mrb[49].mxu1 }
0x124a   :  { %v1688_v1 = vpop.f32.mrb[50].mxu1 }
0x124b   :  { %v2976_v6 = vpop.f32.mrb[51].mxu1 }
0x124c   :  { %v1738_v8 = vpop.f32.mrb[44].mxu0 }
0x124d   :  { %v1739_v10 = vadd.f32 %v1738_v8, %v3669_v16  ;;  %v2981_v12 = vpop.f32.mrb[45].mxu0 }
0x124e   :  { %v1741_v17 = vpop.f32.mrb[46].mxu0 }
0x124f   :  { %v2982_v18 = vpop.f32.mrb[47].mxu0  ;;  %v1795_v13 = vsel %vm295_vm6, %v1739_v10, -inf }
0x1250   :  { %1796 = vmax.xlane.f32.xlu1 %v1795_v13  ;;  %v1789_v15 = vpop.f32.mrb[52].mxu1 }
0x1251   :  { %v1790_v20 = vadd.f32 %v1789_v15, %v3672_v19  ;;  %v2987_v52 = vpop.f32.mrb[53].mxu1 }
0x1252   :  { %v1792_v56 = vpop.f32.mrb[54].mxu1 }
0x1253   :  { %v2988_v62 = vpop.f32.mrb[55].mxu1  ;;  %v1798_v21 = vsel %vm295_vm6, %v1790_v20, -inf }
0x1254   :  { %1799 = vmax.xlane.f32.xlu0 %v1798_v21 }
0x1261   :  { %1819 = vrot.lane.b32.xlu1 %v3637_v51, %s3201_s30 }
0x1265   :  { %1927 = vrot.lane.b32.xlu1 %v3637_v51, %s3205_s4 }
0x1269   :  { %1977 = vrot.lane.b32.xlu1 %v3639_v54, %s3205_s4 }
0x126d   :  { %1925 = vrot.lane.b32.xlu1 %v3649_v7, %s3205_s4 }
0x12dd   :  { %v1797_v22 = vpop.xlane.xlu1 %1796 }
0x12de   :  { %v1801_v23 = vsub.f32 %v1739_v10, %v1797_v22 }
0x12e0   :  { %v1803_v24 = vmul.f32 1.442695, %v1801_v23 }
0x12e1   :  { %v1820_v25 = vpop.permute.xlu1 %1819  ;;  %v1800_v5 = vpop.xlane.xlu0 %1799 }
0x12e2   :  { %3164 = vpow2.f32 %v1803_v24  ;;  %v1825_v26 = vsel %vm420_vm9, %v1820_v25, 0  ;;  %v1802_v27 = vsub.f32 %v1790_v20, %v1800_v5 }
0x12e3   :  { %2990 = vmatpush3.bf16.msra.mxu0 %v1825_v26 }
0x12e4   :  { %v1805_v11 = vmul.f32 1.442695, %v1802_v27  ;;  %3001 = vmatprep.subr.bf16.mxu0 %v3196_v14 }
0x12e5   :  { %v1928_v35 = vpop.permute.xlu1 %1927 }
0x12e6   :  { %3166 = vpow2.f32 %v1805_v11  ;;  %v1933_v39 = vsel %vm295_vm6, %v1928_v35, 0 }
0x12e9   :  { %v1978_v41 = vpop.permute.xlu1 %1977 }
0x12ea   :  { %v1983_v59 = vsel %vm295_vm6, %v1978_v41, 0 }
0x12ec   :  { %v3165_v28 = vpop.eup %3164 }
0x12ed   :  { %v1807_v29 = vsel %vm295_vm6, %v3165_v28, 0.0  ;;  %v1926_v43 = vpop.permute.xlu1 %1925 }
0x12ee   :  { %1808 = vadd.xlane.f32.xlu0 %v1807_v29 }
0x12f0   :  { %v3167_v30 = vpop.eup %3166 }
0x12f1   :  { %v1810_v31 = vsel %vm295_vm6, %v3167_v30, 0.0 }
0x12f2   :  { %1811 = vadd.xlane.f32.xlu0 %v1810_v31 }
0x1308   :  { %1867 = vrot.lane.b32.xlu0 %v3639_v54, %s3201_s30 }
0x130c   :  { %1975 = vrot.lane.b32.xlu0 %v3651_v9, %s3205_s4 }
0x137b   :  { %v1809_v60 = vpop.xlane.xlu0 %1808 }
0x137c   :  { %3168 = vrcp.f32 %v1809_v60 }
0x137f   :  { %v1812_v32 = vpop.xlane.xlu0 %1811 }
0x1380   :  { %3170 = vrcp.f32 %v1812_v32 }
0x1383   :  { %v1868_v33 = vpop.permute.xlu0 %1867 }
0x1384   :  { %v1873_v49 = vsel %vm420_vm9, %v1868_v33, 0 }
0x1385   :  { %2996 = vmatpush3.bf16.msra.mxu1 %v1873_v49 }
0x1386   :  { %v3169_v34 = vpop.eup %3168  ;;  %3007 = vmatprep.subr.bf16.mxu1 %v3196_v14 }
0x1387   :  { %v1815_v36 = vmul.f32 %v3169_v34, %v3165_v28  ;;  %v1976_v44 = vpop.permute.xlu0 %1975 }
0x1389   :  { %v1817_v37 = vpack.c.bf16 %v1815_v36, %v1815_v36 }
0x138a   :  { %v3171_v38 = vpop.eup %3170 }
0x138b   :  { %v1816_v40 = vmul.f32 %v3171_v38, %v3167_v30  ;;  %2992 = vmatmul.mubr.msk.bf16.vlgmr.msra.gmra.mrb[48].mxu0 %vm295_vm6, %v1817_v37 }
0x138c   :  { %3002 = vmatpush3.bf16.xpose.msra.mxu0 %v1933_v39  ;;  %3003 = vmatprep.mubr.msk.bf16.mxu0 %vm3197_vm1, %v3196_v14 }
0x138d   :  { %v1818_v42 = vpack.c.bf16 %v1816_v40, %v1816_v40  ;;  %3013 = vmatprep.subr.bf16.mxu0 %v3196_v14 }
0x138f   :  { %2998 = vmatmul.mubr.msk.bf16.vlgmr.msra.gmra.mrb[56].mxu1 %vm295_vm6, %v1818_v42 }
0x1390   :  { %3008 = vmatpush3.bf16.xpose.msra.mxu1 %v1983_v59  ;;  %3009 = vmatprep.mubr.msk.bf16.mxu1 %vm3197_vm1, %v3196_v14 }
0x1391   :  { %3019 = vmatprep.subr.bf16.mxu1 %v3196_v14 }
0x1393   :  { %3004 = vmatmul.mubr.msk.bf16.vlgmr.msra.gmra.mrb[52].mxu0 %vm295_vm6, %v1926_v43 }
0x1394   :  { %3015 = vmatprep.mubr.msk.bf16.mxu0 %vm3197_vm1, %v3196_v14 }
0x1397   :  { %3010 = vmatmul.mubr.msk.bf16.vlgmr.msra.gmra.mrb[60].mxu1 %vm295_vm6, %v1976_v44 }
0x1398   :  { %3021 = vmatprep.mubr.msk.bf16.mxu1 %vm3197_vm1, %v3196_v14 }
0x145e   :  { %v3752_v45 = vpop.f32.mrb[48].mxu0 }
0x145f   :  { %v2993_v46 = vpop.f32.mrb[49].mxu0 }
0x1460   :  { %v1864_v47 = vpop.f32.mrb[50].mxu0 }
0x1461   :  { %v2994_v48 = vpop.f32.mrb[51].mxu0 }
0x1462   :  { %v3754_v50 = vpop.f32.mrb[56].mxu1 }
0x1463   :  { %v2999_v53 = vpop.f32.mrb[57].mxu1 }
0x1464   :  { %v1912_v55 = vpop.f32.mrb[58].mxu1 }
0x1465   :  { %v3000_v58 = vpop.f32.mrb[59].mxu1 }
0x1466   :  { %v1969_v61 = vpop.f32.mrb[52].mxu0 }
0x1467   :  { %v1970_v2 = vadd.f32 %v1969_v61, %v3669_v16  ;;  %v3005_v3 = vpop.f32.mrb[53].mxu0 }
0x1468   :  { %v1972_v4 = vpop.f32.mrb[54].mxu0 }
0x1469   :  { %v3006_v0 = vpop.f32.mrb[55].mxu0  ;;  %v2025_v1 = vsel %vm295_vm6, %v1970_v2, -inf }
0x146a   :  { %2026 = vmax.xlane.f32.xlu1 %v2025_v1  ;;  %v2019_v6 = vpop.f32.mrb[60].mxu1 }
0x146b   :  { %v2020_v8 = vadd.f32 %v2019_v6, %v3672_v19  ;;  %v3011_v10 = vpop.f32.mrb[61].mxu1 }
0x146c   :  { %v2022_v12 = vpop.f32.mrb[62].mxu1 }
0x146d   :  { %v3012_v17 = vpop.f32.mrb[63].mxu1  ;;  %v2028_v18 = vsel %vm295_vm6, %v2020_v8, -inf }
0x146e   :  { %2029 = vmax.xlane.f32.xlu0 %v2028_v18 }
0x147b   :  { %2049 = vrot.lane.b32.xlu1 %v3637_v51, %s3204_s8 }
0x147f   :  { %2157 = vrot.lane.b32.xlu1 %v3637_v51, %s3208_s26 }
0x1483   :  { %2207 = vrot.lane.b32.xlu1 %v3639_v54, %s3208_s26 }
0x1487   :  { %2155 = vrot.lane.b32.xlu1 %v3649_v7, %s3208_s26 }
0x14f7   :  { %v2027_v13 = vpop.xlane.xlu1 %2026 }
0x14f8   :  { %v2031_v15 = vsub.f32 %v1970_v2, %v2027_v13 }
0x14fa   :  { %v2033_v20 = vmul.f32 1.442695, %v2031_v15 }
0x14fb   :  { %v2050_v52 = vpop.permute.xlu1 %2049  ;;  %v2030_v56 = vpop.xlane.xlu0 %2029 }
0x14fc   :  { %3172 = vpow2.f32 %v2033_v20  ;;  %v2055_v62 = vsel %vm420_vm9, %v2050_v52, 0  ;;  %v2032_v21 = vsub.f32 %v2020_v8, %v2030_v56 }
0x14fd   :  { %3014 = vmatpush3.bf16.msra.mxu0 %v2055_v62 }
0x14fe   :  { %v2035_v22 = vmul.f32 1.442695, %v2032_v21  ;;  %3025 = vmatprep.subr.bf16.mxu0 %v3196_v14 }
0x14ff   :  { %v2158_v29 = vpop.permute.xlu1 %2157 }
0x1500   :  { %3174 = vpow2.f32 %v2035_v22  ;;  %v2163_v32 = vsel %vm295_vm6, %v2158_v29, 0 }
0x1506   :  { %v3173_v23 = vpop.eup %3172 }
0x1507   :  { %v2037_v24 = vsel %vm295_vm6, %v3173_v23, 0.0 }
0x1508   :  { %2038 = vadd.xlane.f32.xlu0 %v2037_v24 }
0x150a   :  { %v3175_v25 = vpop.eup %3174 }
0x150b   :  { %v2040_v7 = vsel %vm295_vm6, %v3175_v25, 0.0 }
0x150c   :  { %2041 = vadd.xlane.f32.xlu0 %v2040_v7 }
0x1522   :  { %2097 = vrot.lane.b32.xlu0 %v3639_v54, %s3204_s8 }
0x1526   :  { %2205 = vrot.lane.b32.xlu0 %v3651_v9, %s3208_s26  ;;  %v2208_v9 = vpop.permute.xlu1 %2207 }
0x1527   :  { %v2213_v34 = vsel %vm295_vm6, %v2208_v9, 0 }
0x152a   :  { %v2156_v35 = vpop.permute.xlu1 %2155 }
0x1595   :  { %v2039_v5 = vpop.xlane.xlu0 %2038 }
0x1596   :  { %3176 = vrcp.f32 %v2039_v5 }
0x1599   :  { %v2042_v26 = vpop.xlane.xlu0 %2041 }
0x159a   :  { %3178 = vrcp.f32 %v2042_v26  ;;  %v3100_v26 = vld [vmem:[%s3917_s14] sm:$0xff]  }
0x159d   :  { %v2098_v27 = vpop.permute.xlu0 %2097 }
0x159e   :  { %v2103_v11 = vsel %vm420_vm9, %v2098_v27, 0  ;;  %v3101_v27 = vld [vmem:[%s3917_s14 + $0x8] sm:$0xff]  }
0x159f   :  { %3020 = vmatpush3.bf16.msra.mxu1 %v2103_v11 }
0x15a0   :  { %v3177_v28 = vpop.eup %3176  ;;  %3031 = vmatprep.subr.bf16.mxu1 %v3196_v14 }
0x15a1   :  { %v2045_v30 = vmul.f32 %v3177_v28, %v3173_v23  ;;  %v2206_v36 = vpop.permute.xlu0 %2205 }
0x15a3   :  { %v2047_v31 = vpack.c.bf16 %v2045_v30, %v2045_v30 }
0x15a4   :  { %v3179_v60 = vpop.eup %3178 }
0x15a5   :  { %v2046_v33 = vmul.f32 %v3179_v60, %v3175_v25  ;;  %3016 = vmatmul.mubr.msk.bf16.vlgmr.msra.gmra.mrb[56].mxu0 %vm295_vm6, %v2047_v31 }
0x15a6   :  { %3026 = vmatpush3.bf16.xpose.msra.mxu0 %v2163_v32  ;;  %3027 = vmatprep.mubr.msk.bf16.mxu0 %vm3197_vm1, %v3196_v14 }
0x15a7   :  { %v2048_v49 = vpack.c.bf16 %v2046_v33, %v2046_v33  ;;  %3037 = vmatprep.subr.bf16.mxu0 %v3196_v14 }
0x15a9   :  { %3022 = vmatmul.mubr.msk.bf16.vlgmr.msra.gmra.mrb[64].mxu1 %vm295_vm6, %v2048_v49 }
0x15aa   :  { %3032 = vmatpush3.bf16.xpose.msra.mxu1 %v2213_v34  ;;  %3033 = vmatprep.mubr.msk.bf16.mxu1 %vm3197_vm1, %v3196_v14 }
0x15ab   :  { %3043 = vmatprep.subr.bf16.mxu1 %v3196_v14 }
0x15ad   :  { %3028 = vmatmul.mubr.msk.bf16.vlgmr.msra.gmra.mrb[60].mxu0 %vm295_vm6, %v2156_v35 }
0x15ae   :  { %3039 = vmatprep.mubr.msk.bf16.mxu0 %vm3197_vm1, %v3196_v14 }
0x15b1   :  { %3034 = vmatmul.mubr.msk.bf16.vlgmr.msra.gmra.mrb[68].mxu1 %vm295_vm6, %v2206_v36 }
0x15b2   :  { %3045 = vmatprep.mubr.msk.bf16.mxu1 %vm3197_vm1, %v3196_v14 }
0x1678   :  { %v2091_v37 = vpop.f32.mrb[56].mxu0 }
0x1679   :  { %v3017_v38 = vpop.f32.mrb[57].mxu0 }
0x167a   :  { %v2094_v39 = vpop.f32.mrb[58].mxu0 }
0x167b   :  { %v3018_v40 = vpop.f32.mrb[59].mxu0 }
0x167c   :  { %v2139_v41 = vpop.f32.mrb[64].mxu1 }
0x167d   :  { %v3023_v42 = vpop.f32.mrb[65].mxu1 }
0x167e   :  { %v2142_v59 = vpop.f32.mrb[66].mxu1 }
0x167f   :  { %v3024_v43 = vpop.f32.mrb[67].mxu1 }
0x1680   :  { %v2199_v44 = vpop.f32.mrb[60].mxu0 }
0x1681   :  { %v2200_v46 = vadd.f32 %v2199_v44, %v3669_v16  ;;  %v3029_v47 = vpop.f32.mrb[61].mxu0 }
0x1682   :  { %v2202_v48 = vpop.f32.mrb[62].mxu0 }
0x1683   :  { %v3030_v53 = vpop.f32.mrb[63].mxu0  ;;  %v2255_v55 = vsel %vm295_vm6, %v2200_v46, -inf }
0x1684   :  { %2256 = vmax.xlane.f32.xlu1 %v2255_v55  ;;  %v2249_v58 = vpop.f32.mrb[68].mxu1 }
0x1685   :  { %v2250_v61 = vadd.f32 %v2249_v58, %v3672_v19  ;;  %v3035_v2 = vpop.f32.mrb[69].mxu1 }
0x1686   :  { %v2252_v3 = vpop.f32.mrb[70].mxu1 }
0x1687   :  { %v3036_v4 = vpop.f32.mrb[71].mxu1  ;;  %v2258_v0 = vsel %vm295_vm6, %v2250_v61, -inf }
0x1688   :  { %2259 = vmax.xlane.f32.xlu0 %v2258_v0  ;;  %v3102_v0 = vld [vmem:[%s3919_s18] sm:$0xff]  }
0x1695   :  { %2279 = vrot.lane.b32.xlu1 %v3637_v51, %s3207_s5 }
0x1699   :  { %1917 = vrot.lane.b32.xlu1 %v3752_v45, %s3210_s28 }
0x169d   :  { %1919 = vrot.lane.b32.xlu1 %v3754_v50, %s3210_s28 }
0x16a1   :  { %2147 = vrot.lane.b32.xlu1 %v2091_v37, %s3211_s23  ;;  %v2722_v37 = vld [vmem:[%s3918_s15] ss:$0 sm:$0xff] }
0x1711   :  { %v2257_v16 = vpop.xlane.xlu1 %2256 }
0x1712   :  { %v2261_v1 = vsub.f32 %v2200_v46, %v2257_v16  ;;  %v3103_v16 = vld [vmem:[%s3919_s18 + $0x8] sm:$0xff]  }
0x1714   :  { %v2263_v19 = vmul.f32 1.442695, %v2261_v1  ;;  %v3104_v1 = vld [vmem:[%s3920_s20] sm:$0xff]  }
0x1715   :  { %v2280_v6 = vpop.permute.xlu1 %2279  ;;  %v2260_v8 = vpop.xlane.xlu0 %2259 }
0x1716   :  { %3180 = vpow2.f32 %v2263_v19  ;;  %v2285_v10 = vsel %vm420_vm9, %v2280_v6, 0  ;;  %v2262_v12 = vsub.f32 %v2250_v61, %v2260_v8  ;;  %v3105_v19 = vld [vmem:[%s3920_s20 + $0x8] sm:$0xff]  }
0x1717   :  { %3038 = vmatpush3.bf16.msra.mxu0 %v2285_v10 }
0x1718   :  { %v2265_v17 = vmul.f32 1.442695, %v2262_v12  ;;  %3049 = vmatprep.subr.bf16.mxu0 %v3196_v14 }
0x1719   :  { %v1918_v51 = vpop.permute.xlu1 %1917 }
0x171a   :  { %3182 = vpow2.f32 %v2265_v17  ;;  %1923 = vst.msk [vmem:[#allocation2] sm:$0xff] %vm744_vm10, %v1918_v51 }
0x171d   :  { %v1920_v45 = vpop.permute.xlu1 %1919 }
0x171e   :  { %1924 = vst.msk [vmem:[#allocation2 + $0x8] sm:$0xff] %vm744_vm10, %v1920_v45 }
0x1720   :  { %v3181_v50 = vpop.eup %3180 }
0x1721   :  { %v2148_v18 = vpop.permute.xlu1 %2147  ;;  %v2267_v13 = vsel %vm295_vm6, %v3181_v50, 0.0 }
0x1722   :  { %2153 = vst.msk [vmem:[#allocation2] sm:$0xff] %vm975_vm11, %v2148_v18  ;;  %2268 = vadd.xlane.f32.xlu0 %v2267_v13 }
0x1724   :  { %v3183_v15 = vpop.eup %3182 }
0x1725   :  { %v2270_v20 = vsel %vm295_vm6, %v3183_v15, 0.0 }
0x1726   :  { %2271 = vadd.xlane.f32.xlu0 %v2270_v20 }
0x173c   :  { %2327 = vrot.lane.b32.xlu0 %v3639_v54, %s3207_s5 }
0x1740   :  { %2149 = vrot.lane.b32.xlu0 %v2139_v41, %s3211_s23 }
0x17af   :  { %v2269_v52 = vpop.xlane.xlu0 %2268 }
0x17b0   :  { %3184 = vrcp.f32 %v2269_v52 }
0x17b3   :  { %v2272_v56 = vpop.xlane.xlu0 %2271 }
0x17b4   :  { %3186 = vrcp.f32 %v2272_v56 }
0x17b7   :  { %v2328_v62 = vpop.permute.xlu0 %2327 }
0x17b8   :  { %v2333_v21 = vsel %vm420_vm9, %v2328_v62, 0 }
0x17b9   :  { %3044 = vmatpush3.bf16.msra.mxu1 %v2333_v21 }
0x17ba   :  { %v3185_v22 = vpop.eup %3184  ;;  %3057 = vmatprep.subr.bf16.mxu1 %v3196_v14 }
0x17bb   :  { %v2275_v23 = vmul.f32 %v3185_v22, %v3181_v50  ;;  %v2150_v24 = vpop.permute.xlu0 %2149  ;;  %v2726_v22 = vld [vmem:[%s3921_s16] ss:$0 sm:$0xff] }
0x17bc   :  { %2154 = vst.msk [vmem:[#allocation2 + $0x8] sm:$0xff] %vm975_vm11, %v2150_v24 }
0x17bd   :  { %v2277_v25 = vpack.c.bf16 %v2275_v23, %v2275_v23 }
0x17be   :  { %v3187_v7 = vpop.eup %3186 }
0x17bf   :  { %v2276_v54 = vmul.f32 %v3187_v7, %v3183_v15  ;;  %3040 = vmatmul.mubr.msk.bf16.vlgmr.msra.gmra.mrb[64].mxu0 %vm295_vm6, %v2277_v25 }
0x17c0   :  { %3053 = vmatprep.mubr.msk.bf16.mxu0 %vm3197_vm1, %v3196_v14  ;;  %3050 = vmatpush3.bf16.msra.mxu0 %v3100_v26 }
0x17c1   :  { %v2278_v5 = vpack.c.bf16 %v2276_v54, %v2276_v54  ;;  %3051 = vmatprep.subr.bf16.mxu0 %v3196_v14 }
0x17c3   :  { %3046 = vmatmul.mubr.msk.bf16.vlgmr.msra.gmra.mrb[72].mxu1 %vm295_vm6, %v2278_v5  ;;  %v2727_v5 = vld [vmem:[%s3922_s17] ss:$0 sm:$0xff] }
0x17c4   :  { %3061 = vmatprep.mubr.msk.bf16.mxu1 %vm3197_vm1, %v3196_v14  ;;  %3052 = vmatpush3.bf16.msra.mxu0 %v3101_v27 }
0x17c5   :  { %3065 = vmatprep.subr.bf16.mxu0 %v3196_v14  ;;  %3058 = vmatpush3.bf16.msra.mxu1 %v3102_v0 }
0x17c6   :  { %3059 = vmatprep.subr.bf16.mxu1 %v3196_v14 }
0x17c9   :  { %3060 = vmatpush3.bf16.msra.mxu1 %v3103_v16 }
0x1892   :  { %v2321_v11 = vpop.f32.mrb[64].mxu0 }
0x1893   :  { %2377 = vrot.lane.b32.xlu1 %v2321_v11, %s3212_s27  ;;  %v3041_v28 = vpop.f32.mrb[65].mxu0 }
0x1894   :  { %v2324_v29 = vpop.f32.mrb[66].mxu0 }
0x1895   :  { %v3042_v30 = vpop.f32.mrb[67].mxu0  ;;  %v3106_v29 = vld [vmem:[%s3920_s20 + $0x10] sm:$0xff]  }
0x1896   :  { %v2369_v31 = vpop.f32.mrb[72].mxu1  ;;  %v3107_v30 = vld [vmem:[%s3920_s20 + $0x18] sm:$0xff]  }
0x1897   :  { %2379 = vrot.lane.b32.xlu0 %v2369_v31, %s3212_s27  ;;  %v3047_v60 = vpop.f32.mrb[73].mxu1  ;;  %v2728_v31 = vld [vmem:[%s3923_s19] ss:$0 sm:$0xff] }
0x1898   :  { %v2372_v32 = vpop.f32.mrb[74].mxu1 }
0x1899   :  { %v3048_v33 = vpop.f32.mrb[75].mxu1 }
0x1905   :  { %v2378_v9 = vpop.permute.xlu1 %2377 }
0x1906   :  { %2383 = vst.msk [vmem:[#allocation2] sm:$0xff] %vm1206_vm12, %v2378_v9 }
0x1909   :  { %v2380_v49 = vpop.permute.xlu0 %2379 }
0x190a   :  { %2384 = vst.msk [vmem:[#allocation2 + $0x8] sm:$0xff] %vm1206_vm12, %v2380_v49 }
0x190d   :  { %v2385_v34 = vld [vmem:[#allocation2] sm:$0xff] }
0x1911   :  { %v2386_v35 = vld [vmem:[#allocation2 + $0x8] sm:$0xff] }
0x1912   :  { %v2387_v36 = vpack.c.bf16 %v2386_v35, %v2385_v34 }
0x1914   :  { %3054 = vmatmul.mubr.msk.bf16.vlgmr.msra.gmra.mrb[68].mxu0 %vm154_vm0, %v2387_v36 }
0x1915   :  { %3073 = vmatprep.mubr.msk.bf16.mxu0 %vm3197_vm1, %v3196_v14  ;;  %3066 = vmatpush3.bf16.msra.mxu0 %v3104_v1 }
0x1916   :  { %3067 = vmatprep.subr.bf16.mxu0 %v3196_v14 }
0x1919   :  { %3068 = vmatpush3.bf16.msra.mxu0 %v3105_v19 }
0x191a   :  { %3069 = vmatprep.subr.bf16.mxu0 %v3196_v14 }
0x191d   :  { %3070 = vmatpush3.bf16.msra.mxu0 %v3106_v29 }
0x191e   :  { %3071 = vmatprep.subr.bf16.mxu0 %v3196_v14  ;;  %v2732_v14 = vld [vmem:[%s3924_s21] ss:$0 sm:$0xff] }
0x1921   :  { %3072 = vmatpush3.bf16.msra.mxu0 %v3107_v30 }
0x19e7   :  { %v2443_v38 = vpop.f32.mrb[68].mxu0 }
0x19e8   :  { %v2444_v39 = vadd.f32 %v2722_v37, %v2443_v38  ;;  %v3055_v40 = vpop.f32.mrb[69].mxu0 }
0x19e9   :  { %v2446_v41 = vpop.f32.mrb[70].mxu0 }
0x19ea   :  { %v3843_v42 = vadd.f32 %v2444_v39, %v3587_v57  ;;  %v2447_v59 = vadd.f32 %v2722_v37, %v2446_v41  ;;  %v3056_v43 = vpop.f32.mrb[71].mxu0 }
0x19ec   :  { %v3846_v44 = vadd.f32 %v2447_v59, %v3590_v63  ;;  %v2468_v46 = vsel %vm154_vm0, %v3843_v42, 0.0 }
0x19ed   :  { %2469 = vadd.xlane.f32.xlu1 %v2468_v46 }
0x19ee   :  { %v2471_v47 = vsel %vm154_vm0, %v3846_v44, 0.0 }
0x19ef   :  { %2472 = vadd.xlane.f32.xlu0 %v2471_v47 }
0x1a7a   :  { %v2470_v48 = vpop.xlane.xlu1 %2469 }
0x1a7b   :  { %v2474_v53 = vmul.f32 0.03125, %v2470_v48 }
0x1a7c   :  { %v2473_v55 = vpop.xlane.xlu0 %2472 }
0x1a7d   :  { %v2476_v58 = vsub.f32 %v3843_v42, %v2474_v53  ;;  %v2475_v57 = vmul.f32 0.03125, %v2473_v55 }
0x1a7f   :  { %v2477_v61 = vsub.f32 %v3846_v44, %v2475_v57  ;;  %v2478_v2 = vmul.f32 %v2476_v58, %v2476_v58  ;;  %v2494_v24 = vmul.f32 %v2726_v22, %v2476_v58 }
0x1a81   :  { %v2480_v63 = vsel %vm154_vm0, %v2478_v2, 0.0  ;;  %v2479_v3 = vmul.f32 %v2477_v61, %v2477_v61  ;;  %v2495_v25 = vmul.f32 %v2726_v22, %v2477_v61 }
0x1a82   :  { %2481 = vadd.xlane.f32.xlu0 %v2480_v63 }
0x1a83   :  { %v2483_v4 = vsel %vm154_vm0, %v2479_v3, 0.0 }
0x1a86   :  { %2484 = vadd.xlane.f32.xlu0 %v2483_v4 }
0x1b0f   :  { %v2482_v6 = vpop.xlane.xlu0 %2481 }
0x1b10   :  { %v2486_v8 = vmul.f32 0.032258064, %v2482_v6 }
0x1b12   :  { %3188 = vrsqrt.f32 %v2486_v8  ;;  %vm2498_vm1 = vcmp.eq.f32.partialorder %v2486_v8, inf  ;;  %v2501_v45 = vand.u32 2147483648, %v2486_v8  ;;  %vm2500_vm4 = vcmp.eq.f32.partialorder %v2486_v8, 0.0 }
0x1b13   :  { %v2485_v10 = vpop.xlane.xlu0 %2484 }
0x1b14   :  { %v2487_v12 = vmul.f32 0.032258064, %v2485_v10 }
0x1b16   :  { %3190 = vrsqrt.f32 %v2487_v12  ;;  %vm2505_vm5 = vcmp.eq.f32.partialorder %v2487_v12, inf  ;;  %v2508_v52 = vand.u32 2147483648, %v2487_v12  ;;  %vm2507_vm6 = vcmp.eq.f32.partialorder %v2487_v12, 0.0 }
0x1b1c   :  { %v3189_v17 = vpop.eup %3188 }
0x1b1d   :  { %v2497_v51 = vmul.f32 %v3189_v17, %v2486_v8 }
0x1b1f   :  { %v2499_v50 = vsel %vm2498_vm1, %v2486_v8, %v2497_v51 }
0x1b20   :  { %v3191_v18 = vpop.eup %3190  ;;  %v2502_v13 = vsel %vm2500_vm4, %v2501_v45, %v2499_v50 }
0x1b21   :  { %v2510_v15 = vadd.f32 1e-06, %v2502_v13  ;;  %v2504_v20 = vmul.f32 %v3191_v18, %v2487_v12 }
0x1b23   :  { %3192 = vrcp.f32 %v2510_v15  ;;  %v2506_v56 = vsel %vm2505_vm5, %v2487_v12, %v2504_v20 }
0x1b24   :  { %v2509_v62 = vsel %vm2507_vm6, %v2508_v52, %v2506_v56 }
0x1b25   :  { %v2511_v21 = vadd.f32 1e-06, %v2509_v62 }
0x1b27   :  { %3194 = vrcp.f32 %v2511_v21 }
0x1b2d   :  { %v3193_v23 = vpop.eup %3192 }
0x1b2e   :  { %v2513_v7 = vmul.f32 %v3193_v23, %v2494_v24 }
0x1b30   :  { %v2522_v27 = vadd.f32 %v2727_v5, %v2513_v7 }
0x1b31   :  { %v3195_v54 = vpop.eup %3194 }
0x1b32   :  { %v2515_v26 = vmul.f32 %v3195_v54, %v2495_v25 }
0x1b34   :  { %v2523_v11 = vadd.f32 %v2727_v5, %v2515_v26 }
0x1b36   :  { %v2524_v28 = vpack.c.bf16 %v2523_v11, %v2522_v27 }
0x1b38   :  { %3062 = vmatmul.mubr.msk.bf16.vlgmr.msra.gmra.mrb[76].mxu1 %vm154_vm0, %v2524_v28 }
0x1c0b   :  { %v2580_v60 = vpop.f32.mrb[76].mxu1 }
0x1c0c   :  { %v2581_v32 = vadd.f32 %v2728_v31, %v2580_v60  ;;  %v3063_v33 = vpop.f32.mrb[77].mxu1 }
0x1c0d   :  { %v2583_v9 = vpop.f32.mrb[78].mxu1 }
0x1c0e   :  { %v2584_v49 = vadd.f32 %v2728_v31, %v2583_v9  ;;  %v3064_v34 = vpop.f32.mrb[79].mxu1  ;;  %v2587_v35 = vmax.f32 %v2581_v32, 0.0 }
0x1c10   :  { %v2588_v36 = vmax.f32 %v2584_v49, 0.0 }
0x1c12   :  { %v2589_v37 = vpack.c.bf16 %v2588_v36, %v2587_v35 }
0x1c14   :  { %3074 = vmatmul.mubr.msk.bf16.vlgmr.msra.gmra.mrb[72].mxu0 %vm2620_vm7, %v2589_v37 }
0x1ce7   :  { %v2658_v38 = vpop.f32.mrb[72].mxu0 }
0x1ce8   :  { %v2659_v39 = vadd.f32 %v2732_v14, %v2658_v38  ;;  %v3075_v40 = vpop.f32.mrb[73].mxu0 }
0x1ce9   :  { %v2661_v41 = vpop.f32.mrb[74].mxu0 }
0x1cea   :  { %v2665_v59 = vadd.f32 %v2659_v39, %v3843_v42  ;;  %v2662_v43 = vadd.f32 %v2732_v14, %v2661_v41  ;;  %v3076_v46 = vpop.f32.mrb[75].mxu0 }
0x1cec   :  { %2667 = vst.msk [vmem:[%s3925_s24] sm:$0xff] %vm154_vm0, %v2665_v59  ;;  %v2666_v47 = vadd.f32 %v2662_v43, %v3846_v44 }
0x1cee   :  { %2668 = vst.msk [vmem:[%s3925_s24 + $0x8] sm:$0xff] %vm154_vm0, %v2666_v47 }

// kernel: encoder_decoder_forward.7
= control target key start
LH: loop header
LB: loop body
LE: loop exit
PB: predicated region body
PF: predicated region fallthrough
CT: control target
= control target key end

     0   :  { %s4027_s0 = inlined_call_operand.vmem [shape: f32[2,8,32], index: 0, kind: input, shape index: {}]   ;;  %s4028_s1 = inlined_call_operand.vmem [shape: f32[2,8,32], index: 1, kind: input, shape index: {}]   ;;  %s4029_s2 = inlined_call_operand.vmem [shape: f32[2,8], index: 2, kind: input, shape index: {}]   ;;  %s4030_s3 = inlined_call_operand.vmem [shape: f32[2,8], index: 3, kind: input, shape index: {}]   ;;  %s4031_s4 = inlined_call_operand.vmem [shape: f32[1,32], index: 4, kind: input, shape index: {}]   ;;  %s4032_s5 = inlined_call_operand.vmem [shape: f32[1,32], index: 5, kind: input, shape index: {}]   ;;  %s4033_s6 = inlined_call_operand.vmem [shape: bf16[32,96], index: 6, kind: input, shape index: {}]   ;;  %s4034_s7 = inlined_call_operand.vmem [shape: f32[1,96], index: 7, kind: input, shape index: {}]   ;;  %s4035_s8 = inlined_call_operand.vmem [shape: bf16[32,32], index: 8, kind: input, shape index: {}]   ;;  %s4036_s9 = inlined_call_operand.vmem [shape: f32[1,32], index: 9, kind: input, shape index: {}]   ;;  %s4037_s10 = inlined_call_operand.vmem [shape: f32[1,32], index: 10, kind: input, shape index: {}]   ;;  %s4038_s11 = inlined_call_operand.vmem [shape: f32[1,32], index: 11, kind: input, shape index: {}]   ;;  %s4039_s12 = inlined_call_operand.vmem [shape: bf16[32,96], index: 12, kind: input, shape index: {}]   ;;  %s4040_s13 = inlined_call_operand.vmem [shape: f32[1,96], index: 13, kind: input, shape index: {}]   ;;  %s4041_s14 = inlined_call_operand.vmem [shape: bf16[32,32], index: 14, kind: input, shape index: {}]   ;;  %s4042_s15 = inlined_call_operand.vmem [shape: f32[1,32], index: 15, kind: input, shape index: {}]   ;;  %s4043_s16 = inlined_call_operand.vmem [shape: f32[1,32], index: 16, kind: input, shape index: {}]   ;;  %s4044_s17 = inlined_call_operand.vmem [shape: f32[1,32], index: 17, kind: input, shape index: {}]   ;;  %s4045_s18 = inlined_call_operand.vmem [shape: bf16[32,64], index: 18, kind: input, shape index: {}]   ;;  %s4046_s19 = inlined_call_operand.vmem [shape: f32[1,64], index: 19, kind: input, shape index: {}]   ;;  %s4047_s20 = inlined_call_operand.vmem [shape: bf16[64,32], index: 20, kind: input, shape index: {}]   ;;  %s4048_s21 = inlined_call_operand.vmem [shape: f32[1,32], index: 21, kind: input, shape index: {}]   ;;  %s4049_s22 = inlined_call_operand.vmem [shape: f32[1,32], index: 22, kind: input, shape index: {}]   ;;  %s4050_s23 = inlined_call_operand.vmem [shape: f32[1,32], index: 23, kind: input, shape index: {}]   ;;  %s4051_s24 = inlined_call_operand.hbm [shape: f32[2,8,32], index: 24, kind: output, shape index: {}]  }
   0x1   :  { %4056 = sst [smem:[#allocation6_spill]] %s4027_s0 }
   0x2   :  { %4057 = sst [smem:[#allocation7_spill]] %s4028_s1 }
   0x3   :  { %4058 = sst [smem:[#allocation8_spill]] %s4029_s2 }
   0x4   :  { %4059 = sst [smem:[#allocation9_spill]] %s4030_s3 }
   0x5   :  { %4060 = sst [smem:[#allocation10_spill]] %s4031_s4 }
   0x6   :  { %4061 = sst [smem:[#allocation11_spill]] %s4032_s5 }
   0x7   :  { %4062 = sst [smem:[#allocation12_spill]] %s4033_s6 }
   0x8   :  { %4063 = sst [smem:[#allocation13_spill]] %s4034_s7 }
   0x9   :  { %4064 = sst [smem:[#allocation14_spill]] %s4035_s8 }
   0xa   :  { %s4065_s27 = sld [smem:[#allocation6_spill]]  ;;  %vm155_vm0 = vcmask 261120  }
  0x10   :  { %v3450_v0 = vld [vmem:[%s4065_s27] sm:$0xff]  ;;  %v3455_v1 = vld [vmem:[%s4065_s27 + $0x8] sm:$0xff] }
  0x11   :  { %v156_v2 = vsel %vm155_vm0, %v3450_v0, 0.0  ;;  %v159_v3 = vsel %vm155_vm0, %v3455_v1, 0.0 }
  0x12   :  { %157 = vadd.xlane.f32.xlu0 %v156_v2 }
  0x16   :  { %160 = vadd.xlane.f32.xlu0 %v159_v3 }
  0x17   :  { %29 = vsyncpa [#allocation4], 0  ;;  %s4066_s0 = sld [smem:[#allocation12_spill]]  ;;  %v3303_v15 = vmov 0.0   ;;  %vm3304_vm1 = vmmov 0   ;;  %s4067_s8 = sld [smem:[#allocation10_spill]]  ;;  %v90_v63 = vlaneseq }
  0x18   :  { %2898 = vmatprep.subr.bf16.mxu1 %v3303_v15  ;;  %2902 = vmatprep.mubr.msk.bf16.mxu1 %vm3304_vm1, %v3303_v15  ;;  %s4068_s5 = sld [smem:[#allocation11_spill]]  ;;  %s4069_s28 = sld [smem:[#allocation13_spill]]  ;;  %vm296_vm6 = vcmask 64512   ;;  %v3306_v61 = vmov 1966171168   ;;  %vm421_vm9 = vcmask 1043456  }
  0x19   :  { %2912 = vmatprep.subr.bf16.mxu0 %v3303_v15  ;;  %2914 = vmatprep.mubr.msk.bf16.mxu0 %vm3304_vm1, %v3303_v15  ;;  %s3305_s6 = smov 96   ;;  %v88_v62 = vunpack.c.l.s4 %v3306_v61  ;;  %s3307_s7 = smov 64   ;;  %vm745_vm10 = vcmask 130112   ;;  %vm976_vm11 = vcmask 195712   ;;  %vm1207_vm12 = vcmask 261312  }
  0x1a   :  { %s3308_s30 = smov 88   ;;  %s3309_s3 = smov 120  }
  0x1b   :  { %v89_v3 = vunpack.c.0.s8 %v88_v62  ;;  %s3310_s25 = smov 56   ;;  %s3312_s4 = smov 112  }
  0x1c   :  { %s3313_s1 = smov 48   ;;  %s3315_s26 = smov 104  }
  0x1d   :  { %v3169_v14 = vld [vmem:[%s4066_s0] sm:$0xff]   ;;  %v3170_v16 = vld [vmem:[%s4066_s0 + $0x8] sm:$0xff]   ;;  %s4070_s0 = sld [smem:[#allocation9_spill]]  ;;  %s3316_s27 = smov 40  }
  0x1e   :  { %2899 = vmatpush3.bf16.msra.mxu1 %v3169_v14  ;;  %v2744_v33 = vld [vmem:[%s4067_s8] ss:$0 sm:$0xff]  ;;  %s3311_s8 = smov 80   ;;  %s3318_s2 = smov 16  }
  0x1f   :  { %2900 = vmatprep.subr.bf16.mxu1 %v3303_v15  ;;  %v2745_v39 = vld [vmem:[%s4068_s5] ss:$0 sm:$0xff]  ;;  %s3314_s5 = smov 72  }
  0x20   :  { %v2746_v44 = vld [vmem:[%s4069_s28] ss:$0 sm:$0xff]  ;;  %s3317_s28 = smov 8  }
  0x22   :  { %2901 = vmatpush3.bf16.msra.mxu1 %v3170_v16 }
  0x23   :  { %2906 = vmatprep.subr.bf16.mxu1 %v3303_v15  ;;  %v83_v2 = vld [vmem:[%s4070_s0] sm:$0x3] }
  0x24   :  { %vm84_vm7 = vcmp.eq.f32.partialorder %v83_v2, 0.0 }
  0x9f   :  { %v158_v4 = vpop.xlane.xlu0 %157 }
  0xa0   :  { %v163_v5 = vmul.f32 0.03125, %v158_v4  ;;  %v91_v4 = vshrl.u32 %v90_v63, 7 }
  0xa2   :  { %v165_v6 = vsub.f32 %v3450_v0, %v163_v5  ;;  %v3518_v5 = vsub.s32 %v89_v3, %v91_v4 }
  0xa3   :  { %v161_v7 = vpop.xlane.xlu0 %160 }
  0xa4   :  { %v164_v8 = vmul.f32 0.03125, %v161_v7  ;;  %v167_v9 = vmul.f32 %v165_v6, %v165_v6  ;;  %v184_v35 = vmul.f32 %v2744_v33, %v165_v6  ;;  %v85_v6 = vsel %vm84_vm7, -1e+09, %v3303_v15 }
  0xa5   :  { %v93_v7 = vrot.slane %v85_v6, %v3518_v5  ;;  %vm2621_vm7 = vcmask 523264  }
  0xa6   :  { %v166_v10 = vsub.f32 %v3455_v1, %v164_v8  ;;  %v169_v11 = vsel %vm155_vm0, %v167_v9, 0.0  ;;  %v112_v8 = vand.u32 127, %v90_v63 }
  0xa7   :  { %170 = vadd.xlane.f32.xlu1 %v169_v11  ;;  %v94_v9 = vcombine.high %v93_v7, %v93_v7  ;;  %v3523_v11 = vsub.s32 0, %v91_v4 }
  0xa8   :  { %v168_v12 = vmul.f32 %v166_v10, %v166_v10  ;;  %v185_v36 = vmul.f32 %v2744_v33, %v166_v10  ;;  %v101_v10 = vrot.slane %v93_v7, %v3518_v5  ;;  %vm113_vm8 = vcmp.gt.s32.totalorder %v112_v8, %v91_v4 }
  0xa9   :  { %v114_v14 = vsel %vm113_vm8, -1e+09, %v3303_v15 }
  0xaa   :  { %v172_v13 = vsel %vm155_vm0, %v168_v12, 0.0  ;;  %v108_v12 = vrot.slane %v94_v9, %v3518_v5 }
  0xab   :  { %173 = vadd.xlane.f32.xlu1 %v172_v13  ;;  %v118_v13 = vrot.slane %v101_v10, %v3523_v11 }
  0xac   :  { %v122_v16 = vrot.slane %v108_v12, %v3523_v11 }
 0x134   :  { %v171_v17 = vpop.xlane.xlu1 %170 }
 0x135   :  { %v176_v18 = vmul.f32 0.032258064, %v171_v17  ;;  %v3529_v17 = vadd.f32 %v118_v13, %v114_v14 }
 0x137   :  { %3183 = vrsqrt.f32 %v176_v18  ;;  %vm188_vm2 = vcmp.eq.f32.partialorder %v176_v18, inf  ;;  %v191_v23 = vand.u32 2147483648, %v176_v18  ;;  %vm190_vm3 = vcmp.eq.f32.partialorder %v176_v18, 0.0 }
 0x138   :  { %v174_v19 = vpop.xlane.xlu1 %173 }
 0x139   :  { %v177_v20 = vmul.f32 0.032258064, %v174_v19 }
 0x13b   :  { %3185 = vrsqrt.f32 %v177_v20  ;;  %vm195_vm4 = vcmp.eq.f32.partialorder %v177_v20, inf  ;;  %v198_v29 = vand.u32 2147483648, %v177_v20  ;;  %vm197_vm5 = vcmp.eq.f32.partialorder %v177_v20, 0.0 }
 0x141   :  { %v3184_v21 = vpop.eup %3183 }
 0x142   :  { %v187_v22 = vmul.f32 %v3184_v21, %v176_v18 }
 0x144   :  { %v189_v24 = vsel %vm188_vm2, %v176_v18, %v187_v22  ;;  %v3531_v18 = vadd.f32 %v122_v16, %v114_v14 }
 0x145   :  { %v3186_v25 = vpop.eup %3185  ;;  %v192_v26 = vsel %vm190_vm3, %v191_v23, %v189_v24 }
 0x146   :  { %v200_v27 = vadd.f32 1e-06, %v192_v26  ;;  %v194_v28 = vmul.f32 %v3186_v25, %v177_v20 }
 0x148   :  { %v196_v30 = vsel %vm195_vm4, %v177_v20, %v194_v28  ;;  %3187 = vrcp.f32 %v200_v27 }
 0x149   :  { %v199_v31 = vsel %vm197_vm5, %v198_v29, %v196_v30 }
 0x14a   :  { %v201_v32 = vadd.f32 1e-06, %v199_v31 }
 0x14c   :  { %3189 = vrcp.f32 %v201_v32 }
 0x152   :  { %v3188_v34 = vpop.eup %3187 }
 0x153   :  { %v203_v37 = vmul.f32 %v3188_v34, %v184_v35 }
 0x155   :  { %v212_v41 = vadd.f32 %v2745_v39, %v203_v37 }
 0x156   :  { %v3190_v38 = vpop.eup %3189 }
 0x157   :  { %v205_v40 = vmul.f32 %v3190_v38, %v185_v36 }
 0x159   :  { %v213_v42 = vadd.f32 %v2745_v39, %v205_v40 }
 0x15b   :  { %v224_v43 = vpack.c.bf16 %v213_v42, %v212_v41 }
 0x15d   :  { %2903 = vmatmul.mubr.msk.bf16.vlgmr.msra.gmra.mrb[0].mxu1 %vm155_vm0, %v224_v43 }
 0x15e   :  { %2908 = vmatprep.mubr.msk.bf16.mxu1 %vm3304_vm1, %v3303_v15 }
 0x230   :  { %v280_v45 = vpop.f32.mrb[0].mxu1 }
 0x231   :  { %v281_v46 = vadd.f32 %v2746_v44, %v280_v45  ;;  %v2904_v47 = vpop.f32.mrb[1].mxu1 }
 0x232   :  { %v283_v48 = vpop.f32.mrb[2].mxu1 }
 0x233   :  { %v3491_v49 = vpack.c.bf16 %v281_v46, %v281_v46  ;;  %v284_v50 = vadd.f32 %v2746_v44, %v283_v48  ;;  %v2905_v51 = vpop.f32.mrb[3].mxu1  ;;  %v287_v56 = vmul.f32 0.35355338, %v281_v46 }
 0x235   :  { %v3493_v52 = vpack.c.bf16 %v284_v50, %v284_v50  ;;  %294 = vrot.lane.b32.xlu0 %v3491_v49, %s3305_s6  ;;  %v288_v58 = vmul.f32 0.35355338, %v284_v50  ;;  %v3503_v59 = vpack.c.bf16 %v287_v56, %v287_v56 }
 0x237   :  { %344 = vrot.lane.b32.xlu1 %v3493_v52, %s3305_s6  ;;  %v3505_v60 = vpack.c.bf16 %v288_v58, %v288_v58 }
 0x2a7   :  { %v295_v53 = vpop.permute.xlu0 %294 }
 0x2a8   :  { %v301_v54 = vsel %vm296_vm6, %v295_v53, 0 }
 0x2a9   :  { %2907 = vmatpush3.bf16.xpose.msra.mxu1 %v301_v54  ;;  %v345_v55 = vpop.permute.xlu1 %344 }
 0x2aa   :  { %v350_v57 = vsel %vm296_vm6, %v345_v55, 0  ;;  %2918 = vmatprep.subr.bf16.mxu1 %v3303_v15 }
 0x2ab   :  { %2913 = vmatpush3.bf16.xpose.msra.mxu0 %v350_v57 }
 0x2ac   :  { %2924 = vmatprep.subr.bf16.mxu0 %v3303_v15 }
 0x2b0   :  { %2909 = vmatmul.mubr.msk.bf16.vlgmr.msra.gmra.mrb[4].mxu1 %vm296_vm6, %v3503_v59 }
 0x2b1   :  { %2920 = vmatprep.mubr.msk.bf16.mxu1 %vm3304_vm1, %v3303_v15 }
 0x2b2   :  { %2915 = vmatmul.mubr.msk.bf16.vlgmr.msra.gmra.mrb[0].mxu0 %vm296_vm6, %v3505_v60 }
 0x2b3   :  { %2926 = vmatprep.mubr.msk.bf16.mxu0 %vm3304_vm1, %v3303_v15 }
 0x383   :  { %v337_v19 = vpop.f32.mrb[4].mxu1 }
 0x384   :  { %v338_v20 = vadd.f32 %v337_v19, %v3529_v17  ;;  %v2910_v21 = vpop.f32.mrb[5].mxu1 }
 0x385   :  { %v340_v22 = vpop.f32.mrb[6].mxu1  ;;  %v386_v23 = vpop.f32.mrb[0].mxu0 }
 0x386   :  { %v387_v24 = vadd.f32 %v386_v23, %v3531_v18  ;;  %v2911_v25 = vpop.f32.mrb[7].mxu1  ;;  %v2916_v26 = vpop.f32.mrb[1].mxu0  ;;  %v392_v27 = vsel %vm296_vm6, %v338_v20, -inf }
 0x387   :  { %v389_v28 = vpop.f32.mrb[2].mxu0  ;;  %393 = vmax.xlane.f32.xlu1 %v392_v27 }
 0x388   :  { %v2917_v29 = vpop.f32.mrb[3].mxu0  ;;  %v395_v30 = vsel %vm296_vm6, %v387_v24, -inf }
 0x389   :  { %396 = vmax.xlane.f32.xlu0 %v395_v30 }
 0x398   :  { %465 = vrot.lane.b32.xlu1 %v3493_v52, %s3307_s7 }
 0x39c   :  { %518 = vrot.lane.b32.xlu1 %v3491_v49, %s3308_s30 }
 0x414   :  { %v394_v31 = vpop.xlane.xlu1 %393 }
 0x415   :  { %v398_v32 = vsub.f32 %v338_v20, %v394_v31 }
 0x416   :  { %v397_v33 = vpop.xlane.xlu0 %396 }
 0x417   :  { %v400_v34 = vmul.f32 1.442695, %v398_v32  ;;  %v399_v35 = vsub.f32 %v387_v24, %v397_v33 }
 0x418   :  { %v466_v36 = vpop.permute.xlu1 %465 }
 0x419   :  { %3191 = vpow2.f32 %v400_v34  ;;  %v402_v37 = vmul.f32 1.442695, %v399_v35  ;;  %v471_v38 = vsel %vm421_vm9, %v466_v36, 0 }
 0x41a   :  { %2925 = vmatpush3.bf16.msra.mxu0 %v471_v38 }
 0x41b   :  { %3193 = vpow2.f32 %v402_v37  ;;  %2936 = vmatprep.subr.bf16.mxu0 %v3303_v15 }
 0x41c   :  { %v519_v43 = vpop.permute.xlu1 %518 }
 0x41d   :  { %v524_v56 = vsel %vm296_vm6, %v519_v43, 0 }
 0x423   :  { %v3192_v39 = vpop.eup %3191 }
 0x424   :  { %v404_v40 = vsel %vm296_vm6, %v3192_v39, 0.0 }
 0x425   :  { %v3194_v41 = vpop.eup %3193  ;;  %405 = vadd.xlane.f32.xlu0 %v404_v40 }
 0x426   :  { %v407_v42 = vsel %vm296_vm6, %v3194_v41, 0.0 }
 0x427   :  { %408 = vadd.xlane.f32.xlu1 %v407_v42 }
 0x438   :  { %569 = vrot.lane.b32.xlu1 %v3493_v52, %s3308_s30 }
 0x43b   :  { %416 = vrot.lane.b32.xlu0 %v3491_v49, %s3307_s7  ;;  %s4071_s7 = sld [smem:[#allocation14_spill]] }
 0x43c   :  { %567 = vrot.lane.b32.xlu1 %v3505_v60, %s3309_s3 }
 0x43f   :  { %516 = vrot.lane.b32.xlu0 %v3503_v59, %s3309_s3 }
 0x4b2   :  { %v406_v44 = vpop.xlane.xlu0 %405 }
 0x4b3   :  { %3195 = vrcp.f32 %v406_v44 }
 0x4b4   :  { %v409_v45 = vpop.xlane.xlu1 %408 }
 0x4b5   :  { %3197 = vrcp.f32 %v409_v45 }
 0x4b6   :  { %v417_v46 = vpop.permute.xlu0 %416 }
 0x4b7   :  { %v423_v47 = vsel %vm421_vm9, %v417_v46, 0 }
 0x4b8   :  { %2919 = vmatpush3.bf16.msra.mxu1 %v423_v47  ;;  %v570_v55 = vpop.permute.xlu1 %569 }
 0x4b9   :  { %2930 = vmatprep.subr.bf16.mxu1 %v3303_v15  ;;  %v575_v58 = vsel %vm296_vm6, %v570_v55, 0 }
 0x4ba   :  { %v517_v61 = vpop.permute.xlu0 %516 }
 0x4bc   :  { %v568_v62 = vpop.permute.xlu1 %567 }
 0x4bd   :  { %v3196_v48 = vpop.eup %3195 }
 0x4be   :  { %v412_v50 = vmul.f32 %v3196_v48, %v3192_v39 }
 0x4bf   :  { %v3198_v51 = vpop.eup %3197 }
 0x4c0   :  { %v413_v53 = vmul.f32 %v3198_v51, %v3194_v41  ;;  %v414_v54 = vpack.c.bf16 %v412_v50, %v412_v50 }
 0x4c2   :  { %2921 = vmatmul.mubr.msk.bf16.vlgmr.msra.gmra.mrb[8].mxu1 %vm296_vm6, %v414_v54  ;;  %v415_v57 = vpack.c.bf16 %v413_v53, %v413_v53 }
 0x4c3   :  { %2931 = vmatpush3.bf16.xpose.msra.mxu1 %v524_v56  ;;  %2932 = vmatprep.mubr.msk.bf16.mxu1 %vm3304_vm1, %v3303_v15 }
 0x4c4   :  { %2927 = vmatmul.mubr.msk.bf16.vlgmr.msra.gmra.mrb[4].mxu0 %vm296_vm6, %v415_v57  ;;  %2942 = vmatprep.subr.bf16.mxu1 %v3303_v15 }
 0x4c5   :  { %2937 = vmatpush3.bf16.xpose.msra.mxu0 %v575_v58  ;;  %2938 = vmatprep.mubr.msk.bf16.mxu0 %vm3304_vm1, %v3303_v15 }
 0x4c6   :  { %2948 = vmatprep.subr.bf16.mxu0 %v3303_v15 }
 0x4ca   :  { %2933 = vmatmul.mubr.msk.bf16.vlgmr.msra.gmra.mrb[12].mxu1 %vm296_vm6, %v517_v61 }
 0x4cb   :  { %2944 = vmatprep.mubr.msk.bf16.mxu1 %vm3304_vm1, %v3303_v15 }
 0x4cc   :  { %2939 = vmatmul.mubr.msk.bf16.vlgmr.msra.gmra.mrb[8].mxu0 %vm296_vm6, %v568_v62 }
 0x4cd   :  { %2950 = vmatprep.mubr.msk.bf16.mxu0 %vm3304_vm1, %v3303_v15 }
 0x595   :  { %v459_v63 = vpop.f32.mrb[8].mxu1 }
 0x596   :  { %513 = vst.msk [vmem:[#allocation2] sm:$0xff] %vm296_vm6, %v459_v63  ;;  %v2922_v2 = vpop.f32.mrb[9].mxu1 }
 0x597   :  { %v462_v3 = vpop.f32.mrb[10].mxu1  ;;  %v507_v4 = vpop.f32.mrb[4].mxu0 }
 0x598   :  { %514 = vst.msk [vmem:[#allocation2 + $0x8] sm:$0xff] %vm296_vm6, %v507_v4  ;;  %v2923_v6 = vpop.f32.mrb[11].mxu1  ;;  %v2928_v7 = vpop.f32.mrb[5].mxu0 }
 0x599   :  { %v510_v8 = vpop.f32.mrb[6].mxu0 }
 0x59a   :  { %v2929_v9 = vpop.f32.mrb[7].mxu0 }
 0x59d   :  { %v560_v10 = vpop.f32.mrb[12].mxu1 }
 0x59e   :  { %v561_v12 = vadd.f32 %v560_v10, %v3529_v17  ;;  %v2934_v13 = vpop.f32.mrb[13].mxu1 }
 0x59f   :  { %v563_v14 = vpop.f32.mrb[14].mxu1  ;;  %v611_v16 = vpop.f32.mrb[8].mxu0 }
 0x5a0   :  { %v612_v19 = vadd.f32 %v611_v16, %v3531_v18  ;;  %v2935_v20 = vpop.f32.mrb[15].mxu1  ;;  %v2940_v21 = vpop.f32.mrb[9].mxu0  ;;  %v617_v22 = vsel %vm296_vm6, %v561_v12, -inf }
 0x5a1   :  { %v614_v23 = vpop.f32.mrb[10].mxu0  ;;  %618 = vmax.xlane.f32.xlu0 %v617_v22 }
 0x5a2   :  { %v2941_v24 = vpop.f32.mrb[11].mxu0  ;;  %v620_v25 = vsel %vm296_vm6, %v612_v19, -inf }
 0x5a3   :  { %621 = vmax.xlane.f32.xlu1 %v620_v25 }
 0x5b4   :  { %689 = vrot.lane.b32.xlu1 %v3493_v52, %s3310_s25 }
 0x5b8   :  { %750 = vrot.lane.b32.xlu1 %v3491_v49, %s3311_s8 }
 0x5bc   :  { %800 = vrot.lane.b32.xlu1 %v3493_v52, %s3311_s8 }
 0x5c0   :  { %798 = vrot.lane.b32.xlu1 %v3505_v60, %s3312_s4 }
 0x62e   :  { %v619_v26 = vpop.xlane.xlu0 %618 }
 0x62f   :  { %v623_v27 = vsub.f32 %v561_v12, %v619_v26 }
 0x630   :  { %v622_v28 = vpop.xlane.xlu1 %621 }
 0x631   :  { %v625_v29 = vmul.f32 1.442695, %v623_v27  ;;  %v624_v30 = vsub.f32 %v612_v19, %v622_v28 }
 0x633   :  { %3199 = vpow2.f32 %v625_v29  ;;  %v627_v31 = vmul.f32 1.442695, %v624_v30 }
 0x634   :  { %v690_v32 = vpop.permute.xlu1 %689 }
 0x635   :  { %3201 = vpow2.f32 %v627_v31  ;;  %v695_v33 = vsel %vm421_vm9, %v690_v32, 0 }
 0x636   :  { %2949 = vmatpush3.bf16.msra.mxu0 %v695_v33 }
 0x637   :  { %2960 = vmatprep.subr.bf16.mxu0 %v3303_v15 }
 0x638   :  { %v751_v43 = vpop.permute.xlu1 %750 }
 0x639   :  { %v756_v50 = vsel %vm296_vm6, %v751_v43, 0 }
 0x63c   :  { %v801_v48 = vpop.permute.xlu1 %800 }
 0x63d   :  { %v3200_v34 = vpop.eup %3199  ;;  %v806_v53 = vsel %vm296_vm6, %v801_v48, 0 }
 0x63e   :  { %v629_v35 = vsel %vm296_vm6, %v3200_v34, 0.0 }
 0x63f   :  { %v3202_v36 = vpop.eup %3201  ;;  %630 = vadd.xlane.f32.xlu0 %v629_v35 }
 0x640   :  { %v632_v37 = vsel %vm296_vm6, %v3202_v36, 0.0  ;;  %v799_v55 = vpop.permute.xlu1 %798 }
 0x643   :  { %633 = vadd.xlane.f32.xlu0 %v632_v37 }
 0x659   :  { %641 = vrot.lane.b32.xlu0 %v3491_v49, %s3310_s25 }
 0x65d   :  { %748 = vrot.lane.b32.xlu0 %v3503_v59, %s3312_s4 }
 0x6cc   :  { %v631_v38 = vpop.xlane.xlu0 %630 }
 0x6cd   :  { %3203 = vrcp.f32 %v631_v38 }
 0x6d0   :  { %v634_v39 = vpop.xlane.xlu0 %633 }
 0x6d1   :  { %3205 = vrcp.f32 %v634_v39 }
 0x6d4   :  { %v642_v40 = vpop.permute.xlu0 %641 }
 0x6d5   :  { %v647_v41 = vsel %vm421_vm9, %v642_v40, 0 }
 0x6d6   :  { %2943 = vmatpush3.bf16.msra.mxu1 %v647_v41 }
 0x6d7   :  { %v3204_v42 = vpop.eup %3203  ;;  %2954 = vmatprep.subr.bf16.mxu1 %v3303_v15 }
 0x6d8   :  { %v637_v44 = vmul.f32 %v3204_v42, %v3200_v34  ;;  %v749_v54 = vpop.permute.xlu0 %748 }
 0x6da   :  { %v639_v45 = vpack.c.bf16 %v637_v44, %v637_v44 }
 0x6db   :  { %v3206_v46 = vpop.eup %3205 }
 0x6dc   :  { %v638_v47 = vmul.f32 %v3206_v46, %v3202_v36  ;;  %2945 = vmatmul.mubr.msk.bf16.vlgmr.msra.gmra.mrb[16].mxu1 %vm296_vm6, %v639_v45 }
 0x6dd   :  { %2956 = vmatprep.mubr.msk.bf16.mxu1 %vm3304_vm1, %v3303_v15 }
 0x6de   :  { %v640_v51 = vpack.c.bf16 %v638_v47, %v638_v47 }
 0x6df   :  { %2955 = vmatpush3.bf16.xpose.msra.mxu1 %v756_v50 }
 0x6e0   :  { %2951 = vmatmul.mubr.msk.bf16.vlgmr.msra.gmra.mrb[12].mxu0 %vm296_vm6, %v640_v51  ;;  %2966 = vmatprep.subr.bf16.mxu1 %v3303_v15 }
 0x6e1   :  { %2961 = vmatpush3.bf16.xpose.msra.mxu0 %v806_v53  ;;  %2962 = vmatprep.mubr.msk.bf16.mxu0 %vm3304_vm1, %v3303_v15 }
 0x6e2   :  { %2972 = vmatprep.subr.bf16.mxu0 %v3303_v15 }
 0x6e6   :  { %2957 = vmatmul.mubr.msk.bf16.vlgmr.msra.gmra.mrb[20].mxu1 %vm296_vm6, %v749_v54 }
 0x6e7   :  { %2968 = vmatprep.mubr.msk.bf16.mxu1 %vm3304_vm1, %v3303_v15 }
 0x6e8   :  { %2963 = vmatmul.mubr.msk.bf16.vlgmr.msra.gmra.mrb[16].mxu0 %vm296_vm6, %v799_v55 }
 0x6e9   :  { %2974 = vmatprep.mubr.msk.bf16.mxu0 %vm3304_vm1, %v3303_v15 }
 0x7af   :  { %v3607_v56 = vpop.f32.mrb[16].mxu1 }
 0x7b0   :  { %v2946_v57 = vpop.f32.mrb[17].mxu1 }
 0x7b1   :  { %v686_v58 = vpop.f32.mrb[18].mxu1 }
 0x7b2   :  { %v2947_v61 = vpop.f32.mrb[19].mxu1 }
 0x7b3   :  { %v3609_v62 = vpop.f32.mrb[12].mxu0 }
 0x7b4   :  { %v2952_v63 = vpop.f32.mrb[13].mxu0 }
 0x7b5   :  { %v734_v2 = vpop.f32.mrb[14].mxu0 }
 0x7b6   :  { %v2953_v3 = vpop.f32.mrb[15].mxu0 }
 0x7b9   :  { %v792_v4 = vpop.f32.mrb[20].mxu1 }
 0x7ba   :  { %v793_v6 = vadd.f32 %v792_v4, %v3529_v17  ;;  %v2958_v7 = vpop.f32.mrb[21].mxu1 }
 0x7bb   :  { %v795_v8 = vpop.f32.mrb[22].mxu1  ;;  %v842_v9 = vpop.f32.mrb[16].mxu0 }
 0x7bc   :  { %v843_v10 = vadd.f32 %v842_v9, %v3531_v18  ;;  %v2959_v12 = vpop.f32.mrb[23].mxu1  ;;  %v2964_v13 = vpop.f32.mrb[17].mxu0  ;;  %v848_v14 = vsel %vm296_vm6, %v793_v6, -inf }
 0x7bd   :  { %v845_v16 = vpop.f32.mrb[18].mxu0  ;;  %849 = vmax.xlane.f32.xlu0 %v848_v14 }
 0x7be   :  { %v2965_v19 = vpop.f32.mrb[19].mxu0  ;;  %v851_v20 = vsel %vm296_vm6, %v843_v10, -inf }
 0x7bf   :  { %852 = vmax.xlane.f32.xlu1 %v851_v20 }
 0x7d0   :  { %920 = vrot.lane.b32.xlu1 %v3493_v52, %s3313_s1 }
 0x7d4   :  { %981 = vrot.lane.b32.xlu1 %v3491_v49, %s3314_s5 }
 0x7d8   :  { %1031 = vrot.lane.b32.xlu1 %v3493_v52, %s3314_s5 }
 0x7dc   :  { %1029 = vrot.lane.b32.xlu1 %v3505_v60, %s3315_s26 }
 0x84a   :  { %v850_v21 = vpop.xlane.xlu0 %849 }
 0x84b   :  { %v854_v22 = vsub.f32 %v793_v6, %v850_v21 }
 0x84c   :  { %v853_v23 = vpop.xlane.xlu1 %852 }
 0x84d   :  { %v856_v24 = vmul.f32 1.442695, %v854_v22  ;;  %v855_v25 = vsub.f32 %v843_v10, %v853_v23 }
 0x84f   :  { %3207 = vpow2.f32 %v856_v24  ;;  %v858_v26 = vmul.f32 1.442695, %v855_v25 }
 0x850   :  { %v921_v27 = vpop.permute.xlu1 %920 }
 0x851   :  { %3209 = vpow2.f32 %v858_v26  ;;  %v926_v28 = vsel %vm421_vm9, %v921_v27, 0 }
 0x852   :  { %2973 = vmatpush3.bf16.msra.mxu0 %v926_v28 }
 0x853   :  { %2984 = vmatprep.subr.bf16.mxu0 %v3303_v15 }
 0x854   :  { %v982_v37 = vpop.permute.xlu1 %981 }
 0x858   :  { %v1032_v42 = vpop.permute.xlu1 %1031 }
 0x859   :  { %v3208_v29 = vpop.eup %3207  ;;  %v1037_v44 = vsel %vm296_vm6, %v1032_v42, 0 }
 0x85a   :  { %v860_v30 = vsel %vm296_vm6, %v3208_v29, 0.0 }
 0x85b   :  { %v3210_v31 = vpop.eup %3209  ;;  %861 = vadd.xlane.f32.xlu0 %v860_v30 }
 0x85c   :  { %v863_v60 = vsel %vm296_vm6, %v3210_v31, 0.0  ;;  %v1030_v46 = vpop.permute.xlu1 %1029 }
 0x85f   :  { %864 = vadd.xlane.f32.xlu0 %v863_v60 }
 0x875   :  { %872 = vrot.lane.b32.xlu0 %v3491_v49, %s3313_s1 }
 0x879   :  { %979 = vrot.lane.b32.xlu0 %v3503_v59, %s3315_s26  ;;  %v987_v59 = vsel %vm296_vm6, %v982_v37, 0 }
 0x8e8   :  { %v862_v32 = vpop.xlane.xlu0 %861 }
 0x8e9   :  { %3211 = vrcp.f32 %v862_v32 }
 0x8ec   :  { %v865_v33 = vpop.xlane.xlu0 %864 }
 0x8ed   :  { %3213 = vrcp.f32 %v865_v33 }
 0x8f0   :  { %v873_v34 = vpop.permute.xlu0 %872 }
 0x8f1   :  { %v878_v35 = vsel %vm421_vm9, %v873_v34, 0 }
 0x8f2   :  { %2967 = vmatpush3.bf16.msra.mxu1 %v878_v35  ;;  %v3171_v35 = vld [vmem:[%s4071_s7] sm:$0xff]  }
 0x8f3   :  { %v3212_v36 = vpop.eup %3211  ;;  %2978 = vmatprep.subr.bf16.mxu1 %v3303_v15 }
 0x8f4   :  { %v868_v38 = vmul.f32 %v3212_v36, %v3208_v29  ;;  %v980_v45 = vpop.permute.xlu0 %979  ;;  %v3172_v36 = vld [vmem:[%s4071_s7 + $0x8] sm:$0xff]   ;;  %s4072_s7 = sld [smem:[#allocation7_spill]] }
 0x8f6   :  { %v870_v39 = vpack.c.bf16 %v868_v38, %v868_v38 }
 0x8f7   :  { %v3214_v40 = vpop.eup %3213 }
 0x8f8   :  { %v869_v41 = vmul.f32 %v3214_v40, %v3210_v31  ;;  %2969 = vmatmul.mubr.msk.bf16.vlgmr.msra.gmra.mrb[24].mxu1 %vm296_vm6, %v870_v39 }
 0x8f9   :  { %2980 = vmatprep.mubr.msk.bf16.mxu1 %vm3304_vm1, %v3303_v15 }
 0x8fa   :  { %v871_v43 = vpack.c.bf16 %v869_v41, %v869_v41 }
 0x8fb   :  { %2979 = vmatpush3.bf16.xpose.msra.mxu1 %v987_v59 }
 0x8fc   :  { %2975 = vmatmul.mubr.msk.bf16.vlgmr.msra.gmra.mrb[20].mxu0 %vm296_vm6, %v871_v43  ;;  %2990 = vmatprep.subr.bf16.mxu1 %v3303_v15 }
 0x8fd   :  { %2985 = vmatpush3.bf16.xpose.msra.mxu0 %v1037_v44  ;;  %2986 = vmatprep.mubr.msk.bf16.mxu0 %vm3304_vm1, %v3303_v15 }
 0x8fe   :  { %2996 = vmatprep.subr.bf16.mxu0 %v3303_v15 }
 0x902   :  { %2981 = vmatmul.mubr.msk.bf16.vlgmr.msra.gmra.mrb[28].mxu1 %vm296_vm6, %v980_v45 }
 0x903   :  { %2992 = vmatprep.mubr.msk.bf16.mxu1 %vm3304_vm1, %v3303_v15 }
 0x904   :  { %2987 = vmatmul.mubr.msk.bf16.vlgmr.msra.gmra.mrb[24].mxu0 %vm296_vm6, %v1030_v46 }
 0x905   :  { %2998 = vmatprep.mubr.msk.bf16.mxu0 %vm3304_vm1, %v3303_v15 }
 0x9cb   :  { %v914_v47 = vpop.f32.mrb[24].mxu1 }
 0x9cc   :  { %v2970_v48 = vpop.f32.mrb[25].mxu1 }
 0x9cd   :  { %v917_v50 = vpop.f32.mrb[26].mxu1 }
 0x9ce   :  { %v2971_v51 = vpop.f32.mrb[27].mxu1  ;;  %v2766_v50 = vld [vmem:[%s4036_s9] ss:$0 sm:$0xff]  ;;  %s4073_s9 = sld [smem:[#allocation8_spill]] }
 0x9cf   :  { %v962_v53 = vpop.f32.mrb[20].mxu0 }
 0x9d0   :  { %v2976_v54 = vpop.f32.mrb[21].mxu0 }
 0x9d1   :  { %v965_v55 = vpop.f32.mrb[22].mxu0 }
 0x9d2   :  { %v2977_v57 = vpop.f32.mrb[23].mxu0 }
 0x9d5   :  { %v1023_v58 = vpop.f32.mrb[28].mxu1 }
 0x9d6   :  { %v1024_v61 = vadd.f32 %v1023_v58, %v3529_v17  ;;  %v2982_v63 = vpop.f32.mrb[29].mxu1 }
 0x9d7   :  { %v1026_v2 = vpop.f32.mrb[30].mxu1  ;;  %v1073_v3 = vpop.f32.mrb[24].mxu0 }
 0x9d8   :  { %v1074_v4 = vadd.f32 %v1073_v3, %v3531_v18  ;;  %v2983_v6 = vpop.f32.mrb[31].mxu1  ;;  %v2988_v7 = vpop.f32.mrb[25].mxu0  ;;  %v1079_v8 = vsel %vm296_vm6, %v1024_v61, -inf }
 0x9d9   :  { %v1076_v9 = vpop.f32.mrb[26].mxu0  ;;  %1080 = vmax.xlane.f32.xlu0 %v1079_v8 }
 0x9da   :  { %v2989_v10 = vpop.f32.mrb[27].mxu0  ;;  %v1082_v12 = vsel %vm296_vm6, %v1074_v4, -inf }
 0x9db   :  { %1083 = vmax.xlane.f32.xlu1 %v1082_v12 }
 0x9ec   :  { %1151 = vrot.lane.b32.xlu1 %v3493_v52, %s3316_s27 }
 0x9f0   :  { %739 = vrot.lane.b32.xlu1 %v3607_v56, %s3317_s28 }
 0x9f4   :  { %741 = vrot.lane.b32.xlu1 %v3609_v62, %s3317_s28 }
 0x9f8   :  { %972 = vrot.lane.b32.xlu1 %v962_v53, %s3318_s2 }
 0xa66   :  { %v1081_v17 = vpop.xlane.xlu0 %1080 }
 0xa67   :  { %v1085_v18 = vsub.f32 %v1024_v61, %v1081_v17 }
 0xa68   :  { %v1084_v13 = vpop.xlane.xlu1 %1083 }
 0xa69   :  { %v1087_v14 = vmul.f32 1.442695, %v1085_v18  ;;  %v1086_v16 = vsub.f32 %v1074_v4, %v1084_v13  ;;  %v3173_v4 = vld [vmem:[%s4039_s12] sm:$0xff]  }
 0xa6b   :  { %3215 = vpow2.f32 %v1087_v14  ;;  %v1089_v19 = vmul.f32 1.442695, %v1086_v16  ;;  %v3722_v14 = vld [vmem:[%s4040_s13] ss:$0 sm:$0xff] }
 0xa6c   :  { %v1152_v20 = vpop.permute.xlu1 %1151 }
 0xa6d   :  { %3217 = vpow2.f32 %v1089_v19  ;;  %v1157_v52 = vsel %vm421_vm9, %v1152_v20, 0 }
 0xa6e   :  { %2997 = vmatpush3.bf16.msra.mxu0 %v1157_v52 }
 0xa6f   :  { %3010 = vmatprep.subr.bf16.mxu0 %v3303_v15 }
 0xa70   :  { %v740_v56 = vpop.permute.xlu1 %739 }
 0xa71   :  { %746 = vst.msk [vmem:[#allocation2] sm:$0xff] %vm745_vm10, %v740_v56 }
 0xa74   :  { %v742_v62 = vpop.permute.xlu1 %741 }
 0xa75   :  { %v3216_v21 = vpop.eup %3215  ;;  %747 = vst.msk [vmem:[#allocation2 + $0x8] sm:$0xff] %vm745_vm10, %v742_v62  ;;  %v81_v62 = vld [vmem:[%s4072_s7] sm:$0xff] }
 0xa76   :  { %v1091_v22 = vsel %vm296_vm6, %v3216_v21, 0.0 }
 0xa77   :  { %v3218_v23 = vpop.eup %3217  ;;  %1092 = vadd.xlane.f32.xlu0 %v1091_v22 }
 0xa78   :  { %v973_v24 = vpop.permute.xlu1 %972  ;;  %v1094_v25 = vsel %vm296_vm6, %v3218_v23, 0.0 }
 0xa79   :  { %978 = vst.msk [vmem:[#allocation2 + $0x8] sm:$0xff] %vm976_vm11, %v973_v24 }
 0xa7b   :  { %1095 = vadd.xlane.f32.xlu0 %v1094_v25 }
 0xa91   :  { %1103 = vrot.lane.b32.xlu0 %v3491_v49, %s3316_s27  ;;  %s3319_s27 = smov 24  }
 0xa95   :  { %970 = vrot.lane.b32.xlu0 %v914_v47, %s3318_s2 }
 0xb04   :  { %v1093_v26 = vpop.xlane.xlu0 %1092 }
 0xb05   :  { %3219 = vrcp.f32 %v1093_v26 }
 0xb08   :  { %v1096_v27 = vpop.xlane.xlu0 %1095 }
 0xb09   :  { %3221 = vrcp.f32 %v1096_v27 }
 0xb0c   :  { %v1104_v28 = vpop.permute.xlu0 %1103 }
 0xb0d   :  { %v1109_v29 = vsel %vm421_vm9, %v1104_v28, 0 }
 0xb0e   :  { %2991 = vmatpush3.bf16.msra.mxu1 %v1109_v29 }
 0xb0f   :  { %v3220_v30 = vpop.eup %3219  ;;  %3002 = vmatprep.subr.bf16.mxu1 %v3303_v15 }
 0xb10   :  { %v1099_v31 = vmul.f32 %v3220_v30, %v3216_v21  ;;  %v971_v60 = vpop.permute.xlu0 %970  ;;  %v82_v21 = vld [vmem:[%s4072_s7 + $0x8] sm:$0xff] }
 0xb11   :  { %977 = vst.msk [vmem:[#allocation2] sm:$0xff] %vm976_vm11, %v971_v60 }
 0xb12   :  { %v1101_v32 = vpack.c.bf16 %v1099_v31, %v1099_v31 }
 0xb13   :  { %v3222_v33 = vpop.eup %3221 }
 0xb14   :  { %v1100_v49 = vmul.f32 %v3222_v33, %v3218_v23  ;;  %2993 = vmatmul.mubr.msk.bf16.vlgmr.msra.gmra.mrb[32].mxu1 %vm296_vm6, %v1101_v32  ;;  %v1410_v23 = vpack.c.bf16 %v82_v21, %v81_v62 }
 0xb15   :  { %3006 = vmatprep.mubr.msk.bf16.mxu1 %vm3304_vm1, %v3303_v15  ;;  %3003 = vmatpush3.bf16.msra.mxu1 %v3171_v35 }
 0xb16   :  { %v1102_v34 = vpack.c.bf16 %v1100_v49, %v1100_v49  ;;  %3004 = vmatprep.subr.bf16.mxu1 %v3303_v15 }
 0xb18   :  { %2999 = vmatmul.mubr.msk.bf16.vlgmr.msra.gmra.mrb[28].mxu0 %vm296_vm6, %v1102_v34  ;;  %v2770_v34 = vld [vmem:[%s4037_s10] ss:$0 sm:$0xff] }
 0xb19   :  { %3014 = vmatprep.mubr.msk.bf16.mxu0 %vm3304_vm1, %v3303_v15  ;;  %3005 = vmatpush3.bf16.msra.mxu1 %v3172_v36 }
 0xb1a   :  { %3018 = vmatprep.subr.bf16.mxu1 %v3303_v15  ;;  %3011 = vmatpush3.bf16.msra.mxu0 %v3173_v4 }
 0xb1b   :  { %3012 = vmatprep.subr.bf16.mxu0 %v3303_v15 }
 0xbe7   :  { %v1145_v37 = vpop.f32.mrb[32].mxu1 }
 0xbe8   :  { %1201 = vrot.lane.b32.xlu0 %v1145_v37, %s3319_s27  ;;  %v2994_v38 = vpop.f32.mrb[33].mxu1 }
 0xbe9   :  { %v1148_v39 = vpop.f32.mrb[34].mxu1 }
 0xbea   :  { %v2995_v40 = vpop.f32.mrb[35].mxu1 }
 0xbeb   :  { %v1193_v41 = vpop.f32.mrb[28].mxu0  ;;  %v2771_v40 = vld [vmem:[%s4038_s11] ss:$0 sm:$0xff] }
 0xbec   :  { %1203 = vrot.lane.b32.xlu1 %v1193_v41, %s3319_s27  ;;  %v3000_v42 = vpop.f32.mrb[29].mxu0 }
 0xbed   :  { %v1196_v59 = vpop.f32.mrb[30].mxu0 }
 0xbee   :  { %v3001_v43 = vpop.f32.mrb[31].mxu0 }
 0xc5a   :  { %v1202_v44 = vpop.permute.xlu0 %1201 }
 0xc5b   :  { %1208 = vst.msk [vmem:[#allocation2] sm:$0xff] %vm1207_vm12, %v1202_v44 }
 0xc5e   :  { %v1204_v45 = vpop.permute.xlu1 %1203 }
 0xc5f   :  { %1209 = vst.msk [vmem:[#allocation2 + $0x8] sm:$0xff] %vm1207_vm12, %v1204_v45 }
 0xc62   :  { %v1210_v46 = vld [vmem:[#allocation2] sm:$0xff] }
 0xc66   :  { %v1211_v47 = vld [vmem:[#allocation2 + $0x8] sm:$0xff] }
 0xc67   :  { %v1212_v48 = vpack.c.bf16 %v1211_v47, %v1210_v46 }
 0xc69   :  { %3007 = vmatmul.mubr.msk.bf16.vlgmr.msra.gmra.mrb[36].mxu1 %vm155_vm0, %v1212_v48 }
 0xc6a   :  { %3022 = vmatprep.mubr.msk.bf16.mxu1 %vm3304_vm1, %v3303_v15 }
 0xd3c   :  { %v1268_v51 = vpop.f32.mrb[36].mxu1 }
 0xd3d   :  { %v1269_v53 = vadd.f32 %v2766_v50, %v1268_v51  ;;  %v3008_v54 = vpop.f32.mrb[37].mxu1 }
 0xd3e   :  { %v1271_v55 = vpop.f32.mrb[38].mxu1 }
 0xd3f   :  { %v3696_v57 = vadd.f32 %v1269_v53, %v3450_v0  ;;  %v1272_v58 = vadd.f32 %v2766_v50, %v1271_v55  ;;  %v3009_v61 = vpop.f32.mrb[39].mxu1  ;;  %v3174_v0 = vld [vmem:[%s4039_s12 + $0x8] sm:$0xff]  }
 0xd40   :  { %3013 = vmatpush3.bf16.msra.mxu0 %v3174_v0 }
 0xd41   :  { %v3699_v63 = vadd.f32 %v1272_v58, %v3455_v1  ;;  %v1279_v2 = vsel %vm155_vm0, %v3696_v57, 0.0  ;;  %3026 = vmatprep.subr.bf16.mxu0 %v3303_v15 }
 0xd42   :  { %1280 = vadd.xlane.f32.xlu0 %v1279_v2 }
 0xd43   :  { %v1282_v3 = vsel %vm155_vm0, %v3699_v63, 0.0 }
 0xd44   :  { %1283 = vadd.xlane.f32.xlu1 %v1282_v3 }
 0xd55   :  { %1413 = vrot.lane.b32.xlu1 %v3174_v0, %s3305_s6 }
 0xd59   :  { %1417 = vrot.lane.b32.xlu1 %v3722_v14, %s3305_s6 }
 0xdcf   :  { %v1281_v1 = vpop.xlane.xlu0 %1280 }
 0xdd0   :  { %v1285_v6 = vmul.f32 0.03125, %v1281_v1 }
 0xdd1   :  { %v1284_v7 = vpop.xlane.xlu1 %1283 }
 0xdd2   :  { %v1287_v8 = vsub.f32 %v3696_v57, %v1285_v6  ;;  %v1286_v9 = vmul.f32 0.03125, %v1284_v7 }
 0xdd4   :  { %v1288_v10 = vsub.f32 %v3699_v63, %v1286_v9  ;;  %v1289_v12 = vmul.f32 %v1287_v8, %v1287_v8  ;;  %v1305_v36 = vmul.f32 %v2770_v34, %v1287_v8 }
 0xdd5   :  { %v1414_v22 = vpop.permute.xlu1 %1413 }
 0xdd6   :  { %v1291_v17 = vsel %vm155_vm0, %v1289_v12, 0.0  ;;  %v1290_v18 = vmul.f32 %v1288_v10, %v1288_v10  ;;  %v1306_v37 = vmul.f32 %v2770_v34, %v1288_v10  ;;  %v127_v10 = vld [vmem:[%s4073_s9] sm:$0x3] }
 0xdd7   :  { %1292 = vadd.xlane.f32.xlu0 %v1291_v17  ;;  %vm128_vm3 = vcmp.eq.f32.partialorder %v127_v10, 0.0 }
 0xdd8   :  { %v1294_v13 = vsel %vm155_vm0, %v1290_v18, 0.0  ;;  %v129_v12 = vsel %vm128_vm3, -1e+09, %v3303_v15 }
 0xdd9   :  { %v1418_v44 = vpop.permute.xlu1 %1417  ;;  %v137_v17 = vrot.slane %v129_v12, %v3518_v5 }
 0xddb   :  { %1295 = vadd.xlane.f32.xlu0 %v1294_v13  ;;  %v138_v18 = vcombine.high %v137_v17, %v137_v17  ;;  %v145_v13 = vrot.slane %v137_v17, %v3518_v5 }
 0xdf1   :  { %1411 = vrot.lane.b32.xlu0 %v3173_v4, %s3305_s6 }
 0xe64   :  { %v1293_v16 = vpop.xlane.xlu0 %1292 }
 0xe65   :  { %v1297_v19 = vmul.f32 0.032258064, %v1293_v16  ;;  %v3778_v16 = vrot.slane %v145_v13, %v3523_v11 }
 0xe67   :  { %3223 = vrsqrt.f32 %v1297_v19  ;;  %vm1309_vm13 = vcmp.eq.f32.partialorder %v1297_v19, inf  ;;  %v1312_v26 = vand.u32 2147483648, %v1297_v19  ;;  %vm1311_vm14 = vcmp.eq.f32.partialorder %v1297_v19, 0.0 }
 0xe68   :  { %v1296_v20 = vpop.xlane.xlu0 %1295 }
 0xe69   :  { %v1298_v52 = vmul.f32 0.032258064, %v1296_v20 }
 0xe6b   :  { %3225 = vrsqrt.f32 %v1298_v52  ;;  %vm1316_vm15 = vcmp.eq.f32.partialorder %v1298_v52, inf  ;;  %v1319_v60 = vand.u32 2147483648, %v1298_v52  ;;  %vm1318_vm2 = vcmp.eq.f32.partialorder %v1298_v52, 0.0 }
 0xe6c   :  { %v1412_v56 = vpop.permute.xlu0 %1411 }
 0xe6d   :  { %3019 = vmatpush3.bf16.msra.mxu1 %v1412_v56 }
 0xe6e   :  { %3020 = vmatprep.subr.bf16.mxu1 %v3303_v15 }
 0xe71   :  { %v3224_v24 = vpop.eup %3223  ;;  %3021 = vmatpush3.bf16.msra.mxu1 %v1414_v22 }
 0xe72   :  { %v1308_v25 = vmul.f32 %v3224_v24, %v1297_v19  ;;  %3032 = vmatprep.subr.bf16.mxu1 %v3303_v15 }
 0xe74   :  { %v1310_v27 = vsel %vm1309_vm13, %v1297_v19, %v1308_v25  ;;  %3023 = vmatmul.mubr.msk.bf16.vlgmr.msra.gmra.mrb[40].mxu1 %vm155_vm0, %v1410_v23 }
 0xe75   :  { %v3226_v28 = vpop.eup %3225  ;;  %v1313_v29 = vsel %vm1311_vm14, %v1312_v26, %v1310_v27  ;;  %3034 = vmatprep.mubr.msk.bf16.mxu1 %vm3304_vm1, %v3303_v15 }
 0xe76   :  { %v1321_v30 = vadd.f32 1e-06, %v1313_v29  ;;  %v1315_v31 = vmul.f32 %v3226_v28, %v1298_v52 }
 0xe78   :  { %3227 = vrcp.f32 %v1321_v30  ;;  %v1317_v32 = vsel %vm1316_vm15, %v1298_v52, %v1315_v31 }
 0xe79   :  { %v1320_v33 = vsel %vm1318_vm2, %v1319_v60, %v1317_v32 }
 0xe7a   :  { %v1322_v49 = vadd.f32 1e-06, %v1320_v33 }
 0xe7c   :  { %3229 = vrcp.f32 %v1322_v49 }
 0xe82   :  { %v3228_v35 = vpop.eup %3227 }
 0xe83   :  { %v1324_v38 = vmul.f32 %v3228_v35, %v1305_v36 }
 0xe85   :  { %v1333_v42 = vadd.f32 %v2771_v40, %v1324_v38 }
 0xe86   :  { %v3230_v39 = vpop.eup %3229 }
 0xe87   :  { %v1326_v41 = vmul.f32 %v3230_v39, %v1306_v37 }
 0xe89   :  { %v1334_v59 = vadd.f32 %v2771_v40, %v1326_v41 }
 0xe8b   :  { %v1345_v43 = vpack.c.bf16 %v1334_v59, %v1333_v42 }
 0xe8d   :  { %3015 = vmatmul.mubr.msk.bf16.vlgmr.msra.gmra.mrb[32].mxu0 %vm155_vm0, %v1345_v43 }
 0xe8e   :  { %3028 = vmatprep.mubr.msk.bf16.mxu0 %vm3304_vm1, %v3303_v15 }
 0xf47   :  { %v1457_v45 = vpop.f32.mrb[40].mxu1 }
 0xf48   :  { %v3024_v46 = vpop.f32.mrb[41].mxu1  ;;  %v1458_v47 = vadd.f32 %v1457_v45, %v1418_v44 }
 0xf49   :  { %v1460_v48 = vpop.f32.mrb[42].mxu1 }
 0xf4a   :  { %v1461_v50 = vadd.f32 %v1460_v48, %v1418_v44  ;;  %v3746_v51 = vpack.c.bf16 %v1458_v47, %v1458_v47  ;;  %v3025_v53 = vpop.f32.mrb[43].mxu1 }
 0xf4c   :  { %v3748_v54 = vpack.c.bf16 %v1461_v50, %v1461_v50  ;;  %v1482_v55 = vsel %vm296_vm6, %v3746_v51, 0 }
 0xf4d   :  { %3027 = vmatpush3.bf16.xpose.msra.mxu0 %v1482_v55 }
 0xf4e   :  { %v1528_v58 = vsel %vm296_vm6, %v3748_v54, 0  ;;  %3038 = vmatprep.subr.bf16.mxu0 %v3303_v15 }
 0xf4f   :  { %3033 = vmatpush3.bf16.xpose.msra.mxu1 %v1528_v58 }
 0xf50   :  { %3044 = vmatprep.subr.bf16.mxu1 %v3303_v15 }
 0xf60   :  { %v1401_v61 = vpop.f32.mrb[32].mxu0 }
 0xf61   :  { %v1402_v2 = vadd.f32 %v3722_v14, %v1401_v61  ;;  %v3016_v3 = vpop.f32.mrb[33].mxu0 }
 0xf62   :  { %v1404_v4 = vpop.f32.mrb[34].mxu0 }
 0xf63   :  { %v1408_v0 = vmul.f32 0.35355338, %v1402_v2  ;;  %v1405_v1 = vadd.f32 %v3722_v14, %v1404_v4  ;;  %v3017_v6 = vpop.f32.mrb[35].mxu0  ;;  %v152_v14 = vrot.slane %v138_v18, %v3518_v5 }
 0xf65   :  { %v3758_v7 = vpack.c.bf16 %v1408_v0, %v1408_v0  ;;  %v1409_v8 = vmul.f32 0.35355338, %v1405_v1  ;;  %v3781_v19 = vrot.slane %v152_v14, %v3523_v11 }
 0xf67   :  { %v3760_v9 = vpack.c.bf16 %v1409_v8, %v1409_v8  ;;  %3029 = vmatmul.mubr.msk.bf16.vlgmr.msra.gmra.mrb[36].mxu0 %vm296_vm6, %v3758_v7 }
 0xf68   :  { %3040 = vmatprep.mubr.msk.bf16.mxu0 %vm3304_vm1, %v3303_v15 }
 0xf69   :  { %3035 = vmatmul.mubr.msk.bf16.vlgmr.msra.gmra.mrb[44].mxu1 %vm296_vm6, %v3760_v9 }
 0xf6a   :  { %3046 = vmatprep.mubr.msk.bf16.mxu1 %vm3304_vm1, %v3303_v15 }
0x103a   :  { %v1518_v20 = vpop.f32.mrb[36].mxu0 }
0x103b   :  { %v1519_v52 = vadd.f32 %v1518_v20, %v3778_v16  ;;  %v3030_v56 = vpop.f32.mrb[37].mxu0 }
0x103c   :  { %v1521_v62 = vpop.f32.mrb[38].mxu0  ;;  %v1564_v21 = vpop.f32.mrb[44].mxu1 }
0x103d   :  { %v1565_v22 = vadd.f32 %v1564_v21, %v3781_v19  ;;  %v3031_v23 = vpop.f32.mrb[39].mxu0  ;;  %v3036_v24 = vpop.f32.mrb[45].mxu1  ;;  %v1570_v25 = vsel %vm296_vm6, %v1519_v52, -inf }
0x103e   :  { %1571 = vmax.xlane.f32.xlu1 %v1570_v25  ;;  %v1567_v5 = vpop.f32.mrb[46].mxu1 }
0x103f   :  { %v3037_v26 = vpop.f32.mrb[47].mxu1  ;;  %v1573_v27 = vsel %vm296_vm6, %v1565_v22, -inf }
0x1040   :  { %1574 = vmax.xlane.f32.xlu0 %v1573_v27 }
0x104f   :  { %1595 = vrot.lane.b32.xlu1 %v3746_v51, %s3305_s6 }
0x1053   :  { %1697 = vrot.lane.b32.xlu1 %v3746_v51, %s3309_s3 }
0x1057   :  { %1748 = vrot.lane.b32.xlu1 %v3748_v54, %s3309_s3 }
0x105b   :  { %1695 = vrot.lane.b32.xlu1 %v3758_v7, %s3309_s3 }
0x10cb   :  { %v1572_v11 = vpop.xlane.xlu1 %1571 }
0x10cc   :  { %v1576_v28 = vsub.f32 %v1519_v52, %v1572_v11 }
0x10cd   :  { %v1575_v29 = vpop.xlane.xlu0 %1574 }
0x10ce   :  { %v1578_v30 = vmul.f32 1.442695, %v1576_v28  ;;  %v1577_v31 = vsub.f32 %v1565_v22, %v1575_v29 }
0x10cf   :  { %v1596_v60 = vpop.permute.xlu1 %1595 }
0x10d0   :  { %3231 = vpow2.f32 %v1578_v30  ;;  %v1580_v32 = vmul.f32 1.442695, %v1577_v31  ;;  %v1601_v33 = vsel %vm421_vm9, %v1596_v60, 0 }
0x10d1   :  { %3039 = vmatpush3.bf16.msra.mxu0 %v1601_v33 }
0x10d2   :  { %3233 = vpow2.f32 %v1580_v32  ;;  %3050 = vmatprep.subr.bf16.mxu0 %v3303_v15 }
0x10d3   :  { %v1698_v42 = vpop.permute.xlu1 %1697 }
0x10d4   :  { %v1703_v45 = vsel %vm296_vm6, %v1698_v42, 0 }
0x10d7   :  { %v1749_v47 = vpop.permute.xlu1 %1748 }
0x10d8   :  { %v1754_v50 = vsel %vm296_vm6, %v1749_v47, 0 }
0x10da   :  { %v3232_v49 = vpop.eup %3231 }
0x10db   :  { %v1582_v34 = vsel %vm296_vm6, %v3232_v49, 0.0  ;;  %v1696_v53 = vpop.permute.xlu1 %1695 }
0x10dc   :  { %v3234_v35 = vpop.eup %3233  ;;  %1583 = vadd.xlane.f32.xlu0 %v1582_v34 }
0x10dd   :  { %v1585_v36 = vsel %vm296_vm6, %v3234_v35, 0.0 }
0x10e0   :  { %1586 = vadd.xlane.f32.xlu0 %v1585_v36 }
0x10f6   :  { %1644 = vrot.lane.b32.xlu0 %v3748_v54, %s3305_s6 }
0x10fa   :  { %1746 = vrot.lane.b32.xlu0 %v3760_v9, %s3309_s3 }
0x1169   :  { %v1584_v37 = vpop.xlane.xlu0 %1583 }
0x116a   :  { %3235 = vrcp.f32 %v1584_v37 }
0x116d   :  { %v1587_v38 = vpop.xlane.xlu0 %1586 }
0x116e   :  { %3237 = vrcp.f32 %v1587_v38 }
0x1171   :  { %v1645_v39 = vpop.permute.xlu0 %1644 }
0x1172   :  { %v1650_v40 = vsel %vm421_vm9, %v1645_v39, 0 }
0x1173   :  { %3045 = vmatpush3.bf16.msra.mxu1 %v1650_v40 }
0x1174   :  { %v3236_v41 = vpop.eup %3235  ;;  %3056 = vmatprep.subr.bf16.mxu1 %v3303_v15 }
0x1175   :  { %v1590_v59 = vmul.f32 %v3236_v41, %v3232_v49  ;;  %v1747_v55 = vpop.permute.xlu0 %1746 }
0x1177   :  { %v1592_v43 = vpack.c.bf16 %v1590_v59, %v1590_v59 }
0x1178   :  { %v3238_v44 = vpop.eup %3237 }
0x1179   :  { %v1591_v46 = vmul.f32 %v3238_v44, %v3234_v35  ;;  %3041 = vmatmul.mubr.msk.bf16.vlgmr.msra.gmra.mrb[40].mxu0 %vm296_vm6, %v1592_v43 }
0x117a   :  { %3051 = vmatpush3.bf16.xpose.msra.mxu0 %v1703_v45  ;;  %3052 = vmatprep.mubr.msk.bf16.mxu0 %vm3304_vm1, %v3303_v15 }
0x117b   :  { %v1593_v48 = vpack.c.bf16 %v1591_v46, %v1591_v46  ;;  %3062 = vmatprep.subr.bf16.mxu0 %v3303_v15 }
0x117d   :  { %3047 = vmatmul.mubr.msk.bf16.vlgmr.msra.gmra.mrb[48].mxu1 %vm296_vm6, %v1593_v48 }
0x117e   :  { %3057 = vmatpush3.bf16.xpose.msra.mxu1 %v1754_v50  ;;  %3058 = vmatprep.mubr.msk.bf16.mxu1 %vm3304_vm1, %v3303_v15 }
0x117f   :  { %3068 = vmatprep.subr.bf16.mxu1 %v3303_v15 }
0x1181   :  { %3053 = vmatmul.mubr.msk.bf16.vlgmr.msra.gmra.mrb[44].mxu0 %vm296_vm6, %v1696_v53 }
0x1182   :  { %3064 = vmatprep.mubr.msk.bf16.mxu0 %vm3304_vm1, %v3303_v15 }
0x1185   :  { %3059 = vmatmul.mubr.msk.bf16.vlgmr.msra.gmra.mrb[52].mxu1 %vm296_vm6, %v1747_v55 }
0x1186   :  { %3070 = vmatprep.mubr.msk.bf16.mxu1 %vm3304_vm1, %v3303_v15 }
0x124c   :  { %v1637_v58 = vpop.f32.mrb[40].mxu0 }
0x124d   :  { %1692 = vst.msk [vmem:[#allocation2] sm:$0xff] %vm296_vm6, %v1637_v58  ;;  %v3042_v61 = vpop.f32.mrb[41].mxu0 }
0x124e   :  { %v1640_v2 = vpop.f32.mrb[42].mxu0 }
0x124f   :  { %v3043_v3 = vpop.f32.mrb[43].mxu0 }
0x1250   :  { %v1686_v4 = vpop.f32.mrb[48].mxu1 }
0x1251   :  { %1693 = vst.msk [vmem:[#allocation2 + $0x8] sm:$0xff] %vm296_vm6, %v1686_v4  ;;  %v3048_v0 = vpop.f32.mrb[49].mxu1 }
0x1252   :  { %v1689_v1 = vpop.f32.mrb[50].mxu1 }
0x1253   :  { %v3049_v6 = vpop.f32.mrb[51].mxu1 }
0x1254   :  { %v1739_v8 = vpop.f32.mrb[44].mxu0 }
0x1255   :  { %v1740_v10 = vadd.f32 %v1739_v8, %v3778_v16  ;;  %v3054_v12 = vpop.f32.mrb[45].mxu0 }
0x1256   :  { %v1742_v17 = vpop.f32.mrb[46].mxu0 }
0x1257   :  { %v3055_v18 = vpop.f32.mrb[47].mxu0  ;;  %v1796_v13 = vsel %vm296_vm6, %v1740_v10, -inf }
0x1258   :  { %1797 = vmax.xlane.f32.xlu1 %v1796_v13  ;;  %v1790_v14 = vpop.f32.mrb[52].mxu1 }
0x1259   :  { %v1791_v20 = vadd.f32 %v1790_v14, %v3781_v19  ;;  %v3060_v52 = vpop.f32.mrb[53].mxu1 }
0x125a   :  { %v1793_v56 = vpop.f32.mrb[54].mxu1 }
0x125b   :  { %v3061_v62 = vpop.f32.mrb[55].mxu1  ;;  %v1799_v21 = vsel %vm296_vm6, %v1791_v20, -inf }
0x125c   :  { %1800 = vmax.xlane.f32.xlu0 %v1799_v21 }
0x1269   :  { %1820 = vrot.lane.b32.xlu1 %v3746_v51, %s3308_s30 }
0x126d   :  { %1928 = vrot.lane.b32.xlu1 %v3746_v51, %s3312_s4 }
0x1271   :  { %1978 = vrot.lane.b32.xlu1 %v3748_v54, %s3312_s4 }
0x1275   :  { %1926 = vrot.lane.b32.xlu1 %v3758_v7, %s3312_s4 }
0x12e5   :  { %v1798_v22 = vpop.xlane.xlu1 %1797 }
0x12e6   :  { %v1802_v23 = vsub.f32 %v1740_v10, %v1798_v22 }
0x12e8   :  { %v1804_v24 = vmul.f32 1.442695, %v1802_v23 }
0x12e9   :  { %v1821_v25 = vpop.permute.xlu1 %1820  ;;  %v1801_v5 = vpop.xlane.xlu0 %1800 }
0x12ea   :  { %3239 = vpow2.f32 %v1804_v24  ;;  %v1826_v26 = vsel %vm421_vm9, %v1821_v25, 0  ;;  %v1803_v27 = vsub.f32 %v1791_v20, %v1801_v5 }
0x12eb   :  { %3063 = vmatpush3.bf16.msra.mxu0 %v1826_v26 }
0x12ec   :  { %v1806_v11 = vmul.f32 1.442695, %v1803_v27  ;;  %3074 = vmatprep.subr.bf16.mxu0 %v3303_v15 }
0x12ed   :  { %v1929_v35 = vpop.permute.xlu1 %1928 }
0x12ee   :  { %3241 = vpow2.f32 %v1806_v11  ;;  %v1934_v39 = vsel %vm296_vm6, %v1929_v35, 0 }
0x12f1   :  { %v1979_v41 = vpop.permute.xlu1 %1978 }
0x12f2   :  { %v1984_v59 = vsel %vm296_vm6, %v1979_v41, 0 }
0x12f4   :  { %v3240_v28 = vpop.eup %3239 }
0x12f5   :  { %v1808_v29 = vsel %vm296_vm6, %v3240_v28, 0.0  ;;  %v1927_v43 = vpop.permute.xlu1 %1926 }
0x12f6   :  { %1809 = vadd.xlane.f32.xlu0 %v1808_v29 }
0x12f8   :  { %v3242_v30 = vpop.eup %3241 }
0x12f9   :  { %v1811_v31 = vsel %vm296_vm6, %v3242_v30, 0.0 }
0x12fa   :  { %1812 = vadd.xlane.f32.xlu0 %v1811_v31 }
0x1310   :  { %1868 = vrot.lane.b32.xlu0 %v3748_v54, %s3308_s30 }
0x1314   :  { %1976 = vrot.lane.b32.xlu0 %v3760_v9, %s3312_s4 }
0x1383   :  { %v1810_v60 = vpop.xlane.xlu0 %1809 }
0x1384   :  { %3243 = vrcp.f32 %v1810_v60 }
0x1387   :  { %v1813_v32 = vpop.xlane.xlu0 %1812 }
0x1388   :  { %3245 = vrcp.f32 %v1813_v32 }
0x138b   :  { %v1869_v33 = vpop.permute.xlu0 %1868 }
0x138c   :  { %v1874_v49 = vsel %vm421_vm9, %v1869_v33, 0 }
0x138d   :  { %3069 = vmatpush3.bf16.msra.mxu1 %v1874_v49 }
0x138e   :  { %v3244_v34 = vpop.eup %3243  ;;  %3080 = vmatprep.subr.bf16.mxu1 %v3303_v15 }
0x138f   :  { %v1816_v36 = vmul.f32 %v3244_v34, %v3240_v28  ;;  %v1977_v44 = vpop.permute.xlu0 %1976 }
0x1391   :  { %v1818_v37 = vpack.c.bf16 %v1816_v36, %v1816_v36 }
0x1392   :  { %v3246_v38 = vpop.eup %3245 }
0x1393   :  { %v1817_v40 = vmul.f32 %v3246_v38, %v3242_v30  ;;  %3065 = vmatmul.mubr.msk.bf16.vlgmr.msra.gmra.mrb[48].mxu0 %vm296_vm6, %v1818_v37 }
0x1394   :  { %3075 = vmatpush3.bf16.xpose.msra.mxu0 %v1934_v39  ;;  %3076 = vmatprep.mubr.msk.bf16.mxu0 %vm3304_vm1, %v3303_v15 }
0x1395   :  { %v1819_v42 = vpack.c.bf16 %v1817_v40, %v1817_v40  ;;  %3086 = vmatprep.subr.bf16.mxu0 %v3303_v15 }
0x1397   :  { %3071 = vmatmul.mubr.msk.bf16.vlgmr.msra.gmra.mrb[56].mxu1 %vm296_vm6, %v1819_v42 }
0x1398   :  { %3081 = vmatpush3.bf16.xpose.msra.mxu1 %v1984_v59  ;;  %3082 = vmatprep.mubr.msk.bf16.mxu1 %vm3304_vm1, %v3303_v15 }
0x1399   :  { %3092 = vmatprep.subr.bf16.mxu1 %v3303_v15 }
0x139b   :  { %3077 = vmatmul.mubr.msk.bf16.vlgmr.msra.gmra.mrb[52].mxu0 %vm296_vm6, %v1927_v43 }
0x139c   :  { %3088 = vmatprep.mubr.msk.bf16.mxu0 %vm3304_vm1, %v3303_v15 }
0x139f   :  { %3083 = vmatmul.mubr.msk.bf16.vlgmr.msra.gmra.mrb[60].mxu1 %vm296_vm6, %v1977_v44 }
0x13a0   :  { %3094 = vmatprep.mubr.msk.bf16.mxu1 %vm3304_vm1, %v3303_v15 }
0x1466   :  { %v3861_v45 = vpop.f32.mrb[48].mxu0 }
0x1467   :  { %v3066_v46 = vpop.f32.mrb[49].mxu0 }
0x1468   :  { %v1865_v47 = vpop.f32.mrb[50].mxu0 }
0x1469   :  { %v3067_v48 = vpop.f32.mrb[51].mxu0 }
0x146a   :  { %v3863_v50 = vpop.f32.mrb[56].mxu1 }
0x146b   :  { %v3072_v53 = vpop.f32.mrb[57].mxu1 }
0x146c   :  { %v1913_v55 = vpop.f32.mrb[58].mxu1 }
0x146d   :  { %v3073_v58 = vpop.f32.mrb[59].mxu1 }
0x146e   :  { %v1970_v61 = vpop.f32.mrb[52].mxu0 }
0x146f   :  { %v1971_v2 = vadd.f32 %v1970_v61, %v3778_v16  ;;  %v3078_v3 = vpop.f32.mrb[53].mxu0 }
0x1470   :  { %v1973_v4 = vpop.f32.mrb[54].mxu0 }
0x1471   :  { %v3079_v0 = vpop.f32.mrb[55].mxu0  ;;  %v2026_v1 = vsel %vm296_vm6, %v1971_v2, -inf }
0x1472   :  { %2027 = vmax.xlane.f32.xlu1 %v2026_v1  ;;  %v2020_v6 = vpop.f32.mrb[60].mxu1 }
0x1473   :  { %v2021_v8 = vadd.f32 %v2020_v6, %v3781_v19  ;;  %v3084_v10 = vpop.f32.mrb[61].mxu1 }
0x1474   :  { %v2023_v12 = vpop.f32.mrb[62].mxu1 }
0x1475   :  { %v3085_v17 = vpop.f32.mrb[63].mxu1  ;;  %v2029_v18 = vsel %vm296_vm6, %v2021_v8, -inf }
0x1476   :  { %2030 = vmax.xlane.f32.xlu0 %v2029_v18 }
0x1483   :  { %2050 = vrot.lane.b32.xlu1 %v3746_v51, %s3311_s8 }
0x1487   :  { %2158 = vrot.lane.b32.xlu1 %v3746_v51, %s3315_s26 }
0x148b   :  { %2208 = vrot.lane.b32.xlu1 %v3748_v54, %s3315_s26 }
0x148f   :  { %2156 = vrot.lane.b32.xlu1 %v3758_v7, %s3315_s26 }
0x14ff   :  { %v2028_v13 = vpop.xlane.xlu1 %2027 }
0x1500   :  { %v2032_v14 = vsub.f32 %v1971_v2, %v2028_v13 }
0x1502   :  { %v2034_v20 = vmul.f32 1.442695, %v2032_v14 }
0x1503   :  { %v2051_v52 = vpop.permute.xlu1 %2050  ;;  %v2031_v56 = vpop.xlane.xlu0 %2030 }
0x1504   :  { %3247 = vpow2.f32 %v2034_v20  ;;  %v2056_v62 = vsel %vm421_vm9, %v2051_v52, 0  ;;  %v2033_v21 = vsub.f32 %v2021_v8, %v2031_v56 }
0x1505   :  { %3087 = vmatpush3.bf16.msra.mxu0 %v2056_v62 }
0x1506   :  { %v2036_v22 = vmul.f32 1.442695, %v2033_v21  ;;  %3098 = vmatprep.subr.bf16.mxu0 %v3303_v15 }
0x1507   :  { %v2159_v29 = vpop.permute.xlu1 %2158 }
0x1508   :  { %3249 = vpow2.f32 %v2036_v22  ;;  %v2164_v32 = vsel %vm296_vm6, %v2159_v29, 0 }
0x150e   :  { %v3248_v23 = vpop.eup %3247 }
0x150f   :  { %v2038_v24 = vsel %vm296_vm6, %v3248_v23, 0.0 }
0x1510   :  { %2039 = vadd.xlane.f32.xlu0 %v2038_v24 }
0x1512   :  { %v3250_v25 = vpop.eup %3249 }
0x1513   :  { %v2041_v7 = vsel %vm296_vm6, %v3250_v25, 0.0 }
0x1514   :  { %2042 = vadd.xlane.f32.xlu0 %v2041_v7 }
0x152a   :  { %2098 = vrot.lane.b32.xlu0 %v3748_v54, %s3311_s8  ;;  %s3320_s8 = smov [#allocation3]  }
0x152e   :  { %2206 = vrot.lane.b32.xlu0 %v3760_v9, %s3315_s26  ;;  %v2209_v9 = vpop.permute.xlu1 %2208 }
0x152f   :  { %v2214_v34 = vsel %vm296_vm6, %v2209_v9, 0 }
0x1532   :  { %v2157_v35 = vpop.permute.xlu1 %2156 }
0x159d   :  { %v2040_v5 = vpop.xlane.xlu0 %2039 }
0x159e   :  { %3251 = vrcp.f32 %v2040_v5 }
0x15a1   :  { %v2043_v26 = vpop.xlane.xlu0 %2042 }
0x15a2   :  { %3253 = vrcp.f32 %v2043_v26  ;;  %v3175_v26 = vld [vmem:[%s4041_s14] sm:$0xff]  }
0x15a5   :  { %v2099_v27 = vpop.permute.xlu0 %2098 }
0x15a6   :  { %v2104_v11 = vsel %vm421_vm9, %v2099_v27, 0  ;;  %v3176_v27 = vld [vmem:[%s4041_s14 + $0x8] sm:$0xff]   ;;  %s2733_s14 = sshll.u32 %s3320_s8, 4  ;;  %s2734_s14 = int_to_ptr.vmem [resolvable:$true] %s2733_s14 }
0x15a7   :  { %3093 = vmatpush3.bf16.msra.mxu1 %v2104_v11  ;;  %p3284_p1 = scmp.lt.s32.totalorder %s2734_s14, %s2734_s14 }
0x15a8   :  { %v3252_v28 = vpop.eup %3251  ;;  %3104 = vmatprep.subr.bf16.mxu1 %v3303_v15 }
0x15a9   :  { %v2046_v30 = vmul.f32 %v3252_v28, %v3248_v23  ;;  %v2207_v36 = vpop.permute.xlu0 %2206 }
0x15ab   :  { %v2048_v31 = vpack.c.bf16 %v2046_v30, %v2046_v30 }
0x15ac   :  { %v3254_v60 = vpop.eup %3253 }
0x15ad   :  { %v2047_v33 = vmul.f32 %v3254_v60, %v3250_v25  ;;  %3089 = vmatmul.mubr.msk.bf16.vlgmr.msra.gmra.mrb[56].mxu0 %vm296_vm6, %v2048_v31 }
0x15ae   :  { %3099 = vmatpush3.bf16.xpose.msra.mxu0 %v2164_v32  ;;  %3100 = vmatprep.mubr.msk.bf16.mxu0 %vm3304_vm1, %v3303_v15 }
0x15af   :  { %v2049_v49 = vpack.c.bf16 %v2047_v33, %v2047_v33  ;;  %3110 = vmatprep.subr.bf16.mxu0 %v3303_v15 }
0x15b1   :  { %3095 = vmatmul.mubr.msk.bf16.vlgmr.msra.gmra.mrb[64].mxu1 %vm296_vm6, %v2049_v49 }
0x15b2   :  { %3105 = vmatpush3.bf16.xpose.msra.mxu1 %v2214_v34  ;;  %3106 = vmatprep.mubr.msk.bf16.mxu1 %vm3304_vm1, %v3303_v15 }
0x15b3   :  { %3116 = vmatprep.subr.bf16.mxu1 %v3303_v15 }
0x15b5   :  { %3101 = vmatmul.mubr.msk.bf16.vlgmr.msra.gmra.mrb[60].mxu0 %vm296_vm6, %v2157_v35 }
0x15b6   :  { %3112 = vmatprep.mubr.msk.bf16.mxu0 %vm3304_vm1, %v3303_v15 }
0x15b9   :  { %3107 = vmatmul.mubr.msk.bf16.vlgmr.msra.gmra.mrb[68].mxu1 %vm296_vm6, %v2207_v36 }
0x15ba   :  { %3118 = vmatprep.mubr.msk.bf16.mxu1 %vm3304_vm1, %v3303_v15 }
0x1680   :  { %v2092_v37 = vpop.f32.mrb[56].mxu0 }
0x1681   :  { %v3090_v38 = vpop.f32.mrb[57].mxu0 }
0x1682   :  { %v2095_v39 = vpop.f32.mrb[58].mxu0 }
0x1683   :  { %v3091_v40 = vpop.f32.mrb[59].mxu0 }
0x1684   :  { %v2140_v41 = vpop.f32.mrb[64].mxu1 }
0x1685   :  { %v3096_v42 = vpop.f32.mrb[65].mxu1 }
0x1686   :  { %v2143_v59 = vpop.f32.mrb[66].mxu1 }
0x1687   :  { %v3097_v43 = vpop.f32.mrb[67].mxu1 }
0x1688   :  { %v2200_v44 = vpop.f32.mrb[60].mxu0 }
0x1689   :  { %v2201_v46 = vadd.f32 %v2200_v44, %v3778_v16  ;;  %v3102_v47 = vpop.f32.mrb[61].mxu0 }
0x168a   :  { %v2203_v48 = vpop.f32.mrb[62].mxu0 }
0x168b   :  { %v3103_v53 = vpop.f32.mrb[63].mxu0  ;;  %v2256_v55 = vsel %vm296_vm6, %v2201_v46, -inf }
0x168c   :  { %2257 = vmax.xlane.f32.xlu1 %v2256_v55  ;;  %v2250_v58 = vpop.f32.mrb[68].mxu1 }
0x168d   :  { %v2251_v61 = vadd.f32 %v2250_v58, %v3781_v19  ;;  %v3108_v2 = vpop.f32.mrb[69].mxu1 }
0x168e   :  { %v2253_v3 = vpop.f32.mrb[70].mxu1 }
0x168f   :  { %v3109_v4 = vpop.f32.mrb[71].mxu1  ;;  %v2259_v0 = vsel %vm296_vm6, %v2251_v61, -inf }
0x1690   :  { %2260 = vmax.xlane.f32.xlu0 %v2259_v0  ;;  %v3177_v0 = vld [vmem:[%s4045_s18] sm:$0xff]  }
0x169d   :  { %2280 = vrot.lane.b32.xlu1 %v3746_v51, %s3314_s5 }
0x16a1   :  { %1918 = vrot.lane.b32.xlu1 %v3861_v45, %s3317_s28 }
0x16a5   :  { %1920 = vrot.lane.b32.xlu1 %v3863_v50, %s3317_s28 }
0x16a9   :  { %2148 = vrot.lane.b32.xlu1 %v2092_v37, %s3318_s2  ;;  %v2793_v37 = vld [vmem:[%s4042_s15] ss:$0 sm:$0xff] }
0x1719   :  { %v2258_v16 = vpop.xlane.xlu1 %2257 }
0x171a   :  { %v2262_v1 = vsub.f32 %v2201_v46, %v2258_v16  ;;  %v3178_v16 = vld [vmem:[%s4045_s18 + $0x8] sm:$0xff]  }
0x171c   :  { %v2264_v19 = vmul.f32 1.442695, %v2262_v1  ;;  %v3179_v1 = vld [vmem:[%s4047_s20] sm:$0xff]  }
0x171d   :  { %v2281_v6 = vpop.permute.xlu1 %2280  ;;  %v2261_v8 = vpop.xlane.xlu0 %2260 }
0x171e   :  { %3255 = vpow2.f32 %v2264_v19  ;;  %v2286_v10 = vsel %vm421_vm9, %v2281_v6, 0  ;;  %v2263_v12 = vsub.f32 %v2251_v61, %v2261_v8  ;;  %v3180_v19 = vld [vmem:[%s4047_s20 + $0x8] sm:$0xff]  }
0x171f   :  { %3111 = vmatpush3.bf16.msra.mxu0 %v2286_v10 }
0x1720   :  { %v2266_v17 = vmul.f32 1.442695, %v2263_v12  ;;  %3122 = vmatprep.subr.bf16.mxu0 %v3303_v15 }
0x1721   :  { %v1919_v51 = vpop.permute.xlu1 %1918 }
0x1722   :  { %3257 = vpow2.f32 %v2266_v17  ;;  %1924 = vst.msk [vmem:[#allocation2] sm:$0xff] %vm745_vm10, %v1919_v51 }
0x1725   :  { %v1921_v45 = vpop.permute.xlu1 %1920 }
0x1726   :  { %1925 = vst.msk [vmem:[#allocation2 + $0x8] sm:$0xff] %vm745_vm10, %v1921_v45 }
0x1728   :  { %v3256_v50 = vpop.eup %3255 }
0x1729   :  { %v2149_v18 = vpop.permute.xlu1 %2148  ;;  %v2268_v13 = vsel %vm296_vm6, %v3256_v50, 0.0 }
0x172a   :  { %2154 = vst.msk [vmem:[#allocation2] sm:$0xff] %vm976_vm11, %v2149_v18  ;;  %2269 = vadd.xlane.f32.xlu0 %v2268_v13 }
0x172c   :  { %v3258_v14 = vpop.eup %3257 }
0x172d   :  { %v2271_v20 = vsel %vm296_vm6, %v3258_v14, 0.0 }
0x172e   :  { %2272 = vadd.xlane.f32.xlu0 %v2271_v20 }
0x1744   :  { %2328 = vrot.lane.b32.xlu0 %v3748_v54, %s3314_s5 }
0x1748   :  { %2150 = vrot.lane.b32.xlu0 %v2140_v41, %s3318_s2 }
0x17b7   :  { %v2270_v52 = vpop.xlane.xlu0 %2269 }
0x17b8   :  { %3259 = vrcp.f32 %v2270_v52 }
0x17bb   :  { %v2273_v56 = vpop.xlane.xlu0 %2272 }
0x17bc   :  { %3261 = vrcp.f32 %v2273_v56 }
0x17bf   :  { %v2329_v62 = vpop.permute.xlu0 %2328 }
0x17c0   :  { %v2334_v21 = vsel %vm421_vm9, %v2329_v62, 0 }
0x17c1   :  { %3117 = vmatpush3.bf16.msra.mxu1 %v2334_v21 }
0x17c2   :  { %v3260_v22 = vpop.eup %3259  ;;  %3130 = vmatprep.subr.bf16.mxu1 %v3303_v15 }
0x17c3   :  { %v2276_v23 = vmul.f32 %v3260_v22, %v3256_v50  ;;  %v2151_v24 = vpop.permute.xlu0 %2150  ;;  %v2797_v22 = vld [vmem:[%s4043_s16] ss:$0 sm:$0xff] }
0x17c4   :  { %2155 = vst.msk [vmem:[#allocation2 + $0x8] sm:$0xff] %vm976_vm11, %v2151_v24 }
0x17c5   :  { %v2278_v25 = vpack.c.bf16 %v2276_v23, %v2276_v23 }
0x17c6   :  { %v3262_v7 = vpop.eup %3261 }
0x17c7   :  { %v2277_v54 = vmul.f32 %v3262_v7, %v3258_v14  ;;  %3113 = vmatmul.mubr.msk.bf16.vlgmr.msra.gmra.mrb[64].mxu0 %vm296_vm6, %v2278_v25 }
0x17c8   :  { %3126 = vmatprep.mubr.msk.bf16.mxu0 %vm3304_vm1, %v3303_v15  ;;  %3123 = vmatpush3.bf16.msra.mxu0 %v3175_v26 }
0x17c9   :  { %v2279_v5 = vpack.c.bf16 %v2277_v54, %v2277_v54  ;;  %3124 = vmatprep.subr.bf16.mxu0 %v3303_v15 }
0x17cb   :  { %3119 = vmatmul.mubr.msk.bf16.vlgmr.msra.gmra.mrb[72].mxu1 %vm296_vm6, %v2279_v5  ;;  %v2798_v5 = vld [vmem:[%s4044_s17] ss:$0 sm:$0xff] }
0x17cc   :  { %3134 = vmatprep.mubr.msk.bf16.mxu1 %vm3304_vm1, %v3303_v15  ;;  %3125 = vmatpush3.bf16.msra.mxu0 %v3176_v27 }
0x17cd   :  { %3138 = vmatprep.subr.bf16.mxu0 %v3303_v15  ;;  %3131 = vmatpush3.bf16.msra.mxu1 %v3177_v0 }
0x17ce   :  { %3132 = vmatprep.subr.bf16.mxu1 %v3303_v15 }
0x17d1   :  { %3133 = vmatpush3.bf16.msra.mxu1 %v3178_v16 }
0x189a   :  { %v2322_v11 = vpop.f32.mrb[64].mxu0 }
0x189b   :  { %2378 = vrot.lane.b32.xlu1 %v2322_v11, %s3319_s27  ;;  %v3114_v28 = vpop.f32.mrb[65].mxu0 }
0x189c   :  { %v2325_v29 = vpop.f32.mrb[66].mxu0 }
0x189d   :  { %v3115_v30 = vpop.f32.mrb[67].mxu0  ;;  %v3181_v29 = vld [vmem:[%s4047_s20 + $0x10] sm:$0xff]  }
0x189e   :  { %v2370_v31 = vpop.f32.mrb[72].mxu1  ;;  %v3182_v30 = vld [vmem:[%s4047_s20 + $0x18] sm:$0xff]  }
0x189f   :  { %2380 = vrot.lane.b32.xlu0 %v2370_v31, %s3319_s27  ;;  %v3120_v60 = vpop.f32.mrb[73].mxu1  ;;  %v2799_v31 = vld [vmem:[%s4046_s19] ss:$0 sm:$0xff] }
0x18a0   :  { %v2373_v32 = vpop.f32.mrb[74].mxu1 }
0x18a1   :  { %v3121_v33 = vpop.f32.mrb[75].mxu1 }
0x190d   :  { %v2379_v9 = vpop.permute.xlu1 %2378 }
0x190e   :  { %2384 = vst.msk [vmem:[#allocation2] sm:$0xff] %vm1207_vm12, %v2379_v9 }
0x1911   :  { %v2381_v49 = vpop.permute.xlu0 %2380 }
0x1912   :  { %2385 = vst.msk [vmem:[#allocation2 + $0x8] sm:$0xff] %vm1207_vm12, %v2381_v49 }
0x1915   :  { %v2386_v34 = vld [vmem:[#allocation2] sm:$0xff] }
0x1919   :  { %v2387_v35 = vld [vmem:[#allocation2 + $0x8] sm:$0xff] }
0x191a   :  { %v2388_v36 = vpack.c.bf16 %v2387_v35, %v2386_v34 }
0x191c   :  { %3127 = vmatmul.mubr.msk.bf16.vlgmr.msra.gmra.mrb[68].mxu0 %vm155_vm0, %v2388_v36 }
0x191d   :  { %3146 = vmatprep.mubr.msk.bf16.mxu0 %vm3304_vm1, %v3303_v15  ;;  %3139 = vmatpush3.bf16.msra.mxu0 %v3179_v1 }
0x191e   :  { %3140 = vmatprep.subr.bf16.mxu0 %v3303_v15 }
0x1921   :  { %3141 = vmatpush3.bf16.msra.mxu0 %v3180_v19 }
0x1922   :  { %3142 = vmatprep.subr.bf16.mxu0 %v3303_v15 }
0x1925   :  { %3143 = vmatpush3.bf16.msra.mxu0 %v3181_v29 }
0x1926   :  { %3144 = vmatprep.subr.bf16.mxu0 %v3303_v15  ;;  %v2803_v15 = vld [vmem:[%s4048_s21] ss:$0 sm:$0xff] }
0x1929   :  { %3145 = vmatpush3.bf16.msra.mxu0 %v3182_v30 }
0x19ef   :  { %v2444_v38 = vpop.f32.mrb[68].mxu0 }
0x19f0   :  { %v2445_v39 = vadd.f32 %v2793_v37, %v2444_v38  ;;  %v3128_v40 = vpop.f32.mrb[69].mxu0 }
0x19f1   :  { %v2447_v41 = vpop.f32.mrb[70].mxu0 }
0x19f2   :  { %v3952_v42 = vadd.f32 %v2445_v39, %v3696_v57  ;;  %v2448_v59 = vadd.f32 %v2793_v37, %v2447_v41  ;;  %v3129_v43 = vpop.f32.mrb[71].mxu0 }
0x19f4   :  { %v3955_v44 = vadd.f32 %v2448_v59, %v3699_v63  ;;  %v2469_v46 = vsel %vm155_vm0, %v3952_v42, 0.0 }
0x19f5   :  { %2470 = vadd.xlane.f32.xlu1 %v2469_v46 }
0x19f6   :  { %v2472_v47 = vsel %vm155_vm0, %v3955_v44, 0.0 }
0x19f7   :  { %2473 = vadd.xlane.f32.xlu0 %v2472_v47 }
0x1a82   :  { %v2471_v48 = vpop.xlane.xlu1 %2470 }
0x1a83   :  { %v2475_v53 = vmul.f32 0.03125, %v2471_v48 }
0x1a84   :  { %v2474_v55 = vpop.xlane.xlu0 %2473 }
0x1a85   :  { %v2477_v58 = vsub.f32 %v3952_v42, %v2475_v53  ;;  %v2476_v57 = vmul.f32 0.03125, %v2474_v55 }
0x1a87   :  { %v2478_v61 = vsub.f32 %v3955_v44, %v2476_v57  ;;  %v2479_v2 = vmul.f32 %v2477_v58, %v2477_v58  ;;  %v2495_v24 = vmul.f32 %v2797_v22, %v2477_v58 }
0x1a89   :  { %v2481_v63 = vsel %vm155_vm0, %v2479_v2, 0.0  ;;  %v2480_v3 = vmul.f32 %v2478_v61, %v2478_v61  ;;  %v2496_v25 = vmul.f32 %v2797_v22, %v2478_v61 }
0x1a8a   :  { %2482 = vadd.xlane.f32.xlu0 %v2481_v63 }
0x1a8b   :  { %v2484_v4 = vsel %vm155_vm0, %v2480_v3, 0.0 }
0x1a8e   :  { %2485 = vadd.xlane.f32.xlu0 %v2484_v4 }
0x1b17   :  { %v2483_v6 = vpop.xlane.xlu0 %2482 }
0x1b18   :  { %v2487_v8 = vmul.f32 0.032258064, %v2483_v6 }
0x1b1a   :  { %3263 = vrsqrt.f32 %v2487_v8  ;;  %vm2499_vm1 = vcmp.eq.f32.partialorder %v2487_v8, inf  ;;  %v2502_v45 = vand.u32 2147483648, %v2487_v8  ;;  %vm2501_vm4 = vcmp.eq.f32.partialorder %v2487_v8, 0.0 }
0x1b1b   :  { %v2486_v10 = vpop.xlane.xlu0 %2485 }
0x1b1c   :  { %v2488_v12 = vmul.f32 0.032258064, %v2486_v10 }
0x1b1e   :  { %3265 = vrsqrt.f32 %v2488_v12  ;;  %vm2506_vm5 = vcmp.eq.f32.partialorder %v2488_v12, inf  ;;  %v2509_v52 = vand.u32 2147483648, %v2488_v12  ;;  %vm2508_vm6 = vcmp.eq.f32.partialorder %v2488_v12, 0.0 }
0x1b24   :  { %v3264_v17 = vpop.eup %3263 }
0x1b25   :  { %v2498_v51 = vmul.f32 %v3264_v17, %v2487_v8 }
0x1b27   :  { %v2500_v50 = vsel %vm2499_vm1, %v2487_v8, %v2498_v51 }
0x1b28   :  { %v3266_v18 = vpop.eup %3265  ;;  %v2503_v13 = vsel %vm2501_vm4, %v2502_v45, %v2500_v50 }
0x1b29   :  { %v2511_v14 = vadd.f32 1e-06, %v2503_v13  ;;  %v2505_v20 = vmul.f32 %v3266_v18, %v2488_v12 }
0x1b2b   :  { %3267 = vrcp.f32 %v2511_v14  ;;  %v2507_v56 = vsel %vm2506_vm5, %v2488_v12, %v2505_v20 }
0x1b2c   :  { %v2510_v62 = vsel %vm2508_vm6, %v2509_v52, %v2507_v56  ;;  %v2809_v52 = vld [vmem:[%s4049_s22] ss:$0 sm:$0xff]  ;;  %s3279_s22 = scalar_lea.vmem %s2734_s14, 256 }
0x1b2d   :  { %v2512_v21 = vadd.f32 1e-06, %v2510_v62  ;;  %p3280_p0 = scmp.ne.s32.totalorder %s2734_s14, %s3279_s22  ;;  %p3285_p2 = scmp.lt.s32.totalorder %s3279_s22, %s3279_s22 }
0x1b2f   :  { %3269 = vrcp.f32 %v2512_v21  ;;  %v2810_v21 = vld [vmem:[%s4050_s23] ss:$0 sm:$0xff]  ;;  %p3286_p3 = por %p3285_p2, %p3284_p1 }
0x1b31   :  { %p3287_p4 = pnand %p3286_p3, %p3280_p0 }
0x1b35   :  { %v3268_v23 = vpop.eup %3267 }
0x1b36   :  { %v2514_v7 = vmul.f32 %v3268_v23, %v2495_v24 }
0x1b38   :  { %v2523_v27 = vadd.f32 %v2798_v5, %v2514_v7 }
0x1b39   :  { %v3270_v54 = vpop.eup %3269 }
0x1b3a   :  { %v2516_v26 = vmul.f32 %v3270_v54, %v2496_v25 }
0x1b3c   :  { %v2524_v11 = vadd.f32 %v2798_v5, %v2516_v26 }
0x1b3e   :  { %v2525_v28 = vpack.c.bf16 %v2524_v11, %v2523_v27 }
0x1b40   :  { %3135 = vmatmul.mubr.msk.bf16.vlgmr.msra.gmra.mrb[76].mxu1 %vm155_vm0, %v2525_v28 }
0x1c13   :  { %v2581_v60 = vpop.f32.mrb[76].mxu1 }
0x1c14   :  { %v2582_v32 = vadd.f32 %v2799_v31, %v2581_v60  ;;  %v3136_v33 = vpop.f32.mrb[77].mxu1 }
0x1c15   :  { %v2584_v9 = vpop.f32.mrb[78].mxu1 }
0x1c16   :  { %v2585_v49 = vadd.f32 %v2799_v31, %v2584_v9  ;;  %v3137_v34 = vpop.f32.mrb[79].mxu1  ;;  %v2588_v35 = vmax.f32 %v2582_v32, 0.0 }
0x1c18   :  { %v2589_v36 = vmax.f32 %v2585_v49, 0.0 }
0x1c1a   :  { %v2590_v37 = vpack.c.bf16 %v2589_v36, %v2588_v35 }
0x1c1c   :  { %3147 = vmatmul.mubr.msk.bf16.vlgmr.msra.gmra.mrb[72].mxu0 %vm2621_vm7, %v2590_v37 }
0x1cef   :  { %v2659_v38 = vpop.f32.mrb[72].mxu0 }
0x1cf0   :  { %v2660_v39 = vadd.f32 %v2803_v15, %v2659_v38  ;;  %v3148_v40 = vpop.f32.mrb[73].mxu0 }
0x1cf1   :  { %v2662_v41 = vpop.f32.mrb[74].mxu0 }
0x1cf2   :  { %v2666_v59 = vadd.f32 %v2660_v39, %v3952_v42  ;;  %v2663_v43 = vadd.f32 %v2803_v15, %v2662_v41  ;;  %v3149_v46 = vpop.f32.mrb[75].mxu0 }
0x1cf4   :  { %v2667_v47 = vadd.f32 %v2663_v43, %v3955_v44  ;;  %v2670_v48 = vsel %vm155_vm0, %v2666_v59, 0.0 }
0x1cf5   :  { %2671 = vadd.xlane.f32.xlu1 %v2670_v48 }
0x1cf6   :  { %v2673_v53 = vsel %vm155_vm0, %v2667_v47, 0.0 }
0x1cf7   :  { %2674 = vadd.xlane.f32.xlu0 %v2673_v53 }
0x1d82   :  { %v2672_v55 = vpop.xlane.xlu1 %2671 }
0x1d83   :  { %v2676_v58 = vmul.f32 0.03125, %v2672_v55 }
0x1d84   :  { %v2675_v57 = vpop.xlane.xlu0 %2674 }
0x1d85   :  { %v2678_v61 = vsub.f32 %v2666_v59, %v2676_v58  ;;  %v2677_v2 = vmul.f32 0.03125, %v2675_v57 }
0x1d87   :  { %v2679_v63 = vsub.f32 %v2667_v47, %v2677_v2  ;;  %v2680_v3 = vmul.f32 %v2678_v61, %v2678_v61  ;;  %v2696_v56 = vmul.f32 %v2809_v52, %v2678_v61 }
0x1d89   :  { %v2682_v4 = vsel %vm155_vm0, %v2680_v3, 0.0  ;;  %v2681_v42 = vmul.f32 %v2679_v63, %v2679_v63  ;;  %v2697_v23 = vmul.f32 %v2809_v52, %v2679_v63 }
0x1d8a   :  { %2683 = vadd.xlane.f32.xlu1 %v2682_v4 }
0x1d8b   :  { %v2685_v0 = vsel %vm155_vm0, %v2681_v42, 0.0 }
0x1d8c   :  { %2686 = vadd.xlane.f32.xlu0 %v2685_v0 }
0x1e17   :  { %v2684_v44 = vpop.xlane.xlu1 %2683 }
0x1e18   :  { %v2688_v16 = vmul.f32 0.032258064, %v2684_v44 }
0x1e19   :  { %v2687_v1 = vpop.xlane.xlu0 %2686 }
0x1e1a   :  { %3271 = vrsqrt.f32 %v2688_v16  ;;  %v2689_v19 = vmul.f32 0.032258064, %v2687_v1  ;;  %vm2700_vm8 = vcmp.eq.f32.partialorder %v2688_v16, inf  ;;  %v2703_v10 = vand.u32 2147483648, %v2688_v16 }
0x1e1b   :  { %vm2702_vm9 = vcmp.eq.f32.partialorder %v2688_v16, 0.0 }
0x1e1c   :  { %3273 = vrsqrt.f32 %v2689_v19  ;;  %vm2707_vm10 = vcmp.eq.f32.partialorder %v2689_v19, inf  ;;  %v2710_v18 = vand.u32 2147483648, %v2689_v19  ;;  %vm2709_vm11 = vcmp.eq.f32.partialorder %v2689_v19, 0.0 }
0x1e24   :  { %v3272_v6 = vpop.eup %3271 }
0x1e25   :  { %v2699_v8 = vmul.f32 %v3272_v6, %v2688_v16 }
0x1e26   :  { %v3274_v12 = vpop.eup %3273 }
0x1e27   :  { %v2701_v17 = vsel %vm2700_vm8, %v2688_v16, %v2699_v8  ;;  %v2706_v45 = vmul.f32 %v3274_v12, %v2689_v19 }
0x1e28   :  { %v2704_v51 = vsel %vm2702_vm9, %v2703_v10, %v2701_v17 }
0x1e29   :  { %v2712_v50 = vadd.f32 1e-06, %v2704_v51  ;;  %v2708_v13 = vsel %vm2707_vm10, %v2689_v19, %v2706_v45 }
0x1e2a   :  { %v2711_v14 = vsel %vm2709_vm11, %v2710_v18, %v2708_v13 }
0x1e2b   :  { %3275 = vrcp.f32 %v2712_v50  ;;  %v2713_v20 = vadd.f32 1e-06, %v2711_v14 }
0x1e2d   :  { %3277 = vrcp.f32 %v2713_v20 }
0x1e35   :  { %v3276_v62 = vpop.eup %3275 }
0x1e36   :  { %v2715_v22 = vmul.f32 %v3276_v62, %v2696_v56 }
0x1e37   :  { %v3278_v24 = vpop.eup %3277 }
0x1e38   :  { %v2724_v25 = vadd.f32 %v2810_v21, %v2715_v22  ;;  %v2717_v7 = vmul.f32 %v3278_v24, %v2697_v23 }
0x1e3a   :  { %2726 = vst.msk [vmem:[#allocation3] sm:$0xff] %vm155_vm0, %v2724_v25  ;;  %v2725_v54 = vadd.f32 %v2810_v21, %v2717_v7 }
0x1e3c   :  { %2727 = vst.msk [vmem:[#allocation3 + $0x8] sm:$0xff] %vm155_vm0, %v2725_v54 }
0x1e3d   :  { %3290 = shalt.err (!%p3287_p4)
}
0x1e3e   :  { %s3291_s15 = scalar_lea.hbm %s4051_s24, 256 }
0x1e3f   :  { %p3292_p5 = scmp.ne.s32.totalorder %s4051_s24, %s3291_s15  ;;  %p3295_p6 = scmp.lt.u32.totalorder %s3291_s15, %s4051_s24 }
0x1e41   :  { %p3297_p7 = pnand %p3295_p6, %p3292_p5 }
0x1e43   :  { %3300 = shalt.err (!%p3297_p7)
}
0x1e44   :  { %s3321_s7 = smov 128  }
0x1e45   :  { %2739 = dma.vmem_to_hbm [thread:$0]  %s2734_s14, 256, %s4051_s24, [#allocation4], %s3321_s7, %s3321_s7, %s3317_s28  }
0x1e46   :  { %3301 = dma.done.wait [#allocation4], 256  }
0x1e47   :  { %3302 = vsyncadd [#allocation4], 4294967040 }
0x1e48   :  { %2743 = vsyncpa [#allocation4], 1 }

</bundles_post_ra>
